<compile_context>
chip_gen: v5e
topology: v5e:2x2
jax: 0.10.0
libtpu: 0.0.40
codegen_flags: <defaults>
</compile_context>

<pallas_src>
import functools

import jax
import jax.numpy as jnp
from jax.experimental import pallas as pl
from jax.experimental.pallas import tpu as pltpu

LANE = 128


def _round_up(x, m):
    return (x + m - 1) // m * m


# ----------------------------------------------------------------------------- kernel

def _lenet_fused_kernel(p_ref, w1_ref, b1_ref, w2_ref, b2_ref,
                        fw1_ref, fb1_ref, fw2_ref, fb2_ref, o_ref,
                        *, kh, kw, c1, c2):
    f32, bf16 = jnp.float32, jnp.bfloat16

    def maxpool2x2(o):
        # Floor-mode 2x2 / stride-2 max pool (matches nn.MaxPool2d(2)).
        bt, h, w, c = o.shape
        hp, wp = h // 2, w // 2
        o = o[:, :2 * hp, :2 * wp, :]
        # H (major axis): layout-preserving split + pairwise max -> no concat, no copies.
        r = o.reshape(bt, hp, 2, 2 * wp, c)
        o = jnp.maximum(r[:, :, 0], r[:, :, 1])                       # (bt, hp, 2wp, c)
        # W (sublane axis): pairwise max of adjacent columns via unit-stride slices.
        cols = [jnp.maximum(o[:, :, 2 * j:2 * j + 1, :], o[:, :, 2 * j + 1:2 * j + 2, :])
                for j in range(wp)]
        return cols[0] if wp == 1 else jnp.concatenate(cols, axis=2)

    # ---- conv1: im2col pre-built lane-dense in the wrapper -> ONE MXU matmul.
    bt, h1, w1s, k1p = p_ref.shape
    c1p = w1_ref.shape[1]
    xm = p_ref[...].reshape(bt * h1 * w1s, k1p)                       # bf16, lane-dense
    y1 = jnp.dot(xm, w1_ref[...], preferred_element_type=f32) + b1_ref[...]
    y1 = jnp.maximum(y1, 0.0).reshape(bt, h1, w1s, c1p)
    p1 = maxpool2x2(y1)                                               # (bt, hp1, wp1, c1p) f32

    # ---- conv2: in-kernel im2col over only the c1 VALID channels -> compact K.
    hp1, wp1 = p1.shape[1], p1.shape[2]
    ho, wo = hp1 - kh + 1, wp1 - kw + 1
    k2p, c2p = w2_ref.shape
    cols = [p1[:, dy:dy + ho, dx:dx + wo, :c1]
            for dy in range(kh) for dx in range(kw)]
    k2 = kh * kw * c1
    if k2p > k2:
        cols.append(jnp.zeros((bt, ho, wo, k2p - k2), f32))
    xm2 = jnp.concatenate(cols, axis=-1).reshape(bt * ho * wo, k2p).astype(bf16)
    y2 = jnp.dot(xm2, w2_ref[...], preferred_element_type=f32) + b2_ref[...]
    y2 = jnp.maximum(y2, 0.0).reshape(bt, ho, wo, c2p)
    p2 = maxpool2x2(y2)                                               # (bt, PH, PW, c2p)

    # ---- fc1: flatten p2's VALID channels in (h, w, c) order (fw1 rows pre-permuted,
    #           compact K = PH*PW*c2 padded to a lane multiple).
    ph, pw = p2.shape[1], p2.shape[2]
    kfp = fw1_ref.shape[0]
    parts = [p2[:, hh, ww, :c2] for hh in range(ph) for ww in range(pw)]
    kf = ph * pw * c2
    if kfp > kf:
        parts.append(jnp.zeros((bt, kfp - kf), f32))
    zin = parts[0] if len(parts) == 1 else jnp.concatenate(parts, axis=-1)
    z1 = jnp.dot(zin.astype(bf16), fw1_ref[...], preferred_element_type=f32) + fb1_ref[...]
    z1 = jnp.maximum(z1, 0.0)

    # ---- fc2 + lane-dense (bt, 128) store.
    out = jnp.dot(z1.astype(bf16), fw2_ref[...], preferred_element_type=f32) + fb2_ref[...]
    o_ref[...] = out.astype(o_ref.dtype)


# ------------------------------------------------------------------------------ wrapper

def lenet_forward_pallas(packed, x_nchw, *, kh, kw, c1, c2, num_classes, block_batch=32):
    """Fully fused LeNet5 forward. `packed` comes from pack_params()."""
    x = jnp.transpose(x_nchw, (0, 2, 3, 1)).astype(jnp.float32)       # NCHW -> NHWC
    B, H, W, cin = x.shape
    h1, w1s = H - kh + 1, W - kw + 1
    k1, k1p = kh * kw * cin, packed["w1"].shape[0]

    # conv1 im2col hoisted to XLA (review item): feeds the kernel a lane-dense bf16
    # (B, h1, w1, 128) patch slab instead of doing 25x 4-lane shuffles in-kernel.
    cols = [x[:, dy:dy + h1, dx:dx + w1s, :] for dy in range(kh) for dx in range(kw)]
    patches = jnp.concatenate(cols, axis=-1)                          # (B, h1, w1, k1)
    if k1p > k1:
        patches = jnp.pad(patches, ((0, 0), (0, 0), (0, 0), (0, k1p - k1)))
    patches = patches.astype(jnp.bfloat16)

    # Batch tiling: large enough to fill the MXU M dim; prefer >=2 grid steps (v7x has
    # 2 TensorCores); padded batch rows are sliced off at the end.
    bt = max(8, min(_round_up(block_batch, 8), _round_up(B, 8)))
    if _round_up(B, bt) // bt < 2 and bt >= 16:
        bt //= 2
    Bp = _round_up(B, bt)
    if Bp != B:
        patches = jnp.pad(patches, ((0, Bp - B), (0, 0), (0, 0), (0, 0)))
    nb = Bp // bt
    ncp = packed["fw2"].shape[1]

    kernel = functools.partial(_lenet_fused_kernel, kh=kh, kw=kw, c1=c1, c2=c2)

    def wspec(shape):
        # Grid-invariant: fetched once, stays VMEM-resident across batch tiles.
        # (Single-buffering via pl.Buffered(1) intentionally omitted: all weights total
        #  ~170 KiB bf16 after the compact-K repack, so the saving is negligible.)
        return pl.BlockSpec(shape, lambda i: (0,) * len(shape))

    out = pl.pallas_call(
        kernel,
        out_shape=jax.ShapeDtypeStruct((Bp, ncp), jnp.float32),
        grid=(nb,),
        in_specs=[
            pl.BlockSpec((bt, h1, w1s, k1p), lambda i: (i, 0, 0, 0)),
            wspec(packed["w1"].shape), wspec(packed["b1"].shape),
            wspec(packed["w2"].shape), wspec(packed["b2"].shape),
            wspec(packed["fw1"].shape), wspec(packed["fb1"].shape),
            wspec(packed["fw2"].shape), wspec(packed["fb2"].shape),
        ],
        out_specs=pl.BlockSpec((bt, ncp), lambda i: (i, 0)),
        compiler_params=pltpu.CompilerParams(
            dimension_semantics=("parallel",),
            vmem_limit_bytes=32 * 1024 * 1024),
    )(patches, packed["w1"], packed["b1"], packed["w2"], packed["b2"],
      packed["fw1"], packed["fb1"], packed["fw2"], packed["fb2"])
    return out[:B, :num_classes]


def pack_params(params, input_size):
    """One-off conversion of PyTorch-layout params into compact, lane-dense bf16 layout."""
    cin, H, W = input_size
    w1, b1 = params["conv1_w"], params["conv1_b"]      # (c1, cin, kh, kw), (c1,)
    w2, b2 = params["conv2_w"], params["conv2_b"]      # (c2, c1, kh, kw), (c2,)
    fw1, fb1 = params["fc1_w"], params["fc1_b"]        # (c2*PH*PW, fc), (fc,)
    fw2, fb2 = params["fc2_w"], params["fc2_b"]        # (fc, nc), (nc,)

    c1, _, kh, kw = w1.shape
    c2 = w2.shape[0]
    fc = fw1.shape[1]
    nc = fw2.shape[1]
    c1p, c2p = _round_up(c1, LANE), _round_up(c2, LANE)
    fcp, ncp = _round_up(fc, LANE), _round_up(nc, LANE)
    wdt = jnp.bfloat16     # bf16 weights: native MXU path, half the DMA/VMEM

    # conv1: rows in (dy, dx, cin) order (matches the wrapper-built im2col); K -> 128.
    k1 = kh * kw * cin
    k1p = _round_up(k1, LANE)
    wm1 = jnp.transpose(w1, (2, 3, 1, 0)).reshape(k1, c1)
    wm1 = jnp.pad(wm1, ((0, k1p - k1), (0, c1p - c1))).astype(wdt)
    bm1 = jnp.pad(b1, (0, c1p - c1)).reshape(1, c1p).astype(jnp.float32)

    # conv2 (review's "single biggest lever"): COMPACT K = kh*kw*c1 (not kh*kw*c1p);
    # the kernel slices p1[..., :c1] before the tap concat.
    k2 = kh * kw * c1
    k2p = _round_up(k2, LANE)
    wm2 = jnp.transpose(w2, (2, 3, 1, 0)).reshape(k2, c2)
    wm2 = jnp.pad(wm2, ((0, k2p - k2), (0, c2p - c2))).astype(wdt)
    bm2 = jnp.pad(b2, (0, c2p - c2)).reshape(1, c2p).astype(jnp.float32)

    # Spatial sizes after the conv stack (floor-mode pooling).
    h1, w1s = H - kh + 1, W - kw + 1
    hp1, wp1 = h1 // 2, w1s // 2
    h2, w2s = hp1 - kh + 1, wp1 - kw + 1
    PH, PW = h2 // 2, w2s // 2
    assert hp1 >= 1 and wp1 >= 1 and PH >= 1 and PW >= 1, "input too small for LeNet5"
    assert fw1.shape[0] == c2 * PH * PW, (fw1.shape, c2, PH, PW)

    # fc1: rows permuted from PyTorch NCHW flatten order (c,h,w) to the kernel's
    # (h, w, c-compact) order; K = PH*PW*c2 padded to a lane multiple.
    kf = PH * PW * c2
    kfp = _round_up(kf, LANE)
    fwm1 = fw1.reshape(c2, PH, PW, fc).transpose(1, 2, 0, 3).reshape(kf, fc)
    fwm1 = jnp.pad(fwm1, ((0, kfp - kf), (0, fcp - fc))).astype(wdt)
    fbm1 = jnp.pad(fb1, (0, fcp - fc)).reshape(1, fcp).astype(jnp.float32)

    fwm2 = jnp.pad(fw2, ((0, fcp - fc), (0, ncp - nc))).astype(wdt)
    fbm2 = jnp.pad(fb2, (0, ncp - nc)).reshape(1, ncp).astype(jnp.float32)

    packed = {"w1": wm1, "b1": bm1, "w2": wm2, "b2": bm2,
              "fw1": fwm1, "fb1": fbm1, "fw2": fwm2, "fb2": fbm2}
    meta = {"kh": int(kh), "kw": int(kw), "c1": int(c1), "c2": int(c2),
            "num_classes": int(nc)}
    return packed, meta


# ----------------------------------------------------------------------------- reference

def lenet_reference(params, x_nchw):
    """Plain-JAX (XLA) f32 reference for the same inference forward pass."""
    def conv_relu(x, w, b):
        y = jax.lax.conv_general_dilated(
            x, w, window_strides=(1, 1), padding="VALID",
            dimension_numbers=("NCHW", "OIHW", "NCHW"))
        return jax.nn.relu(y + b[None, :, None, None])

    def pool(x):
        n, c, h, w = x.shape
        x = x[:, :, :h // 2 * 2, :w // 2 * 2]
        return x.reshape(n, c, h // 2, 2, w // 2, 2).max(axis=(3, 5))

    o = pool(conv_relu(x_nchw, params["conv1_w"], params["conv1_b"]))
    o = pool(conv_relu(o, params["conv2_w"], params["conv2_b"]))
    o = o.reshape(o.shape[0], -1)                       # NCHW flatten: (c, h, w) order
    o = jax.nn.relu(o @ params["fc1_w"] + params["fc1_b"])
    return o @ params["fc2_w"] + params["fc2_b"]


def init_params(key, in_ch, conv_dims, flat_fts, fc_dims, num_classes):
    k = jax.random.split(key, 8)

    def he(kk, shape, fan_in):
        return jax.random.normal(kk, shape, jnp.float32) * jnp.sqrt(2.0 / fan_in)

    c1, c2 = conv_dims
    return {
        "conv1_w": he(k[0], (c1, in_ch, 5, 5), in_ch * 25),
        "conv1_b": 0.1 * jax.random.normal(k[1], (c1,), jnp.float32),
        "conv2_w": he(k[2], (c2, c1, 5, 5), c1 * 25),
        "conv2_b": 0.1 * jax.random.normal(k[3], (c2,), jnp.float32),
        "fc1_w": he(k[4], (flat_fts, fc_dims), flat_fts),
        "fc1_b": 0.1 * jax.random.normal(k[5], (fc_dims,), jnp.float32),
        "fc2_w": he(k[6], (fc_dims, num_classes), fc_dims),
        "fc2_b": 0.1 * jax.random.normal(k[7], (num_classes,), jnp.float32),
    }


if __name__ == "__main__":
    # Small config consistent with the module:
    #   input_size=(4, 16, 16), conv_dims=(8, 16), fc_dims=32, num_classes=10
    #   16 -conv5-> 12 -pool-> 6 -conv5-> 2 -pool-> 1  => flat_fts = 16*1*1 = 16
    batch, in_ch, H, W = 2, 4, 16, 16
    conv_dims = (8, 16)
    fc_dims = 32
    num_classes = 10
    flat_fts = conv_dims[1] * 1 * 1

    key = jax.random.PRNGKey(0)
    kx, kp = jax.random.split(key)
    x = jax.random.normal(kx, (batch, in_ch, H, W), jnp.float32)
    params = init_params(kp, in_ch, conv_dims, flat_fts, fc_dims, num_classes)

    packed, meta = pack_params(params, (in_ch, H, W))
    fwd = jax.jit(lenet_forward_pallas,
                  static_argnames=("kh", "kw", "c1", "c2", "num_classes", "block_batch"))
    out = jax.block_until_ready(fwd(packed, x, block_batch=32, **meta))
    assert out.shape == (batch, num_classes), out.shape

    ref = jax.block_until_ready(lenet_reference(params, x))
    err = float(jnp.max(jnp.abs(out - ref)))
    scale = float(jnp.max(jnp.abs(ref))) + 1e-6
    # Tolerance reflects the bf16 weight / bf16 matmul-operand policy (f32 accumulate);
    # an all-f32 variant of this kernel matches the reference to ~1e-5.
    assert err <= 0.05 * scale + 0.05, f"max abs err {err} vs ref scale {scale}"
    print("KERNEL_OK")
</pallas_src>

<mosaic_0001>
module attributes {stable_mosaic.version = 11 : i64} {
  func.func @_lenet_fused_kernel(%arg0: i32, %arg1: memref<8x12x12x128xbf16, #tpu.memory_space<vmem>>, %arg2: memref<128x128xbf16, #tpu.memory_space<vmem>>, %arg3: memref<1x128xf32, #tpu.memory_space<vmem>>, %arg4: memref<256x128xbf16, #tpu.memory_space<vmem>>, %arg5: memref<1x128xf32, #tpu.memory_space<vmem>>, %arg6: memref<128x128xbf16, #tpu.memory_space<vmem>>, %arg7: memref<1x128xf32, #tpu.memory_space<vmem>>, %arg8: memref<128x128xbf16, #tpu.memory_space<vmem>>, %arg9: memref<1x128xf32, #tpu.memory_space<vmem>>, %arg10: memref<8x128xf32, #tpu.memory_space<vmem>>) attributes {dimension_semantics = [#tpu.dimension_semantics<parallel>], iteration_bounds = array<i64: 1>, scalar_prefetch = 0 : i64, scratch_operands = 0 : i64, tpu.core_type = #tpu.core_type<tc>, window_params = [{transform_indices = @transform_0, window_bounds = array<i64: 8, 12, 12, 128>}, {pipeline_mode = #tpu.pipeline_mode<synchronous>, transform_indices = @transform_1, window_bounds = array<i64: 128, 128>}, {pipeline_mode = #tpu.pipeline_mode<synchronous>, transform_indices = @transform_2, window_bounds = array<i64: 1, 128>}, {pipeline_mode = #tpu.pipeline_mode<synchronous>, transform_indices = @transform_3, window_bounds = array<i64: 256, 128>}, {pipeline_mode = #tpu.pipeline_mode<synchronous>, transform_indices = @transform_4, window_bounds = array<i64: 1, 128>}, {pipeline_mode = #tpu.pipeline_mode<synchronous>, transform_indices = @transform_5, window_bounds = array<i64: 128, 128>}, {pipeline_mode = #tpu.pipeline_mode<synchronous>, transform_indices = @transform_6, window_bounds = array<i64: 1, 128>}, {pipeline_mode = #tpu.pipeline_mode<synchronous>, transform_indices = @transform_7, window_bounds = array<i64: 128, 128>}, {pipeline_mode = #tpu.pipeline_mode<synchronous>, transform_indices = @transform_8, window_bounds = array<i64: 1, 128>}, {transform_indices = @transform_9, window_bounds = array<i64: 8, 128>}]} {
    %c0 = arith.constant 0 : index
    %c0_0 = arith.constant 0 : index
    %c0_1 = arith.constant 0 : index
    %c0_2 = arith.constant 0 : index
    %0 = vector.load %arg1[%c0, %c0_0, %c0_1, %c0_2] : memref<8x12x12x128xbf16, #tpu.memory_space<vmem>>, vector<8x12x12x128xbf16>
    %1 = vector.shape_cast %0 : vector<8x12x12x128xbf16> to vector<1152x128xbf16>
    %c0_3 = arith.constant 0 : index
    %c0_4 = arith.constant 0 : index
    %2 = vector.load %arg2[%c0_3, %c0_4] : memref<128x128xbf16, #tpu.memory_space<vmem>>, vector<128x128xbf16>
    %cst = arith.constant dense<0.000000e+00> : vector<1152x128xf32>
    %3 = tpu.matmul %1, %2, %cst {dimension_numbers = #tpu.dot_dimension_numbers<[1], [0], [0], [1], [0, 0, 1, 1], [], []>} : vector<1152x128xbf16>, vector<128x128xbf16>, vector<1152x128xf32> -> vector<1152x128xf32>
    %c0_5 = arith.constant 0 : index
    %c0_6 = arith.constant 0 : index
    %4 = vector.load %arg3[%c0_5, %c0_6] : memref<1x128xf32, #tpu.memory_space<vmem>>, vector<1x128xf32>
    %5 = vector.broadcast %4 : vector<1x128xf32> to vector<1152x128xf32>
    %6 = arith.addf %3, %5 : vector<1152x128xf32>
    %cst_7 = arith.constant 0.000000e+00 : f32
    %7 = vector.broadcast %cst_7 : f32 to vector<1152x128xf32>
    %8 = arith.maximumf %6, %7 : vector<1152x128xf32>
    %9 = vector.shape_cast %8 : vector<1152x128xf32> to vector<8x12x12x128xf32>
    %10 = vector.shape_cast %9 : vector<8x12x12x128xf32> to vector<8x6x2x12x128xf32>
    %11 = vector.extract_strided_slice %10 {offsets = [0, 0, 0, 0, 0], sizes = [8, 6, 1, 12, 128], strides = [1, 1, 1, 1, 1]} : vector<8x6x2x12x128xf32> to vector<8x6x1x12x128xf32>
    %12 = vector.shape_cast %11 : vector<8x6x1x12x128xf32> to vector<8x6x12x128xf32>
    %13 = vector.extract_strided_slice %10 {offsets = [0, 0, 1, 0, 0], sizes = [8, 6, 1, 12, 128], strides = [1, 1, 1, 1, 1]} : vector<8x6x2x12x128xf32> to vector<8x6x1x12x128xf32>
    %14 = vector.shape_cast %13 : vector<8x6x1x12x128xf32> to vector<8x6x12x128xf32>
    %15 = arith.maximumf %12, %14 : vector<8x6x12x128xf32>
    %16 = vector.extract_strided_slice %15 {offsets = [0, 0, 0, 0], sizes = [8, 6, 1, 128], strides = [1, 1, 1, 1]} : vector<8x6x12x128xf32> to vector<8x6x1x128xf32>
    %17 = vector.extract_strided_slice %15 {offsets = [0, 0, 1, 0], sizes = [8, 6, 1, 128], strides = [1, 1, 1, 1]} : vector<8x6x12x128xf32> to vector<8x6x1x128xf32>
    %18 = arith.maximumf %16, %17 : vector<8x6x1x128xf32>
    %19 = vector.extract_strided_slice %15 {offsets = [0, 0, 2, 0], sizes = [8, 6, 1, 128], strides = [1, 1, 1, 1]} : vector<8x6x12x128xf32> to vector<8x6x1x128xf32>
    %20 = vector.extract_strided_slice %15 {offsets = [0, 0, 3, 0], sizes = [8, 6, 1, 128], strides = [1, 1, 1, 1]} : vector<8x6x12x128xf32> to vector<8x6x1x128xf32>
    %21 = arith.maximumf %19, %20 : vector<8x6x1x128xf32>
    %22 = vector.extract_strided_slice %15 {offsets = [0, 0, 4, 0], sizes = [8, 6, 1, 128], strides = [1, 1, 1, 1]} : vector<8x6x12x128xf32> to vector<8x6x1x128xf32>
    %23 = vector.extract_strided_slice %15 {offsets = [0, 0, 5, 0], sizes = [8, 6, 1, 128], strides = [1, 1, 1, 1]} : vector<8x6x12x128xf32> to vector<8x6x1x128xf32>
    %24 = arith.maximumf %22, %23 : vector<8x6x1x128xf32>
    %25 = vector.extract_strided_slice %15 {offsets = [0, 0, 6, 0], sizes = [8, 6, 1, 128], strides = [1, 1, 1, 1]} : vector<8x6x12x128xf32> to vector<8x6x1x128xf32>
    %26 = vector.extract_strided_slice %15 {offsets = [0, 0, 7, 0], sizes = [8, 6, 1, 128], strides = [1, 1, 1, 1]} : vector<8x6x12x128xf32> to vector<8x6x1x128xf32>
    %27 = arith.maximumf %25, %26 : vector<8x6x1x128xf32>
    %28 = vector.extract_strided_slice %15 {offsets = [0, 0, 8, 0], sizes = [8, 6, 1, 128], strides = [1, 1, 1, 1]} : vector<8x6x12x128xf32> to vector<8x6x1x128xf32>
    %29 = vector.extract_strided_slice %15 {offsets = [0, 0, 9, 0], sizes = [8, 6, 1, 128], strides = [1, 1, 1, 1]} : vector<8x6x12x128xf32> to vector<8x6x1x128xf32>
    %30 = arith.maximumf %28, %29 : vector<8x6x1x128xf32>
    %31 = vector.extract_strided_slice %15 {offsets = [0, 0, 10, 0], sizes = [8, 6, 1, 128], strides = [1, 1, 1, 1]} : vector<8x6x12x128xf32> to vector<8x6x1x128xf32>
    %32 = vector.extract_strided_slice %15 {offsets = [0, 0, 11, 0], sizes = [8, 6, 1, 128], strides = [1, 1, 1, 1]} : vector<8x6x12x128xf32> to vector<8x6x1x128xf32>
    %33 = arith.maximumf %31, %32 : vector<8x6x1x128xf32>
    %34 = tpu.concatenate %18, %21, %24, %27, %30, %33 in 2 : vector<8x6x1x128xf32>, vector<8x6x1x128xf32>, vector<8x6x1x128xf32>, vector<8x6x1x128xf32>, vector<8x6x1x128xf32>, vector<8x6x1x128xf32> -> vector<8x6x6x128xf32>
    %35 = vector.extract_strided_slice %34 {offsets = [0, 0, 0, 0], sizes = [8, 2, 2, 8], strides = [1, 1, 1, 1]} : vector<8x6x6x128xf32> to vector<8x2x2x8xf32>
    %36 = vector.extract_strided_slice %34 {offsets = [0, 0, 1, 0], sizes = [8, 2, 2, 8], strides = [1, 1, 1, 1]} : vector<8x6x6x128xf32> to vector<8x2x2x8xf32>
    %37 = vector.extract_strided_slice %34 {offsets = [0, 0, 2, 0], sizes = [8, 2, 2, 8], strides = [1, 1, 1, 1]} : vector<8x6x6x128xf32> to vector<8x2x2x8xf32>
    %38 = vector.extract_strided_slice %34 {offsets = [0, 0, 3, 0], sizes = [8, 2, 2, 8], strides = [1, 1, 1, 1]} : vector<8x6x6x128xf32> to vector<8x2x2x8xf32>
    %39 = vector.extract_strided_slice %34 {offsets = [0, 0, 4, 0], sizes = [8, 2, 2, 8], strides = [1, 1, 1, 1]} : vector<8x6x6x128xf32> to vector<8x2x2x8xf32>
    %40 = vector.extract_strided_slice %34 {offsets = [0, 1, 0, 0], sizes = [8, 2, 2, 8], strides = [1, 1, 1, 1]} : vector<8x6x6x128xf32> to vector<8x2x2x8xf32>
    %41 = vector.extract_strided_slice %34 {offsets = [0, 1, 1, 0], sizes = [8, 2, 2, 8], strides = [1, 1, 1, 1]} : vector<8x6x6x128xf32> to vector<8x2x2x8xf32>
    %42 = vector.extract_strided_slice %34 {offsets = [0, 1, 2, 0], sizes = [8, 2, 2, 8], strides = [1, 1, 1, 1]} : vector<8x6x6x128xf32> to vector<8x2x2x8xf32>
    %43 = vector.extract_strided_slice %34 {offsets = [0, 1, 3, 0], sizes = [8, 2, 2, 8], strides = [1, 1, 1, 1]} : vector<8x6x6x128xf32> to vector<8x2x2x8xf32>
    %44 = vector.extract_strided_slice %34 {offsets = [0, 1, 4, 0], sizes = [8, 2, 2, 8], strides = [1, 1, 1, 1]} : vector<8x6x6x128xf32> to vector<8x2x2x8xf32>
    %45 = vector.extract_strided_slice %34 {offsets = [0, 2, 0, 0], sizes = [8, 2, 2, 8], strides = [1, 1, 1, 1]} : vector<8x6x6x128xf32> to vector<8x2x2x8xf32>
    %46 = vector.extract_strided_slice %34 {offsets = [0, 2, 1, 0], sizes = [8, 2, 2, 8], strides = [1, 1, 1, 1]} : vector<8x6x6x128xf32> to vector<8x2x2x8xf32>
    %47 = vector.extract_strided_slice %34 {offsets = [0, 2, 2, 0], sizes = [8, 2, 2, 8], strides = [1, 1, 1, 1]} : vector<8x6x6x128xf32> to vector<8x2x2x8xf32>
    %48 = vector.extract_strided_slice %34 {offsets = [0, 2, 3, 0], sizes = [8, 2, 2, 8], strides = [1, 1, 1, 1]} : vector<8x6x6x128xf32> to vector<8x2x2x8xf32>
    %49 = vector.extract_strided_slice %34 {offsets = [0, 2, 4, 0], sizes = [8, 2, 2, 8], strides = [1, 1, 1, 1]} : vector<8x6x6x128xf32> to vector<8x2x2x8xf32>
    %50 = vector.extract_strided_slice %34 {offsets = [0, 3, 0, 0], sizes = [8, 2, 2, 8], strides = [1, 1, 1, 1]} : vector<8x6x6x128xf32> to vector<8x2x2x8xf32>
    %51 = vector.extract_strided_slice %34 {offsets = [0, 3, 1, 0], sizes = [8, 2, 2, 8], strides = [1, 1, 1, 1]} : vector<8x6x6x128xf32> to vector<8x2x2x8xf32>
    %52 = vector.extract_strided_slice %34 {offsets = [0, 3, 2, 0], sizes = [8, 2, 2, 8], strides = [1, 1, 1, 1]} : vector<8x6x6x128xf32> to vector<8x2x2x8xf32>
    %53 = vector.extract_strided_slice %34 {offsets = [0, 3, 3, 0], sizes = [8, 2, 2, 8], strides = [1, 1, 1, 1]} : vector<8x6x6x128xf32> to vector<8x2x2x8xf32>
    %54 = vector.extract_strided_slice %34 {offsets = [0, 3, 4, 0], sizes = [8, 2, 2, 8], strides = [1, 1, 1, 1]} : vector<8x6x6x128xf32> to vector<8x2x2x8xf32>
    %55 = vector.extract_strided_slice %34 {offsets = [0, 4, 0, 0], sizes = [8, 2, 2, 8], strides = [1, 1, 1, 1]} : vector<8x6x6x128xf32> to vector<8x2x2x8xf32>
    %56 = vector.extract_strided_slice %34 {offsets = [0, 4, 1, 0], sizes = [8, 2, 2, 8], strides = [1, 1, 1, 1]} : vector<8x6x6x128xf32> to vector<8x2x2x8xf32>
    %57 = vector.extract_strided_slice %34 {offsets = [0, 4, 2, 0], sizes = [8, 2, 2, 8], strides = [1, 1, 1, 1]} : vector<8x6x6x128xf32> to vector<8x2x2x8xf32>
    %58 = vector.extract_strided_slice %34 {offsets = [0, 4, 3, 0], sizes = [8, 2, 2, 8], strides = [1, 1, 1, 1]} : vector<8x6x6x128xf32> to vector<8x2x2x8xf32>
    %59 = vector.extract_strided_slice %34 {offsets = [0, 4, 4, 0], sizes = [8, 2, 2, 8], strides = [1, 1, 1, 1]} : vector<8x6x6x128xf32> to vector<8x2x2x8xf32>
    %cst_8 = arith.constant 0.000000e+00 : f32
    %60 = vector.broadcast %cst_8 : f32 to vector<8x2x2x56xf32>
    %61 = tpu.concatenate %35, %36, %37, %38, %39, %40, %41, %42, %43, %44, %45, %46, %47, %48, %49, %50 in 3 : vector<8x2x2x8xf32>, vector<8x2x2x8xf32>, vector<8x2x2x8xf32>, vector<8x2x2x8xf32>, vector<8x2x2x8xf32>, vector<8x2x2x8xf32>, vector<8x2x2x8xf32>, vector<8x2x2x8xf32>, vector<8x2x2x8xf32>, vector<8x2x2x8xf32>, vector<8x2x2x8xf32>, vector<8x2x2x8xf32>, vector<8x2x2x8xf32>, vector<8x2x2x8xf32>, vector<8x2x2x8xf32>, vector<8x2x2x8xf32> -> vector<8x2x2x128xf32>
    %62 = tpu.concatenate %51, %52, %53, %54, %55, %56, %57, %58, %59, %60 in 3 : vector<8x2x2x8xf32>, vector<8x2x2x8xf32>, vector<8x2x2x8xf32>, vector<8x2x2x8xf32>, vector<8x2x2x8xf32>, vector<8x2x2x8xf32>, vector<8x2x2x8xf32>, vector<8x2x2x8xf32>, vector<8x2x2x8xf32>, vector<8x2x2x56xf32> -> vector<8x2x2x128xf32>
    %63 = tpu.concatenate %61, %62 in 3 : vector<8x2x2x128xf32>, vector<8x2x2x128xf32> -> vector<8x2x2x256xf32>
    %64 = vector.shape_cast %63 : vector<8x2x2x256xf32> to vector<32x256xf32>
    %65 = arith.truncf %64 : vector<32x256xf32> to vector<32x256xbf16>
    %c0_9 = arith.constant 0 : index
    %c0_10 = arith.constant 0 : index
    %66 = vector.load %arg4[%c0_9, %c0_10] : memref<256x128xbf16, #tpu.memory_space<vmem>>, vector<256x128xbf16>
    %cst_11 = arith.constant dense<0.000000e+00> : vector<32x128xf32>
    %67 = tpu.matmul %65, %66, %cst_11 {dimension_numbers = #tpu.dot_dimension_numbers<[1], [0], [0], [1], [0, 0, 1, 1], [], []>} : vector<32x256xbf16>, vector<256x128xbf16>, vector<32x128xf32> -> vector<32x128xf32>
    %c0_12 = arith.constant 0 : index
    %c0_13 = arith.constant 0 : index
    %68 = vector.load %arg5[%c0_12, %c0_13] : memref<1x128xf32, #tpu.memory_space<vmem>>, vector<1x128xf32>
    %69 = vector.broadcast %68 : vector<1x128xf32> to vector<32x128xf32>
    %70 = arith.addf %67, %69 : vector<32x128xf32>
    %cst_14 = arith.constant 0.000000e+00 : f32
    %71 = vector.broadcast %cst_14 : f32 to vector<32x128xf32>
    %72 = arith.maximumf %70, %71 : vector<32x128xf32>
    %73 = vector.shape_cast %72 : vector<32x128xf32> to vector<8x2x2x128xf32>
    %74 = vector.shape_cast %73 : vector<8x2x2x128xf32> to vector<8x1x2x2x128xf32>
    %75 = vector.extract_strided_slice %74 {offsets = [0, 0, 0, 0, 0], sizes = [8, 1, 1, 2, 128], strides = [1, 1, 1, 1, 1]} : vector<8x1x2x2x128xf32> to vector<8x1x1x2x128xf32>
    %76 = vector.shape_cast %75 : vector<8x1x1x2x128xf32> to vector<8x1x2x128xf32>
    %77 = vector.extract_strided_slice %74 {offsets = [0, 0, 1, 0, 0], sizes = [8, 1, 1, 2, 128], strides = [1, 1, 1, 1, 1]} : vector<8x1x2x2x128xf32> to vector<8x1x1x2x128xf32>
    %78 = vector.shape_cast %77 : vector<8x1x1x2x128xf32> to vector<8x1x2x128xf32>
    %79 = arith.maximumf %76, %78 : vector<8x1x2x128xf32>
    %80 = vector.extract_strided_slice %79 {offsets = [0, 0, 0, 0], sizes = [8, 1, 1, 128], strides = [1, 1, 1, 1]} : vector<8x1x2x128xf32> to vector<8x1x1x128xf32>
    %81 = vector.extract_strided_slice %79 {offsets = [0, 0, 1, 0], sizes = [8, 1, 1, 128], strides = [1, 1, 1, 1]} : vector<8x1x2x128xf32> to vector<8x1x1x128xf32>
    %82 = arith.maximumf %80, %81 : vector<8x1x1x128xf32>
    %83 = vector.extract_strided_slice %82 {offsets = [0, 0, 0, 0], sizes = [8, 1, 1, 16], strides = [1, 1, 1, 1]} : vector<8x1x1x128xf32> to vector<8x1x1x16xf32>
    %84 = vector.shape_cast %83 : vector<8x1x1x16xf32> to vector<8x16xf32>
    %cst_15 = arith.constant 0.000000e+00 : f32
    %85 = vector.broadcast %cst_15 : f32 to vector<8x112xf32>
    %86 = tpu.concatenate %84, %85 in 1 : vector<8x16xf32>, vector<8x112xf32> -> vector<8x128xf32>
    %87 = arith.truncf %86 : vector<8x128xf32> to vector<8x128xbf16>
    %c0_16 = arith.constant 0 : index
    %c0_17 = arith.constant 0 : index
    %88 = vector.load %arg6[%c0_16, %c0_17] : memref<128x128xbf16, #tpu.memory_space<vmem>>, vector<128x128xbf16>
    %cst_18 = arith.constant dense<0.000000e+00> : vector<8x128xf32>
    %89 = tpu.matmul %87, %88, %cst_18 {dimension_numbers = #tpu.dot_dimension_numbers<[1], [0], [0], [1], [0, 0, 1, 1], [], []>} : vector<8x128xbf16>, vector<128x128xbf16>, vector<8x128xf32> -> vector<8x128xf32>
    %c0_19 = arith.constant 0 : index
    %c0_20 = arith.constant 0 : index
    %90 = vector.load %arg7[%c0_19, %c0_20] : memref<1x128xf32, #tpu.memory_space<vmem>>, vector<1x128xf32>
    %91 = vector.broadcast %90 : vector<1x128xf32> to vector<8x128xf32>
    %92 = arith.addf %89, %91 : vector<8x128xf32>
    %cst_21 = arith.constant 0.000000e+00 : f32
    %93 = vector.broadcast %cst_21 : f32 to vector<8x128xf32>
    %94 = arith.maximumf %92, %93 : vector<8x128xf32>
    %95 = arith.truncf %94 : vector<8x128xf32> to vector<8x128xbf16>
    %c0_22 = arith.constant 0 : index
    %c0_23 = arith.constant 0 : index
    %96 = vector.load %arg8[%c0_22, %c0_23] : memref<128x128xbf16, #tpu.memory_space<vmem>>, vector<128x128xbf16>
    %cst_24 = arith.constant dense<0.000000e+00> : vector<8x128xf32>
    %97 = tpu.matmul %95, %96, %cst_24 {dimension_numbers = #tpu.dot_dimension_numbers<[1], [0], [0], [1], [0, 0, 1, 1], [], []>} : vector<8x128xbf16>, vector<128x128xbf16>, vector<8x128xf32> -> vector<8x128xf32>
    %c0_25 = arith.constant 0 : index
    %c0_26 = arith.constant 0 : index
    %98 = vector.load %arg9[%c0_25, %c0_26] : memref<1x128xf32, #tpu.memory_space<vmem>>, vector<1x128xf32>
    %99 = vector.broadcast %98 : vector<1x128xf32> to vector<8x128xf32>
    %100 = arith.addf %97, %99 : vector<8x128xf32>
    %c0_27 = arith.constant 0 : index
    %c0_28 = arith.constant 0 : index
    %101 = vector.load %arg10[%c0_27, %c0_28] : memref<8x128xf32, #tpu.memory_space<vmem>>, vector<8x128xf32>
    tpu.vector_store %arg10[%c0_27, %c0_28], %100 {strides = array<i32>} : memref<8x128xf32, #tpu.memory_space<vmem>>, vector<8x128xf32>,
    return
  }
  func.func @transform_0(%arg0: i32) -> (i32, i32, i32, i32) {
    %c0_i32 = arith.constant 0 : i32
    %c0_i32_0 = arith.constant 0 : i32
    %c0_i32_1 = arith.constant 0 : i32
    %c0_i32_2 = arith.constant 0 : i32
    return %arg0, %c0_i32, %c0_i32_0, %c0_i32_1 : i32, i32, i32, i32
  }
  func.func @transform_1(%arg0: i32) -> (i32, i32) {
    %c0_i32 = arith.constant 0 : i32
    %c0_i32_0 = arith.constant 0 : i32
    %c0_i32_1 = arith.constant 0 : i32
    return %c0_i32, %c0_i32_0 : i32, i32
  }
  func.func @transform_2(%arg0: i32) -> (i32, i32) {
    %c0_i32 = arith.constant 0 : i32
    %c0_i32_0 = arith.constant 0 : i32
    %c0_i32_1 = arith.constant 0 : i32
    return %c0_i32, %c0_i32_0 : i32, i32
  }
  func.func @transform_3(%arg0: i32) -> (i32, i32) {
    %c0_i32 = arith.constant 0 : i32
    %c0_i32_0 = arith.constant 0 : i32
    %c0_i32_1 = arith.constant 0 : i32
    return %c0_i32, %c0_i32_0 : i32, i32
  }
  func.func @transform_4(%arg0: i32) -> (i32, i32) {
    %c0_i32 = arith.constant 0 : i32
    %c0_i32_0 = arith.constant 0 : i32
    %c0_i32_1 = arith.constant 0 : i32
    return %c0_i32, %c0_i32_0 : i32, i32
  }
  func.func @transform_5(%arg0: i32) -> (i32, i32) {
    %c0_i32 = arith.constant 0 : i32
    %c0_i32_0 = arith.constant 0 : i32
    %c0_i32_1 = arith.constant 0 : i32
    return %c0_i32, %c0_i32_0 : i32, i32
  }
  func.func @transform_6(%arg0: i32) -> (i32, i32) {
    %c0_i32 = arith.constant 0 : i32
    %c0_i32_0 = arith.constant 0 : i32
    %c0_i32_1 = arith.constant 0 : i32
    return %c0_i32, %c0_i32_0 : i32, i32
  }
  func.func @transform_7(%arg0: i32) -> (i32, i32) {
    %c0_i32 = arith.constant 0 : i32
    %c0_i32_0 = arith.constant 0 : i32
    %c0_i32_1 = arith.constant 0 : i32
    return %c0_i32, %c0_i32_0 : i32, i32
  }
  func.func @transform_8(%arg0: i32) -> (i32, i32) {
    %c0_i32 = arith.constant 0 : i32
    %c0_i32_0 = arith.constant 0 : i32
    %c0_i32_1 = arith.constant 0 : i32
    return %c0_i32, %c0_i32_0 : i32, i32
  }
  func.func @transform_9(%arg0: i32) -> (i32, i32) {
    %c0_i32 = arith.constant 0 : i32
    %c0_i32_0 = arith.constant 0 : i32
    return %arg0, %c0_i32 : i32, i32
  }
}

</mosaic_0001>

<bundles_post_ra>
// kernel: lenet_forward_pallas.1
= control target key start
LH: loop header
LB: loop body
LE: loop exit
PB: predicated region body
PF: predicated region fallthrough
CT: control target
= control target key end

     0   :  { %vm11846_vm0 = vcmask 1041408   ;;  %vm612_vm1 = vcmask 1043458   ;;  %vm4510_vm2 = vcmask 1040384   ;;  %vm11841_vm3 = vcmask 1042432   ;;  %s7491_s17 = smov 24   ;;  %s7492_s18 = smov 16   ;;  %s11732_s1 = inlined_call_operand.vmem [shape: bf16[128,128], index: 1, kind: input, shape index: {}]   ;;  %s11733_s0 = inlined_call_operand.vmem [shape: bf16[8,12,12,128], index: 0, kind: input, shape index: {}]   ;;  %s11734_s2 = inlined_call_operand.vmem [shape: f32[1,128], index: 2, kind: input, shape index: {}]   ;;  %s11735_s3 = inlined_call_operand.vmem [shape: bf16[256,128], index: 3, kind: input, shape index: {}]   ;;  %s11736_s4 = inlined_call_operand.vmem [shape: f32[1,128], index: 4, kind: input, shape index: {}]   ;;  %s11737_s5 = inlined_call_operand.vmem [shape: bf16[128,128], index: 5, kind: input, shape index: {}]   ;;  %s11738_s6 = inlined_call_operand.vmem [shape: f32[1,128], index: 6, kind: input, shape index: {}]   ;;  %s11739_s7 = inlined_call_operand.vmem [shape: bf16[128,128], index: 7, kind: input, shape index: {}]   ;;  %s11740_s8 = inlined_call_operand.vmem [shape: f32[1,128], index: 8, kind: input, shape index: {}]   ;;  %s11741_s9 = inlined_call_operand.vmem [shape: f32[8,128], index: 9, kind: output, shape index: {}]  }
   0x1   :  { %v7410_v0 = vld [vmem:[%s11732_s1 + $0x38] sm:$0xff]  ;;  %v7409_v1 = vld [vmem:[%s11732_s1 + $0x30] sm:$0xff]  ;;  %v32_v2 = vld [vmem:[%s11733_s0] sm:$0xf]  ;;  %vm11840_vm4 = vcmask 1043456   ;;  %vm11830_vm5 = vcmask 1044480  }
   0x2   :  { %2077 = vmatpush.bf16.msra.mxu0 %v7410_v0  ;;  %7443 = vmatpush.bf16.msra.mxu1 %v7410_v0  ;;  %v33_v3 = vld [vmem:[%s11733_s0 + $0x4] sm:$0x3]  ;;  %v34_v4 = vld [vmem:[%s11733_s0 + $0x8] sm:$0xf]  ;;  %v416_v5 = vrot.slane %v32_v2, 2  ;;  %v7406_v35 = vld [vmem:[%s11732_s1 + $0x18] sm:$0xff] }
   0x3   :  { %7444 = vmatpush.bf16.msra.mxu2 %v7410_v0  ;;  %7445 = vmatpush.bf16.msra.mxu3 %v7410_v0  ;;  %v417_v6 = vrot.slane %v33_v3, 2  ;;  %v418_v7 = vrot.slane %v34_v4, 2  ;;  %v35_v8 = vld [vmem:[%s11733_s0 + $0xc] sm:$0x3]  ;;  %v36_v9 = vld [vmem:[%s11733_s0 + $0x10] sm:$0xf] }
   0x4   :  { %v611_v10 = vsel %vm11846_vm0, %v32_v2, %v416_v5  ;;  %v613_v11 = vsel %vm612_vm1, %v32_v2, %v416_v5  ;;  %v419_v12 = vrot.slane %v35_v8, 2  ;;  %v420_v13 = vrot.slane %v36_v9, 2  ;;  %v38_v14 = vld [vmem:[%s11733_s0 + $0x18] sm:$0xf]  ;;  %v7408_v15 = vld [vmem:[%s11732_s1 + $0x28] sm:$0xff]  ;;  %v7407_v28 = vld [vmem:[%s11732_s1 + $0x20] sm:$0xff] }
   0x5   :  { %v615_v16 = vrot.slane %v613_v11, 2  ;;  %v618_v17 = vsel %vm11846_vm0, %v33_v3, %v417_v6  ;;  %v621_v18 = vsel %vm11846_vm0, %v34_v4, %v418_v7  ;;  %1494 = vst [vmem:[#allocation1] ss:$4 sm:$0xff] %v611_v10  ;;  %v622_v19 = vsel %vm612_vm1, %v34_v4, %v418_v7  ;;  %v37_v22 = vld [vmem:[%s11733_s0 + $0x14] sm:$0x3]  ;;  %v7404_v55 = vld [vmem:[%s11732_s1 + $0x8] sm:$0xff] }
   0x6   :  { %2078 = vmatpush.bf16.msra.mxu0 %v7409_v1  ;;  %1499 = vst [vmem:[#allocation1 + $0x2] ss:$4 sm:$0xff] %v618_v17  ;;  %v624_v20 = vrot.slane %v622_v19, 2  ;;  %v631_v21 = vsel %vm612_vm1, %v36_v9, %v420_v13  ;;  %7446 = vmatpush.bf16.msra.mxu1 %v7409_v1  ;;  %v627_v23 = vsel %vm11846_vm0, %v35_v8, %v419_v12  ;;  %v422_v24 = vrot.slane %v38_v14, 2  ;;  %v40_v25 = vld [vmem:[%s11733_s0 + $0x20] sm:$0xf] }
   0x7   :  { %1497 = vst [vmem:[#allocation1 + $0x1] ss:$4 sm:$0xff] %v615_v16  ;;  %7447 = vmatpush.bf16.msra.mxu2 %v7409_v1  ;;  %7448 = vmatpush.bf16.msra.mxu3 %v7409_v1  ;;  %v630_v26 = vsel %vm11846_vm0, %v36_v9, %v420_v13  ;;  %v633_v27 = vrot.slane %v631_v21, 2  ;;  %v39_v29 = vld [vmem:[%s11733_s0 + $0x1c] sm:$0x3]  ;;  %v421_v30 = vrot.slane %v37_v22, 2 }
   0x8   :  { %1501 = vst [vmem:[#allocation1 + $0x3] ss:$4 sm:$0xff] %v621_v18  ;;  %v424_v31 = vrot.slane %v40_v25, 2  ;;  %v640_v32 = vsel %vm612_vm1, %v38_v14, %v422_v24  ;;  %v423_v33 = vrot.slane %v39_v29, 2  ;;  %v41_v34 = vld [vmem:[%s11733_s0 + $0x24] sm:$0x3]  ;;  %v639_v38 = vsel %vm11846_vm0, %v38_v14, %v422_v24 }
   0x9   :  { %1504 = vst [vmem:[#allocation1 + $0x20] ss:$4 sm:$0xff] %v624_v20  ;;  %v636_v36 = vsel %vm11846_vm0, %v37_v22, %v421_v30  ;;  %v42_v37 = vld [vmem:[%s11733_s0 + $0x28] sm:$0xf]  ;;  %v642_v39 = vrot.slane %v640_v32, 2  ;;  %v425_v42 = vrot.slane %v41_v34, 2 }
   0xa   :  { %2079 = vmatpush.bf16.msra.mxu0 %v7408_v15  ;;  %1506 = vst [vmem:[#allocation1 + $0x21] ss:$4 sm:$0xff] %v627_v23  ;;  %7449 = vmatpush.bf16.msra.mxu1 %v7408_v15  ;;  %v649_v40 = vsel %vm612_vm1, %v40_v25, %v424_v31  ;;  %v645_v43 = vsel %vm11846_vm0, %v39_v29, %v423_v33  ;;  %v426_v44 = vrot.slane %v42_v37, 2  ;;  %v44_v45 = vld [vmem:[%s11733_s0 + $0x30] sm:$0xf]  ;;  %v7403_v0 = vld [vmem:[%s11732_s1] sm:$0xff] }
   0xb   :  { %1508 = vst [vmem:[#allocation1 + $0x22] ss:$4 sm:$0xff] %v630_v26  ;;  %7450 = vmatpush.bf16.msra.mxu2 %v7408_v15  ;;  %7451 = vmatpush.bf16.msra.mxu3 %v7408_v15  ;;  %v7405_v46 = vld [vmem:[%s11732_s1 + $0x10] sm:$0xff]  ;;  %v648_v47 = vsel %vm11846_vm0, %v40_v25, %v424_v31  ;;  %v651_v48 = vrot.slane %v649_v40, 2  ;;  %v43_v49 = vld [vmem:[%s11733_s0 + $0x2c] sm:$0x3]  ;;  %v654_v51 = vsel %vm11846_vm0, %v41_v34, %v425_v42 }
   0xc   :  { %1511 = vst [vmem:[#allocation1 + $0x23] ss:$4 sm:$0xff] %v633_v27  ;;  %v428_v52 = vrot.slane %v44_v45, 2  ;;  %v657_v53 = vsel %vm11846_vm0, %v42_v37, %v426_v44  ;;  %v658_v54 = vsel %vm612_vm1, %v42_v37, %v426_v44  ;;  %v427_v56 = vrot.slane %v43_v49, 2  ;;  %v45_v57 = vld [vmem:[%s11733_s0 + $0x34] sm:$0x3] }
   0xd   :  { %v46_v58 = vld [vmem:[%s11733_s0 + $0x38] sm:$0xf]  ;;  %v660_v59 = vrot.slane %v658_v54, 2  ;;  %v47_v62 = vld [vmem:[%s11733_s0 + $0x3c] sm:$0x3]  ;;  %v429_v63 = vrot.slane %v45_v57, 2 }
   0xe   :  { %2080 = vmatpush.bf16.msra.mxu0 %v7407_v28  ;;  %7452 = vmatpush.bf16.msra.mxu1 %v7407_v28  ;;  %v667_v60 = vsel %vm612_vm1, %v44_v45, %v428_v52  ;;  %v430_v61 = vrot.slane %v46_v58, 2  ;;  %v48_v1 = vld [vmem:[%s11733_s0 + $0x40] sm:$0xf]  ;;  %v663_v2 = vsel %vm11846_vm0, %v43_v49, %v427_v56  ;;  %v666_v4 = vsel %vm11846_vm0, %v44_v45, %v428_v52  ;;  %v49_v8 = vld [vmem:[%s11733_s0 + $0x44] sm:$0x3]  ;;  %s7493_s1 = smov 8  }
   0xf   :  { %v7616_v41 = vld.sshfl [vmem:[#allocation1] sm:$0xff pattern:$0x73625140]  ;;  %7453 = vmatpush.bf16.msra.mxu2 %v7407_v28  ;;  %7454 = vmatpush.bf16.msra.mxu3 %v7407_v28  ;;  %v669_v5 = vrot.slane %v667_v60, 2  ;;  %v431_v7 = vrot.slane %v47_v62, 2  ;;  %v432_v9 = vrot.slane %v48_v1, 2  ;;  %v672_v10 = vsel %vm11846_vm0, %v45_v57, %v429_v63 }
  0x10   :  { %1514 = vst [vmem:[#allocation1] ss:$4 sm:$0xff] %v636_v36  ;;  %v676_v6 = vsel %vm612_vm1, %v46_v58, %v430_v61  ;;  %v50_v11 = vld [vmem:[%s11733_s0 + $0x48] sm:$0xf]  ;;  %v675_v12 = vsel %vm11846_vm0, %v46_v58, %v430_v61  ;;  %v433_v18 = vrot.slane %v49_v8, 2  ;;  %s7494_s25 = smov 32  }
  0x11   :  { %1515 = vst [vmem:[#allocation1 + $0x1] ss:$4 sm:$0xff] %v639_v38  ;;  %v678_v13 = vrot.slane %v676_v6, 2  ;;  %v681_v15 = vsel %vm11846_vm0, %v47_v62, %v431_v7  ;;  %v434_v16 = vrot.slane %v50_v11, 2  ;;  %v685_v17 = vsel %vm612_vm1, %v48_v1, %v432_v9  ;;  %v52_v19 = vld [vmem:[%s11733_s0 + $0x50] sm:$0xf] }
  0x12   :  { %2081 = vmatpush.bf16.msra.mxu0 %v7406_v35  ;;  %1517 = vst [vmem:[#allocation1 + $0x2] ss:$4 sm:$0xff] %v642_v39  ;;  %7455 = vmatpush.bf16.msra.mxu1 %v7406_v35  ;;  %v51_v20 = vld [vmem:[%s11733_s0 + $0x4c] sm:$0x3]  ;;  %v684_v21 = vsel %vm11846_vm0, %v48_v1, %v432_v9  ;;  %v687_v22 = vrot.slane %v685_v17, 2  ;;  %v436_v24 = vrot.slane %v52_v19, 2  ;;  %v690_v25 = vsel %vm11846_vm0, %v49_v8, %v433_v18 }
  0x13   :  { %v7629_v50 = vld.sshfl [vmem:[#allocation1 + $0x20] sm:$0xff pattern:$0x73625140]  ;;  %1518 = vst [vmem:[#allocation1 + $0x3] ss:$4 sm:$0xff] %v645_v43  ;;  %7456 = vmatpush.bf16.msra.mxu2 %v7406_v35  ;;  %7457 = vmatpush.bf16.msra.mxu3 %v7406_v35  ;;  %v694_v23 = vsel %vm612_vm1, %v50_v11, %v434_v16  ;;  %v435_v27 = vrot.slane %v51_v20, 2  ;;  %v693_v28 = vsel %vm11846_vm0, %v50_v11, %v434_v16 }
  0x14   :  { %1519 = vst [vmem:[#allocation1 + $0x20] ss:$4 sm:$0xff] %v648_v47  ;;  %v696_v29 = vrot.slane %v694_v23, 2  ;;  %v54_v30 = vld [vmem:[%s11733_s0 + $0x58] sm:$0xf]  ;;  %v703_v31 = vsel %vm612_vm1, %v52_v19, %v436_v24  ;;  %v702_v36 = vsel %vm11846_vm0, %v52_v19, %v436_v24  ;;  %s7495_s30 = smov 40  }
  0x15   :  { %1521 = vst [vmem:[#allocation1 + $0x21] ss:$4 sm:$0xff] %v651_v48  ;;  %v699_v32 = vsel %vm11846_vm0, %v51_v20, %v435_v27  ;;  %v53_v33 = vld [vmem:[%s11733_s0 + $0x54] sm:$0x3]  ;;  %v438_v35 = vrot.slane %v54_v30, 2  ;;  %v705_v37 = vrot.slane %v703_v31, 2 }
  0x16   :  { %2082 = vmatpush.bf16.msra.mxu0 %v7405_v46  ;;  %1522 = vst [vmem:[#allocation1 + $0x22] ss:$4 sm:$0xff] %v654_v51  ;;  %7458 = vmatpush.bf16.msra.mxu1 %v7405_v46  ;;  %v56_v38 = vld [vmem:[%s11733_s0 + $0x60] sm:$0xf]  ;;  %v55_v39 = vld [vmem:[%s11733_s0 + $0x5c] sm:$0x3] }
  0x17   :  { %1523 = vst [vmem:[#allocation1 + $0x23] ss:$4 sm:$0xff] %v657_v53  ;;  %7459 = vmatpush.bf16.msra.mxu2 %v7405_v46  ;;  %7460 = vmatpush.bf16.msra.mxu3 %v7405_v46  ;;  %v437_v40 = vrot.slane %v53_v33, 2  ;;  %v440_v42 = vrot.slane %v56_v38, 2  ;;  %v439_v43 = vrot.slane %v55_v39, 2  ;;  %v711_v47 = vsel %vm11846_vm0, %v54_v30, %v438_v35  ;;  %s7496_s10 = smov 48  }
  0x18   :  { %v57_v45 = vld [vmem:[%s11733_s0 + $0x64] sm:$0x3]  ;;  %v58_v46 = vld [vmem:[%s11733_s0 + $0x68] sm:$0xf]  ;;  %v62_v60 = vld [vmem:[%s11733_s0 + $0x78] sm:$0xf] }
  0x19   :  { %v708_v44 = vsel %vm11846_vm0, %v53_v33, %v437_v40  ;;  %v721_v51 = vsel %vm612_vm1, %v56_v38, %v440_v42  ;;  %v717_v52 = vsel %vm11846_vm0, %v55_v39, %v439_v43  ;;  %v441_v53 = vrot.slane %v57_v45, 2  ;;  %v61_v1 = vld [vmem:[%s11733_s0 + $0x74] sm:$0x3]  ;;  %v64_v6 = vld [vmem:[%s11733_s0 + $0x80] sm:$0xf]  ;;  %s7497_s11 = smov 64  }
  0x1a   :  { %2083 = vmatpush.bf16.msra.mxu0 %v7404_v55  ;;  %v7654_v3 = vld.sshfl [vmem:[#allocation1] sm:$0xff pattern:$0x73625140]  ;;  %7461 = vmatpush.bf16.msra.mxu1 %v7404_v55  ;;  %v442_v54 = vrot.slane %v58_v46, 2  ;;  %v720_v56 = vsel %vm11846_vm0, %v56_v38, %v440_v42  ;;  %v723_v57 = vrot.slane %v721_v51, 2  ;;  %v445_v9 = vrot.slane %v61_v1, 2 }
  0x1b   :  { %1527 = vst [vmem:[#allocation1] ss:$4 sm:$0xff] %v660_v59  ;;  %7462 = vmatpush.bf16.msra.mxu2 %v7404_v55  ;;  %7463 = vmatpush.bf16.msra.mxu3 %v7404_v55  ;;  %v59_v55 = vld [vmem:[%s11733_s0 + $0x6c] sm:$0x3]  ;;  %v726_v61 = vsel %vm11846_vm0, %v57_v45, %v441_v53  ;;  %v63_v8 = vld [vmem:[%s11733_s0 + $0x7c] sm:$0x3] }
  0x1c   :  { %1528 = vst [vmem:[#allocation1 + $0x1] ss:$4 sm:$0xff] %v663_v2  ;;  %v730_v59 = vsel %vm612_vm1, %v58_v46, %v442_v54  ;;  %v443_v63 = vrot.slane %v59_v55, 2  ;;  %v447_v16 = vrot.slane %v63_v8, 2  ;;  %v66_v17 = vld [vmem:[%s11733_s0 + $0x88] sm:$0xf]  ;;  %v744_v18 = vsel %vm11846_vm0, %v61_v1, %v445_v9 }
  0x1d   :  { %1529 = vst [vmem:[#allocation1 + $0x2] ss:$4 sm:$0xff] %v666_v4  ;;  %v732_v2 = vrot.slane %v730_v59, 2  ;;  %v65_v19 = vld [vmem:[%s11733_s0 + $0x84] sm:$0x3]  ;;  %s7498_s20 = smov 72  }
  0x1e   :  { %2084 = vmatpush.bf16.msra.mxu0 %v7403_v0  ;;  %v7666_v14 = vld.sshfl [vmem:[#allocation1 + $0x20] sm:$0xff pattern:$0x73625140]  ;;  %7464 = vmatpush.bf16.msra.mxu1 %v7403_v0  ;;  %1531 = vst [vmem:[#allocation1 + $0x3] ss:$4 sm:$0xff] %v669_v5  ;;  %v446_v5 = vrot.slane %v62_v60, 2  ;;  %v735_v7 = vsel %vm11846_vm0, %v59_v55, %v443_v63 }
  0x1f   :  { %1532 = vst [vmem:[#allocation1 + $0x20] ss:$4 sm:$0xff] %v672_v10  ;;  %7465 = vmatpush.bf16.msra.mxu2 %v7403_v0  ;;  %7466 = vmatpush.bf16.msra.mxu3 %v7403_v0  ;;  %v729_v0 = vsel %vm11846_vm0, %v58_v46, %v442_v54  ;;  %v68_v24 = vld [vmem:[%s11733_s0 + $0x90] sm:$0xf]  ;;  %v449_v27 = vrot.slane %v65_v19, 2  ;;  %s7499_s21 = smov 56  }
  0x20   :  { %1533 = vst [vmem:[#allocation1 + $0x21] ss:$4 sm:$0xff] %v675_v12  ;;  %v747_v20 = vsel %vm11846_vm0, %v62_v60, %v446_v5  ;;  %v452_v31 = vrot.slane %v68_v24, 2  ;;  %v70_v33 = vld [vmem:[%s11733_s0 + $0x98] sm:$0xf]  ;;  %s7500_s24 = smov 80  }
  0x21   :  { %2085 = vmatmul.bf16.vlgmr.msra.gmra.mxu0 %v7616_v41  ;;  %1535 = vst [vmem:[#allocation1 + $0x22] ss:$4 sm:$0xff] %v678_v13  ;;  %v712_v41 = vsel %vm612_vm1, %v54_v30, %v438_v35  ;;  %v748_v13 = vsel %vm612_vm1, %v62_v60, %v446_v5  ;;  %v762_v35 = vsel %vm11846_vm0, %v65_v19, %v449_v27  ;;  %v69_v39 = vld [vmem:[%s11733_s0 + $0x94] sm:$0x3]  ;;  %v454_v42 = vrot.slane %v70_v33, 2  ;;  %s7501_s22 = smov 88  }
  0x22   :  { %1536 = vst [vmem:[#allocation1 + $0x23] ss:$4 sm:$0xff] %v681_v15  ;;  %v714_v48 = vrot.slane %v712_v41, 2  ;;  %v448_v15 = vrot.slane %v64_v6, 2  ;;  %v775_v41 = vsel %vm612_vm1, %v68_v24, %v452_v31  ;;  %v71_v43 = vld [vmem:[%s11733_s0 + $0x9c] sm:$0x3] }
  0x23   :  { %v453_v46 = vrot.slane %v69_v39, 2  ;;  %v455_v53 = vrot.slane %v71_v43, 2  ;;  %v73_v55 = vld [vmem:[%s11733_s0 + $0xa4] sm:$0x3]  ;;  %v76_v60 = vld [vmem:[%s11733_s0 + $0xb0] sm:$0xf] }
  0x24   :  { %v757_v23 = vsel %vm612_vm1, %v64_v6, %v448_v15  ;;  %v457_v63 = vrot.slane %v73_v55, 2  ;;  %v75_v1 = vld [vmem:[%s11733_s0 + $0xac] sm:$0x3]  ;;  %v460_v5 = vrot.slane %v76_v60, 2  ;;  %s7502_s13 = smov 96   ;;  %s7503_s23 = smov 104  }
  0x25   :  { %v7680_v26 = vld.sshfl [vmem:[#allocation1] sm:$0xff pattern:$0x73625140]  ;;  %v759_v30 = vrot.slane %v757_v23, 2  ;;  %v780_v54 = vsel %vm11846_vm0, %v69_v39, %v453_v46  ;;  %v86_v46 = vld [vmem:[%s11733_s0 + $0xd8] sm:$0xf] }
  0x26   :  { %1539 = vst [vmem:[#allocation1] ss:$4 sm:$0xff] %v684_v21  ;;  %v750_v21 = vrot.slane %v748_v13, 2  ;;  %v77_v13 = vld [vmem:[%s11733_s0 + $0xb4] sm:$0x3]  ;;  %vm5642_vm6 = vcmask 64512  }
  0x27   :  { %1541 = vst [vmem:[#allocation1 + $0x1] ss:$4 sm:$0xff] %v687_v22  ;;  %vm5659_vm7 = vcmask 130048   ;;  %vm11845_vm8 = vcmask 195584   ;;  %vm11844_vm9 = vcmask 261120   ;;  %vm5710_vm10 = vcmask 326656  }
  0x28   :  { %1542 = vst [vmem:[#allocation1 + $0x2] ss:$4 sm:$0xff] %v690_v25  ;;  %v753_v25 = vsel %vm11846_vm0, %v63_v8, %v447_v16  ;;  %v798_v8 = vsel %vm11846_vm0, %v73_v55, %v457_v63  ;;  %v811_v16 = vsel %vm612_vm1, %v76_v60, %v460_v5  ;;  %vm5727_vm11 = vcmask 392192  }
  0x29   :  { %1543 = vst [vmem:[#allocation1 + $0x3] ss:$4 sm:$0xff] %v693_v28  ;;  %v7691_v34 = vld.sshfl [vmem:[#allocation1 + $0x20] sm:$0xff pattern:$0x73625140]  ;;  %v813_v23 = vrot.slane %v811_v16, 2 }
  0x2a   :  { %1545 = vst [vmem:[#allocation1 + $0x20] ss:$4 sm:$0xff] %v696_v29  ;;  %v67_v28 = vld [vmem:[%s11733_s0 + $0x8c] sm:$0x3]  ;;  %v756_v29 = vsel %vm11846_vm0, %v64_v6, %v448_v15  ;;  %v92_v16 = vld [vmem:[%s11733_s0 + $0xf0] sm:$0xf] }
  0x2b   :  { %1546 = vst [vmem:[#allocation1 + $0x21] ss:$4 sm:$0xff] %v699_v32  ;;  %vm5744_vm12 = vcmask 457728   ;;  %vm11824_vm13 = vcmask 523264   ;;  %vm5778_vm14 = vcmask 588800   ;;  %vm5795_vm15 = vcmask 654336  }
  0x2c   :  { %1547 = vst [vmem:[#allocation1 + $0x22] ss:$4 sm:$0xff] %v702_v36 }
  0x2d   :  { %1549 = vst [vmem:[#allocation1 + $0x23] ss:$4 sm:$0xff] %v705_v37  ;;  %v451_v37 = vrot.slane %v67_v28, 2 }
  0x2f   :  { %v771_v45 = vsel %vm11846_vm0, %v67_v28, %v451_v37 }
  0x30   :  { %v7710_v49 = vld.sshfl [vmem:[#allocation1] sm:$0xff pattern:$0x73625140] }
  0x31   :  { %2090 = vmatmul.bf16.gmra.mxu0 %v7629_v50  ;;  %v60_v50 = vld [vmem:[%s11733_s0 + $0x70] sm:$0xf]  ;;  %1552 = vst [vmem:[#allocation1] ss:$4 sm:$0xff] %v708_v44  ;;  %v72_v44 = vld [vmem:[%s11733_s0 + $0xa0] sm:$0xf] }
  0x32   :  { %1553 = vst [vmem:[#allocation1 + $0x1] ss:$4 sm:$0xff] %v711_v47  ;;  %v444_v58 = vrot.slane %v60_v50, 2  ;;  %v774_v47 = vsel %vm11846_vm0, %v68_v24, %v452_v31  ;;  %v81_v31 = vld [vmem:[%s11733_s0 + $0xc4] sm:$0x3] }
  0x33   :  { %1555 = vst [vmem:[#allocation1 + $0x2] ss:$4 sm:$0xff] %v714_v48  ;;  %v777_v48 = vrot.slane %v775_v41, 2  ;;  %v83_v41 = vld [vmem:[%s11733_s0 + $0xcc] sm:$0x3] }
  0x34   :  { %1556 = vst [vmem:[#allocation1 + $0x3] ss:$4 sm:$0xff] %v717_v52  ;;  %v7726_v62 = vld.sshfl [vmem:[#allocation1 + $0x20] sm:$0xff pattern:$0x73625140]  ;;  %v739_v4 = vsel %vm612_vm1, %v60_v50, %v444_v58  ;;  %v738_v10 = vsel %vm11846_vm0, %v60_v50, %v444_v58  ;;  %v784_v50 = vsel %vm612_vm1, %v70_v33, %v454_v42  ;;  %v456_v52 = vrot.slane %v72_v44, 2 }
  0x35   :  { %1557 = vst [vmem:[#allocation1 + $0x20] ss:$4 sm:$0xff] %v720_v56  ;;  %v741_v11 = vrot.slane %v739_v4, 2  ;;  %v74_v56 = vld [vmem:[%s11733_s0 + $0xa8] sm:$0xf] }
  0x36   :  { %1559 = vst [vmem:[#allocation1 + $0x21] ss:$4 sm:$0xff] %v723_v57  ;;  %v783_v57 = vsel %vm11846_vm0, %v70_v33, %v454_v42  ;;  %v793_v59 = vsel %vm612_vm1, %v72_v44, %v456_v52 }
  0x37   :  { %1560 = vst [vmem:[#allocation1 + $0x22] ss:$4 sm:$0xff] %v726_v61  ;;  %v789_v61 = vsel %vm11846_vm0, %v71_v43, %v455_v53  ;;  %v795_v4 = vrot.slane %v793_v59, 2  ;;  %v85_v53 = vld [vmem:[%s11733_s0 + $0xd4] sm:$0x3] }
  0x38   :  { %1561 = vst [vmem:[#allocation1 + $0x23] ss:$4 sm:$0xff] %v729_v0  ;;  %v458_v0 = vrot.slane %v74_v56, 2 }
  0x3a   :  { %v802_v6 = vsel %vm612_vm1, %v74_v56, %v458_v0 }
  0x3b   :  { %v7741_v12 = vld.sshfl [vmem:[#allocation1] sm:$0xff pattern:$0x73625140]  ;;  %v804_v15 = vrot.slane %v802_v6, 2 }
  0x3c   :  { %1565 = vst [vmem:[#allocation1] ss:$4 sm:$0xff] %v732_v2  ;;  %v792_v2 = vsel %vm11846_vm0, %v72_v44, %v456_v52  ;;  %v89_v6 = vld [vmem:[%s11733_s0 + $0xe4] sm:$0x3] }
  0x3d   :  { %1566 = vst [vmem:[#allocation1 + $0x1] ss:$4 sm:$0xff] %v735_v7  ;;  %v78_v7 = vld [vmem:[%s11733_s0 + $0xb8] sm:$0xf] }
  0x3e   :  { %1567 = vst [vmem:[#allocation1 + $0x2] ss:$4 sm:$0xff] %v738_v10  ;;  %v459_v10 = vrot.slane %v75_v1, 2 }
  0x3f   :  { %1569 = vst [vmem:[#allocation1 + $0x3] ss:$4 sm:$0xff] %v741_v11  ;;  %v7753_v22 = vld.sshfl [vmem:[#allocation1 + $0x20] sm:$0xff pattern:$0x73625140]  ;;  %v801_v11 = vsel %vm11846_vm0, %v74_v56, %v458_v0  ;;  %v470_v56 = vrot.slane %v86_v46, 2 }
  0x40   :  { %1570 = vst [vmem:[#allocation1 + $0x20] ss:$4 sm:$0xff] %v744_v18  ;;  %v80_v18 = vld [vmem:[%s11733_s0 + $0xc0] sm:$0xf]  ;;  %v807_v19 = vsel %vm11846_vm0, %v75_v1, %v459_v10 }
  0x41   :  { %2095 = vmatmul.bf16.gmra.mxu0 %v7654_v3  ;;  %v450_v3 = vrot.slane %v66_v17, 2  ;;  %1571 = vst [vmem:[#allocation1 + $0x21] ss:$4 sm:$0xff] %v747_v20  ;;  %v79_v20 = vld [vmem:[%s11733_s0 + $0xbc] sm:$0x3]  ;;  %v464_v27 = vrot.slane %v80_v18, 2  ;;  %v856_v1 = vsel %vm612_vm1, %v86_v46, %v470_v56 }
  0x42   :  { %1573 = vst [vmem:[#allocation1 + $0x22] ss:$4 sm:$0xff] %v750_v21  ;;  %v461_v21 = vrot.slane %v77_v13, 2  ;;  %v463_v28 = vrot.slane %v79_v20, 2 }
  0x43   :  { %1574 = vst [vmem:[#allocation1 + $0x23] ss:$4 sm:$0xff] %v753_v25  ;;  %v766_v32 = vsel %vm612_vm1, %v66_v17, %v450_v3  ;;  %v765_v38 = vsel %vm11846_vm0, %v66_v17, %v450_v3  ;;  %v462_v17 = vrot.slane %v78_v7, 2  ;;  %v810_v3 = vsel %vm11846_vm0, %v76_v60, %v460_v5 }
  0x44   :  { %v768_v40 = vrot.slane %v766_v32, 2  ;;  %v829_v37 = vsel %vm612_vm1, %v80_v18, %v464_v27  ;;  %v825_v39 = vsel %vm11846_vm0, %v79_v20, %v463_v28  ;;  %v828_v42 = vsel %vm11846_vm0, %v80_v18, %v464_v27  ;;  %v91_v20 = vld [vmem:[%s11733_s0 + $0xec] sm:$0x3] }
  0x45   :  { %v820_v25 = vsel %vm612_vm1, %v78_v7, %v462_v17  ;;  %v819_v32 = vsel %vm11846_vm0, %v78_v7, %v462_v17  ;;  %v831_v43 = vrot.slane %v829_v37, 2  ;;  %v469_v60 = vrot.slane %v85_v53, 2  ;;  %v95_v37 = vld [vmem:[%s11733_s0 + $0xfc] sm:$0x3] }
  0x46   :  { %v7769_v36 = vld.sshfl [vmem:[#allocation1] sm:$0xff pattern:$0x73625140]  ;;  %v855_v7 = vsel %vm11846_vm0, %v86_v46, %v470_v56  ;;  %v100_v56 = vld [vmem:[%s11733_s0 + $0x110] sm:$0xf] }
  0x47   :  { %1577 = vst [vmem:[#allocation1] ss:$4 sm:$0xff] %v756_v29  ;;  %v82_v29 = vld [vmem:[%s11733_s0 + $0xc8] sm:$0xf]  ;;  %v852_v5 = vsel %vm11846_vm0, %v85_v53, %v469_v60 }
  0x48   :  { %1579 = vst [vmem:[#allocation1 + $0x1] ss:$4 sm:$0xff] %v759_v30  ;;  %v816_v30 = vsel %vm11846_vm0, %v77_v13, %v461_v21  ;;  %v476_v21 = vrot.slane %v92_v16, 2 }
  0x49   :  { %1580 = vst [vmem:[#allocation1 + $0x2] ss:$4 sm:$0xff] %v762_v35  ;;  %v466_v35 = vrot.slane %v82_v29, 2 }
  0x4a   :  { %1581 = vst [vmem:[#allocation1 + $0x3] ss:$4 sm:$0xff] %v765_v38  ;;  %v7784_v51 = vld.sshfl [vmem:[#allocation1 + $0x20] sm:$0xff pattern:$0x73625140] }
  0x4b   :  { %1583 = vst [vmem:[#allocation1 + $0x20] ss:$4 sm:$0xff] %v768_v40  ;;  %v84_v38 = vld [vmem:[%s11733_s0 + $0xd0] sm:$0xf]  ;;  %v465_v40 = vrot.slane %v81_v31, 2  ;;  %v837_v52 = vsel %vm11846_vm0, %v82_v29, %v466_v35 }
  0x4c   :  { %1584 = vst [vmem:[#allocation1 + $0x21] ss:$4 sm:$0xff] %v771_v45  ;;  %v468_v44 = vrot.slane %v84_v38, 2  ;;  %v838_v45 = vsel %vm612_vm1, %v82_v29, %v466_v35  ;;  %v475_v29 = vrot.slane %v91_v20, 2 }
  0x4d   :  { %1585 = vst [vmem:[#allocation1 + $0x22] ss:$4 sm:$0xff] %v774_v47  ;;  %v834_v47 = vsel %vm11846_vm0, %v81_v31, %v465_v40 }
  0x4e   :  { %1587 = vst [vmem:[#allocation1 + $0x23] ss:$4 sm:$0xff] %v777_v48  ;;  %v847_v55 = vsel %vm612_vm1, %v84_v38, %v468_v44  ;;  %v879_v35 = vsel %vm11846_vm0, %v91_v20, %v475_v29 }
  0x4f   :  { %v849_v63 = vrot.slane %v847_v55, 2 }
  0x51   :  { %2100 = vmatmul.bf16.gmra.mxu0 %v7666_v14  ;;  %v786_v14 = vrot.slane %v784_v50, 2  ;;  %v7796_v58 = vld.sshfl [vmem:[#allocation1] sm:$0xff pattern:$0x73625140]  ;;  %v467_v50 = vrot.slane %v83_v41, 2 }
  0x52   :  { %1590 = vst [vmem:[#allocation1] ss:$4 sm:$0xff] %v780_v54  ;;  %v840_v54 = vrot.slane %v838_v45, 2 }
  0x53   :  { %1591 = vst [vmem:[#allocation1 + $0x1] ss:$4 sm:$0xff] %v783_v57  ;;  %v87_v57 = vld [vmem:[%s11733_s0 + $0xdc] sm:$0x3]  ;;  %v843_v59 = vsel %vm11846_vm0, %v83_v41, %v467_v50  ;;  %v882_v41 = vsel %vm11846_vm0, %v92_v16, %v476_v21 }
  0x54   :  { %1593 = vst [vmem:[#allocation1 + $0x2] ss:$4 sm:$0xff] %v786_v14  ;;  %v88_v14 = vld [vmem:[%s11733_s0 + $0xe0] sm:$0xf] }
  0x55   :  { %1594 = vst [vmem:[#allocation1 + $0x3] ss:$4 sm:$0xff] %v789_v61  ;;  %v7812_v9 = vld.sshfl [vmem:[#allocation1 + $0x20] sm:$0xff pattern:$0x73625140]  ;;  %v846_v61 = vsel %vm11846_vm0, %v84_v38, %v468_v44  ;;  %v479_v44 = vrot.slane %v95_v37, 2 }
  0x56   :  { %1595 = vst [vmem:[#allocation1 + $0x20] ss:$4 sm:$0xff] %v792_v2  ;;  %v472_v2 = vrot.slane %v88_v14, 2 }
  0x57   :  { %1597 = vst [vmem:[#allocation1 + $0x21] ss:$4 sm:$0xff] %v795_v4  ;;  %v471_v4 = vrot.slane %v87_v57, 2 }
  0x58   :  { %1598 = vst [vmem:[#allocation1 + $0x22] ss:$4 sm:$0xff] %v798_v8  ;;  %v858_v8 = vrot.slane %v856_v1, 2  ;;  %v864_v18 = vsel %vm11846_vm0, %v88_v14, %v472_v2 }
  0x59   :  { %1599 = vst [vmem:[#allocation1 + $0x23] ss:$4 sm:$0xff] %v801_v11  ;;  %v865_v11 = vsel %vm612_vm1, %v88_v14, %v472_v2  ;;  %v861_v13 = vsel %vm11846_vm0, %v87_v57, %v471_v4 }
  0x5c   :  { %v7827_v24 = vld.sshfl [vmem:[#allocation1] sm:$0xff pattern:$0x73625140] }
  0x5d   :  { %1603 = vst [vmem:[#allocation1] ss:$4 sm:$0xff] %v804_v15  ;;  %v473_v15 = vrot.slane %v89_v6, 2 }
  0x5e   :  { %1604 = vst [vmem:[#allocation1 + $0x1] ss:$4 sm:$0xff] %v807_v19  ;;  %v867_v19 = vrot.slane %v865_v11, 2  ;;  %v104_v11 = vld [vmem:[%s11733_s0 + $0x120] sm:$0xf] }
  0x5f   :  { %1605 = vst [vmem:[#allocation1 + $0x2] ss:$4 sm:$0xff] %v810_v3  ;;  %v94_v3 = vld [vmem:[%s11733_s0 + $0xf8] sm:$0xf] }
  0x60   :  { %1607 = vst [vmem:[#allocation1 + $0x3] ss:$4 sm:$0xff] %v813_v23  ;;  %v7839_v33 = vld.sshfl [vmem:[#allocation1 + $0x20] sm:$0xff pattern:$0x73625140]  ;;  %v870_v23 = vsel %vm11846_vm0, %v89_v6, %v473_v15  ;;  %v478_v31 = vrot.slane %v94_v3, 2 }
  0x61   :  { %2105 = vmatmul.bf16.gmra.mxu0 %v7680_v26  ;;  %v822_v26 = vrot.slane %v820_v25, 2  ;;  %1608 = vst [vmem:[#allocation1 + $0x20] ss:$4 sm:$0xff] %v816_v30  ;;  %v93_v30 = vld [vmem:[%s11733_s0 + $0xf4] sm:$0x3] }
  0x62   :  { %1609 = vst [vmem:[#allocation1 + $0x21] ss:$4 sm:$0xff] %v819_v32  ;;  %v477_v38 = vrot.slane %v93_v30, 2  ;;  %v891_v50 = vsel %vm11846_vm0, %v94_v3, %v478_v31 }
  0x63   :  { %1611 = vst [vmem:[#allocation1 + $0x22] ss:$4 sm:$0xff] %v822_v26  ;;  %v883_v26 = vsel %vm612_vm1, %v92_v16, %v476_v21 }
  0x64   :  { %1612 = vst [vmem:[#allocation1 + $0x23] ss:$4 sm:$0xff] %v825_v39  ;;  %v96_v39 = vld [vmem:[%s11733_s0 + $0x100] sm:$0xf]  ;;  %v888_v46 = vsel %vm11846_vm0, %v93_v30, %v477_v38 }
  0x65   :  { %v480_v45 = vrot.slane %v96_v39, 2 }
  0x67   :  { %v7855_v48 = vld.sshfl [vmem:[#allocation1] sm:$0xff pattern:$0x73625140]  ;;  %v901_v55 = vsel %vm612_vm1, %v96_v39, %v480_v45  ;;  %v900_v60 = vsel %vm11846_vm0, %v96_v39, %v480_v45  ;;  %v110_v45 = vld [vmem:[%s11733_s0 + $0x138] sm:$0xf] }
  0x68   :  { %1615 = vst [vmem:[#allocation1] ss:$4 sm:$0xff] %v828_v42  ;;  %v885_v42 = vrot.slane %v883_v26, 2 }
  0x69   :  { %1617 = vst [vmem:[#allocation1 + $0x1] ss:$4 sm:$0xff] %v831_v43  ;;  %v892_v43 = vsel %vm612_vm1, %v94_v3, %v478_v31  ;;  %v488_v3 = vrot.slane %v104_v11, 2  ;;  %v106_v31 = vld [vmem:[%s11733_s0 + $0x128] sm:$0xf] }
  0x6a   :  { %1618 = vst [vmem:[#allocation1 + $0x2] ss:$4 sm:$0xff] %v834_v47  ;;  %v894_v47 = vrot.slane %v892_v43, 2  ;;  %v490_v39 = vrot.slane %v106_v31, 2 }
  0x6b   :  { %1619 = vst [vmem:[#allocation1 + $0x3] ss:$4 sm:$0xff] %v837_v52  ;;  %v7870_v0 = vld.sshfl [vmem:[#allocation1 + $0x20] sm:$0xff pattern:$0x73625140]  ;;  %v937_v26 = vsel %vm612_vm1, %v104_v11, %v488_v3 }
  0x6c   :  { %1621 = vst [vmem:[#allocation1 + $0x20] ss:$4 sm:$0xff] %v840_v54  ;;  %v97_v52 = vld [vmem:[%s11733_s0 + $0x104] sm:$0x3]  ;;  %v897_v54 = vsel %vm11846_vm0, %v95_v37, %v479_v44  ;;  %v946_v44 = vsel %vm612_vm1, %v106_v31, %v490_v39 }
  0x6d   :  { %1622 = vst [vmem:[#allocation1 + $0x21] ss:$4 sm:$0xff] %v843_v59  ;;  %v481_v57 = vrot.slane %v97_v52, 2  ;;  %v99_v59 = vld [vmem:[%s11733_s0 + $0x10c] sm:$0x3] }
  0x6e   :  { %1623 = vst [vmem:[#allocation1 + $0x22] ss:$4 sm:$0xff] %v846_v61  ;;  %v903_v61 = vrot.slane %v901_v55, 2  ;;  %v494_v55 = vrot.slane %v110_v45, 2 }
  0x6f   :  { %1625 = vst [vmem:[#allocation1 + $0x23] ss:$4 sm:$0xff] %v849_v63  ;;  %v484_v63 = vrot.slane %v100_v56, 2  ;;  %v906_v2 = vsel %vm11846_vm0, %v97_v52, %v481_v57  ;;  %v945_v52 = vsel %vm11846_vm0, %v106_v31, %v490_v39  ;;  %v112_v57 = vld [vmem:[%s11733_s0 + $0x140] sm:$0xf] }
  0x70   :  { %v117_v31 = vld [vmem:[%s11733_s0 + $0x154] sm:$0x3] }
  0x71   :  { %2110 = vmatmul.bf16.gmra.mxu0 %v7691_v34  ;;  %v90_v34 = vld [vmem:[%s11733_s0 + $0xe8] sm:$0xf] }
  0x72   :  { %v7882_v10 = vld.sshfl [vmem:[#allocation1] sm:$0xff pattern:$0x73625140]  ;;  %v474_v17 = vrot.slane %v90_v34, 2 }
  0x73   :  { %1628 = vst [vmem:[#allocation1] ss:$4 sm:$0xff] %v852_v5  ;;  %v483_v5 = vrot.slane %v99_v59, 2 }
  0x74   :  { %1629 = vst [vmem:[#allocation1 + $0x1] ss:$4 sm:$0xff] %v855_v7  ;;  %v874_v27 = vsel %vm612_vm1, %v90_v34, %v474_v17  ;;  %v873_v28 = vsel %vm11846_vm0, %v90_v34, %v474_v17  ;;  %v102_v34 = vld [vmem:[%s11733_s0 + $0x118] sm:$0xf]  ;;  %v101_v17 = vld [vmem:[%s11733_s0 + $0x114] sm:$0x3] }
  0x75   :  { %1631 = vst [vmem:[#allocation1 + $0x2] ss:$4 sm:$0xff] %v858_v8  ;;  %v876_v32 = vrot.slane %v874_v27, 2  ;;  %v919_v8 = vsel %vm612_vm1, %v100_v56, %v484_v63  ;;  %v915_v16 = vsel %vm11846_vm0, %v99_v59, %v483_v5  ;;  %v485_v20 = vrot.slane %v101_v17, 2  ;;  %v114_v5 = vld [vmem:[%s11733_s0 + $0x148] sm:$0xf] }
  0x76   :  { %1632 = vst [vmem:[#allocation1 + $0x3] ss:$4 sm:$0xff] %v861_v13  ;;  %v7897_v25 = vld.sshfl [vmem:[#allocation1 + $0x20] sm:$0xff pattern:$0x73625140]  ;;  %v486_v13 = vrot.slane %v102_v34, 2 }
  0x77   :  { %1633 = vst [vmem:[#allocation1 + $0x20] ss:$4 sm:$0xff] %v864_v18  ;;  %v918_v18 = vsel %vm11846_vm0, %v100_v56, %v484_v63  ;;  %v111_v56 = vld [vmem:[%s11733_s0 + $0x13c] sm:$0x3] }
  0x78   :  { %1635 = vst [vmem:[#allocation1 + $0x21] ss:$4 sm:$0xff] %v867_v19  ;;  %v921_v19 = vrot.slane %v919_v8, 2  ;;  %v928_v21 = vsel %vm612_vm1, %v102_v34, %v486_v13  ;;  %v927_v29 = vsel %vm11846_vm0, %v102_v34, %v486_v13  ;;  %v116_v13 = vld [vmem:[%s11733_s0 + $0x150] sm:$0xf] }
  0x79   :  { %1636 = vst [vmem:[#allocation1 + $0x22] ss:$4 sm:$0xff] %v870_v23  ;;  %v105_v23 = vld [vmem:[%s11733_s0 + $0x124] sm:$0x3]  ;;  %v930_v30 = vrot.slane %v928_v21, 2 }
  0x7a   :  { %1637 = vst [vmem:[#allocation1 + $0x23] ss:$4 sm:$0xff] %v873_v28  ;;  %v924_v28 = vsel %vm11846_vm0, %v101_v17, %v485_v20  ;;  %v489_v38 = vrot.slane %v105_v23, 2 }
  0x7d   :  { %v1638_v40 = vld.sshfl [vmem:[#allocation1] sm:$0xff pattern:$0x73625140] }
  0x7e   :  { %2185 = vmatmul.bf16.vlgmr.msra.gmra.mxu1 %v1638_v40  ;;  %1641 = vst [vmem:[#allocation1] ss:$4 sm:$0xff] %v876_v32  ;;  %v107_v40 = vld [vmem:[%s11733_s0 + $0x12c] sm:$0x3] }
  0x7f   :  { %1642 = vst [vmem:[#allocation1 + $0x1] ss:$4 sm:$0xff] %v879_v35  ;;  %v108_v35 = vld [vmem:[%s11733_s0 + $0x130] sm:$0xf] }
  0x80   :  { %1643 = vst [vmem:[#allocation1 + $0x2] ss:$4 sm:$0xff] %v882_v41  ;;  %v936_v41 = vsel %vm11846_vm0, %v104_v11, %v488_v3  ;;  %v492_v43 = vrot.slane %v108_v35, 2  ;;  %v500_v3 = vrot.slane %v116_v13, 2 }
  0x81   :  { %2115 = vmatmul.bf16.gmra.mxu0 %v7710_v49  ;;  %1645 = vst [vmem:[#allocation1 + $0x3] ss:$4 sm:$0xff] %v885_v42  ;;  %v98_v49 = vld [vmem:[%s11733_s0 + $0x108] sm:$0xf]  ;;  %v939_v42 = vrot.slane %v937_v26, 2 }
  0x82   :  { %v1639_v53 = vld.sshfl [vmem:[#allocation1 + $0x20] sm:$0xff pattern:$0x73625140]  ;;  %v482_v14 = vrot.slane %v98_v49, 2 }
  0x83   :  { %1646 = vst [vmem:[#allocation1 + $0x20] ss:$4 sm:$0xff] %v888_v46  ;;  %v942_v46 = vsel %vm11846_vm0, %v105_v23, %v489_v38  ;;  %v118_v23 = vld [vmem:[%s11733_s0 + $0x158] sm:$0xf]  ;;  %v120_v38 = vld [vmem:[%s11733_s0 + $0x160] sm:$0xf] }
  0x84   :  { %1647 = vst [vmem:[#allocation1 + $0x21] ss:$4 sm:$0xff] %v891_v50  ;;  %v910_v4 = vsel %vm612_vm1, %v98_v49, %v482_v14  ;;  %v909_v6 = vsel %vm11846_vm0, %v98_v49, %v482_v14  ;;  %v491_v50 = vrot.slane %v107_v40, 2  ;;  %v109_v49 = vld [vmem:[%s11733_s0 + $0x134] sm:$0x3] }
  0x85   :  { %1649 = vst [vmem:[#allocation1 + $0x22] ss:$4 sm:$0xff] %v894_v47  ;;  %v912_v7 = vrot.slane %v910_v4, 2  ;;  %v493_v59 = vrot.slane %v109_v49, 2  ;;  %v496_v4 = vrot.slane %v112_v57, 2 }
  0x86   :  { %1650 = vst [vmem:[#allocation1 + $0x23] ss:$4 sm:$0xff] %v897_v54  ;;  %v955_v54 = vsel %vm612_vm1, %v108_v35, %v492_v43  ;;  %v951_v14 = vsel %vm11846_vm0, %v107_v40, %v491_v50  ;;  %v119_v40 = vld [vmem:[%s11733_s0 + $0x15c] sm:$0x3]  ;;  %v121_v50 = vld [vmem:[%s11733_s0 + $0x164] sm:$0x3] }
  0x87   :  { %v973_v11 = vsel %vm612_vm1, %v112_v57, %v496_v4  ;;  %v972_v20 = vsel %vm11846_vm0, %v112_v57, %v496_v4 }
  0x88   :  { %v7932_v1 = vld.sshfl [vmem:[#allocation1] sm:$0xff pattern:$0x73625140]  ;;  %v975_v21 = vrot.slane %v973_v11, 2 }
  0x89   :  { %1653 = vst [vmem:[#allocation1] ss:$4 sm:$0xff] %v900_v60  ;;  %v954_v60 = vsel %vm11846_vm0, %v108_v35, %v492_v43  ;;  %v991_v35 = vsel %vm612_vm1, %v116_v13, %v500_v3 }
  0x8a   :  { %1655 = vst [vmem:[#allocation1 + $0x1] ss:$4 sm:$0xff] %v903_v61  ;;  %v957_v61 = vrot.slane %v955_v54, 2  ;;  %v993_v43 = vrot.slane %v991_v35, 2  ;;  %v129_v35 = vld [vmem:[%s11733_s0 + $0x184] sm:$0x3] }
  0x8b   :  { %1656 = vst [vmem:[#allocation1 + $0x2] ss:$4 sm:$0xff] %v906_v2  ;;  %v964_v2 = vsel %vm612_vm1, %v110_v45, %v494_v55 }
  0x8c   :  { %1657 = vst [vmem:[#allocation1 + $0x3] ss:$4 sm:$0xff] %v909_v6  ;;  %v960_v6 = vsel %vm11846_vm0, %v109_v49, %v493_v59  ;;  %v966_v8 = vrot.slane %v964_v2, 2 }
  0x8d   :  { %v7944_v15 = vld.sshfl [vmem:[#allocation1 + $0x20] sm:$0xff pattern:$0x73625140] }
  0x8e   :  { %2190 = vmatmul.bf16.gmra.mxu1 %v1639_v53  ;;  %1659 = vst [vmem:[#allocation1 + $0x20] ss:$4 sm:$0xff] %v912_v7  ;;  %v948_v53 = vrot.slane %v946_v44, 2  ;;  %v963_v7 = vsel %vm11846_vm0, %v110_v45, %v494_v55  ;;  %v503_v45 = vrot.slane %v119_v40, 2 }
  0x8f   :  { %1660 = vst [vmem:[#allocation1 + $0x21] ss:$4 sm:$0xff] %v915_v16  ;;  %v498_v16 = vrot.slane %v114_v5, 2 }
  0x90   :  { %1661 = vst [vmem:[#allocation1 + $0x22] ss:$4 sm:$0xff] %v918_v18  ;;  %v1005_v57 = vsel %vm11846_vm0, %v119_v40, %v503_v45 }
  0x91   :  { %2120 = vmatmul.bf16.gmra.mxu0 %v7726_v62  ;;  %v103_v62 = vld [vmem:[%s11733_s0 + $0x11c] sm:$0x3]  ;;  %1663 = vst [vmem:[#allocation1 + $0x23] ss:$4 sm:$0xff] %v921_v19  ;;  %v115_v19 = vld [vmem:[%s11733_s0 + $0x14c] sm:$0x3] }
  0x92   :  { %v487_v27 = vrot.slane %v103_v62, 2 }
  0x93   :  { %v7964_v32 = vld.sshfl [vmem:[#allocation1] sm:$0xff pattern:$0x73625140] }
  0x94   :  { %v933_v37 = vsel %vm11846_vm0, %v103_v62, %v487_v27  ;;  %1666 = vst [vmem:[#allocation1] ss:$4 sm:$0xff] %v924_v28  ;;  %v982_v62 = vsel %vm612_vm1, %v114_v5, %v498_v16 }
  0x95   :  { %1667 = vst [vmem:[#allocation1 + $0x1] ss:$4 sm:$0xff] %v927_v29  ;;  %v499_v29 = vrot.slane %v115_v19, 2  ;;  %v984_v26 = vrot.slane %v982_v62, 2 }
  0x96   :  { %1669 = vst [vmem:[#allocation1 + $0x2] ss:$4 sm:$0xff] %v930_v30  ;;  %v981_v30 = vsel %vm11846_vm0, %v114_v5, %v498_v16 }
  0x97   :  { %1670 = vst [vmem:[#allocation1 + $0x3] ss:$4 sm:$0xff] %v933_v37  ;;  %v502_v37 = vrot.slane %v118_v23, 2  ;;  %v987_v39 = vsel %vm11846_vm0, %v115_v19, %v499_v29 }
  0x98   :  { %v7980_v47 = vld.sshfl [vmem:[#allocation1 + $0x20] sm:$0xff pattern:$0x73625140] }
  0x99   :  { %1671 = vst [vmem:[#allocation1 + $0x20] ss:$4 sm:$0xff] %v936_v41  ;;  %v501_v41 = vrot.slane %v117_v31, 2 }
  0x9a   :  { %1673 = vst [vmem:[#allocation1 + $0x21] ss:$4 sm:$0xff] %v939_v42  ;;  %v990_v42 = vsel %vm11846_vm0, %v116_v13, %v500_v3  ;;  %v125_v13 = vld [vmem:[%s11733_s0 + $0x174] sm:$0x3] }
  0x9b   :  { %1674 = vst [vmem:[#allocation1 + $0x22] ss:$4 sm:$0xff] %v942_v46  ;;  %v996_v46 = vsel %vm11846_vm0, %v117_v31, %v501_v41  ;;  %v509_v62 = vrot.slane %v125_v13, 2  ;;  %v130_v41 = vld [vmem:[%s11733_s0 + $0x188] sm:$0xf] }
  0x9c   :  { %1675 = vst [vmem:[#allocation1 + $0x23] ss:$4 sm:$0xff] %v945_v52  ;;  %v999_v52 = vsel %vm11846_vm0, %v118_v23, %v502_v37 }
  0x9e   :  { %2195 = vmatmul.bf16.gmra.mxu1 %v7932_v1  ;;  %v7997_v63 = vld.sshfl [vmem:[#allocation1] sm:$0xff pattern:$0x73625140] }
  0x9f   :  { %1679 = vst [vmem:[#allocation1] ss:$4 sm:$0xff] %v948_v53  ;;  %v113_v1 = vld [vmem:[%s11733_s0 + $0x144] sm:$0x3]  ;;  %v122_v53 = vld [vmem:[%s11733_s0 + $0x168] sm:$0xf] }
  0xa0   :  { %1680 = vst [vmem:[#allocation1 + $0x1] ss:$4 sm:$0xff] %v951_v14  ;;  %v497_v18 = vrot.slane %v113_v1, 2  ;;  %v505_v14 = vrot.slane %v121_v50, 2  ;;  %v506_v59 = vrot.slane %v122_v53, 2 }
  0xa1   :  { %2125 = vmatmul.bf16.gmra.mxu0 %v7741_v12  ;;  %v495_v12 = vrot.slane %v111_v56, 2  ;;  %1681 = vst [vmem:[#allocation1 + $0x2] ss:$4 sm:$0xff] %v954_v60  ;;  %v2086_v60 = vpop.f32.mrf.mxu0 }
  0xa2   :  { %1683 = vst [vmem:[#allocation1 + $0x3] ss:$4 sm:$0xff] %v957_v61  ;;  %v978_v27 = vsel %vm11846_vm0, %v113_v1, %v497_v18  ;;  %v123_v61 = vld [vmem:[%s11733_s0 + $0x16c] sm:$0x3]  ;;  %v1018_v5 = vsel %vm612_vm1, %v122_v53, %v506_v59  ;;  %v1014_v1 = vsel %vm11846_vm0, %v121_v50, %v505_v14  ;;  %v1017_v11 = vsel %vm11846_vm0, %v122_v53, %v506_v59  ;;  %v127_v18 = vld [vmem:[%s11733_s0 + $0x17c] sm:$0x3] }
  0xa3   :  { %v8008_v34 = vld.sshfl [vmem:[#allocation1 + $0x20] sm:$0xff pattern:$0x73625140]  ;;  %v969_v17 = vsel %vm11846_vm0, %v111_v56, %v495_v12  ;;  %v124_v56 = vld [vmem:[%s11733_s0 + $0x170] sm:$0xf]  ;;  %v1020_v16 = vrot.slane %v1018_v5, 2 }
  0xa4   :  { %1684 = vst [vmem:[#allocation1 + $0x20] ss:$4 sm:$0xff] %v960_v6  ;;  %v508_v12 = vrot.slane %v124_v56, 2  ;;  %v126_v6 = vld [vmem:[%s11733_s0 + $0x178] sm:$0xf]  ;;  %v511_v31 = vrot.slane %v127_v18, 2 }
  0xa5   :  { %1685 = vst [vmem:[#allocation1 + $0x21] ss:$4 sm:$0xff] %v963_v7  ;;  %v510_v19 = vrot.slane %v126_v6, 2 }
  0xa6   :  { %1687 = vst [vmem:[#allocation1 + $0x22] ss:$4 sm:$0xff] %v966_v8  ;;  %v507_v8 = vrot.slane %v123_v61, 2  ;;  %v1041_v45 = vsel %vm11846_vm0, %v127_v18, %v511_v31  ;;  %v134_v31 = vld [vmem:[%s11733_s0 + $0x198] sm:$0xf] }
  0xa7   :  { %1688 = vst [vmem:[#allocation1 + $0x23] ss:$4 sm:$0xff] %v969_v17  ;;  %v1027_v17 = vsel %vm612_vm1, %v124_v56, %v508_v12 }
  0xa8   :  { %v1023_v3 = vsel %vm11846_vm0, %v123_v61, %v507_v8 }
  0xa9   :  { %v8024_v28 = vld.sshfl [vmem:[#allocation1] sm:$0xff pattern:$0x73625140] }
  0xaa   :  { %1691 = vst [vmem:[#allocation1] ss:$4 sm:$0xff] %v972_v20  ;;  %v8083_v20 = vld [vmem:[%s11734_s2] ss:$0 sm:$0xff] }
  0xab   :  { %1693 = vst [vmem:[#allocation1 + $0x1] ss:$4 sm:$0xff] %v975_v21  ;;  %v128_v21 = vld [vmem:[%s11733_s0 + $0x180] sm:$0xf] }
  0xac   :  { %1694 = vst [vmem:[#allocation1 + $0x2] ss:$4 sm:$0xff] %v978_v27  ;;  %v1029_v27 = vrot.slane %v1027_v17, 2 }
  0xad   :  { %1695 = vst [vmem:[#allocation1 + $0x3] ss:$4 sm:$0xff] %v981_v30  ;;  %v2088_v30 = vpop.f32.mrf.mxu0 }
  0xae   :  { %2200 = vmatmul.bf16.gmra.mxu1 %v7944_v15  ;;  %v8041_v44 = vld.sshfl [vmem:[#allocation1 + $0x20] sm:$0xff pattern:$0x73625140]  ;;  %v504_v15 = vrot.slane %v120_v38, 2 }
  0xaf   :  { %1697 = vst [vmem:[#allocation1 + $0x20] ss:$4 sm:$0xff] %v984_v26  ;;  %v2087_v26 = vadd.f32 %v8083_v20, %v2086_v60 }
  0xb0   :  { %1698 = vst [vmem:[#allocation1 + $0x21] ss:$4 sm:$0xff] %v987_v39  ;;  %v1009_v55 = vsel %vm612_vm1, %v120_v38, %v504_v15  ;;  %v1008_v2 = vsel %vm11846_vm0, %v120_v38, %v504_v15  ;;  %v1032_v38 = vsel %vm11846_vm0, %v125_v13, %v509_v62  ;;  %v1035_v39 = vsel %vm11846_vm0, %v126_v6, %v510_v19 }
  0xb1   :  { %2130 = vmatmul.bf16.gmra.mxu0 %v7753_v22  ;;  %v1000_v22 = vsel %vm612_vm1, %v118_v23, %v502_v37  ;;  %1699 = vst [vmem:[#allocation1 + $0x22] ss:$4 sm:$0xff] %v990_v42  ;;  %v1011_v4 = vrot.slane %v1009_v55, 2  ;;  %v1026_v23 = vsel %vm11846_vm0, %v124_v56, %v508_v12  ;;  %v2089_v37 = vadd.f32 %v8083_v20, %v2088_v30 }
  0xb2   :  { %1701 = vst [vmem:[#allocation1 + $0x23] ss:$4 sm:$0xff] %v993_v43  ;;  %v1002_v49 = vrot.slane %v1000_v22, 2  ;;  %v513_v22 = vrot.slane %v129_v35, 2 }
  0xb3   :  { %v2447_v42 = vmax.f32 %v2089_v37, 0.0  ;;  %v135_v37 = vld [vmem:[%s11733_s0 + $0x19c] sm:$0x3] }
  0xb4   :  { %v8052_v54 = vld.sshfl [vmem:[#allocation1] sm:$0xff pattern:$0x73625140]  ;;  %v1050_v60 = vsel %vm11846_vm0, %v129_v35, %v513_v22  ;;  %v519_v22 = vrot.slane %v135_v37, 2 }
  0xb5   :  { %1704 = vst [vmem:[#allocation1] ss:$4 sm:$0xff] %v996_v46  ;;  %v2446_v46 = vmax.f32 %v2087_v26, 0.0  ;;  %v2735_v50 = vrot.slane %v2447_v42, 4  ;;  %v2091_v14 = vpop.f32.mrf.mxu0 }
  0xb6   :  { %1705 = vst [vmem:[#allocation1 + $0x1] ss:$4 sm:$0xff] %v999_v52  ;;  %v132_v52 = vld [vmem:[%s11733_s0 + $0x190] sm:$0xf]  ;;  %v2092_v12 = vadd.f32 %v8083_v20, %v2091_v14 }
  0xb7   :  { %1707 = vst [vmem:[#allocation1 + $0x2] ss:$4 sm:$0xff] %v1002_v49  ;;  %v514_v49 = vrot.slane %v130_v41, 2  ;;  %v3022_v56 = vmax.f32 %v2446_v46, %v2735_v50  ;;  %v516_v59 = vrot.slane %v132_v52, 2 }
  0xb8   :  { %1708 = vst [vmem:[#allocation1 + $0x3] ss:$4 sm:$0xff] %v1005_v57  ;;  %v131_v57 = vld [vmem:[%s11733_s0 + $0x18c] sm:$0x3] }
  0xb9   :  { %v8068_v7 = vld.sshfl [vmem:[#allocation1 + $0x20] sm:$0xff pattern:$0x73625140]  ;;  %v1054_v61 = vsel %vm612_vm1, %v130_v41, %v514_v49  ;;  %v1053_v5 = vsel %vm11846_vm0, %v130_v41, %v514_v49 }
  0xba   :  { %1709 = vst [vmem:[#allocation1 + $0x20] ss:$4 sm:$0xff] %v1008_v2  ;;  %v1056_v13 = vrot.slane %v1054_v61, 2 }
  0xbb   :  { %1711 = vst [vmem:[#allocation1 + $0x21] ss:$4 sm:$0xff] %v1011_v4  ;;  %v7104_v4 = vrot.slane %v3022_v56, 9 }
  0xbc   :  { %1712 = vst [vmem:[#allocation1 + $0x22] ss:$4 sm:$0xff] %v1014_v1  ;;  %v2734_v1 = vrot.slane %v2446_v46, 4 }
  0xbd   :  { %1713 = vst [vmem:[#allocation1 + $0x23] ss:$4 sm:$0xff] %v1017_v11  ;;  %v3358_v8 = vmax.f32 %v3022_v56, %v7104_v4  ;;  %v2448_v11 = vmax.f32 %v2092_v12, 0.0  ;;  %v1077_v56 = vsel %vm11846_vm0, %v135_v37, %v519_v22 }
  0xbe   :  { %2205 = vmatmul.bf16.gmra.mxu1 %v7964_v32  ;;  %v512_v32 = vrot.slane %v128_v21, 2 }
  0xbf   :  { %v8090_v29 = vld.sshfl [vmem:[#allocation1] sm:$0xff pattern:$0x73625140]  ;;  %v2736_v17 = vrot.slane %v2448_v11, 4  ;;  %v3023_v18 = vmax.f32 %v2734_v1, %v2448_v11 }
  0xc0   :  { %1717 = vst [vmem:[#allocation1] ss:$4 sm:$0xff] %v1020_v16  ;;  %v1045_v15 = vsel %vm612_vm1, %v128_v21, %v512_v32  ;;  %v1044_v53 = vsel %vm11846_vm0, %v128_v21, %v512_v32  ;;  %v1063_v16 = vsel %vm612_vm1, %v132_v52, %v516_v59  ;;  %v2093_v32 = vpop.f32.mrf.mxu0 }
  0xc1   :  { %2135 = vmatmul.bf16.gmra.mxu0 %v7769_v36  ;;  %v1036_v36 = vsel %vm612_vm1, %v126_v6, %v510_v19  ;;  %1718 = vst [vmem:[#allocation1 + $0x1] ss:$4 sm:$0xff] %v1023_v3  ;;  %v1047_v55 = vrot.slane %v1045_v15, 2  ;;  %v515_v6 = vrot.slane %v131_v57, 2  ;;  %v3934_v19 = vperm.slane %v3358_v8, 2 }
  0xc2   :  { %1719 = vst [vmem:[#allocation1 + $0x2] ss:$4 sm:$0xff] %v1026_v23  ;;  %v1038_v40 = vrot.slane %v1036_v36, 2  ;;  %v3024_v62 = vmax.f32 %v2447_v42, %v2736_v17  ;;  %v7152_v23 = vrot.slane %v3023_v18, 9  ;;  %v1065_v36 = vrot.slane %v1063_v16, 2 }
  0xc3   :  { %1721 = vst [vmem:[#allocation1 + $0x3] ss:$4 sm:$0xff] %v1029_v27  ;;  %v1059_v21 = vsel %vm11846_vm0, %v131_v57, %v515_v6  ;;  %v1062_v27 = vsel %vm11846_vm0, %v132_v52, %v516_v59  ;;  %v4511_v35 = vsel %vm4510_vm2, %v3358_v8, %v3934_v19  ;;  %v2094_v14 = vadd.f32 %v8083_v20, %v2093_v32  ;;  %v136_v16 = vld [vmem:[%s11733_s0 + $0x1a0] sm:$0xf]  ;;  %v137_v17 = vld [vmem:[%s11733_s0 + $0x1a4] sm:$0x3] }
  0xc4   :  { %v8103_v43 = vld.sshfl [vmem:[#allocation1 + $0x20] sm:$0xff pattern:$0x73625140]  ;;  %v7200_v30 = vrot.slane %v3024_v62, 9 }
  0xc5   :  { %1722 = vst [vmem:[#allocation1 + $0x20] ss:$4 sm:$0xff] %v1032_v38  ;;  %v518_v38 = vrot.slane %v134_v31, 2  ;;  %v2449_v1 = vmax.f32 %v2094_v14, 0.0 }
  0xc6   :  { %1723 = vst [vmem:[#allocation1 + $0x21] ss:$4 sm:$0xff] %v1035_v39  ;;  %v3838_v39 = vmax.f32 %v3024_v62, %v7200_v30 }
  0xc7   :  { %1725 = vst [vmem:[#allocation1 + $0x22] ss:$4 sm:$0xff] %v1038_v40  ;;  %v1072_v46 = vsel %vm612_vm1, %v134_v31, %v518_v38 }
  0xc8   :  { %1726 = vst [vmem:[#allocation1 + $0x23] ss:$4 sm:$0xff] %v1041_v45  ;;  %v1071_v45 = vsel %vm11846_vm0, %v134_v31, %v518_v38  ;;  %v4318_v50 = vperm.slane %v3838_v39, 0  ;;  %v4414_v52 = vperm.slane %v3838_v39, 2  ;;  %v2096_v59 = vpop.f32.mrf.mxu0 }
  0xc9   :  { %v2097_v61 = vadd.f32 %v8083_v20, %v2096_v59  ;;  %v139_v59 = vld [vmem:[%s11733_s0 + $0x1ac] sm:$0x3] }
  0xca   :  { %v8116_v2 = vld.sshfl [vmem:[#allocation1] sm:$0xff pattern:$0x73625140] }
  0xcb   :  { %1729 = vst [vmem:[#allocation1] ss:$4 sm:$0xff] %v1044_v53  ;;  %v2450_v6 = vmax.f32 %v2097_v61, 0.0 }
  0xcc   :  { %1731 = vst [vmem:[#allocation1 + $0x1] ss:$4 sm:$0xff] %v1047_v55  ;;  %v1074_v55 = vrot.slane %v1072_v46, 2 }
  0xcd   :  { %1732 = vst [vmem:[#allocation1 + $0x2] ss:$4 sm:$0xff] %v1050_v60  ;;  %v2738_v8 = vrot.slane %v2450_v6, 4 }
  0xce   :  { %1733 = vst [vmem:[#allocation1 + $0x3] ss:$4 sm:$0xff] %v1053_v5  ;;  %2210 = vmatmul.bf16.gmra.mxu1 %v7980_v47  ;;  %v3598_v47 = vmax.f32 %v3023_v18, %v7152_v23  ;;  %v138_v18 = vld [vmem:[%s11733_s0 + $0x1a8] sm:$0xf] }
  0xcf   :  { %v1728_v3 = vld.sshfl [vmem:[#allocation1 + $0x20] sm:$0xff pattern:$0x73625140]  ;;  %v3025_v11 = vmax.f32 %v2449_v1, %v2738_v8  ;;  %v522_v62 = vrot.slane %v138_v18, 2 }
  0xd0   :  { %2260 = vmatmul.bf16.vlgmr.msra.gmra.mxu2 %v1728_v3  ;;  %1735 = vst [vmem:[#allocation1 + $0x20] ss:$4 sm:$0xff] %v1056_v13  ;;  %v4078_v40 = vperm.slane %v3598_v47, 0  ;;  %v4174_v41 = vperm.slane %v3598_v47, 2  ;;  %v2098_v13 = vpop.f32.mrf.mxu0 }
  0xd1   :  { %2140 = vmatmul.bf16.gmra.mxu0 %v7784_v51  ;;  %v133_v51 = vld [vmem:[%s11733_s0 + $0x194] sm:$0x3]  ;;  %1736 = vst [vmem:[#allocation1 + $0x21] ss:$4 sm:$0xff] %v1059_v21  ;;  %v2099_v19 = vadd.f32 %v8083_v20, %v2098_v13  ;;  %v521_v21 = vrot.slane %v137_v17, 2  ;;  %v1090_v61 = vsel %vm612_vm1, %v138_v18, %v522_v62 }
  0xd2   :  { %v517_v26 = vrot.slane %v133_v51, 2  ;;  %1737 = vst [vmem:[#allocation1 + $0x22] ss:$4 sm:$0xff] %v1062_v27  ;;  %v4559_v49 = vsel %vm11846_vm0, %v4511_v35, %v4078_v40  ;;  %v2737_v27 = vrot.slane %v2449_v1, 4  ;;  %v1092_v8 = vrot.slane %v1090_v61, 2 }
  0xd3   :  { %1739 = vst [vmem:[#allocation1 + $0x23] ss:$4 sm:$0xff] %v1065_v36  ;;  %v4608_v53 = vsel %vm11841_vm3, %v4559_v49, %v4174_v41  ;;  %v2451_v36 = vmax.f32 %v2099_v19, 0.0  ;;  %v1086_v31 = vsel %vm11846_vm0, %v137_v17, %v521_v21 }
  0xd4   :  { %v1068_v15 = vsel %vm11846_vm0, %v133_v51, %v517_v26  ;;  %v4657_v57 = vsel %vm11840_vm4, %v4608_v53, %v4318_v50  ;;  %v1089_v26 = vsel %vm11846_vm0, %v138_v18, %v522_v62 }
  0xd5   :  { %v1740_v42 = vld.sshfl [vmem:[#allocation1] sm:$0xff pattern:$0x73625140]  ;;  %v8144_v60 = vsel %vm11830_vm5, %v4657_v57, %v4414_v52  ;;  %v2739_v35 = vrot.slane %v2451_v36, 4  ;;  %v3026_v37 = vmax.f32 %v2737_v27, %v2451_v36 }
  0xd6   :  { %1742 = vst [vmem:[#allocation1] ss:$4 sm:$0xff] %v1068_v15  ;;  %v4898_v4 = vrot.slane %v8144_v60, 3  ;;  %v4834_v12 = vrot.slane %v8144_v60, 2  ;;  %v4770_v5 = vrot.slane %v8144_v60, 1  ;;  %v4962_v3 = vrot.slane %v8144_v60, 4 }
  0xd7   :  { %1743 = vst [vmem:[#allocation1 + $0x1] ss:$4 sm:$0xff] %v1071_v45  ;;  %v3027_v38 = vmax.f32 %v2450_v6, %v2739_v35  ;;  %v7153_v39 = vrot.slane %v3026_v37, 9  ;;  %v523_v6 = vrot.slane %v139_v59, 2 }
  0xd8   :  { %1746 = vst [vmem:[#allocation1 + $0x3] ss:$4 sm:$0xff] %v1077_v56  ;;  %4914 = vrot.lane.b32.xlu2 %v4898_v4, %s7491_s17  ;;  %4850 = vrot.lane.b32.xlu1 %v4834_v12, %s7492_s18  ;;  %v2101_v41 = vpop.f32.mrf.mxu0 }
  0xd9   :  { %11847 = vst [vmem:[#allocation2_spill] sm:$0xff] %v8144_v60  ;;  %4786 = vrot.lane.b32.xlu0 %v4770_v5, %s7493_s1  ;;  %v7201_v22 = vrot.slane %v3027_v38, 9 }
  0xda   :  { %1745 = vst [vmem:[#allocation1 + $0x2] ss:$4 sm:$0xff] %v1074_v55  ;;  %v1741_v23 = vld.sshfl [vmem:[#allocation1 + $0x20] sm:$0xff pattern:$0x73625140] }
  0xdb   :  { %1750 = vst [vmem:[#allocation1 + $0x22] ss:$4 sm:$0xff] %v1086_v31  ;;  %v3839_v15 = vmax.f32 %v3027_v38, %v7201_v22 }
  0xdc   :  { %1751 = vst [vmem:[#allocation1 + $0x23] ss:$4 sm:$0xff] %v1089_v26 }
  0xdd   :  { %v4319_v52 = vperm.slane %v3839_v15, 0  ;;  %v4415_v49 = vperm.slane %v3839_v15, 2 }
  0xde   :  { %2215 = vmatmul.bf16.gmra.mxu1 %v7997_v63  ;;  %v520_v63 = vrot.slane %v136_v16, 2 }
  0xe0   :  { %2265 = vmatmul.bf16.gmra.mxu2 %v1740_v42  ;;  %v1080_v32 = vsel %vm11846_vm0, %v136_v16, %v520_v63  ;;  %v1081_v51 = vsel %vm612_vm1, %v136_v16, %v520_v63  ;;  %v3599_v42 = vmax.f32 %v3026_v37, %v7153_v39  ;;  %v2103_v57 = vpop.f32.mrf.mxu0  ;;  %v1095_v16 = vsel %vm11846_vm0, %v139_v59, %v523_v6 }
  0xe1   :  { %2145 = vmatmul.bf16.gmra.mxu0 %v7796_v58  ;;  %v7105_v58 = vrot.slane %v3025_v11, 9  ;;  %4978 = vrot.lane.b32.xlu0 %v4962_v3, %s7494_s25  ;;  %v1083_v30 = vrot.slane %v1081_v51, 2  ;;  %1747 = vst [vmem:[#allocation1 + $0x20] ss:$4 sm:$0xff] %v1080_v32  ;;  %v2104_v4 = vadd.f32 %v8083_v20, %v2103_v57 }
  0xe2   :  { %v4079_v45 = vperm.slane %v3599_v42, 0  ;;  %v4175_v46 = vperm.slane %v3599_v42, 2 }
  0xe3   :  { %v3359_v47 = vmax.f32 %v3025_v11, %v7105_v58  ;;  %1749 = vst [vmem:[#allocation1 + $0x21] ss:$4 sm:$0xff] %v1083_v30  ;;  %v1752_v11 = vld.sshfl [vmem:[#allocation1] sm:$0xff pattern:$0x73625140]  ;;  %v2453_v13 = vmax.f32 %v2104_v4, 0.0 }
  0xe4   :  { %1755 = vst [vmem:[#allocation1] ss:$4 sm:$0xff] %v1092_v8 }
  0xe5   :  { %v3935_v40 = vperm.slane %v3359_v47, 2  ;;  %v2741_v19 = vrot.slane %v2453_v13, 4  ;;  %1756 = vst [vmem:[#allocation1 + $0x1] ss:$4 sm:$0xff] %v1095_v16 }
  0xe7   :  { %v4512_v50 = vsel %vm4510_vm2, %v3359_v47, %v3935_v40 }
  0xe8   :  { %v4560_v53 = vsel %vm11846_vm0, %v4512_v50, %v4079_v45  ;;  %v2106_v62 = vpop.f32.mrf.mxu0  ;;  %v143_v45 = vld [vmem:[%s11733_s0 + $0x1bc] sm:$0x3] }
  0xe9   :  { %v4609_v55 = vsel %vm11841_vm3, %v4560_v53, %v4175_v46  ;;  %v2107_v27 = vadd.f32 %v8083_v20, %v2106_v62  ;;  %v527_v59 = vrot.slane %v143_v45, 2  ;;  %v146_v62 = vld [vmem:[%s11733_s0 + $0x1c8] sm:$0xf] }
  0xea   :  { %v4658_v56 = vsel %vm11840_vm4, %v4609_v55, %v4319_v52 }
  0xeb   :  { %v8178_v14 = vsel %vm11830_vm5, %v4658_v56, %v4415_v49  ;;  %v2454_v47 = vmax.f32 %v2107_v27, 0.0  ;;  %v1753_v56 = vld.sshfl [vmem:[#allocation1 + $0x20] sm:$0xff pattern:$0x73625140]  ;;  %v530_v27 = vrot.slane %v146_v62, 2 }
  0xec   :  { %11848 = vst [vmem:[#allocation3_spill] sm:$0xff] %v8178_v14  ;;  %5034 = vrot.lane.b32.xlu1 %v8178_v14, %s7495_s30  ;;  %v4835_v12 = vrot.slane %v8178_v14, 2  ;;  %v4771_v5 = vrot.slane %v8178_v14, 1  ;;  %v4963_v3 = vrot.slane %v8178_v14, 4  ;;  %v4899_v36 = vrot.slane %v8178_v14, 3 }
  0xed   :  { %v2742_v31 = vrot.slane %v2454_v47, 4 }
  0xee   :  { %2220 = vmatmul.bf16.gmra.mxu1 %v8008_v34  ;;  %v2102_v34 = vadd.f32 %v8083_v20, %v2101_v41  ;;  %4852 = vrot.lane.b32.xlu2 %v4835_v12, %s7492_s18 }
  0xef   :  { %4788 = vrot.lane.b32.xlu0 %v4771_v5, %s7493_s1  ;;  %v3030_v37 = vmax.f32 %v2453_v13, %v2742_v31 }
  0xf0   :  { %2270 = vmatmul.bf16.gmra.mxu2 %v1741_v23  ;;  %v2452_v58 = vmax.f32 %v2102_v34, 0.0  ;;  %v2108_v40 = vpop.f32.mrf.mxu0 }
  0xf1   :  { %2150 = vmatmul.bf16.gmra.mxu0 %v7812_v9  ;;  %v140_v9 = vld [vmem:[%s11733_s0 + $0x1b0] sm:$0xf]  ;;  %v7202_v42 = vrot.slane %v3030_v37, 9 }
  0xf2   :  { %v524_v1 = vrot.slane %v140_v9, 2  ;;  %v3028_v21 = vmax.f32 %v2452_v58, %v2741_v19  ;;  %v2740_v51 = vrot.slane %v2452_v58, 4  ;;  %v2109_v19 = vadd.f32 %v8083_v20, %v2108_v40 }
  0xf3   :  { %v3840_v52 = vmax.f32 %v3030_v37, %v7202_v42 }
  0xf4   :  { %v1098_v17 = vsel %vm11846_vm0, %v140_v9, %v524_v1  ;;  %v1099_v18 = vsel %vm612_vm1, %v140_v9, %v524_v1  ;;  %v7106_v23 = vrot.slane %v3028_v21, 9  ;;  %4980 = vrot.lane.b32.xlu1 %v4963_v3, %s7494_s25  ;;  %v3029_v26 = vmax.f32 %v2740_v51, %v2454_v47 }
  0xf5   :  { %v1101_v63 = vrot.slane %v1099_v18, 2  ;;  %1757 = vst [vmem:[#allocation1 + $0x2] ss:$4 sm:$0xff] %v1098_v17  ;;  %v4320_v34 = vperm.slane %v3840_v52, 0  ;;  %v4416_v4 = vperm.slane %v3840_v52, 2  ;;  %v2455_v51 = vmax.f32 %v2109_v19, 0.0 }
  0xf6   :  { %5090 = vrot.lane.b32.xlu2 %v4771_v5, %s7496_s10  ;;  %v3360_v30 = vmax.f32 %v3028_v21, %v7106_v23  ;;  %v7154_v38 = vrot.slane %v3029_v26, 9 }
  0xf7   :  { %1759 = vst [vmem:[#allocation1 + $0x3] ss:$4 sm:$0xff] %v1101_v63  ;;  %4916 = vrot.lane.b32.xlu0 %v4899_v36, %s7491_s17  ;;  %v2743_v52 = vrot.slane %v2455_v51, 4 }
  0xf8   :  { %v3936_v39 = vperm.slane %v3360_v30, 2  ;;  %v3600_v41 = vmax.f32 %v3029_v26, %v7154_v38  ;;  %v2111_v17 = vpop.f32.mrf.mxu0 }
  0xf9   :  { %v8245_v63 = vadd.f32 %v8083_v20, %v2111_v17 }
  0xfa   :  { %v4080_v49 = vperm.slane %v3600_v41, 0  ;;  %v4176_v53 = vperm.slane %v3600_v41, 2  ;;  %v4513_v57 = vsel %vm4510_vm2, %v3360_v30, %v3936_v39  ;;  %v1126_v30 = vsel %vm612_vm1, %v146_v62, %v530_v27 }
  0xfb   :  { %v2186_v32 = vpop.f32.mrf.mxu1  ;;  %v2456_v23 = vmax.f32 %v8245_v63, 0.0  ;;  %v1128_v31 = vrot.slane %v1126_v30, 2  ;;  %v153_v63 = vld [vmem:[%s11733_s0 + $0x1e4] sm:$0x3] }
  0xfc   :  { %v8207_v35 = vadd.f32 %v8083_v20, %v2186_v32  ;;  %5202 = vrot.lane.b32.xlu1 %v4899_v36, %s7497_s11  ;;  %v4561_v5 = vsel %vm11846_vm0, %v4513_v57, %v4080_v49  ;;  %v148_v36 = vld [vmem:[%s11733_s0 + $0x1d0] sm:$0xf]  ;;  %v147_v32 = vld [vmem:[%s11733_s0 + $0x1cc] sm:$0x3] }
  0xfd   :  { %v4610_v1 = vsel %vm11841_vm3, %v4561_v5, %v4176_v53  ;;  %v2744_v47 = vrot.slane %v2456_v23, 4  ;;  %v531_v26 = vrot.slane %v147_v32, 2  ;;  %v532_v37 = vrot.slane %v148_v36, 2 }
  0xfe   :  { %2225 = vmatmul.bf16.gmra.mxu1 %v8024_v28  ;;  %v142_v28 = vld [vmem:[%s11733_s0 + $0x1b8] sm:$0xf]  ;;  %v11751_v22 = vmax.f32 %v8207_v35, 0.0  ;;  %5258 = vrot.lane.b32.xlu2 %v4963_v3, %s7498_s20  ;;  %v4659_v13 = vsel %vm11840_vm4, %v4610_v1, %v4320_v34  ;;  %v8268_v38 = vld.sshfl [vmem:[#allocation1] sm:$0xff pattern:$0x73625140] }
  0xff   :  { %v526_v50 = vrot.slane %v142_v28, 2  ;;  %5146 = vrot.lane.b32.xlu0 %v4835_v12, %s7499_s21  ;;  %v1113_v12 = vsel %vm11846_vm0, %v143_v45, %v527_v59  ;;  %v8237_v18 = vsel %vm11830_vm5, %v4659_v13, %v4416_v4  ;;  %v3031_v39 = vmax.f32 %v2455_v51, %v2744_v47  ;;  %v152_v34 = vld [vmem:[%s11733_s0 + $0x1e0] sm:$0xf] }
 0x100   :  { %2275 = vmatmul.bf16.gmra.mxu2 %v1752_v11  ;;  %1764 = vst [vmem:[#allocation1 + $0x23] ss:$4 sm:$0xff] %v1113_v12  ;;  %v5138_v21 = vrot.slane %v8237_v18, 2  ;;  %v5194_v40 = vrot.slane %v8237_v18, 3  ;;  %v2113_v42 = vpop.f32.mrf.mxu0  ;;  %v1135_v57 = vsel %vm612_vm1, %v148_v36, %v532_v37  ;;  %v1134_v4 = vsel %vm11846_vm0, %v148_v36, %v532_v37 }
 0x101   :  { %2155 = vmatmul.bf16.gmra.mxu0 %v7827_v24  ;;  %v141_v24 = vld [vmem:[%s11733_s0 + $0x1b4] sm:$0x3]  ;;  %v1107_v61 = vsel %vm11846_vm0, %v142_v28, %v526_v50  ;;  %v1108_v8 = vsel %vm612_vm1, %v142_v28, %v526_v50  ;;  %v1125_v28 = vsel %vm11846_vm0, %v146_v62, %v530_v27  ;;  %v2114_v45 = vadd.f32 %v8083_v20, %v2113_v42 }
 0x102   :  { %v525_v46 = vrot.slane %v141_v24, 2  ;;  %1761 = vst [vmem:[#allocation1 + $0x21] ss:$4 sm:$0xff] %v1107_v61  ;;  %v1110_v16 = vrot.slane %v1108_v8, 2  ;;  %v1137_v17 = vrot.slane %v1135_v57, 2  ;;  %v11743_v30 = vrot.slane %v8237_v18, 4 }
 0x103   :  { %v2188_v15 = vpop.f32.mrf.mxu1  ;;  %1771 = vst [vmem:[#allocation1 + $0x3] ss:$4 sm:$0xff] %v1125_v28  ;;  %v537_v42 = vrot.slane %v153_v63, 2  ;;  %v150_v28 = vld [vmem:[%s11733_s0 + $0x1d8] sm:$0xf] }
 0x104   :  { %v8221_v55 = vadd.f32 %v8083_v20, %v2188_v15  ;;  %v1104_v9 = vsel %vm11846_vm0, %v141_v24, %v525_v46  ;;  %1763 = vst [vmem:[#allocation1 + $0x22] ss:$4 sm:$0xff] %v1110_v16  ;;  %5148 = vrot.lane.b32.xlu1 %v5138_v21, %s7499_s21  ;;  %v5082_v24 = vrot.slane %v8237_v18, 1  ;;  %v7107_v15 = vrot.slane %v3031_v39, 9  ;;  %v145_v46 = vld [vmem:[%s11733_s0 + $0x1c4] sm:$0x3] }
 0x105   :  { %1760 = vst [vmem:[#allocation1 + $0x20] ss:$4 sm:$0xff] %v1104_v9  ;;  %v529_v53 = vrot.slane %v145_v46, 2  ;;  %v2457_v9 = vmax.f32 %v2114_v45, 0.0  ;;  %v534_v57 = vrot.slane %v150_v28, 2 }
 0x106   :  { %v11748_v6 = vmax.f32 %v8221_v55, 0.0  ;;  %5036 = vrot.lane.b32.xlu2 %v8237_v18, %s7495_s30  ;;  %v3361_v1 = vmax.f32 %v3031_v39, %v7107_v15 }
 0x107   :  { %5314 = vrot.lane.b32.xlu0 %v8237_v18, %s7500_s24  ;;  %v1122_v12 = vsel %vm11846_vm0, %v145_v46, %v529_v53  ;;  %v2745_v13 = vrot.slane %v2457_v9, 4  ;;  %v3032_v16 = vmax.f32 %v2743_v52, %v2457_v9 }
 0x108   :  { %v2775_v11 = vrot.slane %v11748_v6, 4  ;;  %1770 = vst [vmem:[#allocation1 + $0x2] ss:$4 sm:$0xff] %v1122_v12  ;;  %v3937_v51 = vperm.slane %v3361_v1, 2  ;;  %v2116_v47 = vpop.f32.mrf.mxu0 }
 0x109   :  { %v3033_v27 = vmax.f32 %v2456_v23, %v2745_v13  ;;  %v7155_v36 = vrot.slane %v3032_v16, 9  ;;  %v8313_v23 = vadd.f32 %v8083_v20, %v2116_v47 }
 0x10a   :  { %v8241_v58 = vmax.f32 %v11751_v22, %v2775_v11  ;;  %v4514_v52 = vsel %vm4510_vm2, %v3361_v1, %v3937_v51 }
 0x10b   :  { %v2191_v3 = vpop.f32.mrf.mxu1  ;;  %v3601_v37 = vmax.f32 %v3032_v16, %v7155_v36  ;;  %v7203_v39 = vrot.slane %v3033_v27, 9  ;;  %v2458_v12 = vmax.f32 %v8313_v23, 0.0  ;;  %v1158_v36 = vsel %vm11846_vm0, %v153_v63, %v537_v42 }
 0x10c   :  { %v8272_v41 = vld.sshfl [vmem:[#allocation1 + $0x20] sm:$0xff pattern:$0x73625140]  ;;  %5370 = vrot.lane.b32.xlu1 %v5082_v24, %s7501_s22 }
 0x10d   :  { %1773 = vst [vmem:[#allocation1 + $0x20] ss:$4 sm:$0xff] %v1128_v31  ;;  %v3841_v45 = vmax.f32 %v3033_v27, %v7203_v39  ;;  %v4081_v46 = vperm.slane %v3601_v37, 0  ;;  %v2746_v23 = vrot.slane %v2458_v12, 4 }
 0x10e   :  { %2230 = vmatmul.bf16.gmra.mxu1 %v8041_v44  ;;  %v144_v44 = vld [vmem:[%s11733_s0 + $0x1c0] sm:$0xf]  ;;  %5204 = vrot.lane.b32.xlu2 %v5194_v40, %s7497_s11  ;;  %1775 = vst [vmem:[#allocation1 + $0x22] ss:$4 sm:$0xff] %v1134_v4 }
 0x10f   :  { %v528_v50 = vrot.slane %v144_v44, 2  ;;  %5092 = vrot.lane.b32.xlu0 %v5082_v24, %s7496_s10  ;;  %1777 = vst [vmem:[#allocation1 + $0x23] ss:$4 sm:$0xff] %v1137_v17  ;;  %v4417_v4 = vperm.slane %v3841_v45, 2 }
 0x110   :  { %2280 = vmatmul.bf16.gmra.mxu2 %v1753_v56  ;;  %v1131_v56 = vsel %vm11846_vm0, %v147_v32, %v531_v26  ;;  %v8309_v32 = vld [vmem:[%s11733_s0 + $0x1e8] sm:$0xf]  ;;  %v2118_v27 = vpop.f32.mrf.mxu0 }
 0x111   :  { %2160 = vmatmul.bf16.gmra.mxu0 %v7839_v33  ;;  %v2192_v33 = vadd.f32 %v8083_v20, %v2191_v3  ;;  %v1116_v61 = vsel %vm11846_vm0, %v144_v44, %v528_v50  ;;  %v1117_v8 = vsel %vm612_vm1, %v144_v44, %v528_v50  ;;  %v536_v3 = vrot.slane %v152_v34, 2  ;;  %1774 = vst [vmem:[#allocation1 + $0x21] ss:$4 sm:$0xff] %v1131_v56  ;;  %v149_v56 = vld [vmem:[%s11733_s0 + $0x1d4] sm:$0x3] }
 0x112   :  { %1767 = vst [vmem:[#allocation1] ss:$4 sm:$0xff] %v1116_v61  ;;  %v1119_v19 = vrot.slane %v1117_v8, 2  ;;  %v538_v24 = vrot.slane %v8309_v32, 2  ;;  %v4177_v50 = vperm.slane %v3601_v37, 2  ;;  %v4321_v61 = vperm.slane %v3841_v45, 0 }
 0x113   :  { %v2193_v49 = vpop.f32.mrf.mxu1  ;;  %v2488_v5 = vmax.f32 %v2192_v33, 0.0  ;;  %v1153_v44 = vsel %vm612_vm1, %v152_v34, %v536_v3  ;;  %v1152_v53 = vsel %vm11846_vm0, %v152_v34, %v536_v3  ;;  %v533_v8 = vrot.slane %v149_v56, 2 }
 0x114   :  { %v8286_v59 = vadd.f32 %v8083_v20, %v2193_v49  ;;  %1769 = vst [vmem:[#allocation1 + $0x1] ss:$4 sm:$0xff] %v1119_v19  ;;  %v1143_v19 = vsel %vm11846_vm0, %v150_v28, %v534_v57  ;;  %v1144_v45 = vsel %vm612_vm1, %v150_v28, %v534_v57 }
 0x115   :  { %v2776_v31 = vrot.slane %v2488_v5, 4 }
 0x116   :  { %v2489_v11 = vmax.f32 %v8286_v59, 0.0  ;;  %5426 = vrot.lane.b32.xlu2 %v5138_v21, %s7502_s13  ;;  %v151_v21 = vld [vmem:[%s11733_s0 + $0x1dc] sm:$0x3] }
 0x117   :  { %5260 = vrot.lane.b32.xlu0 %v11743_v30, %s7498_s20  ;;  %v535_v17 = vrot.slane %v151_v21, 2 }
 0x118   :  { %v2777_v62 = vrot.slane %v2489_v11, 4  ;;  %v8349_v51 = vld.sshfl [vmem:[#allocation1 + $0x20] sm:$0xff pattern:$0x73625140] }
 0x119   :  { %1785 = vst [vmem:[#allocation1 + $0x20] ss:$4 sm:$0xff] %v1152_v53  ;;  %v1146_v53 = vrot.slane %v1144_v45, 2 }
 0x11a   :  { %v3064_v26 = vmax.f32 %v2488_v5, %v2777_v62  ;;  %v4562_v5 = vsel %vm11846_vm0, %v4514_v52, %v4081_v46  ;;  %1788 = vst [vmem:[#allocation1 + $0x22] ss:$4 sm:$0xff] %v1158_v36  ;;  %v1149_v46 = vsel %vm11846_vm0, %v151_v21, %v535_v17 }
 0x11b   :  { %v2196_v33 = vpop.f32.mrf.mxu1  ;;  %v4611_v34 = vsel %vm11841_vm3, %v4562_v5, %v4177_v50  ;;  %v8340_v13 = vld.sshfl [vmem:[#allocation1] sm:$0xff pattern:$0x73625140]  ;;  %v157_v50 = vld [vmem:[%s11733_s0 + $0x1f4] sm:$0x3] }
 0x11c   :  { %v7118_v15 = vrot.slane %v3064_v26, 9  ;;  %v2197_v49 = vadd.f32 %v8083_v20, %v2196_v33  ;;  %v4660_v16 = vsel %vm11840_vm4, %v4611_v34, %v4321_v61  ;;  %1781 = vst [vmem:[#allocation1 + $0x1] ss:$4 sm:$0xff] %v1143_v19  ;;  %v1140_v33 = vsel %vm11846_vm0, %v149_v56, %v533_v8  ;;  %v158_v34 = vld [vmem:[%s11733_s0 + $0x1f8] sm:$0xf] }
 0x11d   :  { %1780 = vst [vmem:[#allocation1] ss:$4 sm:$0xff] %v1140_v33  ;;  %v542_v36 = vrot.slane %v158_v34, 2  ;;  %v159_v33 = vld [vmem:[%s11733_s0 + $0x1fc] sm:$0x3] }
 0x11e   :  { %v3372_v9 = vmax.f32 %v3064_v26, %v7118_v15  ;;  %2235 = vmatmul.bf16.gmra.mxu1 %v8052_v54  ;;  %v2490_v1 = vmax.f32 %v2197_v49, 0.0  ;;  %v8346_v54 = vsel %vm11830_vm5, %v4660_v16, %v4417_v4  ;;  %v8352_v26 = vadd.f32 %v8083_v20, %v2118_v27  ;;  %v156_v15 = vld [vmem:[%s11733_s0 + $0x1f0] sm:$0xf]  ;;  %v155_v49 = vld [vmem:[%s11733_s0 + $0x1ec] sm:$0x3]  ;;  %v2121_v16 = vpop.f32.mrf.mxu0 }
 0x11f   :  { %5316 = vrot.lane.b32.xlu1 %v8346_v54, %s7500_s24  ;;  %5482 = vrot.lane.b32.xlu0 %v5194_v40, %s7503_s23  ;;  %v5418_v21 = vrot.slane %v8346_v54, 2  ;;  %1784 = vst [vmem:[#allocation1 + $0x3] ss:$4 sm:$0xff] %v1149_v46  ;;  %v540_v5 = vrot.slane %v156_v15, 2  ;;  %v539_v17 = vrot.slane %v155_v49, 2 }
 0x120   :  { %2285 = vmatmul.bf16.gmra.mxu2 %v8268_v38  ;;  %v2778_v3 = vrot.slane %v2490_v1, 4  ;;  %v3065_v62 = vmax.f32 %v2776_v31, %v2490_v1  ;;  %v3948_v47 = vperm.slane %v3372_v9, 2  ;;  %v5362_v38 = vrot.slane %v8346_v54, 1  ;;  %1783 = vst [vmem:[#allocation1 + $0x2] ss:$4 sm:$0xff] %v1146_v53 }
 0x121   :  { %2165 = vmatmul.bf16.gmra.mxu0 %v7855_v48  ;;  %v1155_v48 = vrot.slane %v1153_v44, 2  ;;  %v1161_v31 = vsel %vm11846_vm0, %v8309_v32, %v538_v24  ;;  %v2459_v42 = vmax.f32 %v8352_v26, 0.0  ;;  %v5474_v44 = vrot.slane %v8346_v54, 3 }
 0x122   :  { %v3066_v63 = vmax.f32 %v2489_v11, %v2778_v3  ;;  %v7166_v37 = vrot.slane %v3065_v62, 9  ;;  %5372 = vrot.lane.b32.xlu2 %v5362_v38, %s7501_s22  ;;  %1789 = vst [vmem:[#allocation1 + $0x23] ss:$4 sm:$0xff] %v1161_v31  ;;  %v4525_v40 = vsel %vm4510_vm2, %v3372_v9, %v3948_v47  ;;  %v1162_v9 = vsel %vm612_vm1, %v8309_v32, %v538_v24 }
 0x123   :  { %v2198_v39 = vpop.f32.mrf.mxu1  ;;  %1787 = vst [vmem:[#allocation1 + $0x21] ss:$4 sm:$0xff] %v1155_v48  ;;  %v2747_v52 = vrot.slane %v2459_v42, 4  ;;  %v2122_v3 = vadd.f32 %v8083_v20, %v2121_v16  ;;  %v541_v32 = vrot.slane %v157_v50, 2  ;;  %v1164_v27 = vrot.slane %v1162_v9, 2 }
 0x124   :  { %v3612_v59 = vmax.f32 %v3065_v62, %v7166_v37  ;;  %v7214_v11 = vrot.slane %v3066_v63, 9  ;;  %v8386_v57 = vadd.f32 %v8083_v20, %v2198_v39  ;;  %v1171_v39 = vsel %vm612_vm1, %v156_v15, %v540_v5 }
 0x125   :  { %v3034_v4 = vmax.f32 %v2458_v12, %v2747_v52  ;;  %v1170_v45 = vsel %vm11846_vm0, %v156_v15, %v540_v5  ;;  %v1176_v46 = vsel %vm11846_vm0, %v157_v50, %v541_v32  ;;  %v1180_v15 = vsel %vm612_vm1, %v158_v34, %v542_v36 }
 0x126   :  { %v3852_v56 = vmax.f32 %v3066_v63, %v7214_v11  ;;  %v4092_v61 = vperm.slane %v3612_v59, 0  ;;  %v4188_v28 = vperm.slane %v3612_v59, 2  ;;  %v2460_v63 = vmax.f32 %v2122_v3, 0.0 }
 0x127   :  { %v7108_v12 = vrot.slane %v3034_v4, 9  ;;  %5484 = vrot.lane.b32.xlu1 %v5474_v44, %s7503_s23  ;;  %5428 = vrot.lane.b32.xlu0 %v5418_v21, %s7502_s13  ;;  %v2491_v59 = vmax.f32 %v8386_v57, 0.0  ;;  %v1167_v11 = vsel %vm11846_vm0, %v155_v49, %v539_v17  ;;  %v543_v49 = vrot.slane %v159_v33, 2  ;;  %v2123_v57 = vpop.f32.mrf.mxu0 }
 0x128   :  { %v4332_v1 = vperm.slane %v3852_v56, 0  ;;  %v4428_v48 = vperm.slane %v3852_v56, 2  ;;  %v4573_v8 = vsel %vm11846_vm0, %v4525_v40, %v4092_v61  ;;  %v2748_v40 = vrot.slane %v2460_v63, 4 }
 0x129   :  { %v4622_v19 = vsel %vm11841_vm3, %v4573_v8, %v4188_v28  ;;  %v3362_v47 = vmax.f32 %v3034_v4, %v7108_v12  ;;  %v3035_v52 = vmax.f32 %v2746_v23, %v2460_v63  ;;  %v1173_v61 = vrot.slane %v1171_v39, 2  ;;  %v8423_v28 = vld.sshfl [vmem:[#allocation1] sm:$0xff pattern:$0x73625140]  ;;  %v8433_v23 = vld [vmem:[%s11733_s0 + $0x208] sm:$0xf] }
 0x12a   :  { %v4671_v24 = vsel %vm11840_vm4, %v4622_v19, %v4332_v1  ;;  %5905 = vrot.lane.b32.xlu2 %v5362_v38, %s7493_s1  ;;  %v8407_v37 = vld.sshfl [vmem:[#allocation1 + $0x20] sm:$0xff pattern:$0x73625140]  ;;  %v3036_v50 = vmax.f32 %v2459_v42, %v2748_v40  ;;  %1793 = vst [vmem:[#allocation1] ss:$4 sm:$0xff] %v1164_v27  ;;  %v1179_v9 = vsel %vm11846_vm0, %v158_v34, %v542_v36  ;;  %v1182_v26 = vrot.slane %v1180_v15, 2 }
 0x12b   :  { %v2201_v62 = vpop.f32.mrf.mxu1  ;;  %v8421_v53 = vsel %vm11830_vm5, %v4671_v24, %v4428_v48  ;;  %1798 = vst [vmem:[#allocation1 + $0x20] ss:$4 sm:$0xff] %v1176_v46  ;;  %v3938_v56 = vperm.slane %v3362_v47, 2  ;;  %v546_v16 = vrot.slane %v8433_v23, 2  ;;  %v1185_v17 = vsel %vm11846_vm0, %v159_v33, %v543_v49  ;;  %v163_v24 = vld [vmem:[%s11733_s0 + $0x20c] sm:$0x3] }
 0x12c   :  { %v8403_v31 = vadd.f32 %v8083_v20, %v2201_v62  ;;  %v5140_v4 = vrot.slane %v8421_v53, 2  ;;  %1794 = vst [vmem:[#allocation1 + $0x1] ss:$4 sm:$0xff] %v1167_v11  ;;  %v7204_v48 = vrot.slane %v3036_v50, 9  ;;  %v2779_v27 = vrot.slane %v2491_v59, 4 }
 0x12d   :  { %1795 = vst [vmem:[#allocation1 + $0x2] ss:$4 sm:$0xff] %v1170_v45  ;;  %v4515_v42 = vsel %vm4510_vm2, %v3362_v47, %v3938_v56  ;;  %v2124_v39 = vadd.f32 %v8083_v20, %v2123_v57  ;;  %v1198_v33 = vsel %vm612_vm1, %v8433_v23, %v546_v16  ;;  %v547_v40 = vrot.slane %v163_v24, 2 }
 0x12e   :  { %v2492_v38 = vmax.f32 %v8403_v31, 0.0  ;;  %2240 = vmatmul.bf16.gmra.mxu1 %v8068_v7  ;;  %v7156_v7 = vrot.slane %v3035_v52, 9  ;;  %1797 = vst [vmem:[#allocation1 + $0x3] ss:$4 sm:$0xff] %v1173_v61  ;;  %v3842_v19 = vmax.f32 %v3036_v50, %v7204_v48  ;;  %v5084_v56 = vrot.slane %v8421_v53, 1 }
 0x12f   :  { %5961 = vrot.lane.b32.xlu1 %v5418_v21, %s7492_s18  ;;  %6017 = vrot.lane.b32.xlu0 %v5474_v44, %s7491_s17  ;;  %1799 = vst [vmem:[#allocation1 + $0x21] ss:$4 sm:$0xff] %v1179_v9  ;;  %v2126_v46 = vpop.f32.mrf.mxu0  ;;  %v2461_v9 = vmax.f32 %v2124_v39, 0.0  ;;  %v1203_v31 = vsel %vm11846_vm0, %v163_v24, %v547_v40 }
 0x130   :  { %2290 = vmatmul.bf16.gmra.mxu2 %v8272_v41  ;;  %v3602_v1 = vmax.f32 %v3035_v52, %v7156_v7  ;;  %v164_v41 = vld [vmem:[%s11733_s0 + $0x210] sm:$0xf]  ;;  %1801 = vst [vmem:[#allocation1 + $0x22] ss:$4 sm:$0xff] %v1182_v26  ;;  %v4322_v36 = vperm.slane %v3842_v19, 0  ;;  %v4418_v52 = vperm.slane %v3842_v19, 2 }
 0x131   :  { %2170 = vmatmul.bf16.gmra.mxu0 %v7870_v0  ;;  %v2780_v0 = vrot.slane %v2492_v38, 4  ;;  %v548_v62 = vrot.slane %v164_v41, 2  ;;  %1802 = vst [vmem:[#allocation1 + $0x23] ss:$4 sm:$0xff] %v1185_v17  ;;  %v1200_v7 = vrot.slane %v1198_v33, 2 }
 0x132   :  { %v4082_v12 = vperm.slane %v3602_v1, 0  ;;  %v4178_v3 = vperm.slane %v3602_v1, 2  ;;  %5156 = vrot.lane.b32.xlu2 %v5140_v4, %s7499_s21 }
 0x133   :  { %v3067_v5 = vmax.f32 %v2491_v59, %v2780_v0  ;;  %v2203_v8 = vpop.f32.mrf.mxu1  ;;  %v8463_v59 = vadd.f32 %v8083_v20, %v2126_v46  ;;  %v1207_v61 = vsel %vm612_vm1, %v164_v41, %v548_v62  ;;  %v1206_v17 = vsel %vm11846_vm0, %v164_v41, %v548_v62  ;;  %v161_v41 = vld [vmem:[%s11733_s0 + $0x204] sm:$0x3] }
 0x134   :  { %v2204_v21 = vadd.f32 %v8083_v20, %v2203_v8  ;;  %v4563_v32 = vsel %vm11846_vm0, %v4515_v42, %v4082_v12  ;;  %v169_v8 = vld [vmem:[%s11733_s0 + $0x224] sm:$0x3] }
 0x135   :  { %v7119_v34 = vrot.slane %v3067_v5, 9  ;;  %v4612_v63 = vsel %vm11841_vm3, %v4563_v32, %v4178_v3  ;;  %v2462_v20 = vmax.f32 %v8463_v59, 0.0  ;;  %v2749_v32 = vrot.slane %v2461_v9, 4  ;;  %v8521_v46 = vld.sshfl [vmem:[#allocation1] sm:$0xff pattern:$0x73625140] }
 0x136   :  { %v2493_v47 = vmax.f32 %v2204_v21, 0.0  ;;  %v4661_v49 = vsel %vm11840_vm4, %v4612_v63, %v4322_v36  ;;  %v553_v40 = vrot.slane %v169_v8, 2  ;;  %v173_v59 = vld [vmem:[%s11733_s0 + $0x234] sm:$0x3] }
 0x137   :  { %v3373_v44 = vmax.f32 %v3067_v5, %v7119_v34  ;;  %5322 = vrot.lane.b32.xlu1 %v8421_v53, %s7500_s24  ;;  %5044 = vrot.lane.b32.xlu0 %v8421_v53, %s7495_s30  ;;  %v168_v5 = vld [vmem:[%s11733_s0 + $0x220] sm:$0xf]  ;;  %v8485_v26 = vsel %vm11830_vm5, %v4661_v49, %v4418_v52  ;;  %v2750_v42 = vrot.slane %v2462_v20, 4  ;;  %v1209_v34 = vrot.slane %v1207_v61, 2 }
 0x138   :  { %v2781_v11 = vrot.slane %v2493_v47, 4  ;;  %v3068_v45 = vmax.f32 %v2779_v27, %v2493_v47  ;;  %v8494_v19 = vld.sshfl [vmem:[#allocation1 + $0x20] sm:$0xff pattern:$0x73625140]  ;;  %v552_v3 = vrot.slane %v168_v5, 2  ;;  %v2128_v47 = vpop.f32.mrf.mxu0  ;;  %v11746_v63 = vrot.slane %v8485_v26, 2 }
 0x139   :  { %v3949_v57 = vperm.slane %v3373_v44, 2  ;;  %1811 = vst [vmem:[#allocation1 + $0x20] ss:$4 sm:$0xff] %v1200_v7  ;;  %v3037_v24 = vmax.f32 %v2461_v9, %v2750_v42  ;;  %v8511_v27 = vld [vmem:[%s11734_s2] ss:$0 sm:$0xff]  ;;  %v545_v61 = vrot.slane %v161_v41, 2 }
 0x13a   :  { %v3069_v15 = vmax.f32 %v2492_v38, %v2781_v11  ;;  %v7167_v0 = vrot.slane %v3068_v45, 9  ;;  %5378 = vrot.lane.b32.xlu2 %v5084_v56, %s7501_s22  ;;  %v160_v38 = vld [vmem:[%s11733_s0 + $0x200] sm:$0xf]  ;;  %1812 = vst [vmem:[#allocation1 + $0x21] ss:$4 sm:$0xff] %v1203_v31  ;;  %v1225_v52 = vsel %vm612_vm1, %v168_v5, %v552_v3 }
 0x13b   :  { %v2206_v50 = vpop.f32.mrf.mxu1  ;;  %1813 = vst [vmem:[#allocation1 + $0x22] ss:$4 sm:$0xff] %v1206_v17  ;;  %v7109_v33 = vrot.slane %v3037_v24, 9  ;;  %v544_v11 = vrot.slane %v160_v38, 2  ;;  %v11742_v17 = vrot.slane %v8421_v53, 4 }
 0x13c   :  { %v3613_v1 = vmax.f32 %v3068_v45, %v7167_v0  ;;  %v7215_v48 = vrot.slane %v3069_v15, 9  ;;  %v8514_v36 = vadd.f32 %v8511_v27, %v2206_v50  ;;  %1815 = vst [vmem:[#allocation1 + $0x23] ss:$4 sm:$0xff] %v1209_v34  ;;  %v1224_v50 = vsel %vm11846_vm0, %v168_v5, %v552_v3 }
 0x13d   :  { %v3363_v7 = vmax.f32 %v3037_v24, %v7109_v33  ;;  %v1189_v9 = vsel %vm612_vm1, %v160_v38, %v544_v11  ;;  %v1227_v5 = vrot.slane %v1225_v52, 2 }
 0x13e   :  { %2245 = vmatmul.bf16.gmra.mxu1 %v8090_v29  ;;  %v4093_v12 = vperm.slane %v3613_v1, 0  ;;  %v4526_v29 = vsel %vm4510_vm2, %v3373_v44, %v3949_v57  ;;  %v8502_v21 = vmax.f32 %v3069_v15, %v7215_v48  ;;  %v4189_v62 = vperm.slane %v3613_v1, 2 }
 0x13f   :  { %v5196_v44 = vrot.slane %v8421_v53, 3  ;;  %5100 = vrot.lane.b32.xlu1 %v5084_v56, %s7496_s10  ;;  %v1188_v57 = vsel %vm11846_vm0, %v160_v38, %v544_v11  ;;  %v2494_v1 = vmax.f32 %v8514_v36, 0.0  ;;  %v1191_v34 = vrot.slane %v1189_v9, 2 }
 0x140   :  { %2295 = vmatmul.bf16.gmra.mxu2 %v8340_v13  ;;  %v4574_v39 = vsel %vm11846_vm0, %v4526_v29, %v4093_v12  ;;  %v2129_v13 = vadd.f32 %v8511_v27, %v2128_v47  ;;  %v4333_v49 = vperm.slane %v8502_v21, 0  ;;  %1805 = vst [vmem:[#allocation1] ss:$4 sm:$0xff] %v1188_v57  ;;  %v4429_v42 = vperm.slane %v8502_v21, 2 }
 0x141   :  { %2175 = vmatmul.bf16.gmra.mxu0 %v7882_v10  ;;  %v8499_v10 = vld [vmem:[%s11733_s0 + $0x228] sm:$0xf]  ;;  %5212 = vrot.lane.b32.xlu0 %v5196_v44, %s7497_s11  ;;  %v4623_v56 = vsel %vm11841_vm3, %v4574_v39, %v4189_v62  ;;  %v1194_v12 = vsel %vm11846_vm0, %v161_v41, %v545_v61  ;;  %v3939_v21 = vperm.slane %v3363_v7, 2  ;;  %v1230_v62 = vsel %vm11846_vm0, %v169_v8, %v553_v40 }
 0x142   :  { %v2463_v15 = vmax.f32 %v2129_v13, 0.0  ;;  %v554_v0 = vrot.slane %v8499_v10, 2  ;;  %5963 = vrot.lane.b32.xlu2 %v11746_v63, %s7492_s18  ;;  %v4672_v24 = vsel %vm11840_vm4, %v4623_v56, %v4333_v49  ;;  %1808 = vst [vmem:[#allocation1 + $0x2] ss:$4 sm:$0xff] %v1194_v12  ;;  %v1197_v11 = vsel %vm11846_vm0, %v8433_v23, %v546_v16  ;;  %v166_v23 = vld [vmem:[%s11733_s0 + $0x218] sm:$0xf]  ;;  %v8581_v16 = vpop.permute.xlu2 %4914 }
 0x143   :  { %v2208_v45 = vpop.f32.mrf.mxu1  ;;  %v8550_v36 = vld.sshfl [vmem:[#allocation1 + $0x20] sm:$0xff pattern:$0x73625140]  ;;  %1807 = vst [vmem:[#allocation1 + $0x1] ss:$4 sm:$0xff] %v1191_v34  ;;  %v8564_v13 = vsel %vm11830_vm5, %v4672_v24, %v4429_v42  ;;  %v2782_v49 = vrot.slane %v2494_v1, 4 }
 0x144   :  { %v2751_v48 = vrot.slane %v2463_v15, 4  ;;  %v3038_v31 = vmax.f32 %v2749_v32, %v2463_v15  ;;  %v8541_v3 = vadd.f32 %v8511_v27, %v2208_v45  ;;  %v174_v32 = vld [vmem:[%s11733_s0 + $0x238] sm:$0xf]  ;;  %1823 = vst [vmem:[#allocation1 + $0x20] ss:$4 sm:$0xff] %v1224_v50  ;;  %v4516_v15 = vsel %vm4510_vm2, %v3363_v7, %v3939_v21 }
 0x145   :  { %v558_v8 = vrot.slane %v174_v32, 2  ;;  %1825 = vst [vmem:[#allocation1 + $0x21] ss:$4 sm:$0xff] %v1227_v5  ;;  %v557_v50 = vrot.slane %v173_v59, 2  ;;  %v175_v7 = vld [vmem:[%s11733_s0 + $0x23c] sm:$0x3] }
 0x146   :  { %v3039_v29 = vmax.f32 %v2462_v20, %v2751_v48  ;;  %v7157_v38 = vrot.slane %v3038_v31, 9  ;;  %v2495_v41 = vmax.f32 %v8541_v3, 0.0  ;;  %v1233_v20 = vsel %vm11846_vm0, %v8499_v10, %v554_v0  ;;  %11849 = vst [vmem:[#allocation4_spill] sm:$0xff] %v8564_v13 }
 0x147   :  { %5268 = vrot.lane.b32.xlu1 %v11742_v17, %s7498_s20  ;;  %1826 = vst [vmem:[#allocation1 + $0x22] ss:$4 sm:$0xff] %v1230_v62  ;;  %v1252_v12 = vsel %vm612_vm1, %v174_v32, %v558_v8  ;;  %v550_v3 = vrot.slane %v166_v23, 2  ;;  %v1248_v62 = vsel %vm11846_vm0, %v173_v59, %v557_v50 }
 0x148   :  { %v3603_v47 = vmax.f32 %v3038_v31, %v7157_v38  ;;  %v7205_v39 = vrot.slane %v3039_v29, 9  ;;  %v2783_v45 = vrot.slane %v2495_v41, 4  ;;  %1827 = vst [vmem:[#allocation1 + $0x23] ss:$4 sm:$0xff] %v1233_v20  ;;  %v8588_v31 = vpop.f32.mrf.mxu0  ;;  %v1254_v20 = vrot.slane %v1252_v12, 2 }
 0x149   :  { %5434 = vrot.lane.b32.xlu0 %v5140_v4, %s7502_s13  ;;  %11850 = vst [vmem:[#allocation5_spill] sm:$0xff] %v8581_v16 }
 0x14a   :  { %v3843_v40 = vmax.f32 %v3039_v29, %v7205_v39  ;;  %v4083_v52 = vperm.slane %v3603_v47, 0  ;;  %v4179_v61 = vperm.slane %v3603_v47, 2  ;;  %5324 = vrot.lane.b32.xlu2 %v8564_v13, %s7500_s24  ;;  %v3070_v57 = vmax.f32 %v2494_v1, %v2783_v45  ;;  %1809 = vst [vmem:[#allocation1 + $0x3] ss:$4 sm:$0xff] %v1197_v11  ;;  %v167_v47 = vld [vmem:[%s11733_s0 + $0x21c] sm:$0x3]  ;;  %v8732_v30 = vpop.permute.xlu1 %4850 }
 0x14b   :  { %v2211_v33 = vpop.f32.mrf.mxu1  ;;  %v559_v29 = vrot.slane %v175_v7, 2  ;;  %v8611_v45 = vld [vmem:[%s11733_s0 + $0x248] sm:$0xf]  ;;  %v551_v50 = vrot.slane %v167_v47, 2  ;;  %11856 = vst [vmem:[#allocation11_spill] sm:$0xff] %v8732_v30 }
 0x14c   :  { %v2212_v56 = vadd.f32 %v8511_v27, %v2211_v33  ;;  %v4323_v4 = vperm.slane %v3843_v40, 0  ;;  %v4419_v9 = vperm.slane %v3843_v40, 2  ;;  %v4564_v48 = vsel %vm11846_vm0, %v4516_v15, %v4083_v52 }
 0x14d   :  { %v4613_v5 = vsel %vm11841_vm3, %v4564_v48, %v4179_v61  ;;  %v7120_v1 = vrot.slane %v3070_v57, 9  ;;  %v1216_v61 = vsel %vm612_vm1, %v166_v23, %v550_v3 }
 0x14e   :  { %2250 = vmatmul.bf16.gmra.mxu1 %v8103_v43  ;;  %v2496_v42 = vmax.f32 %v2212_v56, 0.0  ;;  %v4662_v34 = vsel %vm11840_vm4, %v4613_v5, %v4323_v4  ;;  %v562_v4 = vrot.slane %v8611_v45, 2 }
 0x14f   :  { %v8598_v43 = vsel %vm11830_vm5, %v4662_v34, %v4419_v9  ;;  %v3374_v21 = vmax.f32 %v3070_v57, %v7120_v1  ;;  %5490 = vrot.lane.b32.xlu1 %v5196_v44, %s7503_s23  ;;  %v8613_v52 = vld.sshfl [vmem:[#allocation1 + $0x20] sm:$0xff pattern:$0x73625140]  ;;  %v5476_v44 = vrot.slane %v8564_v13, 3  ;;  %v8620_v57 = vpop.permute.xlu2 %4852  ;;  %v1215_v1 = vsel %vm11846_vm0, %v166_v23, %v550_v3 }
 0x150   :  { %2300 = vmatmul.bf16.gmra.mxu2 %v8349_v51  ;;  %v2784_v38 = vrot.slane %v2496_v42, 4  ;;  %v3071_v24 = vmax.f32 %v2782_v49, %v2496_v42  ;;  %v1251_v51 = vsel %vm11846_vm0, %v174_v32, %v558_v8  ;;  %v11747_v49 = vrot.slane %v8485_v26, 1  ;;  %1836 = vst [vmem:[#allocation1 + $0x20] ss:$4 sm:$0xff] %v1248_v62  ;;  %v172_v42 = vld [vmem:[%s11733_s0 + $0x230] sm:$0xf]  ;;  %v2133_v12 = vpop.f32.mrf.mxu0 }
 0x151   :  { %2180 = vmatmul.bf16.gmra.mxu0 %v7897_v25  ;;  %v165_v25 = vld [vmem:[%s11733_s0 + $0x214] sm:$0x3]  ;;  %v3950_v40 = vperm.slane %v3374_v21, 2  ;;  %v1257_v32 = vsel %vm11846_vm0, %v175_v7, %v559_v29  ;;  %1837 = vst [vmem:[#allocation1 + $0x21] ss:$4 sm:$0xff] %v1251_v51  ;;  %v1270_v62 = vsel %vm612_vm1, %v8611_v45, %v562_v4  ;;  %v556_v51 = vrot.slane %v172_v42, 2 }
 0x152   :  { %v549_v39 = vrot.slane %v165_v25, 2  ;;  %v3072_v33 = vmax.f32 %v2495_v41, %v2784_v38  ;;  %v7168_v11 = vrot.slane %v3071_v24, 9  ;;  %11851 = vst [vmem:[#allocation6_spill] sm:$0xff] %v8620_v57  ;;  %v8624_v48 = vld.sshfl [vmem:[#allocation1] sm:$0xff pattern:$0x73625140]  ;;  %5907 = vrot.lane.b32.xlu0 %v11747_v49, %s7493_s1  ;;  %5492 = vrot.lane.b32.xlu2 %v5476_v44, %s7503_s23 }
 0x153   :  { %v2261_v59 = vpop.f32.mrf.mxu2  ;;  %v2213_v15 = vpop.f32.mrf.mxu1  ;;  %v4527_v56 = vsel %vm4510_vm2, %v3374_v21, %v3950_v40  ;;  %1839 = vst [vmem:[#allocation1 + $0x22] ss:$4 sm:$0xff] %v1254_v20  ;;  %v171_v29 = vld [vmem:[%s11733_s0 + $0x22c] sm:$0x3]  ;;  %v11745_v38 = vrot.slane %v8485_v26, 3  ;;  %v1221_v21 = vsel %vm11846_vm0, %v167_v47, %v551_v50  ;;  %v1234_v47 = vsel %vm612_vm1, %v8499_v10, %v554_v0 }
 0x154   :  { %v3614_v41 = vmax.f32 %v3071_v24, %v7168_v11  ;;  %v7216_v8 = vrot.slane %v3072_v33, 9  ;;  %v1212_v9 = vsel %vm11846_vm0, %v165_v25, %v549_v39  ;;  %v1218_v25 = vrot.slane %v1216_v61, 2  ;;  %1840 = vst [vmem:[#allocation1 + $0x23] ss:$4 sm:$0xff] %v1257_v32  ;;  %v8664_v32 = vpop.permute.xlu0 %4786  ;;  %v179_v10 = vld [vmem:[%s11733_s0 + $0x24c] sm:$0x3] }
 0x155   :  { %1818 = vst [vmem:[#allocation1] ss:$4 sm:$0xff] %v1212_v9  ;;  %v8650_v23 = vadd.f32 %v8511_v27, %v2261_v59  ;;  %v555_v39 = vrot.slane %v171_v29, 2  ;;  %v1272_v11 = vrot.slane %v1270_v62, 2  ;;  %v5364_v40 = vrot.slane %v8564_v13, 1 }
 0x156   :  { %v3854_v7 = vmax.f32 %v3072_v33, %v7216_v8  ;;  %v4094_v5 = vperm.slane %v3614_v41, 0  ;;  %v4190_v34 = vperm.slane %v3614_v41, 2  ;;  %1819 = vst [vmem:[#allocation1 + $0x1] ss:$4 sm:$0xff] %v1215_v1  ;;  %v180_v59 = vld [vmem:[%s11733_s0 + $0x250] sm:$0xf] }
 0x157   :  { %6019 = vrot.lane.b32.xlu1 %v11745_v38, %s7491_s17  ;;  %1821 = vst [vmem:[#allocation1 + $0x2] ss:$4 sm:$0xff] %v1218_v25  ;;  %v5420_v41 = vrot.slane %v8564_v13, 2  ;;  %v564_v8 = vrot.slane %v180_v59, 2  ;;  %v11753_v0 = vmax.f32 %v8650_v23, 0.0  ;;  %v1236_v9 = vrot.slane %v1234_v47, 2 }
 0x158   :  { %v4575_v24 = vsel %vm11846_vm0, %v4527_v56, %v4094_v5  ;;  %v4334_v3 = vperm.slane %v3854_v7, 0  ;;  %1822 = vst [vmem:[#allocation1 + $0x3] ss:$4 sm:$0xff] %v1221_v21  ;;  %v4430_v50 = vperm.slane %v3854_v7, 2  ;;  %v1239_v7 = vsel %vm11846_vm0, %v171_v29, %v555_v39 }
 0x159   :  { %v4624_v33 = vsel %vm11841_vm3, %v4575_v24, %v4190_v34  ;;  %11852 = vst [vmem:[#allocation7_spill] sm:$0xff] %v8664_v32  ;;  %v1243_v34 = vsel %vm612_vm1, %v172_v42, %v556_v51  ;;  %v8679_v24 = vpop.permute.xlu2 %5090  ;;  %v563_v21 = vrot.slane %v179_v10, 2  ;;  %v1278_v29 = vsel %vm11846_vm0, %v180_v59, %v564_v8 }
 0x15a   :  { %5380 = vrot.lane.b32.xlu0 %v5364_v40, %s7501_s22  ;;  %v4673_v1 = vsel %vm11840_vm4, %v4624_v33, %v4334_v3  ;;  %5969 = vrot.lane.b32.xlu2 %v5420_v41, %s7492_s18  ;;  %11853 = vst [vmem:[#allocation8_spill] sm:$0xff] %v8679_v24  ;;  %v8685_v3 = vadd.f32 %v8511_v27, %v2133_v12  ;;  %v2136_v33 = vpop.f32.mrf.mxu0 }
 0x15b   :  { %v2263_v20 = vpop.f32.mrf.mxu2  ;;  %v1842_v5 = vld.sshfl [vmem:[#allocation1 + $0x20] sm:$0xff pattern:$0x73625140]  ;;  %v2216_v25 = vpop.f32.mrf.mxu1  ;;  %v1279_v39 = vsel %vm612_vm1, %v180_v59, %v564_v8  ;;  %v1242_v12 = vsel %vm11846_vm0, %v172_v42, %v556_v51 }
 0x15c   :  { %v8662_v61 = vadd.f32 %v8511_v27, %v2263_v20  ;;  %2350 = vmatmul.bf16.vlgmr.msra.gmra.mxu3 %v1842_v5  ;;  %1849 = vst [vmem:[#allocation1 + $0x20] ss:$4 sm:$0xff] %v1272_v11  ;;  %v8693_v20 = vsel %vm11830_vm5, %v4673_v1, %v4430_v50  ;;  %v2217_v47 = vadd.f32 %v8511_v27, %v2216_v25  ;;  %v1245_v5 = vrot.slane %v1243_v34, 2  ;;  %v177_v51 = vld [vmem:[%s11733_s0 + $0x244] sm:$0x3] }
 0x15d   :  { %v1275_v11 = vsel %vm11846_vm0, %v179_v10, %v563_v21  ;;  %1851 = vst [vmem:[#allocation1 + $0x22] ss:$4 sm:$0xff] %v1278_v29  ;;  %v1281_v25 = vrot.slane %v1279_v39, 2  ;;  %v2132_v10 = vadd.f32 %v8511_v27, %v8588_v31  ;;  %v11754_v21 = vmax.f32 %v8685_v3, 0.0 }
 0x15e   :  { %2255 = vmatmul.bf16.gmra.mxu1 %v8116_v2  ;;  %v11752_v56 = vmax.f32 %v8662_v61, 0.0  ;;  %v2214_v2 = vadd.f32 %v8511_v27, %v2213_v15  ;;  %v176_v15 = vld [vmem:[%s11733_s0 + $0x240] sm:$0xf]  ;;  %1850 = vst [vmem:[#allocation1 + $0x21] ss:$4 sm:$0xff] %v1275_v11  ;;  %v2498_v1 = vmax.f32 %v2217_v47, 0.0 }
 0x15f   :  { %5436 = vrot.lane.b32.xlu1 %v5420_v41, %s7502_s13  ;;  %v8703_v17 = vld.sshfl [vmem:[#allocation1] sm:$0xff pattern:$0x73625140]  ;;  %v560_v50 = vrot.slane %v176_v15, 2  ;;  %v11744_v41 = vrot.slane %v8693_v20, 3  ;;  %v2753_v39 = vrot.slane %v11754_v21, 4 }
 0x160   :  { %v2805_v62 = vrot.slane %v11752_v56, 4  ;;  %2305 = vmatmul.bf16.gmra.mxu2 %v8423_v28  ;;  %v2497_v8 = vmax.f32 %v2214_v2, 0.0  ;;  %1831 = vst [vmem:[#allocation1] ss:$4 sm:$0xff] %v1236_v9  ;;  %v2786_v42 = vrot.slane %v2498_v1, 4  ;;  %v8713_v9 = vpop.permute.xlu0 %4978  ;;  %v561_v47 = vrot.slane %v177_v51, 2 }
 0x161   :  { %1832 = vst [vmem:[#allocation1 + $0x1] ss:$4 sm:$0xff] %v1239_v7  ;;  %v1261_v7 = vsel %vm612_vm1, %v176_v15, %v560_v50  ;;  %v8720_v29 = vpop.permute.xlu2 %5258 }
 0x162   :  { %v8700_v28 = vmax.f32 %v11753_v0, %v2805_v62  ;;  %1833 = vst [vmem:[#allocation1 + $0x2] ss:$4 sm:$0xff] %v1242_v12  ;;  %5913 = vrot.lane.b32.xlu0 %v5364_v40, %s7493_s1  ;;  %6027 = vrot.lane.b32.xlu2 %v11744_v41, %s7491_s17  ;;  %v2785_v31 = vrot.slane %v2497_v8, 4  ;;  %v3073_v34 = vmax.f32 %v2497_v8, %v2786_v42  ;;  %v2464_v40 = vmax.f32 %v2132_v10, 0.0 }
 0x163   :  { %v2266_v59 = vpop.f32.mrf.mxu2  ;;  %1835 = vst [vmem:[#allocation1 + $0x3] ss:$4 sm:$0xff] %v1245_v5  ;;  %v2218_v2 = vpop.f32.mrf.mxu1  ;;  %v1260_v42 = vsel %vm11846_vm0, %v176_v15, %v560_v50  ;;  %v1269_v15 = vsel %vm11846_vm0, %v8611_v45, %v562_v4 }
 0x164   :  { %11854 = vst [vmem:[#allocation9_spill] sm:$0xff] %v8713_v9  ;;  %v2219_v62 = vadd.f32 %v8511_v27, %v2218_v2  ;;  %v7121_v11 = vrot.slane %v3073_v34, 9  ;;  %v8724_v5 = vpop.f32.mrf.mxu0  ;;  %v2267_v8 = vadd.f32 %v8511_v27, %v2266_v59  ;;  %v1263_v2 = vrot.slane %v1261_v7, 2 }
 0x165   :  { %11855 = vst [vmem:[#allocation10_spill] sm:$0xff] %v8720_v29  ;;  %v2752_v49 = vrot.slane %v2464_v40, 4  ;;  %v1266_v59 = vsel %vm11846_vm0, %v177_v51, %v561_v47 }
 0x166   :  { %1853 = vst [vmem:[#allocation1 + $0x23] ss:$4 sm:$0xff] %v1281_v25  ;;  %v2499_v12 = vmax.f32 %v2219_v62, 0.0  ;;  %v2137_v25 = vadd.f32 %v8511_v27, %v2136_v33  ;;  %v3375_v41 = vmax.f32 %v3073_v34, %v7121_v11  ;;  %v11749_v62 = vrot.slane %v8693_v20, 2 }
 0x167   :  { %6025 = vrot.lane.b32.xlu1 %v5476_v44, %s7491_s17  ;;  %v3040_v44 = vmax.f32 %v2464_v40, %v2753_v39 }
 0x168   :  { %v2787_v38 = vrot.slane %v2499_v12, 4  ;;  %v3074_v63 = vmax.f32 %v2785_v31, %v2499_v12  ;;  %v2518_v31 = vmax.f32 %v2267_v8, 0.0  ;;  %v2466_v34 = vmax.f32 %v2137_v25, 0.0  ;;  %v8751_v51 = vpop.permute.xlu0 %4788 }
 0x169   :  { %11857 = vst [vmem:[#allocation12_spill] sm:$0xff] %v8751_v51  ;;  %v3951_v47 = vperm.slane %v3375_v41, 2  ;;  %v8753_v4 = vpop.permute.xlu2 %5036  ;;  %v7110_v12 = vrot.slane %v3040_v44, 9 }
 0x16a   :  { %v8743_v33 = vld.sshfl [vmem:[#allocation1] sm:$0xff pattern:$0x73625140]  ;;  %v3075_v50 = vmax.f32 %v2498_v1, %v2787_v38  ;;  %5971 = vrot.lane.b32.xlu0 %v11749_v62, %s7492_s18  ;;  %v7169_v40 = vrot.slane %v3074_v63, 9  ;;  %11858 = vst [vmem:[#allocation13_spill] sm:$0xff] %v8753_v4  ;;  %v11750_v38 = vrot.slane %v8693_v20, 1  ;;  %v3041_v25 = vmax.f32 %v2752_v49, %v2466_v34 }
 0x16b   :  { %v2268_v10 = vpop.f32.mrf.mxu2  ;;  %1843 = vst [vmem:[#allocation1] ss:$4 sm:$0xff] %v1260_v42  ;;  %v8749_v39 = vpop.f32.mrf.mxu1  ;;  %v2754_v56 = vrot.slane %v2466_v34, 4 }
 0x16c   :  { %v8736_v6 = vadd.f32 %v8511_v27, %v2268_v10  ;;  %1845 = vst [vmem:[#allocation1 + $0x1] ss:$4 sm:$0xff] %v1263_v2  ;;  %v7217_v45 = vrot.slane %v3075_v50, 9  ;;  %v3615_v11 = vmax.f32 %v3074_v63, %v7169_v40  ;;  %v8760_v42 = vpop.f32.mrf.mxu0  ;;  %v183_v63 = vld [vmem:[%s11733_s0 + $0x25c] sm:$0x3]  ;;  %v7158_v57 = vrot.slane %v3041_v25, 9 }
 0x16d   :  { %1846 = vst [vmem:[#allocation1 + $0x2] ss:$4 sm:$0xff] %v1266_v59  ;;  %v567_v29 = vrot.slane %v183_v63, 2 }
 0x16e   :  { %v2519_v7 = vmax.f32 %v8736_v6, 0.0  ;;  %v181_v6 = vld [vmem:[%s11733_s0 + $0x254] sm:$0x3]  ;;  %1847 = vst [vmem:[#allocation1 + $0x3] ss:$4 sm:$0xff] %v1269_v15  ;;  %v3855_v8 = vmax.f32 %v3075_v50, %v7217_v45  ;;  %v4095_v10 = vperm.slane %v3615_v11, 0  ;;  %v4528_v15 = vsel %vm4510_vm2, %v3375_v41, %v3951_v47  ;;  %v8772_v45 = vpop.permute.xlu1 %5034 }
 0x16f   :  { %5915 = vrot.lane.b32.xlu1 %v11750_v38, %s7493_s1  ;;  %v4191_v62 = vperm.slane %v3615_v11, 2  ;;  %11859 = vst [vmem:[#allocation14_spill] sm:$0xff] %v8772_v45  ;;  %v565_v38 = vrot.slane %v181_v6, 2 }
 0x170   :  { %v2807_v1 = vrot.slane %v2519_v7, 4  ;;  %2310 = vmatmul.bf16.gmra.mxu2 %v8407_v37  ;;  %v182_v37 = vld [vmem:[%s11733_s0 + $0x258] sm:$0xf]  ;;  %v4335_v50 = vperm.slane %v3855_v8, 0  ;;  %v4431_v40 = vperm.slane %v3855_v8, 2  ;;  %v4576_v22 = vsel %vm11846_vm0, %v4528_v15, %v4095_v10  ;;  %v8780_v8 = vpop.permute.xlu0 %4916 }
 0x171   :  { %v4625_v0 = vsel %vm11841_vm3, %v4576_v22, %v4191_v62  ;;  %v566_v21 = vrot.slane %v182_v37, 2  ;;  %11860 = vst [vmem:[#allocation15_spill] sm:$0xff] %v8780_v8  ;;  %v1284_v34 = vsel %vm11846_vm0, %v181_v6, %v565_v38  ;;  %v3364_v10 = vmax.f32 %v3040_v44, %v7110_v12 }
 0x172   :  { %v3094_v2 = vmax.f32 %v2518_v31, %v2807_v1  ;;  %v2806_v1 = vrot.slane %v2518_v31, 4  ;;  %v4674_v41 = vsel %vm11840_vm4, %v4625_v0, %v4335_v50  ;;  %v11862_v0 = vmax.f32 %v8685_v3, 0.0 }
 0x173   :  { %v2271_v59 = vpop.f32.mrf.mxu2  ;;  %v8778_v47 = vpop.f32.mrf.mxu1  ;;  %v8783_v31 = vsel %vm11830_vm5, %v4674_v41, %v4431_v40  ;;  %v1288_v8 = vsel %vm612_vm1, %v182_v37, %v566_v21  ;;  %v1293_v40 = vsel %vm11846_vm0, %v183_v63, %v567_v29  ;;  %v3604_v38 = vmax.f32 %v3041_v25, %v7158_v57 }
 0x174   :  { %v7128_v49 = vrot.slane %v3094_v2, 9  ;;  %v2272_v11 = vadd.f32 %v8511_v27, %v2271_v59  ;;  %v8785_v59 = vpop.permute.xlu2 %5204  ;;  %v3042_v50 = vmax.f32 %v11862_v0, %v2754_v56  ;;  %v1290_v6 = vrot.slane %v1288_v8, 2 }
 0x175   :  { %11861 = vst [vmem:[#allocation16_spill] sm:$0xff] %v8785_v59  ;;  %v1854_v22 = vld.sshfl [vmem:[#allocation1] sm:$0xff pattern:$0x73625140]  ;;  %v4084_v57 = vperm.slane %v3604_v38, 0 }
 0x176   :  { %v3382_v4 = vmax.f32 %v3094_v2, %v7128_v49  ;;  %v2520_v24 = vmax.f32 %v2272_v11, 0.0  ;;  %v1287_v2 = vsel %vm11846_vm0, %v182_v37, %v566_v21  ;;  %2355 = vmatmul.bf16.gmra.mxu3 %v1854_v22  ;;  %v2143_v11 = vpop.f32.mrf.mxu0  ;;  %1856 = vst [vmem:[#allocation1] ss:$4 sm:$0xff] %v1284_v34  ;;  %v7206_v3 = vrot.slane %v3042_v50, 9  ;;  %v8794_v56 = vpop.permute.xlu1 %4980 }
 0x177   :  { %1857 = vst [vmem:[#allocation1 + $0x1] ss:$4 sm:$0xff] %v1287_v2 }
 0x178   :  { %v2808_v62 = vrot.slane %v2520_v24, 4  ;;  %v3095_v15 = vmax.f32 %v2806_v1, %v2520_v24  ;;  %v3958_v49 = vperm.slane %v3382_v4, 2  ;;  %v3940_v24 = vperm.slane %v3364_v10, 2  ;;  %1860 = vst [vmem:[#allocation1 + $0x3] ss:$4 sm:$0xff] %v1293_v40  ;;  %v8798_v63 = vpop.permute.xlu0 %5146 }
 0x179   :  { %11863 = vst [vmem:[#allocation17_spill] sm:$0xff] %v8794_v56 }
 0x17a   :  { %v3096_v41 = vmax.f32 %v2519_v7, %v2808_v62  ;;  %v7176_v59 = vrot.slane %v3095_v15, 9  ;;  %v4535_v22 = vsel %vm4510_vm2, %v3382_v4, %v3958_v49  ;;  %1859 = vst [vmem:[#allocation1 + $0x2] ss:$4 sm:$0xff] %v1290_v6  ;;  %v4517_v8 = vsel %vm4510_vm2, %v3364_v10, %v3940_v24 }
 0x17b   :  { %v2273_v44 = vpop.f32.mrf.mxu2  ;;  %v8796_v7 = vpop.f32.mrf.mxu1  ;;  %11864 = vst [vmem:[#allocation18_spill] sm:$0xff] %v8798_v63  ;;  %v4180_v49 = vperm.slane %v3604_v38, 2  ;;  %v8813_v10 = vadd.f32 %v8511_v27, %v8760_v42 }
 0x17c   :  { %v3622_v12 = vmax.f32 %v3095_v15, %v7176_v59  ;;  %v7224_v1 = vrot.slane %v3096_v41, 9  ;;  %v8800_v25 = vpop.permute.xlu2 %5426  ;;  %v3844_v15 = vmax.f32 %v3042_v50, %v7206_v3  ;;  %v2274_v0 = vadd.f32 %v8511_v27, %v2273_v44  ;;  %v1855_v3 = vld.sshfl [vmem:[#allocation1 + $0x20] sm:$0xff pattern:$0x73625140] }
 0x17d   :  { %11865 = vst [vmem:[#allocation19_spill] sm:$0xff] %v8800_v25  ;;  %v2139_v44 = vadd.f32 %v8511_v27, %v8724_v5 }
 0x17e   :  { %v3862_v21 = vmax.f32 %v3096_v41, %v7224_v1  ;;  %v4102_v37 = vperm.slane %v3622_v12, 0  ;;  %v4198_v29 = vperm.slane %v3622_v12, 2  ;;  %v8806_v2 = vpop.f32.mrf.mxu0  ;;  %v4565_v41 = vsel %vm11846_vm0, %v4517_v8, %v4084_v57  ;;  %v8831_v8 = vpop.permute.xlu1 %5202 }
 0x17f   :  { %v4324_v12 = vperm.slane %v3844_v15, 0  ;;  %v4614_v1 = vsel %vm11841_vm3, %v4565_v41, %v4180_v49  ;;  %v2468_v57 = vmax.f32 %v8813_v10, 0.0  ;;  %11868 = vst [vmem:[#allocation22_spill] sm:$0xff] %v8831_v8 }
 0x180   :  { %v4342_v59 = vperm.slane %v3862_v21, 0  ;;  %v4438_v34 = vperm.slane %v3862_v21, 2  ;;  %v4583_v4 = vsel %vm11846_vm0, %v4535_v22, %v4102_v37  ;;  %2315 = vmatmul.bf16.gmra.mxu2 %v8521_v46  ;;  %v2521_v22 = vmax.f32 %v2274_v0, 0.0  ;;  %v8828_v37 = vpop.permute.xlu0 %5314 }
 0x181   :  { %v4632_v62 = vsel %vm11841_vm3, %v4583_v4, %v4198_v29  ;;  %11867 = vst [vmem:[#allocation21_spill] sm:$0xff] %v8828_v37  ;;  %v4420_v29 = vperm.slane %v3844_v15, 2  ;;  %v2467_v4 = vmax.f32 %v2139_v44, 0.0  ;;  %v4663_v49 = vsel %vm11840_vm4, %v4614_v1, %v4324_v12  ;;  %v1866_v56 = vld.sshfl [vmem:[#allocation1] sm:$0xff pattern:$0x73625140] }
 0x182   :  { %v4681_v40 = vsel %vm11840_vm4, %v4632_v62, %v4342_v59  ;;  %v2756_v15 = vrot.slane %v2468_v57, 4  ;;  %v2809_v12 = vrot.slane %v2521_v22, 4 }
 0x183   :  { %v2276_v6 = vpop.f32.mrf.mxu2  ;;  %v8816_v24 = vsel %vm11830_vm5, %v4681_v40, %v4438_v34  ;;  %v8826_v42 = vpop.f32.mrf.mxu1  ;;  %v2144_v34 = vadd.f32 %v8511_v27, %v2143_v11  ;;  %v2755_v41 = vrot.slane %v2467_v4, 4  ;;  %v8842_v10 = vsel %vm11830_vm5, %v4663_v49, %v4420_v29 }
 0x184   :  { %11866 = vst [vmem:[#allocation20_spill] sm:$0xff] %v8816_v24  ;;  %v2277_v46 = vadd.f32 %v8511_v27, %v2276_v6  ;;  %v4778_v50 = vrot.slane %v8816_v24, 1  ;;  %v4842_v38 = vrot.slane %v8816_v24, 2  ;;  %v8833_v59 = vpop.permute.xlu2 %5372  ;;  %v4906_v62 = vrot.slane %v8816_v24, 3 }
 0x185   :  { %11869 = vst [vmem:[#allocation23_spill] sm:$0xff] %v8833_v59  ;;  %v4836_v44 = vrot.slane %v8842_v10, 2  ;;  %v3043_v59 = vmax.f32 %v2467_v4, %v2756_v15  ;;  %v8852_v29 = vadd.f32 %v8511_v27, %v8778_v47  ;;  %v2222_v4 = vadd.f32 %v8511_v27, %v8749_v39 }
 0x186   :  { %v2522_v21 = vmax.f32 %v2277_v46, 0.0  ;;  %4802 = vrot.lane.b32.xlu2 %v4778_v50, %s7493_s1  ;;  %4866 = vrot.lane.b32.xlu0 %v4842_v38, %s7492_s18  ;;  %v8838_v0 = vpop.f32.mrf.mxu0  ;;  %11870 = vst [vmem:[#allocation24_spill] sm:$0xff] %v8842_v10  ;;  %v2469_v50 = vmax.f32 %v2144_v34, 0.0  ;;  %v4970_v38 = vrot.slane %v8816_v24, 4  ;;  %v4772_v47 = vrot.slane %v8842_v10, 1 }
 0x187   :  { %2360 = vmatmul.bf16.gmra.mxu3 %v1855_v3  ;;  %4930 = vrot.lane.b32.xlu1 %v4906_v62, %s7491_s17  ;;  %v8855_v62 = vpop.permute.xlu1 %5148  ;;  %v7111_v24 = vrot.slane %v3043_v59, 9  ;;  %v2500_v39 = vmax.f32 %v2222_v4, 0.0 }
 0x188   :  { %v2810_v5 = vrot.slane %v2522_v21, 4  ;;  %11871 = vst [vmem:[#allocation25_spill] sm:$0xff] %v8855_v62  ;;  %v8857_v34 = vpop.permute.xlu0 %5092  ;;  %v4964_v62 = vrot.slane %v8842_v10, 4 }
 0x189   :  { %11872 = vst [vmem:[#allocation26_spill] sm:$0xff] %v8857_v34  ;;  %v3365_v25 = vmax.f32 %v3043_v59, %v7111_v24 }
 0x18a   :  { %v3097_v40 = vmax.f32 %v2521_v22, %v2810_v5  ;;  %v3044_v22 = vmax.f32 %v2755_v41, %v2469_v50 }
 0x18b   :  { %v2278_v6 = vpop.f32.mrf.mxu2  ;;  %v8848_v3 = vpop.f32.mrf.mxu1 }
 0x18c   :  { %v7129_v46 = vrot.slane %v3097_v40, 9  ;;  %v2279_v11 = vadd.f32 %v8511_v27, %v2278_v6 }
 0x18e   :  { %v2523_v1 = vmax.f32 %v2279_v11, 0.0  ;;  %4994 = vrot.lane.b32.xlu2 %v4970_v38, %s7494_s25  ;;  %v3383_v5 = vmax.f32 %v3097_v40, %v7129_v46  ;;  %4854 = vrot.lane.b32.xlu0 %v4836_v44, %s7492_s18  ;;  %v8860_v11 = vpop.permute.xlu2 %5905  ;;  %v2757_v40 = vrot.slane %v2469_v50, 4  ;;  %v8865_v15 = vpop.f32.mrf.mxu0 }
 0x18f   :  { %11873 = vst [vmem:[#allocation27_spill] sm:$0xff] %v8860_v11  ;;  %4790 = vrot.lane.b32.xlu1 %v4772_v47, %s7493_s1 }
 0x190   :  { %v2811_v49 = vrot.slane %v2523_v1, 4  ;;  %v3098_v6 = vmax.f32 %v2809_v12, %v2523_v1  ;;  %2320 = vmatmul.bf16.gmra.mxu2 %v8494_v19  ;;  %v3959_v44 = vperm.slane %v3383_v5, 2  ;;  %v7159_v1 = vrot.slane %v3044_v22, 9 }
 0x191   :  { %v3045_v50 = vmax.f32 %v2468_v57, %v2757_v40 }
 0x192   :  { %v3099_v46 = vmax.f32 %v2522_v21, %v2811_v49  ;;  %v7177_v38 = vrot.slane %v3098_v6, 9  ;;  %v2227_v21 = vadd.f32 %v8511_v27, %v8796_v7  ;;  %v4536_v49 = vsel %vm4510_vm2, %v3383_v5, %v3959_v44  ;;  %v8880_v7 = vpop.permute.xlu1 %5370 }
 0x193   :  { %v2281_v12 = vpop.f32.mrf.mxu2  ;;  %v3605_v57 = vmax.f32 %v3044_v22, %v7159_v1  ;;  %v8877_v40 = vpop.f32.mrf.mxu1  ;;  %11875 = vst [vmem:[#allocation28_spill] sm:$0xff] %v8880_v7  ;;  %v2788_v5 = vrot.slane %v2500_v39, 4  ;;  %v4900_v44 = vrot.slane %v8842_v10, 3  ;;  %v3941_v22 = vperm.slane %v3365_v25, 2 }
 0x194   :  { %v3623_v19 = vmax.f32 %v3098_v6, %v7177_v38  ;;  %v7225_v41 = vrot.slane %v3099_v46, 9  ;;  %v11874_v6 = vmax.f32 %v8852_v29, 0.0  ;;  %v2502_v24 = vmax.f32 %v2227_v21, 0.0 }
 0x196   :  { %v3863_v37 = vmax.f32 %v3099_v46, %v7225_v41  ;;  %v4103_v34 = vperm.slane %v3623_v19, 0  ;;  %v4199_v8 = vperm.slane %v3623_v19, 2  ;;  %4982 = vrot.lane.b32.xlu2 %v4964_v62, %s7494_s25  ;;  %v2789_v47 = vrot.slane %v11874_v6, 4  ;;  %v8882_v62 = vpop.permute.xlu0 %5260 }
 0x197   :  { %v7207_v19 = vrot.slane %v3045_v50, 9  ;;  %2365 = vmatmul.bf16.gmra.mxu3 %v1866_v56  ;;  %11876 = vst [vmem:[#allocation29_spill] sm:$0xff] %v8882_v62  ;;  %v4085_v56 = vperm.slane %v3605_v57, 0  ;;  %4918 = vrot.lane.b32.xlu1 %v4900_v44, %s7491_s17 }
 0x198   :  { %v4343_v38 = vperm.slane %v3863_v37, 0  ;;  %v4439_v63 = vperm.slane %v3863_v37, 2  ;;  %v4584_v4 = vsel %vm11846_vm0, %v4536_v49, %v4103_v34  ;;  %v8886_v37 = vpop.permute.xlu2 %5156  ;;  %v8888_v34 = vpop.f32.mrf.mxu0  ;;  %v3076_v41 = vmax.f32 %v2500_v39, %v2789_v47 }
 0x199   :  { %v4633_v46 = vsel %vm11841_vm3, %v4584_v4, %v4199_v8  ;;  %11877 = vst [vmem:[#allocation30_spill] sm:$0xff] %v8886_v37  ;;  %v3845_v6 = vmax.f32 %v3045_v50, %v7207_v19  ;;  %v3077_v4 = vmax.f32 %v2788_v5, %v2502_v24  ;;  %v4181_v47 = vperm.slane %v3605_v57, 2 }
 0x19a   :  { %v4682_v59 = vsel %vm11840_vm4, %v4633_v46, %v4343_v38  ;;  %v2282_v38 = vadd.f32 %v8511_v27, %v2281_v12  ;;  %v7122_v39 = vrot.slane %v3076_v41, 9  ;;  %v8910_v37 = vpop.permute.xlu1 %5316 }
 0x19b   :  { %v2283_v1 = vpop.f32.mrf.mxu2  ;;  %v8891_v8 = vsel %vm11830_vm5, %v4682_v59, %v4439_v63  ;;  %v4518_v63 = vsel %vm4510_vm2, %v3365_v25, %v3941_v22  ;;  %v4325_v44 = vperm.slane %v3845_v6, 0  ;;  %v7170_v19 = vrot.slane %v3077_v4, 9  ;;  %11879 = vst [vmem:[#allocation32_spill] sm:$0xff] %v8910_v37 }
 0x19c   :  { %11878 = vst [vmem:[#allocation31_spill] sm:$0xff] %v8891_v8  ;;  %v8894_v49 = vadd.f32 %v8511_v27, %v2283_v1  ;;  %5050 = vrot.lane.b32.xlu0 %v8891_v8, %s7495_s30  ;;  %v11756_v21 = vrot.slane %v8891_v8, 3  ;;  %v4566_v59 = vsel %vm11846_vm0, %v4518_v63, %v4085_v56  ;;  %v2790_v1 = vrot.slane %v2502_v24, 4 }
 0x19d   :  { %v2524_v50 = vmax.f32 %v2282_v38, 0.0  ;;  %v4843_v12 = vrot.slane %v8891_v8, 2  ;;  %v4779_v5 = vrot.slane %v8891_v8, 1  ;;  %v3376_v25 = vmax.f32 %v3076_v41, %v7122_v39 }
 0x19e   :  { %4932 = vrot.lane.b32.xlu2 %v11756_v21, %s7491_s17  ;;  %v2525_v46 = vmax.f32 %v8894_v49, 0.0  ;;  %v8912_v21 = vpop.f32.mrf.mxu1  ;;  %v4615_v57 = vsel %vm11841_vm3, %v4566_v59, %v4181_v47  ;;  %v8915_v56 = vpop.permute.xlu0 %5482  ;;  %v4421_v41 = vperm.slane %v3845_v6, 2  ;;  %v3616_v59 = vmax.f32 %v3077_v4, %v7170_v19 }
 0x19f   :  { %11880 = vst [vmem:[#allocation33_spill] sm:$0xff] %v8915_v56  ;;  %4868 = vrot.lane.b32.xlu1 %v4843_v12, %s7492_s18  ;;  %v4664_v39 = vsel %vm11840_vm4, %v4615_v57, %v4325_v44  ;;  %v2812_v47 = vrot.slane %v2524_v50, 4 }
 0x1a0   :  { %2325 = vmatmul.bf16.gmra.mxu2 %v8624_v48  ;;  %v2813_v22 = vrot.slane %v2525_v46, 4  ;;  %v11881_v48 = vmax.f32 %v8852_v29, 0.0  ;;  %v8922_v63 = vpop.permute.xlu2 %5378  ;;  %v8924_v37 = vpop.f32.mrf.mxu0  ;;  %v3952_v29 = vperm.slane %v3376_v25, 2  ;;  %v4096_v56 = vperm.slane %v3616_v59, 0 }
 0x1a1   :  { %11882 = vst [vmem:[#allocation34_spill] sm:$0xff] %v8922_v63  ;;  %v4971_v63 = vrot.slane %v8891_v8, 4 }
 0x1a2   :  { %v3078_v24 = vmax.f32 %v11881_v48, %v2790_v1  ;;  %v3100_v1 = vmax.f32 %v2524_v50, %v2813_v22  ;;  %v8932_v10 = vpop.permute.xlu1 %5484  ;;  %v4529_v44 = vsel %vm4510_vm2, %v3376_v25, %v3952_v29 }
 0x1a3   :  { %v2286_v49 = vpop.f32.mrf.mxu2  ;;  %11884 = vst [vmem:[#allocation36_spill] sm:$0xff] %v8932_v10 }
 0x1a4   :  { %v2287_v38 = vadd.f32 %v8511_v27, %v2286_v49  ;;  %4804 = vrot.lane.b32.xlu0 %v4779_v5, %s7493_s1  ;;  %v7218_v48 = vrot.slane %v3078_v24, 9  ;;  %v8929_v49 = vsel %vm11830_vm5, %v4664_v39, %v4421_v41  ;;  %v7130_v4 = vrot.slane %v3100_v1, 9 }
 0x1a5   :  { %11883 = vst [vmem:[#allocation35_spill] sm:$0xff] %v8929_v49  ;;  %v11758_v22 = vrot.slane %v8929_v49, 3  ;;  %v4192_v41 = vperm.slane %v3616_v59, 2  ;;  %v4577_v39 = vsel %vm11846_vm0, %v4529_v44, %v4096_v56  ;;  %v4773_v14 = vrot.slane %v8929_v49, 1 }
 0x1a6   :  { %v2526_v62 = vmax.f32 %v2287_v38, 0.0  ;;  %5162 = vrot.lane.b32.xlu2 %v4843_v12, %s7499_s21  ;;  %v8934_v6 = vpop.f32.mrf.mxu1  ;;  %v8939_v12 = vpop.permute.xlu0 %5428  ;;  %v3856_v50 = vmax.f32 %v3078_v24, %v7218_v48  ;;  %v3384_v24 = vmax.f32 %v3100_v1, %v7130_v4  ;;  %v11889_v4 = vrot.slane %v8891_v8, 3 }
 0x1a7   :  { %11885 = vst [vmem:[#allocation37_spill] sm:$0xff] %v8939_v12  ;;  %5106 = vrot.lane.b32.xlu1 %v4779_v5, %s7496_s10  ;;  %v4626_v48 = vsel %vm11841_vm3, %v4577_v39, %v4192_v41  ;;  %v8956_v5 = vadd.f32 %v8511_v27, %v8838_v0 }
 0x1a8   :  { %v3101_v7 = vmax.f32 %v2812_v47, %v2526_v62  ;;  %v2814_v57 = vrot.slane %v2526_v62, 4  ;;  %v8944_v38 = vpop.f32.mrf.mxu0  ;;  %v8950_v25 = vpop.permute.xlu2 %5963  ;;  %v4336_v62 = vperm.slane %v3856_v50, 0  ;;  %v4432_v10 = vperm.slane %v3856_v50, 2 }
 0x1a9   :  { %11886 = vst [vmem:[#allocation38_spill] sm:$0xff] %v8950_v25 }
 0x1aa   :  { %v7178_v47 = vrot.slane %v3101_v7, 9  ;;  %v3102_v29 = vmax.f32 %v2525_v46, %v2814_v57  ;;  %v8958_v56 = vpop.permute.xlu1 %5961  ;;  %v4675_v27 = vsel %vm11840_vm4, %v4626_v48, %v4336_v62  ;;  %v2471_v57 = vmax.f32 %v8956_v5, 0.0 }
 0x1ab   :  { %v8937_v19 = vpop.f32.mrf.mxu2  ;;  %11887 = vst [vmem:[#allocation39_spill] sm:$0xff] %v8958_v56 }
 0x1ac   :  { %4996 = vrot.lane.b32.xlu0 %v4971_v63, %s7494_s25  ;;  %v3624_v59 = vmax.f32 %v3101_v7, %v7178_v47  ;;  %v7226_v46 = vrot.slane %v3102_v29, 9  ;;  %v8977_v7 = vld [vmem:[%s11734_s2] ss:$0 sm:$0xff] }
 0x1ad   :  { %v2147_v50 = vadd.f32 %v8977_v7, %v8806_v2  ;;  %v2152_v45 = vadd.f32 %v8977_v7, %v8865_v15 }
 0x1ae   :  { %4920 = vrot.lane.b32.xlu2 %v11758_v22, %s7491_s17  ;;  %v8960_v44 = vpop.f32.mrf.mxu1  ;;  %v3960_v22 = vperm.slane %v3384_v24, 2  ;;  %v8964_v1 = vpop.permute.xlu0 %6017  ;;  %v4104_v41 = vperm.slane %v3624_v59, 0  ;;  %v3864_v47 = vmax.f32 %v3102_v29, %v7226_v46  ;;  %v4200_v8 = vperm.slane %v3624_v59, 2 }
 0x1af   :  { %11888 = vst [vmem:[#allocation40_spill] sm:$0xff] %v8964_v1  ;;  %5274 = vrot.lane.b32.xlu1 %v4971_v63, %s7498_s20  ;;  %v8985_v63 = vsel %vm11830_vm5, %v4675_v27, %v4432_v10  ;;  %v2470_v48 = vmax.f32 %v2147_v50, 0.0  ;;  %v2472_v50 = vmax.f32 %v2152_v45, 0.0 }
 0x1b0   :  { %2330 = vmatmul.bf16.gmra.mxu2 %v8550_v36  ;;  %v4837_v36 = vrot.slane %v8929_v49, 2  ;;  %v8972_v0 = vpop.f32.mrf.mxu0  ;;  %v4537_v39 = vsel %vm4510_vm2, %v3384_v24, %v3960_v22  ;;  %11890 = vst [vmem:[#allocation41_spill] sm:$0xff] %v8985_v63  ;;  %v8987_v62 = vpop.permute.xlu2 %5324  ;;  %v4904_v5 = vrot.slane %v8985_v63, 3  ;;  %v4344_v24 = vperm.slane %v3864_v47, 0 }
 0x1b1   :  { %11891 = vst [vmem:[#allocation42_spill] sm:$0xff] %v8987_v62  ;;  %v4585_v2 = vsel %vm11846_vm0, %v4537_v39, %v4104_v41  ;;  %v2758_v59 = vrot.slane %v2470_v48, 4  ;;  %v4440_v41 = vperm.slane %v3864_v47, 2  ;;  %v2760_v16 = vrot.slane %v2472_v50, 4 }
 0x1b2   :  { %v8994_v51 = vpop.permute.xlu1 %5322  ;;  %v4634_v27 = vsel %vm11841_vm3, %v4585_v2, %v4200_v8 }
 0x1b3   :  { %v8962_v12 = vpop.f32.mrf.mxu2  ;;  %11892 = vst [vmem:[#allocation43_spill] sm:$0xff] %v8994_v51  ;;  %v4683_v39 = vsel %vm11840_vm4, %v4634_v27, %v4344_v24  ;;  %v3047_v51 = vmax.f32 %v2758_v59, %v2472_v50  ;;  %v184_v24 = vld [vmem:[%s11733_s0 + $0x260] sm:$0xf] }
 0x1b4   :  { %5218 = vrot.lane.b32.xlu0 %v11889_v4, %s7497_s11  ;;  %v2759_v4 = vrot.slane %v2471_v57, 4 }
 0x1b5   :  { %v7160_v47 = vrot.slane %v3047_v51, 9 }
 0x1b6   :  { %5150 = vrot.lane.b32.xlu2 %v4837_v36, %s7499_s21  ;;  %v8998_v10 = vpop.permute.xlu0 %5044  ;;  %v9003_v29 = vpop.f32.mrf.mxu1  ;;  %v3046_v46 = vmax.f32 %v2470_v48, %v2759_v4  ;;  %v9015_v48 = vsel %vm11830_vm5, %v4683_v39, %v4440_v41  ;;  %v568_v41 = vrot.slane %v184_v24, 2 }
 0x1b7   :  { %11893 = vst [vmem:[#allocation44_spill] sm:$0xff] %v8998_v10  ;;  %4792 = vrot.lane.b32.xlu1 %v4773_v14, %s7493_s1  ;;  %v11761_v10 = vrot.slane %v8929_v49, 4  ;;  %v3606_v27 = vmax.f32 %v3047_v51, %v7160_v47 }
 0x1b8   :  { %v9005_v15 = vpop.f32.mrf.mxu0  ;;  %v7112_v62 = vrot.slane %v3046_v46, 9  ;;  %v9012_v9 = vpop.permute.xlu2 %5492  ;;  %11895 = vst [vmem:[#allocation46_spill] sm:$0xff] %v9015_v48  ;;  %v1296_v50 = vsel %vm11846_vm0, %v184_v24, %v568_v41 }
 0x1b9   :  { %11894 = vst [vmem:[#allocation45_spill] sm:$0xff] %v9012_v9 }
 0x1ba   :  { %v9017_v8 = vpop.permute.xlu1 %5100  ;;  %v3366_v45 = vmax.f32 %v3046_v46, %v7112_v62  ;;  %v186_v62 = vld [vmem:[%s11733_s0 + $0x268] sm:$0xf]  ;;  %1861 = vst [vmem:[#allocation1 + $0x20] ss:$4 sm:$0xff] %v1296_v50 }
 0x1bb   :  { %v8996_v22 = vpop.f32.mrf.mxu2  ;;  %11896 = vst [vmem:[#allocation47_spill] sm:$0xff] %v9017_v8  ;;  %v1297_v8 = vsel %vm612_vm1, %v184_v24, %v568_v41 }
 0x1bc   :  { %5038 = vrot.lane.b32.xlu0 %v8929_v49, %s7495_s30  ;;  %v3942_v59 = vperm.slane %v3366_v45, 2  ;;  %v1299_v1 = vrot.slane %v1297_v8, 2  ;;  %v4776_v8 = vrot.slane %v8985_v63, 1 }
 0x1be   :  { %4926 = vrot.lane.b32.xlu2 %v4904_v5, %s7491_s17  ;;  %v9029_v2 = vpop.f32.mrf.mxu1  ;;  %v3048_v5 = vmax.f32 %v2471_v57, %v2760_v16  ;;  %v4519_v60 = vsel %vm4510_vm2, %v3366_v45, %v3942_v59  ;;  %1863 = vst [vmem:[#allocation1 + $0x21] ss:$4 sm:$0xff] %v1299_v1 }
 0x1bf   :  { %4856 = vrot.lane.b32.xlu1 %v4837_v36, %s7492_s18  ;;  %v185_v36 = vld [vmem:[%s11733_s0 + $0x264] sm:$0x3] }
 0x1c0   :  { %2335 = vmatmul.bf16.gmra.mxu2 %v8703_v17  ;;  %v9023_v17 = vpop.permute.xlu0 %5212  ;;  %v9025_v4 = vpop.f32.mrf.mxu0  ;;  %v569_v16 = vrot.slane %v185_v36, 2  ;;  %v7208_v57 = vrot.slane %v3048_v5, 9 }
 0x1c1   :  { %11897 = vst [vmem:[#allocation48_spill] sm:$0xff] %v9023_v17  ;;  %v11899_v17 = vrot.slane %v8929_v49, 3  ;;  %v9048_v51 = vpop.permute.xlu2 %5969 }
 0x1c2   :  { %11900 = vst [vmem:[#allocation50_spill] sm:$0xff] %v9048_v51 }
 0x1c3   :  { %v2296_v30 = vpop.f32.mrf.mxu2 }
 0x1c4   :  { %4984 = vrot.lane.b32.xlu0 %v11761_v10, %s7494_s25  ;;  %v2297_v46 = vadd.f32 %v8977_v7, %v2296_v30  ;;  %v9042_v10 = vpop.permute.xlu1 %5268  ;;  %v570_v30 = vrot.slane %v186_v62, 2 }
 0x1c5   :  { %11898 = vst [vmem:[#allocation49_spill] sm:$0xff] %v9042_v10  ;;  %v4086_v10 = vperm.slane %v3606_v27, 0 }
 0x1c6   :  { %5330 = vrot.lane.b32.xlu2 %v9015_v48, %s7500_s24  ;;  %v2530_v32 = vmax.f32 %v2297_v46, 0.0  ;;  %v9061_v24 = vpop.f32.mrf.mxu1  ;;  %v1305_v45 = vsel %vm11846_vm0, %v186_v62, %v570_v30  ;;  %v1306_v59 = vsel %vm612_vm1, %v186_v62, %v570_v30 }
 0x1c7   :  { %5094 = vrot.lane.b32.xlu1 %v4773_v14, %s7496_s10  ;;  %v1302_v14 = vsel %vm11846_vm0, %v185_v36, %v569_v16  ;;  %v4567_v46 = vsel %vm11846_vm0, %v4519_v60, %v4086_v10  ;;  %1865 = vst [vmem:[#allocation1 + $0x23] ss:$4 sm:$0xff] %v1305_v45  ;;  %v11763_v36 = vrot.slane %v9015_v48, 4  ;;  %v9080_v10 = vadd.f32 %v8977_v7, %v8848_v3 }
 0x1c8   :  { %v9051_v47 = vpop.permute.xlu0 %5434  ;;  %1864 = vst [vmem:[#allocation1 + $0x22] ss:$4 sm:$0xff] %v1302_v14 }
 0x1c9   :  { %11901 = vst [vmem:[#allocation51_spill] sm:$0xff] %v9051_v47  ;;  %v3846_v47 = vmax.f32 %v3048_v5, %v7208_v57  ;;  %v1308_v5 = vrot.slane %v1306_v59, 2  ;;  %v2818_v57 = vrot.slane %v2530_v32, 4  ;;  %v9085_v62 = vpop.permute.xlu2 %6027 }
 0x1ca   :  { %11906 = vst [vmem:[#allocation54_spill] sm:$0xff] %v9085_v62 }
 0x1cb   :  { %v2298_v39 = vpop.f32.mrf.mxu2  ;;  %1869 = vst [vmem:[#allocation1] ss:$4 sm:$0xff] %v1308_v5  ;;  %v4422_v30 = vperm.slane %v3846_v47, 2  ;;  %v2229_v5 = vadd.f32 %v8977_v7, %v8826_v42 }
 0x1cc   :  { %v2299_v9 = vadd.f32 %v8977_v7, %v2298_v39  ;;  %5206 = vrot.lane.b32.xlu0 %v11899_v17, %s7497_s11  ;;  %v2168_v39 = vpop.f32.mrf.mxu0  ;;  %v11902_v17 = vrot.slane %v9015_v48, 1  ;;  %v9068_v16 = vpop.permute.xlu1 %5490 }
 0x1cd   :  { %11903 = vst [vmem:[#allocation52_spill] sm:$0xff] %v9068_v16 }
 0x1ce   :  { %v2531_v25 = vmax.f32 %v2299_v9, 0.0  ;;  %5108 = vrot.lane.b32.xlu2 %v11902_v17, %s7496_s10  ;;  %v4182_v9 = vperm.slane %v3606_v27, 2 }
 0x1d0   :  { %v2819_v56 = vrot.slane %v2531_v25, 4  ;;  %2340 = vmatmul.bf16.gmra.mxu2 %v8613_v52  ;;  %v4326_v52 = vperm.slane %v3846_v47, 0  ;;  %v9072_v1 = vpop.permute.xlu0 %5907  ;;  %v4616_v60 = vsel %vm11841_vm3, %v4567_v46, %v4182_v9  ;;  %v1867_v46 = vld.sshfl [vmem:[#allocation1 + $0x20] sm:$0xff pattern:$0x73625140] }
 0x1d1   :  { %11904 = vst [vmem:[#allocation53_spill] sm:$0xff] %v9072_v1  ;;  %2370 = vmatmul.bf16.gmra.mxu3 %v1867_v46 }
 0x1d2   :  { %v3106_v50 = vmax.f32 %v2530_v32, %v2819_v56  ;;  %v11905_v56 = vrot.slane %v8929_v49, 4 }
 0x1d3   :  { %v2301_v41 = vpop.f32.mrf.mxu2 }
 0x1d4   :  { %v7132_v17 = vrot.slane %v3106_v50, 9  ;;  %v2302_v14 = vadd.f32 %v8977_v7, %v2301_v41  ;;  %4798 = vrot.lane.b32.xlu0 %v4776_v8, %s7493_s1  ;;  %5262 = vrot.lane.b32.xlu1 %v11905_v56, %s7498_s20  ;;  %v2171_v45 = vpop.f32.mrf.mxu0  ;;  %v4665_v8 = vsel %vm11840_vm4, %v4616_v60, %v4326_v52  ;;  %v9092_v56 = vpop.f32.mrf.mxu1  ;;  %v4840_v52 = vrot.slane %v8985_v63, 2 }
 0x1d5   :  { %v9099_v60 = vpop.permute.xlu1 %6019 }
 0x1d6   :  { %v3386_v27 = vmax.f32 %v3106_v50, %v7132_v17  ;;  %v2532_v32 = vmax.f32 %v2302_v14, 0.0  ;;  %5276 = vrot.lane.b32.xlu2 %v11763_v36, %s7498_s20  ;;  %v4968_v14 = vrot.slane %v8985_v63, 4  ;;  %v2169_v36 = vadd.f32 %v8977_v7, %v2168_v39  ;;  %11907 = vst [vmem:[#allocation55_spill] sm:$0xff] %v9099_v60 }
 0x1d7   :  { %v9106_v50 = vadd.f32 %v8977_v7, %v2171_v45  ;;  %v11909_v39 = vmax.f32 %v9080_v10, 0.0  ;;  %v187_v45 = vld [vmem:[%s11733_s0 + $0x26c] sm:$0x3] }
 0x1d8   :  { %v2820_v59 = vrot.slane %v2532_v32, 4  ;;  %v3107_v9 = vmax.f32 %v2818_v57, %v2532_v32  ;;  %v3962_v3 = vperm.slane %v3386_v27, 2  ;;  %v9096_v57 = vsel %vm11830_vm5, %v4665_v8, %v4422_v30 }
 0x1d9   :  { %v2792_v30 = vrot.slane %v11909_v39, 4  ;;  %v571_v49 = vrot.slane %v187_v45, 2 }
 0x1da   :  { %v3108_v41 = vmax.f32 %v2531_v25, %v2820_v59  ;;  %v7180_v17 = vrot.slane %v3107_v9, 9  ;;  %v9102_v25 = vpop.permute.xlu0 %5380  ;;  %v2503_v59 = vmax.f32 %v2229_v5, 0.0  ;;  %v4539_v46 = vsel %vm4510_vm2, %v3386_v27, %v3962_v3  ;;  %v188_v3 = vld [vmem:[%s11733_s0 + $0x270] sm:$0xf] }
 0x1db   :  { %v2303_v47 = vpop.f32.mrf.mxu2  ;;  %11908 = vst [vmem:[#allocation56_spill] sm:$0xff] %v9102_v25  ;;  %v2479_v5 = vmax.f32 %v2169_v36, 0.0  ;;  %v2480_v27 = vmax.f32 %v9106_v50, 0.0 }
 0x1dc   :  { %v3626_v42 = vmax.f32 %v3107_v9, %v7180_v17  ;;  %v7228_v32 = vrot.slane %v3108_v41, 9  ;;  %4990 = vrot.lane.b32.xlu0 %v4968_v14, %s7494_s25  ;;  %4862 = vrot.lane.b32.xlu1 %v4840_v52, %s7492_s18  ;;  %v2234_v9 = vadd.f32 %v8977_v7, %v8877_v40  ;;  %v2304_v52 = vadd.f32 %v8977_v7, %v2303_v47  ;;  %v2173_v39 = vpop.f32.mrf.mxu0 }
 0x1dd   :  { %v2768_v50 = vrot.slane %v2480_v27, 4 }
 0x1de   :  { %v3866_v8 = vmax.f32 %v3108_v41, %v7228_v32  ;;  %v4106_v16 = vperm.slane %v3626_v42, 0  ;;  %v4202_v63 = vperm.slane %v3626_v42, 2  ;;  %5318 = vrot.lane.b32.xlu2 %v9096_v57, %s7500_s24  ;;  %v11766_v42 = vrot.slane %v9015_v48, 2 }
 0x1df   :  { %v3055_v60 = vmax.f32 %v2479_v5, %v2768_v50  ;;  %v2505_v32 = vmax.f32 %v2234_v9, 0.0 }
 0x1e0   :  { %v4346_v41 = vperm.slane %v3866_v8, 0  ;;  %v4442_v17 = vperm.slane %v3866_v8, 2  ;;  %v4587_v14 = vsel %vm11846_vm0, %v4539_v46, %v4106_v16  ;;  %2345 = vmatmul.bf16.gmra.mxu2 %v8743_v33  ;;  %v9125_v40 = vpop.permute.xlu2 %4802  ;;  %v572_v8 = vrot.slane %v188_v3, 2 }
 0x1e1   :  { %11910 = vst [vmem:[#allocation57_spill] sm:$0xff] %v9125_v40  ;;  %v4636_v36 = vsel %vm11841_vm3, %v4587_v14, %v4202_v63  ;;  %v2174_v16 = vadd.f32 %v8977_v7, %v2173_v39  ;;  %v2791_v46 = vrot.slane %v2503_v59, 4  ;;  %v2767_v33 = vrot.slane %v2479_v5, 4  ;;  %v9135_v63 = vpop.permute.xlu1 %5436 }
 0x1e2   :  { %v4685_v25 = vsel %vm11840_vm4, %v4636_v36, %v4346_v41  ;;  %11912 = vst [vmem:[#allocation59_spill] sm:$0xff] %v9135_v63  ;;  %v9143_v41 = vpop.f32.mrf.mxu1  ;;  %v1311_v36 = vsel %vm11846_vm0, %v187_v45, %v571_v49  ;;  %v1314_v39 = vsel %vm11846_vm0, %v188_v3, %v572_v8  ;;  %v7115_v5 = vrot.slane %v3055_v60, 9  ;;  %v9154_v45 = vpop.permute.xlu0 %5913 }
 0x1e3   :  { %v9133_v47 = vsel %vm11830_vm5, %v4685_v25, %v4442_v17  ;;  %v2306_v40 = vpop.f32.mrf.mxu2  ;;  %v1315_v25 = vsel %vm612_vm1, %v188_v3, %v572_v8  ;;  %v3079_v17 = vmax.f32 %v2503_v59, %v2792_v30  ;;  %1870 = vst [vmem:[#allocation1 + $0x1] ss:$4 sm:$0xff] %v1311_v36  ;;  %v2481_v49 = vmax.f32 %v2174_v16, 0.0  ;;  %v9156_v30 = vpop.f32.mrf.mxu3 }
 0x1e4   :  { %11911 = vst [vmem:[#allocation58_spill] sm:$0xff] %v9133_v47  ;;  %v9138_v14 = vadd.f32 %v8977_v7, %v2306_v40  ;;  %5164 = vrot.lane.b32.xlu0 %v11766_v42, %s7499_s21  ;;  %v1317_v50 = vrot.slane %v1315_v25, 2  ;;  %5052 = vrot.lane.b32.xlu1 %v9015_v48, %s7495_s30  ;;  %v2533_v40 = vmax.f32 %v2304_v52, 0.0  ;;  %v11913_v42 = vrot.slane %v9096_v57, 1 }
 0x1e5   :  { %1871 = vst [vmem:[#allocation1 + $0x2] ss:$4 sm:$0xff] %v1314_v39  ;;  %v3369_v3 = vmax.f32 %v3055_v60, %v7115_v5  ;;  %v2769_v8 = vrot.slane %v2481_v49, 4  ;;  %v3056_v36 = vmax.f32 %v2767_v33, %v2481_v49  ;;  %v7123_v52 = vrot.slane %v3079_v17, 9 }
 0x1e6   :  { %v2534_v63 = vmax.f32 %v9138_v14, 0.0  ;;  %5096 = vrot.lane.b32.xlu2 %v11913_v42, %s7496_s10  ;;  %1873 = vst [vmem:[#allocation1 + $0x3] ss:$4 sm:$0xff] %v1317_v50  ;;  %v3080_v25 = vmax.f32 %v2791_v46, %v2505_v32  ;;  %v2793_v16 = vrot.slane %v2505_v32, 4  ;;  %v2821_v39 = vrot.slane %v2533_v40, 4 }
 0x1e7   :  { %11914 = vst [vmem:[#allocation60_spill] sm:$0xff] %v9156_v30  ;;  %v3945_v14 = vperm.slane %v3369_v3, 2  ;;  %v3057_v1 = vmax.f32 %v2480_v27, %v2769_v8  ;;  %v7163_v11 = vrot.slane %v3056_v36, 9  ;;  %v11768_v60 = vrot.slane %v9015_v48, 3 }
 0x1e8   :  { %v2822_v59 = vrot.slane %v2534_v63, 4  ;;  %v9158_v9 = vpop.permute.xlu2 %4994  ;;  %v11917_v46 = vrot.slane %v9015_v48, 1  ;;  %v3377_v27 = vmax.f32 %v3079_v17, %v7123_v52  ;;  %v7171_v49 = vrot.slane %v3080_v25, 9  ;;  %v9179_v52 = vpop.f32.mrf.mxu0 }
 0x1e9   :  { %11915 = vst [vmem:[#allocation61_spill] sm:$0xff] %v9158_v9  ;;  %v9162_v5 = vpop.permute.xlu1 %6025  ;;  %v3609_v30 = vmax.f32 %v3056_v36, %v7163_v11  ;;  %v7211_v33 = vrot.slane %v3057_v1, 9  ;;  %v11918_v11 = vrot.slane %v9096_v57, 4  ;;  %v11919_v17 = vmax.f32 %v9080_v10, 0.0 }
 0x1ea   :  { %v3109_v47 = vmax.f32 %v2533_v40, %v2822_v59  ;;  %11916 = vst [vmem:[#allocation62_spill] sm:$0xff] %v9162_v5  ;;  %v4522_v59 = vsel %vm4510_vm2, %v3369_v3, %v3945_v14  ;;  %v3953_v51 = vperm.slane %v3377_v27, 2 }
 0x1eb   :  { %v2308_v62 = vpop.f32.mrf.mxu2  ;;  %v3849_v42 = vmax.f32 %v3057_v1, %v7211_v33  ;;  %v4089_v5 = vperm.slane %v3609_v30, 0  ;;  %v3081_v36 = vmax.f32 %v11919_v17, %v2793_v16  ;;  %v4185_v3 = vperm.slane %v3609_v30, 2  ;;  %v9183_v1 = vpop.permute.xlu0 %5971 }
 0x1ec   :  { %v7133_v50 = vrot.slane %v3109_v47, 9  ;;  %v2309_v9 = vadd.f32 %v8977_v7, %v2308_v62  ;;  %5386 = vrot.lane.b32.xlu0 %v11917_v46, %s7501_s22  ;;  %5220 = vrot.lane.b32.xlu1 %v11768_v60, %s7497_s11  ;;  %v9175_v62 = vpop.f32.mrf.mxu1  ;;  %11921 = vst [vmem:[#allocation64_spill] sm:$0xff] %v9183_v1  ;;  %v9186_v16 = vpop.f32.mrf.mxu3 }
 0x1ed   :  { %v1879_v8 = vld.sshfl [vmem:[#allocation1] sm:$0xff pattern:$0x73625140]  ;;  %v4425_v60 = vperm.slane %v3849_v42, 2  ;;  %11922 = vst [vmem:[#allocation65_spill] sm:$0xff] %v9186_v16 }
 0x1ee   :  { %v3387_v32 = vmax.f32 %v3109_v47, %v7133_v50  ;;  %v2535_v40 = vmax.f32 %v2309_v9, 0.0  ;;  %5264 = vrot.lane.b32.xlu2 %v11918_v11, %s7498_s20  ;;  %2375 = vmatmul.bf16.gmra.mxu3 %v1879_v8  ;;  %v4329_v47 = vperm.slane %v3849_v42, 0  ;;  %v3617_v50 = vmax.f32 %v3080_v25, %v7171_v49 }
 0x1ef   :  { %v4570_v11 = vsel %vm11846_vm0, %v4522_v59, %v4089_v5  ;;  %v7219_v8 = vrot.slane %v3081_v36, 9  ;;  %v4530_v49 = vsel %vm4510_vm2, %v3377_v27, %v3953_v51  ;;  %v189_v27 = vld [vmem:[%s11733_s0 + $0x274] sm:$0x3] }
 0x1f0   :  { %v2823_v14 = vrot.slane %v2535_v40, 4  ;;  %v3110_v46 = vmax.f32 %v2821_v39, %v2535_v40  ;;  %v9181_v9 = vpop.permute.xlu2 %4982  ;;  %v3963_v33 = vperm.slane %v3387_v32, 2  ;;  %v4619_v30 = vsel %vm11841_vm3, %v4570_v11, %v4185_v3 }
 0x1f1   :  { %11920 = vst [vmem:[#allocation63_spill] sm:$0xff] %v9181_v9  ;;  %v4668_v39 = vsel %vm11840_vm4, %v4619_v30, %v4329_v47  ;;  %v9193_v25 = vpop.permute.xlu1 %5915  ;;  %v4097_v42 = vperm.slane %v3617_v50, 0  ;;  %v3857_v47 = vmax.f32 %v3081_v36, %v7219_v8  ;;  %v2289_v36 = vadd.f32 %v8977_v7, %v8937_v19 }
 0x1f2   :  { %v3111_v13 = vmax.f32 %v2534_v63, %v2823_v14  ;;  %v7181_v10 = vrot.slane %v3110_v46, 9  ;;  %v9191_v9 = vsel %vm11830_vm5, %v4668_v39, %v4425_v60  ;;  %v4540_v5 = vsel %vm4510_vm2, %v3387_v32, %v3963_v33 }
 0x1f3   :  { %v11923_v63 = vrot.slane %v9015_v48, 2  ;;  %v9202_v60 = vadd.f32 %v8977_v7, %v8962_v12  ;;  %v4578_v39 = vsel %vm11846_vm0, %v4530_v49, %v4097_v42  ;;  %v190_v12 = vld [vmem:[%s11733_s0 + $0x278] sm:$0xf]  ;;  %v11771_v8 = vrot.slane %v9096_v57, 2 }
 0x1f4   :  { %v3627_v40 = vmax.f32 %v3110_v46, %v7181_v10  ;;  %v7229_v17 = vrot.slane %v3111_v13, 9  ;;  %v4193_v46 = vperm.slane %v3617_v50, 2  ;;  %v2258_v32 = vpop.f32.mrf.mxu1  ;;  %v4337_v42 = vperm.slane %v3857_v47, 0 }
 0x1f5   :  { %5442 = vrot.lane.b32.xlu1 %v11923_v63, %s7502_s13  ;;  %v5195_v63 = vrot.slane %v9096_v57, 3  ;;  %v2259_v49 = vadd.f32 %v8977_v7, %v2258_v32  ;;  %5152 = vrot.lane.b32.xlu0 %v11771_v8, %s7499_s21  ;;  %v2527_v32 = vmax.f32 %v2289_v36, 0.0 }
 0x1f6   :  { %v3867_v59 = vmax.f32 %v3111_v13, %v7229_v17  ;;  %v4107_v3 = vperm.slane %v3627_v40, 0  ;;  %v4203_v14 = vperm.slane %v3627_v40, 2  ;;  %v9209_v13 = vpop.f32.mrf.mxu0  ;;  %v191_v40 = vld [vmem:[%s11733_s0 + $0x27c] sm:$0x3]  ;;  %v4627_v19 = vsel %vm11841_vm3, %v4578_v39, %v4193_v46 }
 0x1f7   :  { %5486 = vrot.lane.b32.xlu2 %v5195_v63, %s7503_s23  ;;  %v2294_v39 = vadd.f32 %v8977_v7, %v8996_v22  ;;  %v7223_v22 = vrot.slane %v8700_v28, 9 }
 0x1f8   :  { %v4347_v11 = vperm.slane %v3867_v59, 0  ;;  %v4443_v10 = vperm.slane %v3867_v59, 2  ;;  %v4588_v30 = vsel %vm11846_vm0, %v4540_v5, %v4107_v3  ;;  %v9205_v33 = vpop.permute.xlu2 %4932  ;;  %v9224_v17 = vpop.permute.xlu0 %4866 }
 0x1f9   :  { %11924 = vst [vmem:[#allocation66_spill] sm:$0xff] %v9205_v33  ;;  %v4637_v51 = vsel %vm11841_vm3, %v4588_v30, %v4203_v14  ;;  %v2356_v3 = vpop.f32.mrf.mxu3  ;;  %v573_v14 = vrot.slane %v189_v27, 2  ;;  %v11927_v30 = vmax.f32 %v8650_v23, 0.0  ;;  %v575_v33 = vrot.slane %v191_v40, 2  ;;  %v9241_v46 = vpop.permute.xlu1 %4930 }
 0x1fa   :  { %v4686_v50 = vsel %vm11840_vm4, %v4637_v51, %v4347_v11  ;;  %11925 = vst [vmem:[#allocation67_spill] sm:$0xff] %v9224_v17  ;;  %v574_v11 = vrot.slane %v190_v12, 2  ;;  %v4676_v23 = vsel %vm11840_vm4, %v4627_v19, %v4337_v42  ;;  %v11929_v17 = vmax.f32 %v9202_v60, 0.0 }
 0x1fb   :  { %v9227_v5 = vsel %vm11830_vm5, %v4686_v50, %v4443_v10  ;;  %v2804_v51 = vrot.slane %v11927_v30, 4  ;;  %v4433_v10 = vperm.slane %v3857_v47, 2  ;;  %v2515_v50 = vmax.f32 %v2259_v49, 0.0  ;;  %11928 = vst [vmem:[#allocation69_spill] sm:$0xff] %v9241_v46 }
 0x1fc   :  { %11926 = vst [vmem:[#allocation68_spill] sm:$0xff] %v9227_v5  ;;  %v1320_v8 = vsel %vm11846_vm0, %v189_v27, %v573_v14  ;;  %v1323_v59 = vsel %vm11846_vm0, %v190_v12, %v574_v11  ;;  %v1324_v49 = vsel %vm612_vm1, %v190_v12, %v574_v11  ;;  %v2816_v48 = vrot.slane %v11929_v17, 4 }
 0x1fd   :  { %5040 = vrot.lane.b32.xlu1 %v9096_v57, %s7495_s30  ;;  %v2803_v47 = vrot.slane %v2515_v50, 4  ;;  %v3091_v30 = vmax.f32 %v2515_v50, %v2804_v51  ;;  %1874 = vst [vmem:[#allocation1 + $0x20] ss:$4 sm:$0xff] %v1320_v8  ;;  %v1326_v5 = vrot.slane %v1324_v49, 2  ;;  %v1329_v36 = vsel %vm11846_vm0, %v191_v40, %v575_v33 }
 0x1fe   :  { %1875 = vst [vmem:[#allocation1 + $0x21] ss:$4 sm:$0xff] %v1323_v59  ;;  %v11931_v27 = vmax.f32 %v8662_v61, 0.0  ;;  %v2815_v19 = vrot.slane %v2527_v32, 4  ;;  %v2529_v51 = vmax.f32 %v2294_v39, 0.0  ;;  %v2357_v12 = vadd.f32 %v8977_v7, %v2356_v3  ;;  %v9262_v59 = vpop.f32.mrf.mxu0 }
 0x1ff   :  { %v7127_v42 = vrot.slane %v3091_v30, 9  ;;  %1878 = vst [vmem:[#allocation1 + $0x23] ss:$4 sm:$0xff] %v1329_v36  ;;  %v9259_v8 = vsel %vm11830_vm5, %v4676_v23, %v4433_v10  ;;  %v3103_v11 = vmax.f32 %v2527_v32, %v2816_v48  ;;  %v9266_v61 = vadd.f32 %v8977_v7, %v8924_v37 }
 0x200   :  { %v9252_v46 = vpop.permute.xlu2 %5162  ;;  %v3092_v14 = vmax.f32 %v2803_v47, %v11931_v27  ;;  %1877 = vst [vmem:[#allocation1 + $0x22] ss:$4 sm:$0xff] %v1326_v5  ;;  %v11775_v40 = vrot.slane %v9259_v8, 2  ;;  %v11933_v39 = vrot.slane %v9096_v57, 1  ;;  %v9271_v5 = vpop.permute.xlu0 %4854  ;;  %v9274_v3 = vmax.f32 %v8700_v28, %v7223_v22 }
 0x201   :  { %11930 = vst [vmem:[#allocation70_spill] sm:$0xff] %v9252_v46  ;;  %v3381_v17 = vmax.f32 %v3091_v30, %v7127_v42  ;;  %v2358_v50 = vpop.f32.mrf.mxu3  ;;  %v9281_v37 = vpop.permute.xlu1 %4790  ;;  %v2154_v48 = vadd.f32 %v8977_v7, %v8888_v34  ;;  %v3104_v32 = vmax.f32 %v2815_v19, %v2529_v51  ;;  %v2554_v30 = vmax.f32 %v2357_v12, 0.0 }
 0x202   :  { %11932 = vst [vmem:[#allocation71_spill] sm:$0xff] %v9259_v8  ;;  %v7175_v33 = vrot.slane %v3092_v14, 9  ;;  %5374 = vrot.lane.b32.xlu0 %v11933_v39, %s7501_s22  ;;  %v2359_v10 = vadd.f32 %v8977_v7, %v2358_v50  ;;  %4864 = vrot.lane.b32.xlu2 %v11775_v40, %s7492_s18  ;;  %v7131_v27 = vrot.slane %v3103_v11, 9  ;;  %v11776_v19 = vrot.slane %v9259_v8, 3 }
 0x203   :  { %11934 = vst [vmem:[#allocation72_spill] sm:$0xff] %v9271_v5  ;;  %v3957_v47 = vperm.slane %v3381_v17, 2  ;;  %v2473_v12 = vmax.f32 %v2154_v48, 0.0  ;;  %v11937_v48 = vmax.f32 %v9202_v60, 0.0 }
 0x204   :  { %v3621_v23 = vmax.f32 %v3092_v14, %v7175_v33  ;;  %11935 = vst [vmem:[#allocation73_spill] sm:$0xff] %v9281_v37  ;;  %v2555_v49 = vmax.f32 %v2359_v10, 0.0  ;;  %v11777_v14 = vmax.f32 %v9266_v61, 0.0  ;;  %v4341_v33 = vperm.slane %v9274_v3, 0 }
 0x205   :  { %5208 = vrot.lane.b32.xlu1 %v5195_v63, %s7497_s11  ;;  %v4534_v22 = vsel %vm4510_vm2, %v3381_v17, %v3957_v47  ;;  %v2817_v63 = vrot.slane %v2529_v51, 4  ;;  %v7179_v10 = vrot.slane %v3104_v32, 9  ;;  %v3385_v47 = vmax.f32 %v3103_v11, %v7131_v27 }
 0x206   :  { %v4101_v28 = vperm.slane %v3621_v23, 0  ;;  %v4197_v36 = vperm.slane %v3621_v23, 2  ;;  %v2843_v50 = vrot.slane %v2555_v49, 4  ;;  %v2762_v46 = vrot.slane %v11777_v14, 4  ;;  %v2183_v27 = vpop.f32.mrf.mxu0 }
 0x207   :  { %v1880_v40 = vld.sshfl [vmem:[#allocation1 + $0x20] sm:$0xff pattern:$0x73625140]  ;;  %v2159_v51 = vadd.f32 %v8977_v7, %v8944_v38 }
 0x208   :  { %v9287_v42 = vpop.permute.xlu2 %4920  ;;  %v4582_v39 = vsel %vm11846_vm0, %v4534_v22, %v4101_v28  ;;  %2380 = vmatmul.bf16.gmra.mxu3 %v1880_v40  ;;  %v3130_v17 = vmax.f32 %v2554_v30, %v2843_v50  ;;  %v11778_v40 = vrot.slane %v9259_v8, 1  ;;  %v2842_v22 = vrot.slane %v2554_v30, 4 }
 0x209   :  { %11936 = vst [vmem:[#allocation74_spill] sm:$0xff] %v9287_v42  ;;  %v4631_v34 = vsel %vm11841_vm3, %v4582_v39, %v4197_v36  ;;  %v3105_v36 = vmax.f32 %v11937_v48, %v2817_v63  ;;  %v11938_v50 = vrot.slane %v9096_v57, 2  ;;  %v9315_v39 = vpop.permute.xlu1 %4918  ;;  %v2761_v30 = vrot.slane %v2473_v12, 4 }
 0x20a   :  { %v9294_v23 = vsel %vm11840_vm4, %v4631_v34, %v4341_v33  ;;  %v2361_v28 = vpop.f32.mrf.mxu3  ;;  %4928 = vrot.lane.b32.xlu0 %v11776_v19, %s7491_s17  ;;  %v7140_v33 = vrot.slane %v3130_v17, 9  ;;  %5102 = vrot.lane.b32.xlu2 %v11778_v40, %s7496_s10  ;;  %11940 = vst [vmem:[#allocation76_spill] sm:$0xff] %v9315_v39  ;;  %v3625_v34 = vmax.f32 %v3104_v32, %v7179_v10  ;;  %v3961_v48 = vperm.slane %v3385_v47, 2 }
 0x20b   :  { %v2362_v11 = vadd.f32 %v8977_v7, %v2361_v28  ;;  %v3049_v19 = vmax.f32 %v2473_v12, %v2762_v46  ;;  %v2184_v28 = vadd.f32 %v8977_v7, %v2183_v27  ;;  %v7227_v5 = vrot.slane %v3105_v36, 9 }
 0x20c   :  { %v3394_v60 = vmax.f32 %v3130_v17, %v7140_v33  ;;  %v4105_v40 = vperm.slane %v3625_v34, 0  ;;  %v11942_v39 = vmax.f32 %v8207_v35, 0.0  ;;  %v4538_v10 = vsel %vm4510_vm2, %v3385_v47, %v3961_v48 }
 0x20d   :  { %5430 = vrot.lane.b32.xlu1 %v11938_v50, %s7502_s13  ;;  %v2556_v63 = vmax.f32 %v2362_v11, 0.0  ;;  %v2475_v50 = vmax.f32 %v2159_v51, 0.0  ;;  %v7113_v17 = vrot.slane %v3049_v19, 9  ;;  %v2485_v33 = vmax.f32 %v2184_v28, 0.0 }
 0x20e   :  { %v9313_v38 = vpop.permute.xlu0 %5050  ;;  %v3970_v16 = vperm.slane %v3394_v60, 2  ;;  %v2774_v32 = vrot.slane %v11942_v39, 4  ;;  %v11943_v46 = vrot.slane %v9259_v8, 2  ;;  %v3865_v12 = vmax.f32 %v3105_v36, %v7227_v5 }
 0x20f   :  { %11939 = vst [vmem:[#allocation75_spill] sm:$0xff] %v9313_v38  ;;  %v2844_v37 = vrot.slane %v2556_v63, 4  ;;  %v3131_v42 = vmax.f32 %v2842_v22, %v2556_v63  ;;  %v3050_v11 = vmax.f32 %v2761_v30, %v2475_v50  ;;  %v2773_v35 = vrot.slane %v2485_v33, 4 }
 0x210   :  { %v9318_v14 = vpop.permute.xlu2 %5150  ;;  %v3061_v22 = vmax.f32 %v2485_v33, %v2774_v32  ;;  %v4586_v63 = vsel %vm11846_vm0, %v4538_v10, %v4105_v40  ;;  %v2763_v48 = vrot.slane %v2475_v50, 4  ;;  %v4441_v33 = vperm.slane %v3865_v12, 2 }
 0x211   :  { %11941 = vst [vmem:[#allocation77_spill] sm:$0xff] %v9318_v14  ;;  %v3132_v1 = vmax.f32 %v2555_v49, %v2844_v37  ;;  %v7188_v38 = vrot.slane %v3131_v42, 9  ;;  %v4201_v37 = vperm.slane %v3625_v34, 2  ;;  %v4547_v49 = vsel %vm4510_vm2, %v3394_v60, %v3970_v16  ;;  %v9331_v47 = vpop.permute.xlu1 %4868 }
 0x212   :  { %5158 = vrot.lane.b32.xlu0 %v11943_v46, %s7499_s21  ;;  %11945 = vst [vmem:[#allocation79_spill] sm:$0xff] %v9331_v47  ;;  %v7117_v30 = vrot.slane %v3061_v22, 9  ;;  %v3367_v34 = vmax.f32 %v3049_v19, %v7113_v17  ;;  %v4345_v16 = vperm.slane %v3865_v12, 0  ;;  %v9340_v60 = vadd.f32 %v8977_v7, %v8934_v6 }
 0x213   :  { %v3634_v51 = vmax.f32 %v3131_v42, %v7188_v38  ;;  %v7236_v27 = vrot.slane %v3132_v1, 9  ;;  %v11946_v42 = vmax.f32 %v8221_v55, 0.0  ;;  %v4635_v40 = vsel %vm11841_vm3, %v4586_v63, %v4201_v37 }
 0x214   :  { %v7161_v50 = vrot.slane %v3050_v11, 9  ;;  %v11948_v55 = vmax.f32 %v9266_v61, 0.0  ;;  %v11779_v37 = vmax.f32 %v9340_v60, 0.0  ;;  %v4684_v12 = vsel %vm11840_vm4, %v4635_v40, %v4345_v16 }
 0x215   :  { %5046 = vrot.lane.b32.xlu1 %v9259_v8, %s7495_s30  ;;  %v3874_v28 = vmax.f32 %v3132_v1, %v7236_v27  ;;  %v4114_v5 = vperm.slane %v3634_v51, 0  ;;  %v4210_v36 = vperm.slane %v3634_v51, 2  ;;  %v3062_v38 = vmax.f32 %v2773_v35, %v11946_v42 }
 0x216   :  { %v9329_v39 = vpop.permute.xlu0 %4804  ;;  %v3371_v1 = vmax.f32 %v3061_v22, %v7117_v30  ;;  %v3051_v51 = vmax.f32 %v11948_v55, %v2763_v48  ;;  %v4969_v35 = vrot.slane %v9259_v8, 4  ;;  %v3607_v61 = vmax.f32 %v3050_v11, %v7161_v50  ;;  %v9368_v11 = vpop.f32.mrf.mxu3 }
 0x217   :  { %11944 = vst [vmem:[#allocation78_spill] sm:$0xff] %v9329_v39  ;;  %v4595_v32 = vsel %vm11846_vm0, %v4547_v49, %v4114_v5  ;;  %v7165_v10 = vrot.slane %v3062_v38, 9  ;;  %v4354_v27 = vperm.slane %v3874_v28, 0  ;;  %v4450_v19 = vperm.slane %v3874_v28, 2 }
 0x218   :  { %v9336_v46 = vpop.permute.xlu2 %4926  ;;  %v4644_v17 = vsel %vm11841_vm3, %v4595_v32, %v4210_v36  ;;  %v3947_v6 = vperm.slane %v3371_v1, 2  ;;  %v2237_v49 = vadd.f32 %v8977_v7, %v8912_v21  ;;  %5270 = vrot.lane.b32.xlu2 %v4969_v35, %s7498_s20  ;;  %v11950_v28 = vrot.slane %v9259_v8, 1 }
 0x219   :  { %11947 = vst [vmem:[#allocation80_spill] sm:$0xff] %v9336_v46  ;;  %v9348_v42 = vmax.f32 %v3062_v38, %v7165_v10  ;;  %v9362_v5 = vpop.permute.xlu1 %5106  ;;  %v3943_v21 = vperm.slane %v3367_v34, 2  ;;  %v9365_v36 = vsel %vm11830_vm5, %v4684_v12, %v4441_v33  ;;  %v4693_v38 = vsel %vm11840_vm4, %v4644_v17, %v4354_v27  ;;  %v192_v17 = vld [vmem:[%s11733_s0 + $0x280] sm:$0xf] }
 0x21a   :  { %v4524_v63 = vsel %vm4510_vm2, %v3371_v1, %v3947_v6  ;;  %11951 = vst [vmem:[#allocation82_spill] sm:$0xff] %v9362_v5  ;;  %v7209_v30 = vrot.slane %v3051_v51, 9  ;;  %5332 = vrot.lane.b32.xlu0 %v9365_v36, %s7500_s24  ;;  %v9376_v32 = vsel %vm11830_vm5, %v4693_v38, %v4450_v19  ;;  %v2506_v50 = vmax.f32 %v2237_v49, 0.0  ;;  %v193_v6 = vld [vmem:[%s11733_s0 + $0x284] sm:$0x3] }
 0x21b   :  { %v4091_v22 = vperm.slane %v9348_v42, 0  ;;  %11952 = vst [vmem:[#allocation83_spill] sm:$0xff] %v9376_v32  ;;  %v2795_v1 = vrot.slane %v11779_v37, 4  ;;  %v2242_v10 = vadd.f32 %v8977_v7, %v8960_v44  ;;  %v4910_v33 = vrot.slane %v9376_v32, 3  ;;  %v194_v49 = vld [vmem:[%s11733_s0 + $0x288] sm:$0xf] }
 0x21c   :  { %v4087_v55 = vperm.slane %v3607_v61, 0  ;;  %v4520_v27 = vsel %vm4510_vm2, %v3367_v34, %v3943_v21  ;;  %v3847_v19 = vmax.f32 %v3051_v51, %v7209_v30  ;;  %v2794_v12 = vrot.slane %v2506_v50, 4 }
 0x21d   :  { %4800 = vrot.lane.b32.xlu1 %v11950_v28, %s7493_s1  ;;  %v9371_v16 = vsel %vm11846_vm0, %v4524_v63, %v4091_v22  ;;  %v3082_v44 = vmax.f32 %v2506_v50, %v2795_v1  ;;  %v4183_v22 = vperm.slane %v3607_v61, 2  ;;  %v2508_v63 = vmax.f32 %v2242_v10, 0.0 }
 0x21e   :  { %v9357_v48 = vpop.permute.xlu0 %4996  ;;  %v4568_v34 = vsel %vm11846_vm0, %v4520_v27, %v4087_v55  ;;  %v4782_v28 = vrot.slane %v9376_v32, 1  ;;  %v576_v21 = vrot.slane %v192_v17, 2  ;;  %v577_v30 = vrot.slane %v193_v6, 2  ;;  %v2366_v55 = vpop.f32.mrf.mxu3 }
 0x21f   :  { %11949 = vst [vmem:[#allocation81_spill] sm:$0xff] %v9357_v48  ;;  %v578_v37 = vrot.slane %v194_v49, 2  ;;  %v7124_v50 = vrot.slane %v3082_v44, 9  ;;  %v4617_v1 = vsel %vm11841_vm3, %v4568_v34, %v4183_v22  ;;  %v3083_v10 = vmax.f32 %v2794_v12, %v2508_v63 }
 0x220   :  { %v9378_v40 = vpop.permute.xlu2 %5330  ;;  %4938 = vrot.lane.b32.xlu2 %v4910_v33, %s7491_s17  ;;  %v2796_v33 = vrot.slane %v2508_v63, 4  ;;  %v1332_v27 = vsel %vm11846_vm0, %v192_v17, %v576_v21  ;;  %v11780_v5 = vrot.slane %v9365_v36, 2  ;;  %v11957_v63 = vmax.f32 %v9340_v60, 0.0 }
 0x221   :  { %11953 = vst [vmem:[#allocation84_spill] sm:$0xff] %v9378_v40  ;;  %v9401_v38 = vpop.permute.xlu1 %5274  ;;  %v4327_v40 = vperm.slane %v3847_v19, 0  ;;  %v1342_v22 = vsel %vm612_vm1, %v194_v49, %v578_v37  ;;  %v7172_v12 = vrot.slane %v3083_v10, 9  ;;  %v9437_v60 = vadd.f32 %v8977_v7, %v2366_v55 }
 0x222   :  { %11955 = vst [vmem:[#allocation86_spill] sm:$0xff] %v9401_v38  ;;  %4810 = vrot.lane.b32.xlu0 %v4782_v28, %s7493_s1  ;;  %v4423_v38 = vperm.slane %v3847_v19, 2  ;;  %v1341_v28 = vsel %vm11846_vm0, %v194_v49, %v578_v37  ;;  %v195_v19 = vld [vmem:[%s11733_s0 + $0x28c] sm:$0x3]  ;;  %v3084_v34 = vmax.f32 %v11957_v63, %v2796_v33  ;;  %v196_v49 = vld [vmem:[%s11733_s0 + $0x290] sm:$0xf] }
 0x223   :  { %1881 = vst [vmem:[#allocation1] ss:$4 sm:$0xff] %v1332_v27 }
 0x224   :  { %1885 = vst [vmem:[#allocation1 + $0x3] ss:$4 sm:$0xff] %v1341_v28  ;;  %v7220_v27 = vrot.slane %v3084_v34, 9 }
 0x225   :  { %4992 = vrot.lane.b32.xlu1 %v4969_v35, %s7494_s25  ;;  %v1338_v35 = vsel %vm11846_vm0, %v193_v6, %v577_v30  ;;  %v3378_v6 = vmax.f32 %v3082_v44, %v7124_v50  ;;  %v3618_v30 = vmax.f32 %v3083_v10, %v7172_v12  ;;  %v199_v12 = vld [vmem:[%s11733_s0 + $0x29c] sm:$0x3] }
 0x226   :  { %v9398_v51 = vpop.permute.xlu0 %5218  ;;  %1884 = vst [vmem:[#allocation1 + $0x2] ss:$4 sm:$0xff] %v1338_v35 }
 0x227   :  { %11954 = vst [vmem:[#allocation85_spill] sm:$0xff] %v9398_v51  ;;  %v1333_v51 = vsel %vm612_vm1, %v192_v17, %v576_v21  ;;  %v1344_v17 = vrot.slane %v1342_v22, 2  ;;  %v3954_v33 = vperm.slane %v3378_v6, 2  ;;  %v198_v22 = vld [vmem:[%s11733_s0 + $0x298] sm:$0xf] }
 0x228   :  { %v9404_v61 = vpop.permute.xlu2 %5108  ;;  %v1335_v48 = vrot.slane %v1333_v51, 2  ;;  %5444 = vrot.lane.b32.xlu2 %v11780_v5, %s7502_s13  ;;  %v579_v51 = vrot.slane %v195_v19, 2 }
 0x229   :  { %11956 = vst [vmem:[#allocation87_spill] sm:$0xff] %v9404_v61  ;;  %v4666_v61 = vsel %vm11840_vm4, %v4617_v1, %v4327_v40  ;;  %v4974_v40 = vrot.slane %v9376_v32, 4  ;;  %v9431_v21 = vpop.permute.xlu1 %4792  ;;  %v580_v1 = vrot.slane %v196_v49, 2 }
 0x22a   :  { %1883 = vst [vmem:[#allocation1 + $0x1] ss:$4 sm:$0xff] %v1335_v48  ;;  %v11959_v48 = vrot.slane %v9259_v8, 3  ;;  %v9434_v44 = vsel %vm11830_vm5, %v4666_v61, %v4423_v38  ;;  %v1347_v28 = vsel %vm11846_vm0, %v195_v19, %v579_v51  ;;  %v197_v38 = vld [vmem:[%s11733_s0 + $0x294] sm:$0x3]  ;;  %v2364_v61 = vadd.f32 %v8977_v7, %v9368_v11  ;;  %v2368_v19 = vpop.f32.mrf.mxu3 }
 0x22b   :  { %1887 = vst [vmem:[#allocation1 + $0x20] ss:$4 sm:$0xff] %v1344_v17  ;;  %5002 = vrot.lane.b32.xlu0 %v4974_v40, %s7494_s25  ;;  %v11781_v35 = vrot.slane %v9434_v44, 2  ;;  %v1350_v55 = vsel %vm11846_vm0, %v196_v49, %v580_v1  ;;  %v1351_v10 = vsel %vm612_vm1, %v196_v49, %v580_v1  ;;  %v4098_v40 = vperm.slane %v3618_v30, 0  ;;  %v9470_v17 = vld [vmem:[%s11734_s2] ss:$0 sm:$0xff] }
 0x22c   :  { %1888 = vst [vmem:[#allocation1 + $0x21] ss:$4 sm:$0xff] %v1347_v28  ;;  %v1353_v63 = vrot.slane %v1351_v10, 2  ;;  %v4846_v11 = vrot.slane %v9376_v32, 2  ;;  %v581_v49 = vrot.slane %v197_v38, 2  ;;  %v582_v28 = vrot.slane %v198_v22, 2 }
 0x22d   :  { %5214 = vrot.lane.b32.xlu1 %v11959_v48, %s7497_s11  ;;  %1889 = vst [vmem:[#allocation1 + $0x22] ss:$4 sm:$0xff] %v1350_v55  ;;  %v4531_v48 = vsel %vm4510_vm2, %v3378_v6, %v3954_v33  ;;  %v583_v10 = vrot.slane %v199_v12, 2  ;;  %v3858_v55 = vmax.f32 %v3084_v34, %v7220_v27  ;;  %v2557_v5 = vmax.f32 %v2364_v61, 0.0 }
 0x22e   :  { %v9423_v37 = vpop.permute.xlu0 %5038  ;;  %1891 = vst [vmem:[#allocation1 + $0x23] ss:$4 sm:$0xff] %v1353_v63  ;;  %v1356_v6 = vsel %vm11846_vm0, %v197_v38, %v581_v49  ;;  %v4194_v33 = vperm.slane %v3618_v30, 2  ;;  %v11962_v63 = vmax.f32 %v9437_v60, 0.0  ;;  %v4579_v34 = vsel %vm11846_vm0, %v4531_v48, %v4098_v40 }
 0x22f   :  { %11958 = vst [vmem:[#allocation88_spill] sm:$0xff] %v9423_v37  ;;  %v1359_v27 = vsel %vm11846_vm0, %v198_v22, %v582_v28  ;;  %v1360_v61 = vsel %vm612_vm1, %v198_v22, %v582_v28  ;;  %v2845_v38 = vrot.slane %v2557_v5, 4  ;;  %v5475_v49 = vrot.slane %v9434_v44, 3 }
 0x230   :  { %v9440_v50 = vpop.permute.xlu2 %5276  ;;  %5432 = vrot.lane.b32.xlu2 %v11781_v35, %s7502_s13  ;;  %v2369_v35 = vadd.f32 %v9470_v17, %v2368_v19  ;;  %v1365_v19 = vsel %vm11846_vm0, %v199_v12, %v583_v10  ;;  %v11783_v22 = vrot.slane %v9365_v36, 1  ;;  %v200_v12 = vld [vmem:[%s11733_s0 + $0x2a0] sm:$0xf]  ;;  %v7213_v40 = vrot.slane %v8241_v58, 9 }
 0x231   :  { %11960 = vst [vmem:[#allocation89_spill] sm:$0xff] %v9440_v50  ;;  %v1892_v7 = vld.sshfl [vmem:[#allocation1] sm:$0xff pattern:$0x73625140]  ;;  %v9465_v1 = vpop.permute.xlu1 %4856  ;;  %v1362_v50 = vrot.slane %v1360_v61, 2  ;;  %v4187_v8 = vperm.slane %v9348_v42, 2 }
 0x232   :  { %2385 = vmatmul.bf16.gmra.mxu3 %v1892_v7  ;;  %v2846_v7 = vrot.slane %v11962_v63, 4  ;;  %1894 = vst [vmem:[#allocation1] ss:$4 sm:$0xff] %v1356_v6  ;;  %v2559_v30 = vmax.f32 %v2369_v35, 0.0  ;;  %v4628_v6 = vsel %vm11841_vm3, %v4579_v34, %v4194_v33  ;;  %v4434_v35 = vperm.slane %v3858_v55, 2 }
 0x233   :  { %5320 = vrot.lane.b32.xlu0 %v9434_v44, %s7500_s24  ;;  %1895 = vst [vmem:[#allocation1 + $0x1] ss:$4 sm:$0xff] %v1359_v27  ;;  %v202_v33 = vld [vmem:[%s11733_s0 + $0x2a8] sm:$0xf] }
 0x234   :  { %1898 = vst [vmem:[#allocation1 + $0x3] ss:$4 sm:$0xff] %v1365_v19  ;;  %v3133_v32 = vmax.f32 %v2557_v5, %v2846_v7  ;;  %v201_v5 = vld [vmem:[%s11733_s0 + $0x2a4] sm:$0x3]  ;;  %v2847_v27 = vrot.slane %v2559_v30, 4  ;;  %v586_v19 = vrot.slane %v202_v33, 2 }
 0x235   :  { %4874 = vrot.lane.b32.xlu1 %v4846_v11, %s7492_s18  ;;  %v4338_v11 = vperm.slane %v3858_v55, 0  ;;  %1897 = vst [vmem:[#allocation1 + $0x2] ss:$4 sm:$0xff] %v1362_v50  ;;  %v3134_v50 = vmax.f32 %v2845_v38, %v2559_v30  ;;  %v584_v55 = vrot.slane %v200_v12, 2  ;;  %v585_v7 = vrot.slane %v201_v5, 2 }
 0x236   :  { %v9463_v51 = vpop.permute.xlu0 %4984  ;;  %v7141_v34 = vrot.slane %v3133_v32, 9  ;;  %v1893_v61 = vld.sshfl [vmem:[#allocation1 + $0x20] sm:$0xff pattern:$0x73625140]  ;;  %v1378_v30 = vsel %vm612_vm1, %v202_v33, %v586_v19 }
 0x237   :  { %11961 = vst [vmem:[#allocation90_spill] sm:$0xff] %v9463_v51  ;;  %v4677_v10 = vsel %vm11840_vm4, %v4628_v6, %v4338_v11  ;;  %v1368_v38 = vsel %vm11846_vm0, %v200_v12, %v584_v55  ;;  %v3851_v11 = vmax.f32 %v8241_v58, %v7213_v40  ;;  %v1374_v47 = vsel %vm11846_vm0, %v201_v5, %v585_v7 }
 0x238   :  { %v9484_v63 = vpop.permute.xlu2 %5318  ;;  %6021 = vrot.lane.b32.xlu2 %v5475_v49, %s7491_s17  ;;  %v9511_v6 = vsel %vm11830_vm5, %v4677_v10, %v4434_v35  ;;  %1899 = vst [vmem:[#allocation1 + $0x20] ss:$4 sm:$0xff] %v1368_v38  ;;  %v7189_v39 = vrot.slane %v3134_v50, 9  ;;  %v3395_v58 = vmax.f32 %v3133_v32, %v7141_v34  ;;  %v1380_v40 = vrot.slane %v1378_v30, 2 }
 0x239   :  { %11963 = vst [vmem:[#allocation91_spill] sm:$0xff] %v9484_v63  ;;  %v9495_v28 = vpop.permute.xlu1 %5094  ;;  %v11966_v35 = vmax.f32 %v9437_v60, 0.0  ;;  %v5363_v10 = vrot.slane %v9434_v44, 1  ;;  %v6298_v51 = vrot.slane %v9191_v9, 3 }
 0x23a   :  { %11965 = vst [vmem:[#allocation93_spill] sm:$0xff] %v9495_v28  ;;  %v3635_v42 = vmax.f32 %v3134_v50, %v7189_v39  ;;  %v11785_v39 = vrot.slane %v9511_v6, 3  ;;  %v4621_v50 = vsel %vm11841_vm3, %v9371_v16, %v4187_v8 }
 0x23b   :  { %5488 = vrot.lane.b32.xlu0 %v5475_v49, %s7503_s23  ;;  %1902 = vst [vmem:[#allocation1 + $0x22] ss:$4 sm:$0xff] %v1374_v47  ;;  %v4437_v49 = vperm.slane %v9274_v3, 2  ;;  %v9528_v3 = vadd.f32 %v9470_v17, %v9005_v15  ;;  %v11970_v15 = vrot.slane %v9434_v44, 2 }
 0x23c   :  { %v4211_v16 = vperm.slane %v3635_v42, 2 }
 0x23d   :  { %5388 = vrot.lane.b32.xlu1 %v11783_v22, %s7501_s22  ;;  %v1369_v22 = vsel %vm612_vm1, %v200_v12, %v584_v55  ;;  %v3135_v12 = vmax.f32 %v11966_v35, %v2847_v27  ;;  %v9537_v60 = vsel %vm11830_vm5, %v9294_v23, %v4437_v49  ;;  %v2162_v55 = vadd.f32 %v9470_v17, %v8972_v0 }
 0x23e   :  { %v9493_v48 = vpop.permute.xlu0 %5206  ;;  %v1371_v63 = vrot.slane %v1369_v22, 2  ;;  %v1904_v22 = vld.sshfl [vmem:[#allocation1] sm:$0xff pattern:$0x73625140]  ;;  %v2477_v34 = vmax.f32 %v9528_v3, 0.0  ;;  %v4115_v27 = vperm.slane %v3635_v42, 0  ;;  %v2167_v0 = vadd.f32 %v9470_v17, %v9025_v4 }
 0x23f   :  { %11964 = vst [vmem:[#allocation92_spill] sm:$0xff] %v9493_v48  ;;  %v1377_v48 = vsel %vm11846_vm0, %v202_v33, %v586_v19  ;;  %v4427_v33 = vperm.slane %v3851_v11, 2  ;;  %v7237_v7 = vrot.slane %v3135_v12, 9  ;;  %v2476_v38 = vmax.f32 %v2162_v55, 0.0 }
 0x240   :  { %1903 = vst [vmem:[#allocation1 + $0x23] ss:$4 sm:$0xff] %v1377_v48  ;;  %5048 = vrot.lane.b32.xlu2 %v9511_v6, %s7495_s30  ;;  %v9523_v5 = vpop.permute.xlu2 %5096  ;;  %v4331_v48 = vperm.slane %v3851_v11, 0  ;;  %v2765_v8 = vrot.slane %v2477_v34, 4  ;;  %v2478_v3 = vmax.f32 %v2167_v0, 0.0  ;;  %v2249_v0 = vadd.f32 %v9470_v17, %v9061_v24 }
 0x241   :  { %11967 = vst [vmem:[#allocation94_spill] sm:$0xff] %v9523_v5  ;;  %v3875_v11 = vmax.f32 %v3135_v12, %v7237_v7  ;;  %v2764_v35 = vrot.slane %v2476_v38, 4  ;;  %v2244_v12 = vadd.f32 %v9470_v17, %v9003_v29 }
 0x242   :  { %1901 = vst [vmem:[#allocation1 + $0x21] ss:$4 sm:$0xff] %v1371_v63  ;;  %2390 = vmatmul.bf16.gmra.mxu3 %v1893_v61  ;;  %v3971_v63 = vperm.slane %v3395_v58, 2  ;;  %v4670_v23 = vsel %vm11840_vm4, %v4621_v50, %v4331_v48  ;;  %v3052_v48 = vmax.f32 %v2476_v38, %v2765_v8  ;;  %v2766_v38 = vrot.slane %v2478_v3, 4 }
 0x243   :  { %1907 = vst [vmem:[#allocation1] ss:$4 sm:$0xff] %v1380_v40  ;;  %5965 = vrot.lane.b32.xlu0 %v11970_v15, %s7492_s18  ;;  %v9550_v61 = vsel %vm11830_vm5, %v4670_v23, %v4427_v33  ;;  %v4355_v42 = vperm.slane %v3875_v11, 0  ;;  %v5141_v33 = vrot.slane %v9511_v6, 2  ;;  %v4451_v55 = vperm.slane %v3875_v11, 2 }
 0x244   :  { %11971 = vst [vmem:[#allocation97_spill] sm:$0xff] %v9550_v61  ;;  %v4548_v19 = vsel %vm4510_vm2, %v3395_v58, %v3971_v63  ;;  %v9566_v58 = vadd.f32 %v9470_v17, %v9029_v2  ;;  %v203_v2 = vld [vmem:[%s11733_s0 + $0x2ac] sm:$0x3]  ;;  %v204_v63 = vld [vmem:[%s11733_s0 + $0x2b0] sm:$0xf]  ;;  %v2509_v29 = vmax.f32 %v2244_v12, 0.0  ;;  %v3053_v50 = vmax.f32 %v2764_v35, %v2478_v3 }
 0x245   :  { %5376 = vrot.lane.b32.xlu1 %v5363_v10, %s7501_s22  ;;  %v4596_v30 = vsel %vm11846_vm0, %v4548_v19, %v4115_v27  ;;  %v587_v7 = vrot.slane %v203_v2, 2  ;;  %v588_v27 = vrot.slane %v204_v63, 2  ;;  %v7114_v19 = vrot.slane %v3052_v48, 9 }
 0x246   :  { %v9530_v47 = vpop.permute.xlu0 %4798  ;;  %v9533_v32 = vpop.permute.xlu1 %5262  ;;  %v11786_v15 = vmax.f32 %v9566_v58, 0.0  ;;  %v5085_v8 = vrot.slane %v9511_v6, 1 }
 0x247   :  { %11968 = vst [vmem:[#allocation95_spill] sm:$0xff] %v9530_v47  ;;  %v1383_v11 = vsel %vm11846_vm0, %v203_v2, %v587_v7  ;;  %v1387_v35 = vsel %vm612_vm1, %v204_v63, %v588_v27  ;;  %v3054_v2 = vmax.f32 %v2477_v34, %v2766_v38  ;;  %v2511_v7 = vmax.f32 %v2249_v0, 0.0  ;;  %v207_v0 = vld [vmem:[%s11733_s0 + $0x2bc] sm:$0x3] }
 0x248   :  { %11969 = vst [vmem:[#allocation96_spill] sm:$0xff] %v9533_v32  ;;  %5216 = vrot.lane.b32.xlu2 %v11785_v39, %s7497_s11  ;;  %v9559_v49 = vpop.permute.xlu2 %5264  ;;  %v2798_v12 = vrot.slane %v11786_v15, 4 }
 0x249   :  { %11972 = vst [vmem:[#allocation98_spill] sm:$0xff] %v9559_v49  ;;  %v2799_v38 = vrot.slane %v2511_v7, 4 }
 0x24a   :  { %1908 = vst [vmem:[#allocation1 + $0x1] ss:$4 sm:$0xff] %v1383_v11 }
 0x24b   :  { %5326 = vrot.lane.b32.xlu0 %v9511_v6, %s7500_s24 }
 0x24d   :  { %5909 = vrot.lane.b32.xlu1 %v5363_v10, %s7493_s1  ;;  %v4645_v10 = vsel %vm11841_vm3, %v4596_v30, %v4211_v16  ;;  %v1386_v30 = vsel %vm11846_vm0, %v204_v63, %v588_v27  ;;  %v3085_v27 = vmax.f32 %v2509_v29, %v2798_v12 }
 0x24e   :  { %v9562_v40 = vpop.permute.xlu1 %4862  ;;  %v9570_v4 = vpop.permute.xlu0 %4990  ;;  %v4694_v23 = vsel %vm11840_vm4, %v4645_v10, %v4355_v42  ;;  %v1389_v42 = vrot.slane %v1387_v35, 2  ;;  %1909 = vst [vmem:[#allocation1 + $0x2] ss:$4 sm:$0xff] %v1386_v30  ;;  %v2797_v10 = vrot.slane %v2509_v29, 4  ;;  %v11787_v30 = vrot.slane %v9511_v6, 4 }
 0x24f   :  { %11973 = vst [vmem:[#allocation99_spill] sm:$0xff] %v9562_v40  ;;  %v9598_v24 = vsel %vm11830_vm5, %v4694_v23, %v4451_v55  ;;  %v7210_v23 = vrot.slane %v3054_v2, 9  ;;  %v205_v29 = vld [vmem:[%s11733_s0 + $0x2b4] sm:$0x3] }
 0x250   :  { %11974 = vst [vmem:[#allocation100_spill] sm:$0xff] %v9570_v4  ;;  %5438 = vrot.lane.b32.xlu2 %v5141_v33, %s7502_s13  ;;  %v11788_v63 = vrot.slane %v9598_v24, 2  ;;  %v3086_v11 = vmax.f32 %v2797_v10, %v2511_v7  ;;  %v591_v10 = vrot.slane %v207_v0, 2 }
 0x251   :  { %11976 = vst [vmem:[#allocation102_spill] sm:$0xff] %v9598_v24  ;;  %v9600_v3 = vpop.permute.xlu2 %5486 }
 0x252   :  { %2395 = vmatmul.bf16.gmra.mxu3 %v1904_v22  ;;  %v7162_v22 = vrot.slane %v3053_v50, 9  ;;  %11977 = vst [vmem:[#allocation103_spill] sm:$0xff] %v9600_v3 }
 0x253   :  { %5104 = vrot.lane.b32.xlu0 %v5085_v8, %s7496_s10  ;;  %1911 = vst [vmem:[#allocation1 + $0x3] ss:$4 sm:$0xff] %v1389_v42  ;;  %v7173_v42 = vrot.slane %v3086_v11, 9 }
 0x254   :  { %v2371_v15 = vpop.f32.mrf.mxu3 }
 0x255   :  { %5160 = vrot.lane.b32.xlu1 %v5141_v33, %s7499_s21  ;;  %v3368_v33 = vmax.f32 %v3052_v48, %v7114_v19  ;;  %v7125_v48 = vrot.slane %v3085_v27, 9 }
 0x256   :  { %v9589_v16 = vpop.permute.xlu1 %5052  ;;  %v9602_v39 = vpop.permute.xlu0 %5164 }
 0x257   :  { %11975 = vst [vmem:[#allocation101_spill] sm:$0xff] %v9589_v16  ;;  %v3608_v16 = vmax.f32 %v3053_v50, %v7162_v22  ;;  %v3944_v55 = vperm.slane %v3368_v33, 2  ;;  %v206_v50 = vld [vmem:[%s11733_s0 + $0x2b8] sm:$0xf]  ;;  %v3848_v22 = vmax.f32 %v3054_v2, %v7210_v23  ;;  %v3379_v32 = vmax.f32 %v3085_v27, %v7125_v48 }
 0x258   :  { %11978 = vst [vmem:[#allocation104_spill] sm:$0xff] %v9602_v39  ;;  %4876 = vrot.lane.b32.xlu2 %v11788_v63, %s7492_s18  ;;  %v590_v35 = vrot.slane %v206_v50, 2  ;;  %v4783_v63 = vrot.slane %v9598_v24, 1  ;;  %v1401_v2 = vsel %vm11846_vm0, %v207_v0, %v591_v10  ;;  %v11982_v23 = vmax.f32 %v9566_v58, 0.0 }
 0x259   :  { %v4088_v19 = vperm.slane %v3608_v16, 0  ;;  %v4521_v12 = vsel %vm4510_vm2, %v3368_v33, %v3944_v55  ;;  %v4184_v14 = vperm.slane %v3608_v16, 2  ;;  %v2372_v16 = vadd.f32 %v9470_v17, %v2371_v15 }
 0x25a   :  { %v1395_v7 = vsel %vm11846_vm0, %v206_v50, %v590_v35  ;;  %v1396_v3 = vsel %vm612_vm1, %v206_v50, %v590_v35  ;;  %v4328_v27 = vperm.slane %v3848_v22, 0  ;;  %v3955_v58 = vperm.slane %v3379_v32, 2 }
 0x25b   :  { %5272 = vrot.lane.b32.xlu0 %v11787_v30, %s7498_s20  ;;  %v1905_v30 = vld.sshfl [vmem:[#allocation1 + $0x20] sm:$0xff pattern:$0x73625140]  ;;  %v1398_v33 = vrot.slane %v1396_v3, 2  ;;  %v4569_v55 = vsel %vm11846_vm0, %v4521_v12, %v4088_v19  ;;  %v3619_v3 = vmax.f32 %v3086_v11, %v7173_v42  ;;  %v4424_v15 = vperm.slane %v3848_v22, 2 }
 0x25c   :  { %v2373_v49 = vpop.f32.mrf.mxu3  ;;  %1913 = vst [vmem:[#allocation1 + $0x21] ss:$4 sm:$0xff] %v1395_v7  ;;  %v4618_v50 = vsel %vm11841_vm3, %v4569_v55, %v4184_v14  ;;  %v2560_v19 = vmax.f32 %v2372_v16, 0.0  ;;  %v4532_v35 = vsel %vm4510_vm2, %v3379_v32, %v3955_v58  ;;  %v4911_v22 = vrot.slane %v9598_v24, 3  ;;  %v2311_v32 = vpop.f32.mrf.mxu2 }
 0x25d   :  { %5382 = vrot.lane.b32.xlu1 %v5085_v8, %s7501_s22  ;;  %v589_v8 = vrot.slane %v205_v29, 2  ;;  %1915 = vst [vmem:[#allocation1 + $0x22] ss:$4 sm:$0xff] %v1398_v33  ;;  %v4667_v11 = vsel %vm11840_vm4, %v4618_v50, %v4328_v27  ;;  %v4099_v0 = vperm.slane %v3619_v3, 0  ;;  %v4195_v10 = vperm.slane %v3619_v3, 2 }
 0x25e   :  { %v9610_v34 = vpop.permute.xlu1 %5220  ;;  %v9631_v28 = vpop.permute.xlu0 %5386  ;;  %1916 = vst [vmem:[#allocation1 + $0x23] ss:$4 sm:$0xff] %v1401_v2  ;;  %v9658_v14 = vsel %vm11830_vm5, %v4667_v11, %v4424_v15  ;;  %v2252_v27 = vadd.f32 %v9470_v17, %v9092_v56  ;;  %v1917_v50 = vld.sshfl [vmem:[#allocation1] sm:$0xff pattern:$0x73625140] }
 0x25f   :  { %11979 = vst [vmem:[#allocation105_spill] sm:$0xff] %v9610_v34  ;;  %v9626_v34 = vpop.permute.xlu2 %4864  ;;  %v1392_v39 = vsel %vm11846_vm0, %v205_v29, %v589_v8  ;;  %v9639_v29 = vadd.f32 %v9470_v17, %v2373_v49  ;;  %v11984_v49 = vrot.slane %v9511_v6, 3  ;;  %v4975_v8 = vrot.slane %v9598_v24, 4 }
 0x260   :  { %11980 = vst [vmem:[#allocation106_spill] sm:$0xff] %v9626_v34  ;;  %v3087_v34 = vmax.f32 %v11982_v23, %v2799_v38  ;;  %5114 = vrot.lane.b32.xlu2 %v4783_v63, %s7496_s10  ;;  %v4580_v2 = vsel %vm11846_vm0, %v4532_v35, %v4099_v0  ;;  %v9670_v23 = vadd.f32 %v9470_v17, %v9143_v41  ;;  %v2512_v11 = vmax.f32 %v2252_v27, 0.0 }
 0x261   :  { %11981 = vst [vmem:[#allocation107_spill] sm:$0xff] %v9631_v28  ;;  %v2561_v48 = vmax.f32 %v9639_v29, 0.0  ;;  %v11789_v29 = vrot.slane %v9658_v14, 1  ;;  %v4629_v16 = vsel %vm11841_vm3, %v4580_v2, %v4195_v10 }
 0x262   :  { %1912 = vst [vmem:[#allocation1 + $0x20] ss:$4 sm:$0xff] %v1392_v39  ;;  %2400 = vmatmul.bf16.gmra.mxu3 %v1905_v30  ;;  %v7221_v30 = vrot.slane %v3087_v34, 9 }
 0x263   :  { %5494 = vrot.lane.b32.xlu0 %v11984_v49, %s7503_s23  ;;  %v2849_v38 = vrot.slane %v2561_v48, 4 }
 0x264   :  { %v3859_v12 = vmax.f32 %v3087_v34, %v7221_v30 }
 0x265   :  { %5058 = vrot.lane.b32.xlu1 %v9598_v24, %s7495_s30  ;;  %v3136_v7 = vmax.f32 %v2560_v19, %v2849_v38  ;;  %v2513_v38 = vmax.f32 %v9670_v23, 0.0  ;;  %v11991_v23 = vrot.slane %v9598_v24, 2 }
 0x266   :  { %v4339_v34 = vperm.slane %v3859_v12, 0  ;;  %v4435_v30 = vperm.slane %v3859_v12, 2 }
 0x267   :  { %v9645_v39 = vpop.permute.xlu1 %5442  ;;  %v9655_v42 = vpop.permute.xlu2 %5102  ;;  %v7142_v3 = vrot.slane %v3136_v7, 9 }
 0x268   :  { %11983 = vst [vmem:[#allocation108_spill] sm:$0xff] %v9645_v39  ;;  %5282 = vrot.lane.b32.xlu2 %v4975_v8, %s7498_s20  ;;  %v9661_v33 = vpop.permute.xlu0 %5152  ;;  %v4678_v15 = vsel %vm11840_vm4, %v4629_v16, %v4339_v34 }
 0x269   :  { %11985 = vst [vmem:[#allocation109_spill] sm:$0xff] %v9655_v42  ;;  %v3396_v0 = vmax.f32 %v3136_v7, %v7142_v3  ;;  %v9692_v34 = vsel %vm11830_vm5, %v4678_v15, %v4435_v30  ;;  %v2801_v7 = vrot.slane %v2513_v38, 4  ;;  %v2800_v3 = vrot.slane %v2512_v11, 4 }
 0x26a   :  { %11986 = vst [vmem:[#allocation110_spill] sm:$0xff] %v9661_v33 }
 0x26b   :  { %4940 = vrot.lane.b32.xlu0 %v4911_v22, %s7491_s17  ;;  %v3088_v30 = vmax.f32 %v2512_v11, %v2801_v7 }
 0x26d   :  { %4812 = vrot.lane.b32.xlu1 %v4783_v63, %s7493_s1  ;;  %v2848_v63 = vrot.slane %v2560_v19, 4  ;;  %v2257_v19 = vadd.f32 %v9470_v17, %v9175_v62  ;;  %v2313_v62 = vpop.f32.mrf.mxu2 }
 0x26f   :  { %v9665_v55 = vpop.permute.xlu1 %5040 }
 0x270   :  { %11987 = vst [vmem:[#allocation111_spill] sm:$0xff] %v9665_v55  ;;  %5911 = vrot.lane.b32.xlu2 %v11789_v29, %s7493_s1  ;;  %v2312_v29 = vadd.f32 %v9470_v17, %v2311_v32 }
 0x271   :  { %v2376_v58 = vpop.f32.mrf.mxu3 }
 0x272   :  { %v2377_v49 = vadd.f32 %v9470_v17, %v2376_v58  ;;  %2405 = vmatmul.bf16.gmra.mxu3 %v1917_v50  ;;  %v9686_v35 = vpop.permute.xlu2 %5270  ;;  %v3972_v58 = vperm.slane %v3396_v0, 2  ;;  %v2514_v50 = vmax.f32 %v2257_v19, 0.0  ;;  %v2536_v32 = vmax.f32 %v2312_v29, 0.0  ;;  %v208_v29 = vld [vmem:[%s11733_s0 + $0x2c0] sm:$0xf] }
 0x273   :  { %11989 = vst [vmem:[#allocation113_spill] sm:$0xff] %v9686_v35  ;;  %5170 = vrot.lane.b32.xlu0 %v11991_v23, %s7499_s21 }
 0x274   :  { %v2562_v41 = vmax.f32 %v2377_v49, 0.0  ;;  %v9682_v56 = vpop.permute.xlu0 %5374  ;;  %v4549_v23 = vsel %vm4510_vm2, %v3396_v0, %v3972_v58  ;;  %v3089_v19 = vmax.f32 %v2800_v3, %v2514_v50  ;;  %v7126_v0 = vrot.slane %v3088_v30, 9 }
 0x275   :  { %11988 = vst [vmem:[#allocation112_spill] sm:$0xff] %v9682_v56  ;;  %5004 = vrot.lane.b32.xlu1 %v4975_v8, %s7494_s25  ;;  %v5365_v8 = vrot.slane %v9692_v34, 1  ;;  %v2802_v58 = vrot.slane %v2514_v50, 4  ;;  %v11792_v50 = vrot.slane %v9658_v14, 2 }
 0x276   :  { %v2850_v12 = vrot.slane %v2562_v41, 4  ;;  %v3137_v10 = vmax.f32 %v2848_v63, %v2562_v41  ;;  %v9699_v41 = vadd.f32 %v9470_v17, %v2313_v62  ;;  %v7174_v3 = vrot.slane %v3089_v19, 9 }
 0x277   :  { %v9689_v2 = vpop.permute.xlu1 %5208 }
 0x278   :  { %11990 = vst [vmem:[#allocation114_spill] sm:$0xff] %v9689_v2  ;;  %v3138_v16 = vmax.f32 %v2561_v48, %v2850_v12  ;;  %v7190_v27 = vrot.slane %v3137_v10, 9  ;;  %5384 = vrot.lane.b32.xlu2 %v5365_v8, %s7501_s22  ;;  %v11791_v48 = vrot.slane %v9658_v14, 3  ;;  %v11793_v11 = vmax.f32 %v9699_v41, 0.0 }
 0x279   :  { %v2378_v28 = vpop.f32.mrf.mxu3 }
 0x27a   :  { %v3636_v49 = vmax.f32 %v3137_v10, %v7190_v27  ;;  %v7238_v63 = vrot.slane %v3138_v16, 9  ;;  %v9707_v27 = vpop.permute.xlu2 %4938 }
 0x27b   :  { %11993 = vst [vmem:[#allocation116_spill] sm:$0xff] %v9707_v27  ;;  %6023 = vrot.lane.b32.xlu0 %v11791_v48, %s7491_s17  ;;  %v2316_v27 = vpop.f32.mrf.mxu2  ;;  %v211_v48 = vld [vmem:[%s11733_s0 + $0x2cc] sm:$0x3] }
 0x27c   :  { %v4116_v15 = vperm.slane %v3636_v49, 0  ;;  %v9704_v12 = vpop.permute.xlu0 %4928  ;;  %v3876_v10 = vmax.f32 %v3138_v16, %v7238_v63  ;;  %v4212_v7 = vperm.slane %v3636_v49, 2  ;;  %v1918_v63 = vld.sshfl [vmem:[#allocation1 + $0x20] sm:$0xff pattern:$0x73625140]  ;;  %v3380_v49 = vmax.f32 %v3088_v30, %v7126_v0 }
 0x27d   :  { %11992 = vst [vmem:[#allocation115_spill] sm:$0xff] %v9704_v12  ;;  %5226 = vrot.lane.b32.xlu1 %v4911_v22, %s7497_s11  ;;  %v2825_v22 = vrot.slane %v11793_v11, 4  ;;  %v2317_v56 = vadd.f32 %v9470_v17, %v2316_v27  ;;  %v592_v30 = vrot.slane %v208_v29, 2  ;;  %v2824_v27 = vrot.slane %v2536_v32, 4 }
 0x27e   :  { %v4597_v39 = vsel %vm11846_vm0, %v4549_v23, %v4116_v15  ;;  %v4356_v16 = vperm.slane %v3876_v10, 0  ;;  %v209_v15 = vld [vmem:[%s11733_s0 + $0x2c4] sm:$0x3]  ;;  %v4452_v23 = vperm.slane %v3876_v10, 2  ;;  %v3956_v42 = vperm.slane %v3380_v49, 2 }
 0x27f   :  { %v9710_v62 = vpop.permute.xlu1 %5430  ;;  %v4646_v24 = vsel %vm11841_vm3, %v4597_v39, %v4212_v7  ;;  %v11794_v39 = vrot.slane %v9692_v34, 2  ;;  %v9733_v7 = vmax.f32 %v3089_v19, %v7174_v3  ;;  %v212_v19 = vld [vmem:[%s11733_s0 + $0x2d0] sm:$0xf]  ;;  %v3112_v3 = vmax.f32 %v2536_v32, %v2825_v22 }
 0x280   :  { %11994 = vst [vmem:[#allocation117_spill] sm:$0xff] %v9710_v62  ;;  %v3090_v62 = vmax.f32 %v2513_v38, %v2802_v58  ;;  %5917 = vrot.lane.b32.xlu2 %v5365_v8, %s7493_s1  ;;  %v210_v38 = vld [vmem:[%s11733_s0 + $0x2c8] sm:$0xf]  ;;  %v593_v8 = vrot.slane %v209_v15, 2  ;;  %v4695_v58 = vsel %vm11840_vm4, %v4646_v24, %v4356_v16  ;;  %v1404_v16 = vsel %vm11846_vm0, %v208_v29, %v592_v30 }
 0x281   :  { %v594_v10 = vrot.slane %v210_v38, 2  ;;  %1919 = vst [vmem:[#allocation1] ss:$4 sm:$0xff] %v1404_v16  ;;  %v9760_v32 = vsel %vm11830_vm5, %v4695_v58, %v4452_v23  ;;  %v2177_v23 = vadd.f32 %v9470_v17, %v9179_v52  ;;  %v4533_v52 = vsel %vm4510_vm2, %v3380_v49, %v3956_v42 }
 0x282   :  { %2410 = vmatmul.bf16.gmra.mxu3 %v1918_v63  ;;  %v9735_v0 = vpop.permute.xlu2 %5444  ;;  %v1410_v11 = vsel %vm11846_vm0, %v209_v15, %v593_v8  ;;  %11998 = vst [vmem:[#allocation121_spill] sm:$0xff] %v9760_v32  ;;  %v7222_v2 = vrot.slane %v3090_v62, 9 }
 0x283   :  { %11995 = vst [vmem:[#allocation118_spill] sm:$0xff] %v9735_v0  ;;  %5440 = vrot.lane.b32.xlu0 %v11794_v39, %s7502_s13  ;;  %v2538_v0 = vmax.f32 %v2317_v56, 0.0  ;;  %v1413_v35 = vsel %vm11846_vm0, %v210_v38, %v594_v10  ;;  %v1414_v37 = vsel %vm612_vm1, %v210_v38, %v594_v10  ;;  %v595_v39 = vrot.slane %v211_v48, 2 }
 0x284   :  { %v9752_v24 = vpop.permute.xlu0 %5158  ;;  %v1416_v22 = vrot.slane %v1414_v37, 2  ;;  %1922 = vst [vmem:[#allocation1 + $0x2] ss:$4 sm:$0xff] %v1410_v11  ;;  %v9770_v37 = vadd.f32 %v9470_v17, %v9209_v13  ;;  %v5477_v38 = vrot.slane %v9692_v34, 3  ;;  %v3860_v8 = vmax.f32 %v3090_v62, %v7222_v2 }
 0x285   :  { %5967 = vrot.lane.b32.xlu1 %v11792_v50, %s7492_s18  ;;  %11997 = vst [vmem:[#allocation120_spill] sm:$0xff] %v9752_v24  ;;  %v1405_v50 = vsel %vm612_vm1, %v208_v29, %v592_v30  ;;  %v596_v24 = vrot.slane %v212_v19, 2  ;;  %v2379_v29 = vadd.f32 %v9470_v17, %v2378_v28  ;;  %v1419_v56 = vsel %vm11846_vm0, %v211_v48, %v595_v39 }
 0x286   :  { %v1407_v12 = vrot.slane %v1405_v50, 2  ;;  %1923 = vst [vmem:[#allocation1 + $0x3] ss:$4 sm:$0xff] %v1413_v35  ;;  %v3113_v11 = vmax.f32 %v2824_v27, %v2538_v0  ;;  %v4100_v35 = vperm.slane %v9733_v7, 0  ;;  %v7134_v48 = vrot.slane %v3112_v3, 9 }
 0x287   :  { %v9741_v63 = vpop.permute.xlu1 %5046  ;;  %v1422_v50 = vsel %vm11846_vm0, %v212_v19, %v596_v24  ;;  %v1423_v15 = vsel %vm612_vm1, %v212_v19, %v596_v24  ;;  %1925 = vst [vmem:[#allocation1 + $0x20] ss:$4 sm:$0xff] %v1416_v22  ;;  %v2826_v13 = vrot.slane %v2538_v0, 4  ;;  %v4196_v27 = vperm.slane %v9733_v7, 2 }
 0x288   :  { %11996 = vst [vmem:[#allocation119_spill] sm:$0xff] %v9741_v63  ;;  %5060 = vrot.lane.b32.xlu2 %v9760_v32, %s7495_s30  ;;  %v1425_v28 = vrot.slane %v1423_v15, 2  ;;  %v2563_v58 = vmax.f32 %v2379_v29, 0.0  ;;  %v2482_v24 = vmax.f32 %v2177_v23, 0.0  ;;  %v11796_v42 = vmax.f32 %v9770_v37, 0.0 }
 0x289   :  { %1921 = vst [vmem:[#allocation1 + $0x1] ss:$4 sm:$0xff] %v1407_v12  ;;  %v7182_v49 = vrot.slane %v3113_v11, 9  ;;  %v11795_v0 = vrot.slane %v9760_v32, 3  ;;  %v4581_v16 = vsel %vm11846_vm0, %v4533_v52, %v4100_v35  ;;  %v3388_v22 = vmax.f32 %v3112_v3, %v7134_v48 }
 0x28a   :  { %1926 = vst [vmem:[#allocation1 + $0x21] ss:$4 sm:$0xff] %v1419_v56  ;;  %v9780_v30 = vpop.permute.xlu2 %5432  ;;  %v2182_v2 = vadd.f32 %v9470_v17, %v9262_v59  ;;  %v12002_v29 = vmax.f32 %v9699_v41, 0.0  ;;  %v4340_v15 = vperm.slane %v3860_v8, 0  ;;  %v2851_v52 = vrot.slane %v2563_v58, 4 }
 0x28b   :  { %v2381_v12 = vpop.f32.mrf.mxu3  ;;  %11999 = vst [vmem:[#allocation122_spill] sm:$0xff] %v9780_v30  ;;  %6029 = vrot.lane.b32.xlu0 %v5477_v38, %s7491_s17  ;;  %v3628_v35 = vmax.f32 %v3113_v11, %v7182_v49  ;;  %v3964_v3 = vperm.slane %v3388_v22, 2 }
 0x28c   :  { %v9776_v39 = vadd.f32 %v9470_v17, %v2381_v12  ;;  %1927 = vst [vmem:[#allocation1 + $0x22] ss:$4 sm:$0xff] %v1422_v50  ;;  %v9794_v7 = vpop.permute.xlu0 %5332  ;;  %v3114_v56 = vmax.f32 %v12002_v29, %v2826_v13  ;;  %v4630_v12 = vsel %vm11841_vm3, %v4581_v16, %v4196_v27  ;;  %v2484_v48 = vmax.f32 %v2182_v2, 0.0 }
 0x28d   :  { %5328 = vrot.lane.b32.xlu1 %v9692_v34, %s7500_s24  ;;  %1929 = vst [vmem:[#allocation1 + $0x23] ss:$4 sm:$0xff] %v1425_v28  ;;  %v2770_v28 = vrot.slane %v2482_v24, 4  ;;  %v4436_v27 = vperm.slane %v3860_v8, 2  ;;  %v4679_v49 = vsel %vm11840_vm4, %v4630_v12, %v4340_v15  ;;  %v5144_v8 = vrot.slane %v9760_v32, 2 }
 0x28e   :  { %v2564_v10 = vmax.f32 %v9776_v39, 0.0  ;;  %12001 = vst [vmem:[#allocation124_spill] sm:$0xff] %v9794_v7  ;;  %v2771_v39 = vrot.slane %v11796_v42, 4  ;;  %v7230_v13 = vrot.slane %v3114_v56, 9  ;;  %v2772_v15 = vrot.slane %v2484_v48, 4 }
 0x28f   :  { %v9787_v19 = vpop.permute.xlu1 %4800 }
 0x290   :  { %12000 = vst [vmem:[#allocation123_spill] sm:$0xff] %v9787_v19  ;;  %v2852_v62 = vrot.slane %v2564_v10, 4  ;;  %v1930_v50 = vld.sshfl [vmem:[#allocation1] sm:$0xff pattern:$0x73625140]  ;;  %5228 = vrot.lane.b32.xlu2 %v11795_v0, %s7497_s11  ;;  %v3058_v2 = vmax.f32 %v2482_v24, %v2771_v39  ;;  %v4204_v19 = vperm.slane %v3628_v35, 2 }
 0x291   :  { %v214_v39 = vld [vmem:[%s11733_s0 + $0x2d8] sm:$0xf] }
 0x292   :  { %v3139_v23 = vmax.f32 %v2563_v58, %v2852_v62  ;;  %2415 = vmatmul.bf16.gmra.mxu3 %v1930_v50  ;;  %v9805_v62 = vpop.permute.xlu2 %6021  ;;  %v4108_v58 = vperm.slane %v3628_v35, 0  ;;  %v3059_v50 = vmax.f32 %v2770_v28, %v2484_v48  ;;  %v7116_v63 = vrot.slane %v3058_v2, 9 }
 0x293   :  { %v2383_v59 = vpop.f32.mrf.mxu3  ;;  %5338 = vrot.lane.b32.xlu0 %v9760_v32, %s7500_s24  ;;  %v11797_v28 = vrot.slane %v9760_v32, 1 }
 0x294   :  { %v2384_v41 = vadd.f32 %v9470_v17, %v2383_v59  ;;  %v7143_v16 = vrot.slane %v3139_v23, 9  ;;  %v4541_v59 = vsel %vm4510_vm2, %v3388_v22, %v3964_v3  ;;  %v9814_v7 = vpop.permute.xlu0 %4810  ;;  %v7164_v22 = vrot.slane %v3059_v50, 9  ;;  %v1931_v33 = vld.sshfl [vmem:[#allocation1 + $0x20] sm:$0xff pattern:$0x73625140] }
 0x295   :  { %5496 = vrot.lane.b32.xlu1 %v5477_v38, %s7503_s23  ;;  %12004 = vst [vmem:[#allocation126_spill] sm:$0xff] %v9814_v7  ;;  %v3868_v38 = vmax.f32 %v3114_v56, %v7230_v13  ;;  %v4589_v24 = vsel %vm11846_vm0, %v4541_v59, %v4108_v58  ;;  %v213_v56 = vld [vmem:[%s11733_s0 + $0x2d4] sm:$0x3] }
 0x296   :  { %v2565_v29 = vmax.f32 %v2384_v41, 0.0  ;;  %v9818_v41 = vsel %vm11830_vm5, %v4679_v49, %v4436_v27  ;;  %v3397_v30 = vmax.f32 %v3139_v23, %v7143_v16  ;;  %v597_v48 = vrot.slane %v213_v56, 2 }
 0x297   :  { %v9810_v11 = vpop.permute.xlu1 %4992  ;;  %v4348_v23 = vperm.slane %v3868_v38, 0  ;;  %v4638_v13 = vsel %vm11841_vm3, %v4589_v24, %v4204_v19  ;;  %v4444_v7 = vperm.slane %v3868_v38, 2 }
 0x298   :  { %12003 = vst [vmem:[#allocation125_spill] sm:$0xff] %v9810_v11  ;;  %v2853_v0 = vrot.slane %v2565_v29, 4  ;;  %v3140_v42 = vmax.f32 %v2851_v52, %v2565_v29  ;;  %5450 = vrot.lane.b32.xlu2 %v5144_v8, %s7502_s13  ;;  %v598_v52 = vrot.slane %v214_v39, 2  ;;  %v3973_v27 = vperm.slane %v3397_v30, 2 }
 0x299   :  { %v1428_v49 = vsel %vm11846_vm0, %v213_v56, %v597_v48  ;;  %v4687_v16 = vsel %vm11840_vm4, %v4638_v13, %v4348_v23 }
 0x29a   :  { %v7191_v11 = vrot.slane %v3140_v42, 9  ;;  %v3141_v12 = vmax.f32 %v2564_v10, %v2853_v0  ;;  %v9829_v3 = vpop.permute.xlu2 %5048  ;;  %v12006_v10 = vrot.slane %v9692_v34, 2  ;;  %v215_v0 = vld [vmem:[%s11733_s0 + $0x2dc] sm:$0x3]  ;;  %v1431_v58 = vsel %vm11846_vm0, %v214_v39, %v598_v52  ;;  %1932 = vst [vmem:[#allocation1] ss:$4 sm:$0xff] %v1428_v49 }
 0x29b   :  { %12005 = vst [vmem:[#allocation127_spill] sm:$0xff] %v9829_v3  ;;  %5116 = vrot.lane.b32.xlu0 %v11797_v28, %s7496_s10  ;;  %v599_v29 = vrot.slane %v215_v0, 2  ;;  %v1432_v59 = vsel %vm612_vm1, %v214_v39, %v598_v52  ;;  %v12009_v28 = vmax.f32 %v9770_v37, 0.0  ;;  %v4550_v56 = vsel %vm4510_vm2, %v3397_v30, %v3973_v27 }
 0x29c   :  { %v3637_v35 = vmax.f32 %v3140_v42, %v7191_v11  ;;  %v7239_v11 = vrot.slane %v3141_v12, 9  ;;  %v1434_v24 = vrot.slane %v1432_v59, 2  ;;  %1933 = vst [vmem:[#allocation1 + $0x1] ss:$4 sm:$0xff] %v1431_v58  ;;  %v3610_v39 = vmax.f32 %v3059_v50, %v7164_v22  ;;  %v2318_v50 = vpop.f32.mrf.mxu2 }
 0x29d   :  { %5973 = vrot.lane.b32.xlu1 %v12006_v10, %s7492_s18  ;;  %v3370_v10 = vmax.f32 %v3058_v2, %v7116_v63  ;;  %v9847_v19 = vpop.permute.xlu0 %5002  ;;  %v3060_v3 = vmax.f32 %v12009_v28, %v2772_v15  ;;  %v1437_v4 = vsel %vm11846_vm0, %v215_v0, %v599_v29  ;;  %v12010_v2 = vrot.slane %v9818_v41, 2 }
 0x29e   :  { %12008 = vst [vmem:[#allocation129_spill] sm:$0xff] %v9847_v19  ;;  %v3877_v63 = vmax.f32 %v3141_v12, %v7239_v11  ;;  %v9858_v23 = vsel %vm11830_vm5, %v4687_v16, %v4444_v7  ;;  %v4213_v37 = vperm.slane %v3637_v35, 2  ;;  %v11798_v15 = vrot.slane %v9760_v32, 4 }
 0x29f   :  { %v9842_v42 = vpop.permute.xlu1 %5214  ;;  %1935 = vst [vmem:[#allocation1 + $0x2] ss:$4 sm:$0xff] %v1434_v24  ;;  %v3946_v38 = vperm.slane %v3370_v10, 2  ;;  %v7212_v28 = vrot.slane %v3060_v3, 9  ;;  %v4844_v7 = vrot.slane %v9858_v23, 2  ;;  %v4186_v13 = vperm.slane %v3610_v39, 2 }
 0x2a0   :  { %12007 = vst [vmem:[#allocation128_spill] sm:$0xff] %v9842_v42  ;;  %v4117_v42 = vperm.slane %v3637_v35, 0  ;;  %5975 = vrot.lane.b32.xlu2 %v12010_v2, %s7492_s18  ;;  %v4357_v12 = vperm.slane %v3877_v63, 0  ;;  %v12016_v49 = vrot.slane %v9760_v32, 1 }
 0x2a1   :  { %1936 = vst [vmem:[#allocation1 + $0x3] ss:$4 sm:$0xff] %v1437_v4  ;;  %v4090_v4 = vperm.slane %v3610_v39, 0  ;;  %v3850_v52 = vmax.f32 %v3060_v3, %v7212_v28 }
 0x2a2   :  { %12011 = vst [vmem:[#allocation130_spill] sm:$0xff] %v9858_v23  ;;  %2420 = vmatmul.bf16.gmra.mxu3 %v1931_v33  ;;  %v4598_v0 = vsel %vm11846_vm0, %v4550_v56, %v4117_v42  ;;  %v9862_v30 = vpop.permute.xlu2 %5216  ;;  %v4523_v33 = vsel %vm4510_vm2, %v3370_v10, %v3946_v38  ;;  %v11802_v42 = vrot.slane %v9818_v41, 1 }
 0x2a3   :  { %12012 = vst [vmem:[#allocation131_spill] sm:$0xff] %v9862_v30  ;;  %5284 = vrot.lane.b32.xlu0 %v11798_v15, %s7498_s20  ;;  %v4647_v35 = vsel %vm11841_vm3, %v4598_v0, %v4213_v37  ;;  %v4571_v27 = vsel %vm11846_vm0, %v4523_v33, %v4090_v4  ;;  %v4330_v29 = vperm.slane %v3850_v52, 0  ;;  %v4426_v10 = vperm.slane %v3850_v52, 2 }
 0x2a4   :  { %v4696_v16 = vsel %vm11840_vm4, %v4647_v35, %v4357_v12  ;;  %v4620_v58 = vsel %vm11841_vm3, %v4571_v27, %v4186_v13  ;;  %v2321_v24 = vpop.f32.mrf.mxu2  ;;  %v4908_v37 = vrot.slane %v9858_v23, 3  ;;  %v11801_v12 = vrot.slane %v9818_v41, 3 }
 0x2a5   :  { %5172 = vrot.lane.b32.xlu1 %v5144_v8, %s7499_s21  ;;  %v9873_v48 = vpop.permute.xlu0 %5320  ;;  %v4453_v8 = vperm.slane %v3877_v63, 2  ;;  %v4669_v39 = vsel %vm11840_vm4, %v4620_v58, %v4330_v29  ;;  %v2322_v35 = vadd.f32 %v9470_v17, %v2321_v24  ;;  %v2319_v13 = vadd.f32 %v9470_v17, %v2318_v50 }
 0x2a6   :  { %12014 = vst [vmem:[#allocation133_spill] sm:$0xff] %v9873_v48  ;;  %v9901_v38 = vsel %vm11830_vm5, %v4669_v39, %v4426_v10 }
 0x2a7   :  { %v9869_v22 = vpop.permute.xlu1 %4874  ;;  %v9886_v3 = vsel %vm11830_vm5, %v4696_v16, %v4453_v8  ;;  %12019 = vst [vmem:[#allocation137_spill] sm:$0xff] %v9901_v38  ;;  %v4774_v4 = vrot.slane %v9901_v38, 1  ;;  %v2540_v27 = vmax.f32 %v2322_v35, 0.0  ;;  %v4838_v58 = vrot.slane %v9901_v38, 2 }
 0x2a8   :  { %12013 = vst [vmem:[#allocation132_spill] sm:$0xff] %v9869_v22  ;;  %4870 = vrot.lane.b32.xlu2 %v4844_v7, %s7492_s18  ;;  %v11800_v63 = vrot.slane %v9886_v3, 1  ;;  %v1942_v2 = vld.sshfl [vmem:[#allocation1] sm:$0xff pattern:$0x73625140]  ;;  %v11799_v8 = vrot.slane %v9886_v3, 2 }
 0x2a9   :  { %v2539_v24 = vmax.f32 %v2319_v13, 0.0  ;;  %v4902_v13 = vrot.slane %v9901_v38, 3  ;;  %v11805_v22 = vrot.slane %v9550_v61, 2 }
 0x2aa   :  { %v9879_v11 = vpop.permute.xlu2 %5438 }
 0x2ab   :  { %12015 = vst [vmem:[#allocation134_spill] sm:$0xff] %v9879_v11  ;;  %5919 = vrot.lane.b32.xlu0 %v11802_v42, %s7493_s1  ;;  %v2827_v35 = vrot.slane %v2539_v24, 4  ;;  %v4780_v42 = vrot.slane %v9858_v23, 1 }
 0x2ac   :  { %v2323_v52 = vpop.f32.mrf.mxu2 }
 0x2ad   :  { %5394 = vrot.lane.b32.xlu1 %v12016_v49, %s7501_s22  ;;  %v9893_v56 = vpop.permute.xlu0 %5488  ;;  %v2324_v39 = vadd.f32 %v9470_v17, %v2323_v52 }
 0x2ae   :  { %12018 = vst [vmem:[#allocation136_spill] sm:$0xff] %v9893_v56 }
 0x2af   :  { %v9891_v59 = vpop.permute.xlu1 %5388  ;;  %v2541_v15 = vmax.f32 %v2324_v39, 0.0  ;;  %v9948_v39 = vld [vmem:[%s11734_s2] ss:$0 sm:$0xff] }
 0x2b0   :  { %12017 = vst [vmem:[#allocation135_spill] sm:$0xff] %v9891_v59  ;;  %5396 = vrot.lane.b32.xlu2 %v11800_v63, %s7501_s22 }
 0x2b2   :  { %2425 = vmatmul.bf16.gmra.mxu3 %v1942_v2  ;;  %v9904_v28 = vpop.permute.xlu2 %4876 }
 0x2b3   :  { %12020 = vst [vmem:[#allocation138_spill] sm:$0xff] %v9904_v28  ;;  %4934 = vrot.lane.b32.xlu0 %v4908_v37, %s7491_s17  ;;  %v2828_v37 = vrot.slane %v2540_v27, 4 }
 0x2b5   :  { %v2386_v0 = vpop.f32.mrf.mxu3  ;;  %v9911_v33 = vpop.permute.xlu0 %5965  ;;  %6031 = vrot.lane.b32.xlu1 %v11801_v12, %s7491_s17  ;;  %v3115_v52 = vmax.f32 %v2539_v24, %v2828_v37 }
 0x2b6   :  { %v2387_v29 = vadd.f32 %v9470_v17, %v2386_v0 }
 0x2b7   :  { %v9909_v7 = vpop.permute.xlu1 %5376 }
 0x2b8   :  { %12021 = vst [vmem:[#allocation139_spill] sm:$0xff] %v9909_v7  ;;  %4794 = vrot.lane.b32.xlu2 %v4774_v4, %s7493_s1  ;;  %v2566_v0 = vmax.f32 %v2387_v29, 0.0 }
 0x2ba   :  { %v9920_v16 = vpop.permute.xlu2 %5114 }
 0x2bb   :  { %12022 = vst [vmem:[#allocation140_spill] sm:$0xff] %v9920_v16  ;;  %5452 = vrot.lane.b32.xlu0 %v11799_v8, %s7502_s13  ;;  %v9936_v8 = vpop.f32.mrf.mxu2 }
 0x2bd   :  { %v2388_v49 = vpop.f32.mrf.mxu3  ;;  %v9931_v2 = vpop.permute.xlu0 %5326  ;;  %5340 = vrot.lane.b32.xlu1 %v9886_v3, %s7500_s24 }
 0x2be   :  { %v2389_v50 = vadd.f32 %v9470_v17, %v2388_v49  ;;  %12023 = vst [vmem:[#allocation141_spill] sm:$0xff] %v9931_v2 }
 0x2bf   :  { %v9927_v10 = vpop.permute.xlu1 %5909 }
 0x2c0   :  { %v2567_v4 = vmax.f32 %v2389_v50, 0.0  ;;  %4858 = vrot.lane.b32.xlu2 %v4838_v58, %s7492_s18  ;;  %v3116_v50 = vmax.f32 %v2827_v35, %v2541_v15  ;;  %v2854_v58 = vrot.slane %v2566_v0, 4 }
 0x2c2   :  { %v2855_v63 = vrot.slane %v2567_v4, 4  ;;  %v9939_v12 = vpop.permute.xlu2 %5282 }
 0x2c3   :  { %12024 = vst [vmem:[#allocation142_spill] sm:$0xff] %v9939_v12  ;;  %4922 = vrot.lane.b32.xlu0 %v4902_v13, %s7491_s17  ;;  %v2829_v13 = vrot.slane %v2541_v15, 4 }
 0x2c4   :  { %v3142_v17 = vmax.f32 %v2566_v0, %v2855_v63  ;;  %v7135_v63 = vrot.slane %v3115_v52, 9  ;;  %v7183_v0 = vrot.slane %v3116_v50, 9 }
 0x2c5   :  { %v2391_v49 = vpop.f32.mrf.mxu3  ;;  %v9951_v37 = vpop.permute.xlu0 %5104  ;;  %4806 = vrot.lane.b32.xlu1 %v4780_v42, %s7493_s1  ;;  %v4972_v42 = vrot.slane %v9858_v23, 4 }
 0x2c6   :  { %v7144_v59 = vrot.slane %v3142_v17, 9  ;;  %v2392_v24 = vadd.f32 %v9948_v39, %v2391_v49  ;;  %12026 = vst [vmem:[#allocation144_spill] sm:$0xff] %v9951_v37  ;;  %v3389_v28 = vmax.f32 %v3115_v52, %v7135_v63  ;;  %v3117_v49 = vmax.f32 %v2540_v27, %v2829_v13 }
 0x2c7   :  { %v9943_v29 = vpop.permute.xlu1 %5160 }
 0x2c8   :  { %12025 = vst [vmem:[#allocation143_spill] sm:$0xff] %v9943_v29  ;;  %v3398_v12 = vmax.f32 %v3142_v17, %v7144_v59  ;;  %v2568_v16 = vmax.f32 %v2392_v24, 0.0  ;;  %5042 = vrot.lane.b32.xlu2 %v9550_v61, %s7495_s30  ;;  %v2328_v29 = vpop.f32.mrf.mxu2  ;;  %v3965_v24 = vperm.slane %v3389_v28, 2  ;;  %v7231_v63 = vrot.slane %v3117_v49, 9 }
 0x2ca   :  { %v2856_v35 = vrot.slane %v2568_v16, 4  ;;  %v3143_v19 = vmax.f32 %v2854_v58, %v2568_v16  ;;  %v3974_v32 = vperm.slane %v3398_v12, 2  ;;  %v9957_v30 = vpop.permute.xlu2 %5911  ;;  %v3629_v16 = vmax.f32 %v3116_v50, %v7183_v0 }
 0x2cb   :  { %4860 = vrot.lane.b32.xlu0 %v11805_v22, %s7492_s18  ;;  %v9974_v0 = vadd.f32 %v9948_v39, %v2328_v29 }
 0x2cc   :  { %v3144_v37 = vmax.f32 %v2567_v4, %v2856_v35  ;;  %v7192_v11 = vrot.slane %v3143_v19, 9  ;;  %v4551_v27 = vsel %vm4510_vm2, %v3398_v12, %v3974_v32  ;;  %v4775_v4 = vrot.slane %v9550_v61, 1 }
 0x2cd   :  { %v2393_v15 = vpop.f32.mrf.mxu3  ;;  %v9965_v52 = vpop.permute.xlu0 %5272  ;;  %4998 = vrot.lane.b32.xlu1 %v4972_v42, %s7494_s25  ;;  %v4109_v23 = vperm.slane %v3629_v16, 0  ;;  %v3869_v42 = vmax.f32 %v3117_v49, %v7231_v63 }
 0x2ce   :  { %v3638_v17 = vmax.f32 %v3143_v19, %v7192_v11  ;;  %v7240_v58 = vrot.slane %v3144_v37, 9  ;;  %12028 = vst [vmem:[#allocation146_spill] sm:$0xff] %v9965_v52  ;;  %v4542_v11 = vsel %vm4510_vm2, %v3389_v28, %v3965_v24  ;;  %v4966_v24 = vrot.slane %v9901_v38, 4 }
 0x2cf   :  { %v9963_v59 = vpop.permute.xlu1 %5382  ;;  %v4590_v49 = vsel %vm11846_vm0, %v4542_v11, %v4109_v23  ;;  %v4445_v11 = vperm.slane %v3869_v42, 2 }
 0x2d0   :  { %12027 = vst [vmem:[#allocation145_spill] sm:$0xff] %v9963_v59  ;;  %v3878_v13 = vmax.f32 %v3144_v37, %v7240_v58  ;;  %v4118_v35 = vperm.slane %v3638_v17, 0  ;;  %v4214_v22 = vperm.slane %v3638_v17, 2  ;;  %4796 = vrot.lane.b32.xlu2 %v4775_v4, %s7493_s1  ;;  %v2394_v17 = vadd.f32 %v9948_v39, %v2393_v15  ;;  %v2331_v63 = vpop.f32.mrf.mxu2 }
 0x2d1   :  { %v4205_v58 = vperm.slane %v3629_v16, 2  ;;  %v2543_v16 = vmax.f32 %v9974_v0, 0.0 }
 0x2d2   :  { %v4358_v59 = vperm.slane %v3878_v13, 0  ;;  %v4454_v50 = vperm.slane %v3878_v13, 2  ;;  %v4599_v19 = vsel %vm11846_vm0, %v4551_v27, %v4118_v35  ;;  %v9977_v12 = vpop.permute.xlu2 %5384  ;;  %v2327_v27 = vadd.f32 %v9948_v39, %v9936_v8 }
 0x2d3   :  { %v4648_v32 = vsel %vm11841_vm3, %v4599_v19, %v4214_v22  ;;  %12029 = vst [vmem:[#allocation147_spill] sm:$0xff] %v9977_v12  ;;  %5098 = vrot.lane.b32.xlu0 %v4775_v4, %s7496_s10  ;;  %v4967_v4 = vrot.slane %v9550_v61, 4  ;;  %v4349_v8 = vperm.slane %v3869_v42, 0  ;;  %v2569_v13 = vmax.f32 %v2394_v17, 0.0 }
 0x2d4   :  { %v4697_v37 = vsel %vm11840_vm4, %v4648_v32, %v4358_v59  ;;  %v2542_v19 = vmax.f32 %v2327_v27, 0.0  ;;  %v2332_v32 = vadd.f32 %v9948_v39, %v2331_v63 }
 0x2d5   :  { %v9985_v28 = vsel %vm11830_vm5, %v4697_v37, %v4454_v50  ;;  %v2396_v29 = vpop.f32.mrf.mxu3  ;;  %v9992_v15 = vpop.permute.xlu0 %5494  ;;  %4986 = vrot.lane.b32.xlu1 %v4966_v24, %s7494_s25  ;;  %v4639_v50 = vsel %vm11841_vm3, %v4590_v49, %v4205_v58  ;;  %v2831_v37 = vrot.slane %v2543_v16, 4  ;;  %v4903_v58 = vrot.slane %v9550_v61, 3 }
 0x2d6   :  { %v2397_v59 = vadd.f32 %v9948_v39, %v2396_v29  ;;  %12031 = vst [vmem:[#allocation149_spill] sm:$0xff] %v9992_v15  ;;  %v4688_v24 = vsel %vm11840_vm4, %v4639_v50, %v4349_v8  ;;  %v2544_v17 = vmax.f32 %v2332_v32, 0.0  ;;  %v2857_v49 = vrot.slane %v2569_v13, 4 }
 0x2d7   :  { %v9988_v22 = vpop.permute.xlu1 %5058  ;;  %v3118_v52 = vmax.f32 %v2542_v19, %v2831_v37 }
 0x2d8   :  { %12030 = vst [vmem:[#allocation148_spill] sm:$0xff] %v9988_v22  ;;  %v2570_v35 = vmax.f32 %v2397_v59, 0.0  ;;  %4988 = vrot.lane.b32.xlu2 %v4967_v4, %s7494_s25  ;;  %v2830_v22 = vrot.slane %v2542_v19, 4  ;;  %v2832_v19 = vrot.slane %v2544_v17, 4 }
 0x2d9   :  { %v7136_v2 = vrot.slane %v3118_v52, 9 }
 0x2da   :  { %v2858_v23 = vrot.slane %v2570_v35, 4  ;;  %v10000_v29 = vpop.permute.xlu2 %5917  ;;  %v3119_v32 = vmax.f32 %v2830_v22, %v2544_v17  ;;  %v12038_v17 = vrot.slane %v9550_v61, 2 }
 0x2db   :  { %5266 = vrot.lane.b32.xlu0 %v4967_v4, %s7498_s20  ;;  %v2333_v4 = vpop.f32.mrf.mxu2 }
 0x2dc   :  { %v3145_v0 = vmax.f32 %v2569_v13, %v2858_v23  ;;  %v10011_v23 = vsel %vm11830_vm5, %v4688_v24, %v4445_v11 }
 0x2dd   :  { %v2398_v59 = vpop.f32.mrf.mxu3  ;;  %v10008_v42 = vpop.permute.xlu0 %4940  ;;  %12034 = vst [vmem:[#allocation152_spill] sm:$0xff] %v10011_v23  ;;  %4924 = vrot.lane.b32.xlu1 %v4903_v58, %s7491_s17  ;;  %v11807_v13 = vrot.slane %v10011_v23, 2 }
 0x2de   :  { %v7145_v63 = vrot.slane %v3145_v0, 9  ;;  %v2399_v12 = vadd.f32 %v9948_v39, %v2398_v59  ;;  %12033 = vst [vmem:[#allocation151_spill] sm:$0xff] %v10008_v42 }
 0x2df   :  { %v10005_v27 = vpop.permute.xlu1 %4812 }
 0x2e0   :  { %12032 = vst [vmem:[#allocation150_spill] sm:$0xff] %v10005_v27  ;;  %v3399_v8 = vmax.f32 %v3145_v0, %v7145_v63  ;;  %v2571_v50 = vmax.f32 %v2399_v12, 0.0  ;;  %5210 = vrot.lane.b32.xlu2 %v4903_v58, %s7497_s11  ;;  %v7184_v0 = vrot.slane %v3119_v32, 9  ;;  %v3390_v63 = vmax.f32 %v3118_v52, %v7136_v2 }
 0x2e1   :  { %v4781_v2 = vrot.slane %v10011_v23, 1 }
 0x2e2   :  { %v2859_v15 = vrot.slane %v2571_v50, 4  ;;  %v3146_v27 = vmax.f32 %v2857_v49, %v2571_v50  ;;  %v3975_v59 = vperm.slane %v3399_v8, 2  ;;  %v10016_v56 = vpop.permute.xlu2 %5060  ;;  %v3966_v52 = vperm.slane %v3390_v63, 2 }
 0x2e3   :  { %12035 = vst [vmem:[#allocation153_spill] sm:$0xff] %v10016_v56  ;;  %4872 = vrot.lane.b32.xlu0 %v11807_v13, %s7492_s18  ;;  %v3630_v13 = vmax.f32 %v3119_v32, %v7184_v0 }
 0x2e4   :  { %v3147_v37 = vmax.f32 %v2570_v35, %v2859_v15  ;;  %v7193_v11 = vrot.slane %v3146_v27, 9  ;;  %v4552_v50 = vsel %vm4510_vm2, %v3399_v8, %v3975_v59  ;;  %v3120_v15 = vmax.f32 %v2543_v16, %v2832_v19 }
 0x2e5   :  { %v2401_v12 = vpop.f32.mrf.mxu3  ;;  %v10023_v49 = vpop.permute.xlu0 %5170  ;;  %5154 = vrot.lane.b32.xlu1 %v12038_v17, %s7499_s21 }
 0x2e6   :  { %v3639_v24 = vmax.f32 %v3146_v27, %v7193_v11  ;;  %v7241_v58 = vrot.slane %v3147_v37, 9  ;;  %12037 = vst [vmem:[#allocation155_spill] sm:$0xff] %v10023_v49  ;;  %v7232_v16 = vrot.slane %v3120_v15, 9  ;;  %v2402_v32 = vadd.f32 %v9948_v39, %v2401_v12 }
 0x2e7   :  { %v10021_v22 = vpop.permute.xlu1 %5004 }
 0x2e8   :  { %12036 = vst [vmem:[#allocation154_spill] sm:$0xff] %v10021_v22  ;;  %v3879_v35 = vmax.f32 %v3147_v37, %v7241_v58  ;;  %v4119_v56 = vperm.slane %v3639_v24, 0  ;;  %v4215_v42 = vperm.slane %v3639_v24, 2  ;;  %5054 = vrot.lane.b32.xlu2 %v10011_v23, %s7495_s30  ;;  %v2336_v22 = vpop.f32.mrf.mxu2  ;;  %v4110_v58 = vperm.slane %v3630_v13, 0 }
 0x2e9   :  { %v2337_v17 = vadd.f32 %v9948_v39, %v2336_v22  ;;  %v3870_v12 = vmax.f32 %v3120_v15, %v7232_v16 }
 0x2ea   :  { %v4359_v27 = vperm.slane %v3879_v35, 0  ;;  %v4455_v11 = vperm.slane %v3879_v35, 2  ;;  %v4600_v49 = vsel %vm11846_vm0, %v4552_v50, %v4119_v56  ;;  %v10034_v59 = vpop.permute.xlu2 %5228  ;;  %v4909_v56 = vrot.slane %v10011_v23, 3 }
 0x2eb   :  { %v4649_v8 = vsel %vm11841_vm3, %v4600_v49, %v4215_v42  ;;  %12039 = vst [vmem:[#allocation156_spill] sm:$0xff] %v10034_v59  ;;  %5110 = vrot.lane.b32.xlu0 %v4781_v2, %s7496_s10  ;;  %v4543_v50 = vsel %vm4510_vm2, %v3390_v63, %v3966_v52  ;;  %v2572_v35 = vmax.f32 %v2402_v32, 0.0  ;;  %v2546_v59 = vmax.f32 %v2337_v17, 0.0 }
 0x2ec   :  { %v4698_v19 = vsel %vm11840_vm4, %v4649_v8, %v4359_v27  ;;  %v4591_v8 = vsel %vm11846_vm0, %v4543_v50, %v4110_v58  ;;  %v4350_v63 = vperm.slane %v3870_v12, 0  ;;  %v4446_v50 = vperm.slane %v3870_v12, 2 }
 0x2ed   :  { %v10040_v37 = vsel %vm11830_vm5, %v4698_v19, %v4455_v11  ;;  %v2403_v0 = vpop.f32.mrf.mxu3  ;;  %v10046_v49 = vpop.permute.xlu0 %6023  ;;  %4936 = vrot.lane.b32.xlu1 %v4909_v56, %s7491_s17  ;;  %v4206_v11 = vperm.slane %v3630_v13, 2  ;;  %v2334_v19 = vadd.f32 %v9948_v39, %v2333_v4  ;;  %v2860_v4 = vrot.slane %v2572_v35, 4 }
 0x2ee   :  { %12040 = vst [vmem:[#allocation157_spill] sm:$0xff] %v10040_v37  ;;  %v2404_v42 = vadd.f32 %v9948_v39, %v2403_v0  ;;  %v4973_v0 = vrot.slane %v10011_v23, 4  ;;  %v2834_v17 = vrot.slane %v2546_v59, 4 }
 0x2ef   :  { %v10043_v24 = vpop.permute.xlu1 %5226  ;;  %v4640_v15 = vsel %vm11841_vm3, %v4591_v8, %v4206_v11 }
 0x2f0   :  { %12041 = vst [vmem:[#allocation158_spill] sm:$0xff] %v10043_v24  ;;  %v2573_v27 = vmax.f32 %v2404_v42, 0.0  ;;  %4808 = vrot.lane.b32.xlu2 %v4781_v2, %s7493_s1  ;;  %v2338_v22 = vpop.f32.mrf.mxu2  ;;  %v2545_v2 = vmax.f32 %v2334_v19, 0.0  ;;  %v4689_v11 = vsel %vm11840_vm4, %v4640_v15, %v4350_v63 }
 0x2f1   :  { %v2339_v32 = vadd.f32 %v9948_v39, %v2338_v22  ;;  %v10073_v12 = vsel %vm11830_vm5, %v4689_v11, %v4446_v50 }
 0x2f2   :  { %v2861_v24 = vrot.slane %v2573_v27, 4  ;;  %v10055_v37 = vpop.permute.xlu2 %5450  ;;  %v2833_v8 = vrot.slane %v2545_v2, 4  ;;  %v3121_v38 = vmax.f32 %v2545_v2, %v2834_v17  ;;  %12045 = vst [vmem:[#allocation161_spill] sm:$0xff] %v10073_v12  ;;  %v11812_v50 = vrot.slane %v10073_v12, 3 }
 0x2f3   :  { %12042 = vst [vmem:[#allocation159_spill] sm:$0xff] %v10055_v37  ;;  %5278 = vrot.lane.b32.xlu0 %v4973_v0, %s7498_s20  ;;  %v2547_v19 = vmax.f32 %v2339_v32, 0.0 }
 0x2f4   :  { %v3148_v52 = vmax.f32 %v2572_v35, %v2861_v24  ;;  %v12044_v24 = vrot.slane %v10011_v23, 2 }
 0x2f5   :  { %v2406_v13 = vpop.f32.mrf.mxu3  ;;  %v10063_v42 = vpop.permute.xlu0 %5440 }
 0x2f6   :  { %v2407_v58 = vadd.f32 %v9948_v39, %v2406_v13  ;;  %12043 = vst [vmem:[#allocation160_spill] sm:$0xff] %v10063_v42  ;;  %v7146_v37 = vrot.slane %v3148_v52, 9  ;;  %5166 = vrot.lane.b32.xlu1 %v12044_v24, %s7499_s21 }
 0x2f7   :  { %v10059_v16 = vpop.permute.xlu1 %5967 }
 0x2f8   :  { %v2574_v61 = vmax.f32 %v2407_v58, 0.0  ;;  %5000 = vrot.lane.b32.xlu2 %v4973_v0, %s7494_s25  ;;  %v3400_v13 = vmax.f32 %v3148_v52, %v7146_v37  ;;  %v3122_v0 = vmax.f32 %v2833_v8, %v2547_v19  ;;  %v2835_v37 = vrot.slane %v2547_v19, 4 }
 0x2fa   :  { %v2862_v22 = vrot.slane %v2574_v61, 4  ;;  %v3149_v35 = vmax.f32 %v2860_v4, %v2574_v61  ;;  %v10070_v7 = vpop.permute.xlu2 %5975  ;;  %v7137_v61 = vrot.slane %v3121_v38, 9  ;;  %v3976_v2 = vperm.slane %v3400_v13, 2 }
 0x2fb   :  { %5056 = vrot.lane.b32.xlu0 %v10073_v12, %s7495_s30 }
 0x2fc   :  { %v3150_v42 = vmax.f32 %v2573_v27, %v2862_v22  ;;  %v7194_v48 = vrot.slane %v3149_v35, 9  ;;  %v7185_v27 = vrot.slane %v3122_v0, 9  ;;  %v3391_v17 = vmax.f32 %v3121_v38, %v7137_v61 }
 0x2fd   :  { %v2408_v58 = vpop.f32.mrf.mxu3  ;;  %v10079_v32 = vpop.permute.xlu0 %6029  ;;  %v4553_v24 = vsel %vm4510_vm2, %v3400_v13, %v3976_v2 }
 0x2fe   :  { %v3640_v15 = vmax.f32 %v3149_v35, %v7194_v48  ;;  %5334 = vrot.lane.b32.xlu1 %v10073_v12, %s7500_s24  ;;  %v7242_v52 = vrot.slane %v3150_v42, 9  ;;  %v3123_v48 = vmax.f32 %v2546_v59, %v2835_v37  ;;  %v2409_v22 = vadd.f32 %v9948_v39, %v2408_v58 }
 0x2ff   :  { %v10077_v63 = vpop.permute.xlu1 %5328  ;;  %v3967_v59 = vperm.slane %v3391_v17, 2 }
 0x300   :  { %12046 = vst [vmem:[#allocation162_spill] sm:$0xff] %v10077_v63  ;;  %5222 = vrot.lane.b32.xlu2 %v4909_v56, %s7497_s11  ;;  %v4120_v4 = vperm.slane %v3640_v15, 0  ;;  %v3880_v8 = vmax.f32 %v3150_v42, %v7242_v52  ;;  %v4216_v19 = vperm.slane %v3640_v15, 2  ;;  %v5087_v56 = vrot.slane %v10073_v12, 1 }
 0x301   :  { %v3631_v63 = vmax.f32 %v3122_v0, %v7185_v27  ;;  %v6073_v42 = vrot.slane %v8485_v26, 7  ;;  %v7233_v58 = vrot.slane %v3123_v48, 9  ;;  %v2575_v15 = vmax.f32 %v2409_v22, 0.0 }
 0x302   :  { %v10086_v11 = vpop.permute.xlu2 %4870  ;;  %v4601_v38 = vsel %vm11846_vm0, %v4553_v24, %v4120_v4  ;;  %v4360_v2 = vperm.slane %v3880_v8, 0  ;;  %v5143_v4 = vrot.slane %v10073_v12, 2  ;;  %v4544_v24 = vsel %vm4510_vm2, %v3391_v17, %v3967_v59 }
 0x303   :  { %12047 = vst [vmem:[#allocation163_spill] sm:$0xff] %v10086_v11  ;;  %5224 = vrot.lane.b32.xlu0 %v11812_v50, %s7497_s11  ;;  %v4650_v52 = vsel %vm11841_vm3, %v4601_v38, %v4216_v19  ;;  %v4111_v0 = vperm.slane %v3631_v63, 0  ;;  %v4207_v22 = vperm.slane %v3631_v63, 2  ;;  %v11813_v19 = vrot.slane %v10073_v12, 4 }
 0x304   :  { %v4699_v11 = vsel %vm11840_vm4, %v4650_v52, %v4360_v2  ;;  %v2863_v5 = vrot.slane %v2575_v15, 4 }
 0x305   :  { %v2411_v35 = vpop.f32.mrf.mxu3  ;;  %v10097_v61 = vpop.permute.xlu0 %5338 }
 0x306   :  { %v2412_v13 = vadd.f32 %v9948_v39, %v2411_v35  ;;  %12049 = vst [vmem:[#allocation165_spill] sm:$0xff] %v10097_v61  ;;  %5112 = vrot.lane.b32.xlu1 %v5087_v56, %s7496_s10  ;;  %v4456_v35 = vperm.slane %v3880_v8, 2  ;;  %v3871_v61 = vmax.f32 %v3123_v48, %v7233_v58 }
 0x307   :  { %v10093_v23 = vpop.permute.xlu1 %5496 }
 0x308   :  { %12048 = vst [vmem:[#allocation164_spill] sm:$0xff] %v10093_v23  ;;  %v2576_v37 = vmax.f32 %v2412_v13, 0.0  ;;  %6089 = vrot.lane.b32.xlu2 %v6073_v42, %s7494_s25  ;;  %v4592_v42 = vsel %vm11846_vm0, %v4544_v24, %v4111_v0  ;;  %v10117_v48 = vsel %vm11830_vm5, %v4699_v11, %v4456_v35  ;;  %v4351_v63 = vperm.slane %v3871_v61, 0 }
 0x309   :  { %v4641_v2 = vsel %vm11841_vm3, %v4592_v42, %v4207_v22  ;;  %v4848_v0 = vrot.slane %v10117_v48, 2 }
 0x30a   :  { %v2864_v27 = vrot.slane %v2576_v37, 4  ;;  %v10105_v50 = vpop.permute.xlu2 %5396  ;;  %v4690_v11 = vsel %vm11840_vm4, %v4641_v2, %v4351_v63 }
 0x30b   :  { %12050 = vst [vmem:[#allocation166_spill] sm:$0xff] %v10105_v50  ;;  %5446 = vrot.lane.b32.xlu0 %v5143_v4, %s7502_s13 }
 0x30c   :  { %v3151_v23 = vmax.f32 %v2575_v15, %v2864_v27  ;;  %v4447_v27 = vperm.slane %v3871_v61, 2 }
 0x30d   :  { %v2413_v13 = vpop.f32.mrf.mxu3  ;;  %v10114_v8 = vpop.permute.xlu0 %5116 }
 0x30e   :  { %v7147_v46 = vrot.slane %v3151_v23, 9  ;;  %v2414_v17 = vadd.f32 %v9948_v39, %v2413_v13  ;;  %12051 = vst [vmem:[#allocation167_spill] sm:$0xff] %v10114_v8  ;;  %5280 = vrot.lane.b32.xlu1 %v11813_v19, %s7498_s20 }
 0x30f   :  { %v10110_v38 = vpop.permute.xlu1 %5973 }
 0x310   :  { %v3401_v59 = vmax.f32 %v3151_v23, %v7147_v46  ;;  %v2577_v58 = vmax.f32 %v2414_v17, 0.0  ;;  %5168 = vrot.lane.b32.xlu2 %v5143_v4, %s7499_s21  ;;  %v4912_v23 = vrot.slane %v10117_v48, 3  ;;  %v10136_v17 = vsel %vm11830_vm5, %v4690_v11, %v4447_v27 }
 0x311   :  { %v11814_v27 = vrot.slane %v10136_v17, 2 }
 0x312   :  { %v2865_v15 = vrot.slane %v2577_v58, 4  ;;  %v3152_v52 = vmax.f32 %v2863_v5, %v2577_v58  ;;  %v3977_v24 = vperm.slane %v3401_v59, 2  ;;  %v10125_v13 = vpop.permute.xlu2 %4794 }
 0x313   :  { %12052 = vst [vmem:[#allocation168_spill] sm:$0xff] %v10125_v13  ;;  %4878 = vrot.lane.b32.xlu0 %v4848_v0, %s7492_s18 }
 0x314   :  { %v3153_v35 = vmax.f32 %v2576_v37, %v2865_v15  ;;  %v7195_v50 = vrot.slane %v3152_v52, 9  ;;  %v4554_v61 = vsel %vm4510_vm2, %v3401_v59, %v3977_v24  ;;  %v11815_v15 = vrot.slane %v10136_v17, 1 }
 0x315   :  { %v2416_v46 = vpop.f32.mrf.mxu3  ;;  %v10132_v5 = vpop.permute.xlu0 %5284 }
 0x316   :  { %v3641_v4 = vmax.f32 %v3152_v52, %v7195_v50  ;;  %v7243_v42 = vrot.slane %v3153_v35, 9  ;;  %12054 = vst [vmem:[#allocation170_spill] sm:$0xff] %v10132_v5  ;;  %4942 = vrot.lane.b32.xlu1 %v4912_v23, %s7491_s17 }
 0x317   :  { %v10130_v22 = vpop.permute.xlu1 %5172 }
 0x318   :  { %12053 = vst [vmem:[#allocation169_spill] sm:$0xff] %v10130_v22  ;;  %v3881_v37 = vmax.f32 %v3153_v35, %v7243_v42  ;;  %v4121_v63 = vperm.slane %v3641_v4, 0  ;;  %v4217_v58 = vperm.slane %v3641_v4, 2  ;;  %5390 = vrot.lane.b32.xlu2 %v5087_v56, %s7501_s22  ;;  %v2417_v4 = vadd.f32 %v9948_v39, %v2416_v46 }
 0x319   :  { %v4976_v22 = vrot.slane %v10117_v48, 4 }
 0x31a   :  { %v4602_v2 = vsel %vm11846_vm0, %v4554_v61, %v4121_v63  ;;  %v4361_v50 = vperm.slane %v3881_v37, 0  ;;  %v10142_v52 = vpop.permute.xlu2 %4858  ;;  %v4457_v24 = vperm.slane %v3881_v37, 2  ;;  %v2578_v63 = vmax.f32 %v2417_v4, 0.0 }
 0x31b   :  { %12055 = vst [vmem:[#allocation171_spill] sm:$0xff] %v10142_v52  ;;  %v4651_v0 = vsel %vm11841_vm3, %v4602_v2, %v4217_v58  ;;  %5392 = vrot.lane.b32.xlu0 %v11815_v15, %s7501_s22 }
 0x31c   :  { %v4700_v35 = vsel %vm11840_vm4, %v4651_v0, %v4361_v50 }
 0x31d   :  { %v2418_v59 = vpop.f32.mrf.mxu3  ;;  %v10149_v11 = vpop.permute.xlu0 %5919  ;;  %v10162_v61 = vsel %vm11830_vm5, %v4700_v35, %v4457_v24  ;;  %v2866_v24 = vrot.slane %v2578_v63, 4 }
 0x31e   :  { %v2419_v56 = vadd.f32 %v9948_v39, %v2418_v59  ;;  %5448 = vrot.lane.b32.xlu1 %v11814_v27, %s7502_s13  ;;  %v4849_v2 = vrot.slane %v10162_v61, 2  ;;  %v4784_v59 = vrot.slane %v10117_v48, 1  ;;  %v4785_v4 = vrot.slane %v10162_v61, 1 }
 0x31f   :  { %v10156_v23 = vpop.permute.xlu1 %5394  ;;  %v4977_v8 = vrot.slane %v10162_v61, 4 }
 0x320   :  { %12056 = vst [vmem:[#allocation172_spill] sm:$0xff] %v10156_v23  ;;  %5336 = vrot.lane.b32.xlu2 %v10136_v17, %s7500_s24  ;;  %v2579_v42 = vmax.f32 %v2419_v56, 0.0 }
 0x322   :  { %v10164_v37 = vpop.permute.xlu2 %5042  ;;  %v2867_v50 = vrot.slane %v2579_v42, 4 }
 0x323   :  { %12057 = vst [vmem:[#allocation173_spill] sm:$0xff] %v10164_v37  ;;  %5062 = vrot.lane.b32.xlu0 %v10162_v61, %s7495_s30 }
 0x324   :  { %v3154_v19 = vmax.f32 %v2578_v63, %v2867_v50 }
 0x325   :  { %v2421_v58 = vpop.f32.mrf.mxu3  ;;  %v10169_v0 = vpop.permute.xlu0 %4934 }
 0x326   :  { %12058 = vst [vmem:[#allocation174_spill] sm:$0xff] %v10169_v0  ;;  %v2422_v46 = vadd.f32 %v9948_v39, %v2421_v58  ;;  %4880 = vrot.lane.b32.xlu1 %v4849_v2, %s7492_s18  ;;  %v7148_v23 = vrot.slane %v3154_v19, 9 }
 0x327   :  { %v10175_v35 = vpop.permute.xlu1 %6031 }
 0x328   :  { %4814 = vrot.lane.b32.xlu2 %v4784_v59, %s7493_s1  ;;  %v2580_v56 = vmax.f32 %v2422_v46, 0.0  ;;  %v3402_v63 = vmax.f32 %v3154_v19, %v7148_v23 }
 0x32a   :  { %v10178_v27 = vpop.permute.xlu2 %4796  ;;  %v3155_v15 = vmax.f32 %v2866_v24, %v2580_v56  ;;  %v2868_v5 = vrot.slane %v2580_v56, 4  ;;  %v6075_v56 = vrot.slane %v9658_v14, 7 }
 0x32b   :  { %12059 = vst [vmem:[#allocation175_spill] sm:$0xff] %v10178_v27  ;;  %4816 = vrot.lane.b32.xlu0 %v4785_v4, %s7493_s1 }
 0x32c   :  { %v7196_v59 = vrot.slane %v3155_v15, 9  ;;  %v3156_v0 = vmax.f32 %v2579_v42, %v2868_v5 }
 0x32d   :  { %v10181_v58 = vpop.permute.xlu0 %5452  ;;  %v2423_v50 = vpop.f32.mrf.mxu3 }
 0x32e   :  { %12060 = vst [vmem:[#allocation176_spill] sm:$0xff] %v10181_v58  ;;  %5118 = vrot.lane.b32.xlu1 %v4785_v4, %s7496_s10  ;;  %v3642_v24 = vmax.f32 %v3155_v15, %v7196_v59  ;;  %v3978_v58 = vperm.slane %v3402_v63, 2  ;;  %v7244_v4 = vrot.slane %v3156_v0, 9 }
 0x32f   :  { %v10186_v46 = vpop.permute.xlu1 %5340 }
 0x330   :  { %5006 = vrot.lane.b32.xlu2 %v4976_v22, %s7494_s25  ;;  %12061 = vst [vmem:[#allocation177_spill] sm:$0xff] %v10186_v46  ;;  %v4913_v22 = vrot.slane %v10162_v61, 3  ;;  %v4122_v19 = vperm.slane %v3642_v24, 0  ;;  %v4555_v5 = vsel %vm4510_vm2, %v3402_v63, %v3978_v58  ;;  %v3882_v42 = vmax.f32 %v3156_v0, %v7244_v4 }
 0x331   :  { %v4218_v15 = vperm.slane %v3642_v24, 2  ;;  %v6074_v63 = vrot.slane %v8598_v43, 7 }
 0x332   :  { %v10189_v12 = vpop.permute.xlu2 %4988  ;;  %v4362_v52 = vperm.slane %v3882_v42, 0  ;;  %v4458_v0 = vperm.slane %v3882_v42, 2 }
 0x333   :  { %12062 = vst [vmem:[#allocation178_spill] sm:$0xff] %v10189_v12  ;;  %5008 = vrot.lane.b32.xlu0 %v4977_v8, %s7494_s25  ;;  %v4603_v12 = vsel %vm11846_vm0, %v4555_v5, %v4122_v19 }
 0x335   :  { %v10193_v37 = vpop.permute.xlu0 %4922  ;;  %v2426_v59 = vpop.f32.mrf.mxu3 }
 0x336   :  { %12063 = vst [vmem:[#allocation179_spill] sm:$0xff] %v10193_v37  ;;  %6093 = vrot.lane.b32.xlu1 %v6075_v56, %s7494_s25  ;;  %v4652_v56 = vsel %vm11841_vm3, %v4603_v12, %v4218_v15  ;;  %v10213_v58 = vadd.f32 %v9948_v39, %v2426_v59  ;;  %v216_v12 = vld [vmem:[%s11733_s0 + $0x2e0] sm:$0xf] }
 0x337   :  { %v10198_v23 = vpop.permute.xlu1 %4806  ;;  %v4701_v4 = vsel %vm11840_vm4, %v4652_v56, %v4362_v52  ;;  %v600_v19 = vrot.slane %v216_v12, 2 }
 0x338   :  { %4944 = vrot.lane.b32.xlu2 %v4913_v22, %s7491_s17  ;;  %12064 = vst [vmem:[#allocation180_spill] sm:$0xff] %v10198_v23  ;;  %v2582_v52 = vmax.f32 %v10213_v58, 0.0  ;;  %v10234_v59 = vsel %vm11830_vm5, %v4701_v4, %v4458_v0 }
 0x339   :  { %12070 = vst [vmem:[#allocation186_spill] sm:$0xff] %v10234_v59  ;;  %v5145_v13 = vrot.slane %v10234_v59, 2 }
 0x33a   :  { %v10201_v46 = vpop.permute.xlu2 %5210  ;;  %v2870_v27 = vrot.slane %v2582_v52, 4 }
 0x33b   :  { %12065 = vst [vmem:[#allocation181_spill] sm:$0xff] %v10201_v46  ;;  %5230 = vrot.lane.b32.xlu0 %v4913_v22, %s7497_s11  ;;  %v218_v22 = vld [vmem:[%s11733_s0 + $0x2e8] sm:$0xf] }
 0x33c   :  { %v602_v56 = vrot.slane %v218_v22, 2 }
 0x33d   :  { %v10205_v37 = vpop.permute.xlu0 %4860  ;;  %v2428_v42 = vpop.f32.mrf.mxu3 }
 0x33e   :  { %12066 = vst [vmem:[#allocation182_spill] sm:$0xff] %v10205_v37  ;;  %5286 = vrot.lane.b32.xlu1 %v4977_v8, %s7498_s20  ;;  %v217_v8 = vld [vmem:[%s11733_s0 + $0x2e4] sm:$0x3]  ;;  %v1449_v4 = vsel %vm11846_vm0, %v218_v22, %v602_v56  ;;  %v1450_v37 = vsel %vm612_vm1, %v218_v22, %v602_v56  ;;  %v5089_v22 = vrot.slane %v10234_v59, 1 }
 0x33f   :  { %v10210_v23 = vpop.permute.xlu1 %4998  ;;  %v601_v5 = vrot.slane %v217_v8, 2  ;;  %1941 = vst [vmem:[#allocation1 + $0x23] ss:$4 sm:$0xff] %v1449_v4 }
 0x340   :  { %5174 = vrot.lane.b32.xlu2 %v4849_v2, %s7499_s21  ;;  %12067 = vst [vmem:[#allocation183_spill] sm:$0xff] %v10210_v23  ;;  %v2424_v2 = vadd.f32 %v9948_v39, %v2423_v50  ;;  %v1440_v50 = vsel %vm11846_vm0, %v216_v12, %v600_v19 }
 0x341   :  { %v1446_v23 = vsel %vm11846_vm0, %v217_v8, %v601_v5  ;;  %1937 = vst [vmem:[#allocation1 + $0x20] ss:$4 sm:$0xff] %v1440_v50 }
 0x342   :  { %v10216_v24 = vpop.permute.xlu2 %5054  ;;  %v2581_v58 = vmax.f32 %v2424_v2, 0.0  ;;  %1940 = vst [vmem:[#allocation1 + $0x22] ss:$4 sm:$0xff] %v1446_v23  ;;  %v11818_v2 = vrot.slane %v10234_v59, 3 }
 0x343   :  { %12068 = vst [vmem:[#allocation184_spill] sm:$0xff] %v10216_v24  ;;  %6091 = vrot.lane.b32.xlu0 %v6074_v63, %s7494_s25  ;;  %v6076_v63 = vrot.slane %v9191_v9, 7  ;;  %v1441_v24 = vsel %vm612_vm1, %v216_v12, %v600_v19 }
 0x344   :  { %v1443_v46 = vrot.slane %v1441_v24, 2  ;;  %v1452_v24 = vrot.slane %v1450_v37, 2  ;;  %v3157_v19 = vmax.f32 %v2581_v58, %v2870_v27  ;;  %v219_v27 = vld [vmem:[%s11733_s0 + $0x2ec] sm:$0x3] }
 0x345   :  { %v10231_v15 = vpop.permute.xlu0 %5098  ;;  %v603_v50 = vrot.slane %v219_v27, 2 }
 0x346   :  { %12069 = vst [vmem:[#allocation185_spill] sm:$0xff] %v10231_v15  ;;  %5064 = vrot.lane.b32.xlu1 %v10234_v59, %s7495_s30  ;;  %v2429_v15 = vadd.f32 %v9948_v39, %v2428_v42  ;;  %v2869_v39 = vrot.slane %v2581_v58, 4 }
 0x347   :  { %v10244_v0 = vpop.permute.xlu1 %4986  ;;  %1939 = vst [vmem:[#allocation1 + $0x21] ss:$4 sm:$0xff] %v1443_v46  ;;  %v7149_v46 = vrot.slane %v3157_v19, 9 }
 0x348   :  { %6095 = vrot.lane.b32.xlu2 %v6076_v63, %s7494_s25  ;;  %12071 = vst [vmem:[#allocation187_spill] sm:$0xff] %v10244_v0  ;;  %v2583_v8 = vmax.f32 %v2429_v15, 0.0  ;;  %v220_v63 = vld [vmem:[%s11733_s0 + $0x2f0] sm:$0xf] }
 0x349   :  { %1945 = vst [vmem:[#allocation1] ss:$4 sm:$0xff] %v1452_v24  ;;  %v604_v58 = vrot.slane %v220_v63, 2  ;;  %v3403_v24 = vmax.f32 %v3157_v19, %v7149_v46  ;;  %v6077_v46 = vrot.slane %v8693_v20, 7 }
 0x34a   :  { %v10249_v12 = vpop.permute.xlu2 %4808  ;;  %v3158_v23 = vmax.f32 %v2869_v39, %v2583_v8  ;;  %v2871_v15 = vrot.slane %v2583_v8, 4  ;;  %v1455_v8 = vsel %vm11846_vm0, %v219_v27, %v603_v50 }
 0x34b   :  { %12072 = vst [vmem:[#allocation188_spill] sm:$0xff] %v10249_v12  ;;  %5176 = vrot.lane.b32.xlu0 %v5145_v13, %s7499_s21  ;;  %v3979_v19 = vperm.slane %v3403_v24, 2 }
 0x34c   :  { %v7197_v4 = vrot.slane %v3158_v23, 9  ;;  %1946 = vst [vmem:[#allocation1 + $0x1] ss:$4 sm:$0xff] %v1455_v8  ;;  %v6080_v8 = vrot.slane %v9537_v60, 7 }
 0x34d   :  { %v10253_v5 = vpop.permute.xlu0 %5266 }
 0x34e   :  { %12073 = vst [vmem:[#allocation189_spill] sm:$0xff] %v10253_v5  ;;  %5232 = vrot.lane.b32.xlu1 %v11818_v2, %s7497_s11  ;;  %v1943_v42 = vld.sshfl [vmem:[#allocation1 + $0x20] sm:$0xff pattern:$0x73625140]  ;;  %v1459_v2 = vsel %vm612_vm1, %v220_v63, %v604_v58  ;;  %v3643_v5 = vmax.f32 %v3158_v23, %v7197_v4 }
 0x34f   :  { %v10260_v37 = vpop.permute.xlu1 %4924  ;;  %2430 = vmatmul.bf16.gmra.mxu3 %v1943_v42  ;;  %v1458_v42 = vsel %vm11846_vm0, %v220_v63, %v604_v58  ;;  %v1461_v12 = vrot.slane %v1459_v2, 2  ;;  %v4556_v2 = vsel %vm4510_vm2, %v3403_v24, %v3979_v19  ;;  %v222_v19 = vld [vmem:[%s11733_s0 + $0x2f8] sm:$0xf] }
 0x350   :  { %5342 = vrot.lane.b32.xlu2 %v10234_v59, %s7500_s24  ;;  %12074 = vst [vmem:[#allocation190_spill] sm:$0xff] %v10260_v37 }
 0x351   :  { %1947 = vst [vmem:[#allocation1 + $0x2] ss:$4 sm:$0xff] %v1458_v42 }
 0x352   :  { %v10263_v56 = vpop.permute.xlu2 %5000  ;;  %1949 = vst [vmem:[#allocation1 + $0x3] ss:$4 sm:$0xff] %v1461_v12  ;;  %v4219_v12 = vperm.slane %v3643_v5, 2 }
 0x353   :  { %12075 = vst [vmem:[#allocation191_spill] sm:$0xff] %v10263_v56  ;;  %5398 = vrot.lane.b32.xlu0 %v5089_v22, %s7501_s22  ;;  %v3159_v56 = vmax.f32 %v2582_v52, %v2871_v15  ;;  %v4123_v52 = vperm.slane %v3643_v5, 0  ;;  %v221_v5 = vld [vmem:[%s11733_s0 + $0x2f4] sm:$0x3] }
 0x355   :  { %v10272_v39 = vpop.permute.xlu0 %4872  ;;  %v7245_v27 = vrot.slane %v3159_v56, 9  ;;  %v4604_v58 = vsel %vm11846_vm0, %v4556_v2, %v4123_v52  ;;  %v606_v52 = vrot.slane %v222_v19, 2 }
 0x356   :  { %12076 = vst [vmem:[#allocation192_spill] sm:$0xff] %v10272_v39  ;;  %5454 = vrot.lane.b32.xlu1 %v5145_v13, %s7502_s13  ;;  %v6078_v13 = vrot.slane %v8783_v31, 7 }
 0x357   :  { %v10279_v0 = vpop.permute.xlu1 %5154  ;;  %v3883_v23 = vmax.f32 %v3159_v56, %v7245_v27  ;;  %v4653_v56 = vsel %vm11841_vm3, %v4604_v58, %v4219_v12  ;;  %v605_v27 = vrot.slane %v221_v5, 2  ;;  %v6079_v12 = vrot.slane %v9818_v41, 7 }
 0x358   :  { %5120 = vrot.lane.b32.xlu2 %v5089_v22, %s7496_s10  ;;  %12077 = vst [vmem:[#allocation193_spill] sm:$0xff] %v10279_v0  ;;  %v11819_v22 = vrot.slane %v10234_v59, 4  ;;  %v12102_v0 = vrot.slane %v9818_v41, 2 }
 0x359   :  { %v1955_v63 = vld.sshfl [vmem:[#allocation1] sm:$0xff pattern:$0x73625140]  ;;  %v4363_v24 = vperm.slane %v3883_v23, 0  ;;  %v4459_v2 = vperm.slane %v3883_v23, 2 }
 0x35a   :  { %v10282_v50 = vpop.permute.xlu2 %5222 }
 0x35b   :  { %12078 = vst [vmem:[#allocation194_spill] sm:$0xff] %v10282_v50  ;;  %6097 = vrot.lane.b32.xlu0 %v6077_v46, %s7494_s25  ;;  %v223_v46 = vld [vmem:[%s11733_s0 + $0x2fc] sm:$0x3]  ;;  %v4702_v58 = vsel %vm11840_vm4, %v4653_v56, %v4363_v24  ;;  %s7504_s0 = smov 112  }
 0x35c   :  { %v10325_v24 = vsel %vm11830_vm5, %v4702_v58, %v4459_v2  ;;  %v12092_v58 = vrot.slane %v8485_v26, 1 }
 0x35d   :  { %v10287_v15 = vpop.permute.xlu0 %5110 }
 0x35e   :  { %12079 = vst [vmem:[#allocation195_spill] sm:$0xff] %v10287_v15  ;;  %6099 = vrot.lane.b32.xlu1 %v6078_v13, %s7494_s25  ;;  %v607_v13 = vrot.slane %v223_v46, 2 }
 0x35f   :  { %v10295_v4 = vpop.permute.xlu1 %4936  ;;  %2435 = vmatmul.bf16.gmra.mxu3 %v1955_v63 }
 0x360   :  { %5288 = vrot.lane.b32.xlu2 %v11819_v22, %s7498_s20  ;;  %12080 = vst [vmem:[#allocation196_spill] sm:$0xff] %v10295_v4  ;;  %v1467_v22 = vsel %vm11846_vm0, %v222_v19, %v606_v52  ;;  %v1468_v4 = vsel %vm612_vm1, %v222_v19, %v606_v52  ;;  %v1473_v50 = vsel %vm11846_vm0, %v223_v46, %v607_v13  ;;  %v11820_v46 = vrot.slane %v10325_v24, 2 }
 0x361   :  { %v1470_v39 = vrot.slane %v1468_v4, 2  ;;  %1951 = vst [vmem:[#allocation1 + $0x21] ss:$4 sm:$0xff] %v1467_v22  ;;  %v11821_v4 = vrot.slane %v10325_v24, 1  ;;  %vm5812_vm1 = vcmask 719872  }
 0x362   :  { %v10298_v42 = vpop.permute.xlu2 %6089  ;;  %1954 = vst [vmem:[#allocation1 + $0x23] ss:$4 sm:$0xff] %v1473_v50 }
 0x363   :  { %6103 = vrot.lane.b32.xlu0 %v6080_v8, %s7494_s25  ;;  %v1464_v8 = vsel %vm11846_vm0, %v221_v5, %v605_v27  ;;  %1953 = vst [vmem:[#allocation1 + $0x22] ss:$4 sm:$0xff] %v1470_v39 }
 0x364   :  { %1950 = vst [vmem:[#allocation1 + $0x20] ss:$4 sm:$0xff] %v1464_v8  ;;  %v6185_v8 = vrot.slane %v8598_v43, 1 }
 0x365   :  { %v10312_v63 = vpop.permute.xlu0 %5278 }
 0x366   :  { %12081 = vst [vmem:[#allocation197_spill] sm:$0xff] %v10312_v63  ;;  %6137 = vrot.lane.b32.xlu1 %v8485_v26, %s7495_s30 }
 0x368   :  { %6101 = vrot.lane.b32.xlu2 %v6079_v12, %s7494_s25  ;;  %v10322_v23 = vpop.permute.xlu1 %5166 }
 0x369   :  { %12082 = vst [vmem:[#allocation198_spill] sm:$0xff] %v10322_v23 }
 0x36a   :  { %v10327_v56 = vpop.permute.xlu2 %5168 }
 0x36b   :  { %12083 = vst [vmem:[#allocation199_spill] sm:$0xff] %v10327_v56  ;;  %5344 = vrot.lane.b32.xlu0 %v10325_v24, %s7500_s24  ;;  %v1956_v39 = vld.sshfl [vmem:[#allocation1 + $0x20] sm:$0xff pattern:$0x73625140] }
 0x36d   :  { %v10332_v5 = vpop.permute.xlu0 %5056 }
 0x36e   :  { %12084 = vst [vmem:[#allocation200_spill] sm:$0xff] %v10332_v5  ;;  %5400 = vrot.lane.b32.xlu1 %v11821_v4, %s7501_s22  ;;  %v6186_v4 = vrot.slane %v9191_v9, 1  ;;  %v6188_v5 = vrot.slane %v9537_v60, 1 }
 0x36f   :  { %2440 = vmatmul.bf16.gmra.mxu3 %v1956_v39 }
 0x370   :  { %6139 = vrot.lane.b32.xlu2 %v8598_v43, %s7495_s30  ;;  %v10339_v22 = vpop.permute.xlu1 %5334 }
 0x371   :  { %12085 = vst [vmem:[#allocation201_spill] sm:$0xff] %v10339_v22 }
 0x372   :  { %v10341_v19 = vpop.permute.xlu2 %5390 }
 0x373   :  { %12086 = vst [vmem:[#allocation202_spill] sm:$0xff] %v10341_v19  ;;  %6141 = vrot.lane.b32.xlu0 %v9658_v14, %s7495_s30  ;;  %v12098_v19 = vrot.slane %v9658_v14, 2 }
 0x375   :  { %v10345_v50 = vpop.permute.xlu0 %5224 }
 0x376   :  { %12087 = vst [vmem:[#allocation203_spill] sm:$0xff] %v10345_v50  ;;  %6143 = vrot.lane.b32.xlu1 %v9191_v9, %s7495_s30  ;;  %v12094_v50 = vrot.slane %v8693_v20, 1 }
 0x378   :  { %5456 = vrot.lane.b32.xlu2 %v11820_v46, %s7502_s13  ;;  %v10353_v27 = vpop.permute.xlu1 %5112 }
 0x379   :  { %12088 = vst [vmem:[#allocation204_spill] sm:$0xff] %v10353_v27  ;;  %v12097_v27 = vrot.slane %v9818_v41, 1 }
 0x37a   :  { %v10355_v52 = vpop.permute.xlu2 %5336 }
 0x37b   :  { %12089 = vst [vmem:[#allocation205_spill] sm:$0xff] %v10355_v52  ;;  %6147 = vrot.lane.b32.xlu0 %v8783_v31, %s7495_s30 }
 0x37d   :  { %v10359_v13 = vpop.permute.xlu0 %5446 }
 0x37e   :  { %12090 = vst [vmem:[#allocation206_spill] sm:$0xff] %v10359_v13  ;;  %6149 = vrot.lane.b32.xlu1 %v9818_v41, %s7495_s30  ;;  %v6241_v13 = vrot.slane %v8598_v43, 2 }
 0x380   :  { %6145 = vrot.lane.b32.xlu2 %v8693_v20, %s7495_s30  ;;  %v10365_v2 = vpop.permute.xlu1 %5280 }
 0x381   :  { %12091 = vst [vmem:[#allocation207_spill] sm:$0xff] %v10365_v2 }
 0x382   :  { %v4815_v12 = vpop.permute.xlu2 %4814 }
 0x383   :  { %6193 = vrot.lane.b32.xlu0 %v12092_v58, %s7496_s10  ;;  %v12095_v58 = vrot.slane %v9658_v14, 1 }
 0x385   :  { %v4879_v39 = vpop.permute.xlu0 %4878 }
 0x386   :  { %6195 = vrot.lane.b32.xlu1 %v6185_v8, %s7496_s10 }
 0x388   :  { %6151 = vrot.lane.b32.xlu2 %v9537_v60, %s7495_s30  ;;  %v4943_v46 = vpop.permute.xlu1 %4942 }
 0x38a   :  { %v5007_v52 = vpop.permute.xlu2 %5006 }
 0x38b   :  { %6199 = vrot.lane.b32.xlu0 %v6186_v4, %s7496_s10 }
 0x38d   :  { %v10376_v2 = vpop.permute.xlu0 %5392 }
 0x38e   :  { %12093 = vst [vmem:[#allocation208_spill] sm:$0xff] %v10376_v2  ;;  %6201 = vrot.lane.b32.xlu1 %v12094_v50, %s7496_s10  ;;  %v6187_v2 = vrot.slane %v8783_v31, 1 }
 0x390   :  { %6197 = vrot.lane.b32.xlu2 %v12095_v58, %s7496_s10  ;;  %v10384_v8 = vpop.permute.xlu1 %5448 }
 0x391   :  { %12096 = vst [vmem:[#allocation209_spill] sm:$0xff] %v10384_v8 }
 0x392   :  { %v4945_v56 = vpop.permute.xlu2 %4944 }
 0x393   :  { %6205 = vrot.lane.b32.xlu0 %v12097_v27, %s7496_s10  ;;  %v12099_v27 = vrot.slane %v8485_v26, 2 }
 0x395   :  { %v5063_v4 = vpop.permute.xlu0 %5062 }
 0x396   :  { %6207 = vrot.lane.b32.xlu1 %v6188_v5, %s7496_s10  ;;  %v12100_v5 = vrot.slane %v8693_v20, 2 }
 0x398   :  { %6203 = vrot.lane.b32.xlu2 %v6187_v2, %s7496_s10  ;;  %v4881_v50 = vpop.permute.xlu1 %4880  ;;  %v6243_v2 = vrot.slane %v8783_v31, 2 }
 0x39a   :  { %v5175_v58 = vpop.permute.xlu2 %5174 }
 0x39b   :  { %6251 = vrot.lane.b32.xlu0 %v6241_v13, %s7499_s21  ;;  %v6242_v13 = vrot.slane %v9191_v9, 2 }
 0x39d   :  { %v4817_v8 = vpop.permute.xlu0 %4816 }
 0x39e   :  { %6253 = vrot.lane.b32.xlu1 %v12098_v19, %s7499_s21 }
 0x3a0   :  { %6249 = vrot.lane.b32.xlu2 %v12099_v27, %s7499_s21  ;;  %v5119_v22 = vpop.permute.xlu1 %5118  ;;  %v6244_v27 = vrot.slane %v9537_v60, 2 }
 0x3a2   :  { %v10401_v63 = vpop.permute.xlu2 %6095 }
 0x3a3   :  { %6257 = vrot.lane.b32.xlu0 %v12100_v5, %s7499_s21  ;;  %v12101_v5 = vrot.slane %v8485_v26, 3 }
 0x3a5   :  { %v5009_v23 = vpop.permute.xlu0 %5008 }
 0x3a6   :  { %6259 = vrot.lane.b32.xlu1 %v6243_v2, %s7499_s21  ;;  %v5658_v2 = vsel %vm5642_vm6, %v10162_v61, %v4817_v8  ;;  %v6297_v8 = vrot.slane %v8598_v43, 3 }
 0x3a7   :  { %v5675_v55 = vsel %vm5659_vm7, %v5658_v2, %v4881_v50  ;;  %v2341_v2 = vpop.f32.mrf.mxu2 }
 0x3a8   :  { %6255 = vrot.lane.b32.xlu2 %v6242_v13, %s7499_s21  ;;  %v10410_v19 = vpop.permute.xlu1 %6093  ;;  %v5692_v61 = vsel %vm11845_vm8, %v5675_v55, %v4945_v56 }
 0x3aa   :  { %v5343_v15 = vpop.permute.xlu2 %5342 }
 0x3ab   :  { %6263 = vrot.lane.b32.xlu0 %v6244_v27, %s7499_s21  ;;  %v12103_v27 = vrot.slane %v9658_v14, 3 }
 0x3ad   :  { %v5231_v59 = vpop.permute.xlu0 %5230 }
 0x3ae   :  { %6305 = vrot.lane.b32.xlu1 %v12101_v5, %s7497_s11  ;;  %v5657_v5 = vsel %vm5642_vm6, %v10117_v48, %v4815_v12  ;;  %v5709_v48 = vsel %vm11844_vm9, %v5692_v61, %v5009_v23  ;;  %v6299_v12 = vrot.slane %v8783_v31, 3  ;;  %v12105_v23 = vrot.slane %v8693_v20, 3 }
 0x3af   :  { %v5530_v61 = vrot.slane %v8346_v54, 4 }
 0x3b0   :  { %6261 = vrot.lane.b32.xlu2 %v12102_v0, %s7499_s21  ;;  %v5287_v37 = vpop.permute.xlu1 %5286  ;;  %v5674_v0 = vsel %vm5659_vm7, %v5657_v5, %v4879_v39 }
 0x3b1   :  { %v5691_v47 = vsel %vm11845_vm8, %v5674_v0, %v4943_v46 }
 0x3b2   :  { %v5121_v13 = vpop.permute.xlu2 %5120  ;;  %v5708_v9 = vsel %vm11844_vm9, %v5691_v47, %v5007_v52  ;;  %v12104_v47 = vrot.slane %v9818_v41, 3 }
 0x3b3   :  { %6309 = vrot.lane.b32.xlu0 %v12103_v27, %s7497_s11  ;;  %v5725_v43 = vsel %vm5710_vm10, %v5708_v9, %v5063_v4  ;;  %v6300_v9 = vrot.slane %v9537_v60, 3  ;;  %v5531_v60 = vrot.slane %v9434_v44, 4 }
 0x3b5   :  { %v10430_v40 = vpop.permute.xlu0 %6091 }
 0x3b6   :  { %6311 = vrot.lane.b32.xlu1 %v6298_v51, %s7497_s11  ;;  %v5742_v51 = vsel %vm5727_vm11, %v5725_v43, %v5119_v22 }
 0x3b7   :  { %v5759_v31 = vsel %vm5744_vm12, %v5742_v51, %v5175_v58  ;;  %v12106_v58 = vrot.slane %v8237_v18, 4 }
 0x3b8   :  { %6307 = vrot.lane.b32.xlu2 %v6297_v8, %s7497_s11  ;;  %v5065_v50 = vpop.permute.xlu1 %5064  ;;  %v5776_v5 = vsel %vm11824_vm13, %v5759_v31, %v5231_v59  ;;  %v2343_v8 = vpop.f32.mrf.mxu2 }
 0x3b9   :  { %v5726_v46 = vsel %vm5710_vm10, %v5709_v48, %v5065_v50  ;;  %v5793_v0 = vsel %vm5778_vm14, %v5776_v5, %v5287_v37  ;;  %v10473_v37 = vld [vmem:[%s11734_s2] ss:$0 sm:$0xff]  ;;  %s7505_s2 = smov 120  }
 0x3ba   :  { %v5289_v39 = vpop.permute.xlu2 %5288  ;;  %v5743_v56 = vsel %vm5727_vm11, %v5726_v46, %v5121_v13  ;;  %v5810_v48 = vsel %vm5795_vm15, %v5793_v0, %v5343_v15  ;;  %v2342_v15 = vadd.f32 %v10473_v37, %v2341_v2  ;;  %v12110_v2 = vrot.slane %v9511_v6, 4  ;;  %v12111_v0 = vld [vmem:[#allocation4_spill] sm:$0xff] }
 0x3bb   :  { %6315 = vrot.lane.b32.xlu0 %v6299_v12, %s7497_s11  ;;  %v2344_v12 = vadd.f32 %v10473_v37, %v2343_v8 }
 0x3bd   :  { %v5177_v55 = vpop.permute.xlu0 %5176  ;;  %v2549_v43 = vmax.f32 %v2344_v12, 0.0  ;;  %v12113_v12 = vld [vmem:[#allocation62_spill] sm:$0xff] }
 0x3be   :  { %6317 = vrot.lane.b32.xlu1 %v12104_v47, %s7497_s11  ;;  %v5760_v4 = vsel %vm5744_vm12, %v5743_v56, %v5177_v55  ;;  %v12107_v55 = vrot.slane %v8421_v53, 4  ;;  %v2548_v47 = vmax.f32 %v2342_v15, 0.0 }
 0x3c0   :  { %6313 = vrot.lane.b32.xlu2 %v12105_v23, %s7497_s11  ;;  %v5233_v52 = vpop.permute.xlu1 %5232  ;;  %v2346_v56 = vpop.f32.mrf.mxu2  ;;  %v12108_v23 = vrot.slane %v9096_v57, 4  ;;  %v2836_v5 = vrot.slane %v2548_v47, 4 }
 0x3c1   :  { %v5777_v22 = vsel %vm11824_vm13, %v5760_v4, %v5233_v52  ;;  %vm5829_vm13 = vcmask 785408   ;;  %v2347_v31 = vadd.f32 %v10473_v37, %v2346_v56  ;;  %v2837_v4 = vrot.slane %v2549_v43, 4 }
 0x3c2   :  { %v10454_v27 = vpop.permute.xlu2 %6101  ;;  %v10457_v13 = vsel %vm5778_vm14, %v5777_v22, %v5289_v39 }
 0x3c3   :  { %5538 = vrot.lane.b32.xlu0 %v12106_v58, %s7504_s0  ;;  %v2550_v53 = vmax.f32 %v2347_v31, 0.0  ;;  %v5533_v58 = vrot.slane %v9692_v34, 4  ;;  %v3124_v8 = vmax.f32 %v2548_v47, %v2837_v4  ;;  %v6360_v4 = vsel %vm5642_vm6, %v9818_v41, %v10149_v11 }
 0x3c4   :  { %v6376_v11 = vsel %vm5659_vm7, %v6360_v4, %v10070_v7 }
 0x3c5   :  { %v5399_v50 = vpop.permute.xlu0 %5398  ;;  %v3125_v6 = vmax.f32 %v2836_v5, %v2550_v53  ;;  %v7138_v15 = vrot.slane %v3124_v8, 9 }
 0x3c6   :  { %5540 = vrot.lane.b32.xlu1 %v5530_v61, %s7504_s0  ;;  %v5827_v18 = vsel %vm5812_vm1, %v5810_v48, %v5399_v50  ;;  %v6357_v61 = vsel %vm5642_vm6, %v12111_v0, %v9154_v45  ;;  %v12112_v48 = vld [vmem:[#allocation50_spill] sm:$0xff]  ;;  %v2838_v45 = vrot.slane %v2550_v53, 4 }
 0x3c7   :  { %v7186_v31 = vrot.slane %v3125_v6, 9 }
 0x3c8   :  { %6319 = vrot.lane.b32.xlu2 %v6300_v9, %s7497_s11  ;;  %v5455_v59 = vpop.permute.xlu1 %5454  ;;  %v5532_v9 = vrot.slane %v12111_v0, 4 }
 0x3c9   :  { %v10478_v39 = vsel %vm5829_vm13, %v5827_v18, %v5455_v59  ;;  %v6373_v18 = vsel %vm5659_vm7, %v6357_v61, %v12112_v48 }
 0x3ca   :  { %v10480_v46 = vpop.permute.xlu2 %6139 }
 0x3cb   :  { %5544 = vrot.lane.b32.xlu0 %v5531_v60, %s7504_s0  ;;  %v6389_v60 = vsel %vm11845_vm8, %v6373_v18, %v12113_v12 }
 0x3cd   :  { %v6098_v51 = vpop.permute.xlu0 %6097 }
 0x3ce   :  { %5546 = vrot.lane.b32.xlu1 %v12107_v55, %s7504_s0  ;;  %v6405_v55 = vsel %vm11844_vm9, %v6389_v60, %v6098_v51 }
 0x3d0   :  { %5542 = vrot.lane.b32.xlu2 %v12108_v23, %s7504_s0  ;;  %v10491_v52 = vpop.permute.xlu1 %6099  ;;  %v3392_v23 = vmax.f32 %v3124_v8, %v7138_v15  ;;  %v6355_v8 = vsel %vm5642_vm6, %v9434_v44, %v9927_v10 }
 0x3d1   :  { %v6371_v7 = vsel %vm5659_vm7, %v6355_v8, %v9911_v33 }
 0x3d2   :  { %v10493_v22 = vpop.permute.xlu2 %5456  ;;  %v2431_v50 = vpop.f32.mrf.mxu3  ;;  %v3968_v48 = vperm.slane %v3392_v23, 2  ;;  %v6387_v33 = vsel %vm11845_vm8, %v6371_v7, %v9805_v62  ;;  %v12115_v62 = vld [vmem:[#allocation64_spill] sm:$0xff] }
 0x3d3   :  { %12109 = vst [vmem:[#allocation210_spill] sm:$0xff] %v10493_v22  ;;  %5550 = vrot.lane.b32.xlu0 %v12110_v2, %s7504_s0  ;;  %v2432_v5 = vadd.f32 %v10473_v37, %v2431_v50  ;;  %v12199_v22 = vld [vmem:[#allocation187_spill] sm:$0xff] }
 0x3d5   :  { %v6104_v57 = vpop.permute.xlu0 %6103  ;;  %v2584_v18 = vmax.f32 %v2432_v5, 0.0 }
 0x3d6   :  { %5552 = vrot.lane.b32.xlu1 %v5533_v58, %s7504_s0  ;;  %v3126_v58 = vmax.f32 %v2549_v43, %v2838_v45 }
 0x3d8   :  { %5548 = vrot.lane.b32.xlu2 %v5532_v9, %s7504_s0  ;;  %v10507_v59 = vpop.permute.xlu1 %6137  ;;  %v3632_v9 = vmax.f32 %v3125_v6, %v7186_v31  ;;  %v7234_v6 = vrot.slane %v3126_v58, 9 }
 0x3da   :  { %v6146_v56 = vpop.permute.xlu2 %6145  ;;  %v2433_v53 = vpop.f32.mrf.mxu3  ;;  %v4112_v45 = vperm.slane %v3632_v9, 0  ;;  %v3872_v4 = vmax.f32 %v3126_v58, %v7234_v6  ;;  %v12116_v6 = vld [vmem:[#allocation54_spill] sm:$0xff] }
 0x3db   :  { %v10513_v47 = vsel %vm5710_vm10, %v6405_v55, %v6146_v56  ;;  %5596 = vrot.lane.b32.xlu0 %v8485_v26, %s7505_s2  ;;  %v2434_v61 = vadd.f32 %v10473_v37, %v2433_v53  ;;  %v4545_v55 = vsel %vm4510_vm2, %v3392_v23, %v3968_v48  ;;  %v6403_v53 = vsel %vm11844_vm9, %v6387_v33, %v10410_v19  ;;  %v12119_v33 = vld [vmem:[#allocation39_spill] sm:$0xff] }
 0x3dc   :  { %v6359_v48 = vsel %vm5642_vm6, %v9692_v34, %v10000_v29 }
 0x3dd   :  { %v5345_v2 = vpop.permute.xlu0 %5344  ;;  %v2585_v43 = vmax.f32 %v2434_v61, 0.0 }
 0x3de   :  { %v5811_v51 = vsel %vm5795_vm15, %v10457_v13, %v5345_v2  ;;  %5598 = vrot.lane.b32.xlu1 %v9434_v44, %s7505_s2  ;;  %v6392_v13 = vsel %vm11845_vm8, %v6376_v11, %v10175_v35  ;;  %v6358_v35 = vsel %vm5642_vm6, %v8693_v20, %v9193_v25  ;;  %v2872_v2 = vrot.slane %v2584_v18, 4 }
 0x3df   :  { %v6408_v60 = vsel %vm11844_vm9, %v6392_v13, %v6104_v57  ;;  %v2873_v10 = vrot.slane %v2585_v43, 4  ;;  %v4593_v25 = vsel %vm11846_vm0, %v4545_v55, %v4112_v45  ;;  %v6374_v61 = vsel %vm5659_vm7, %v6358_v35, %v12115_v62 }
 0x3e0   :  { %5594 = vrot.lane.b32.xlu2 %v8346_v54, %s7505_s2  ;;  %v5401_v50 = vpop.permute.xlu1 %5400  ;;  %v4352_v11 = vperm.slane %v3872_v4, 0 }
 0x3e1   :  { %v10536_v12 = vsel %vm5812_vm1, %v5811_v51, %v5401_v50  ;;  %v3160_v57 = vmax.f32 %v2584_v18, %v2873_v10  ;;  %v6375_v18 = vsel %vm5659_vm7, %v6359_v48, %v10110_v38  ;;  %v4448_v10 = vperm.slane %v3872_v4, 2  ;;  %v12118_v38 = vld [vmem:[#allocation27_spill] sm:$0xff] }
 0x3e2   :  { %12114 = vst [vmem:[#allocation4_spill] sm:$0xff] %v10536_v12  ;;  %v6152_v44 = vpop.permute.xlu2 %6151  ;;  %v2436_v31 = vpop.f32.mrf.mxu3  ;;  %v6391_v4 = vsel %vm11845_vm8, %v6375_v18, %v10079_v32  ;;  %v12124_v48 = vld [vmem:[#allocation55_spill] sm:$0xff] }
 0x3e3   :  { %v10542_v15 = vsel %vm5710_vm10, %v6408_v60, %v6152_v44  ;;  %5602 = vrot.lane.b32.xlu0 %v12111_v0, %s7505_s2  ;;  %v2437_v5 = vadd.f32 %v10473_v37, %v2436_v31  ;;  %v4208_v0 = vperm.slane %v3632_v9, 2  ;;  %v7150_v8 = vrot.slane %v3160_v57, 9 }
 0x3e4   :  { %v6390_v60 = vsel %vm11845_vm8, %v6374_v61, %v12116_v6  ;;  %v6353_v31 = vsel %vm5642_vm6, %v8346_v54, %v12118_v38 }
 0x3e5   :  { %v6142_v56 = vpop.permute.xlu0 %6141  ;;  %v2586_v58 = vmax.f32 %v2437_v5, 0.0  ;;  %v4642_v19 = vsel %vm11841_vm3, %v4593_v25, %v4208_v0  ;;  %v6406_v7 = vsel %vm11844_vm9, %v6390_v60, %v10491_v52  ;;  %v3404_v45 = vmax.f32 %v3160_v57, %v7150_v8  ;;  %v12125_v60 = vld [vmem:[#allocation58_spill] sm:$0xff] }
 0x3e6   :  { %5604 = vrot.lane.b32.xlu1 %v8693_v20, %s7505_s2  ;;  %v6419_v23 = vsel %vm5710_vm10, %v6403_v53, %v6142_v56  ;;  %v4691_v29 = vsel %vm11840_vm4, %v4642_v19, %v4352_v11  ;;  %v6369_v52 = vsel %vm5659_vm7, %v6353_v31, %v12119_v33  ;;  %v6407_v57 = vsel %vm11844_vm9, %v6391_v4, %v10454_v27  ;;  %v12120_v53 = vld [vmem:[#allocation53_spill] sm:$0xff] }
 0x3e7   :  { %v2874_v9 = vrot.slane %v2586_v58, 4  ;;  %v3161_v50 = vmax.f32 %v2872_v2, %v2586_v58  ;;  %v10597_v5 = vsel %vm11830_vm5, %v4691_v29, %v4448_v10  ;;  %v3980_v0 = vperm.slane %v3404_v45, 2  ;;  %v12121_v58 = vld [vmem:[#allocation40_spill] sm:$0xff] }
 0x3e8   :  { %5600 = vrot.lane.b32.xlu2 %v9658_v14, %s7505_s2  ;;  %v10561_v51 = vpop.permute.xlu1 %6143  ;;  %v6354_v32 = vsel %vm5642_vm6, %v8485_v26, %v12120_v53  ;;  %v6385_v27 = vsel %vm11845_vm8, %v6369_v52, %v12121_v58  ;;  %v11843_v11 = vrot.slane %v10597_v5, 1  ;;  %v2348_v58 = vpop.f32.mrf.mxu2 }
 0x3e9   :  { %v7198_v44 = vrot.slane %v3161_v50, 9  ;;  %v3162_v56 = vmax.f32 %v2585_v43, %v2874_v9  ;;  %v6401_v61 = vsel %vm11844_vm9, %v6385_v27, %v10298_v42  ;;  %v11832_v27 = vrot.slane %v10597_v5, 2 }
 0x3ea   :  { %v6198_v20 = vpop.permute.xlu2 %6197  ;;  %v6417_v9 = vsel %vm5710_vm10, %v6401_v61, %v10507_v59  ;;  %v6356_v59 = vsel %vm5642_vm6, %v9658_v14, %v9957_v30 }
 0x3eb   :  { %v10570_v13 = vsel %vm5727_vm11, %v6419_v23, %v6198_v20  ;;  %5608 = vrot.lane.b32.xlu0 %v9818_v41, %s7505_s2  ;;  %v12117_v41 = vrot.slane %v9365_v36, 1  ;;  %v3644_v43 = vmax.f32 %v3161_v50, %v7198_v44  ;;  %v7246_v23 = vrot.slane %v3162_v56, 9  ;;  %v12123_v20 = vld [vmem:[#allocation38_spill] sm:$0xff] }
 0x3ec   :  { %v6370_v26 = vsel %vm5659_vm7, %v6354_v32, %v12123_v20  ;;  %v4557_v50 = vsel %vm4510_vm2, %v3404_v45, %v3980_v0  ;;  %v11839_v44 = vrot.slane %v12125_v60, 1  ;;  %v6372_v45 = vsel %vm5659_vm7, %v6356_v59, %v10059_v16  ;;  %v12129_v20 = vld [vmem:[#allocation60_spill] sm:$0xff] }
 0x3ed   :  { %v6148_v35 = vpop.permute.xlu0 %6147  ;;  %v4124_v8 = vperm.slane %v3644_v43, 0  ;;  %v6386_v18 = vsel %vm11845_vm8, %v6370_v26, %v12124_v48  ;;  %v3884_v6 = vmax.f32 %v3162_v56, %v7246_v23  ;;  %v11838_v56 = vrot.slane %v9985_v28, 1 }
 0x3ee   :  { %v6422_v55 = vsel %vm5710_vm10, %v6406_v7, %v6148_v35  ;;  %5921 = vrot.lane.b32.xlu1 %v12117_v41, %s7493_s1  ;;  %v6402_v10 = vsel %vm11844_vm9, %v6386_v18, %v10430_v40  ;;  %v4220_v7 = vperm.slane %v3644_v43, 2  ;;  %v6388_v16 = vsel %vm11845_vm8, %v6372_v45, %v10046_v49 }
 0x3ef   :  { %v6418_v35 = vsel %vm5710_vm10, %v6402_v10, %v10480_v46  ;;  %v4605_v29 = vsel %vm11846_vm0, %v4557_v50, %v4124_v8  ;;  %v4364_v40 = vperm.slane %v3884_v6, 0  ;;  %v6404_v41 = vsel %vm11844_vm9, %v6388_v16, %v10401_v63 }
 0x3f0   :  { %5606 = vrot.lane.b32.xlu2 %v9692_v34, %s7505_s2  ;;  %v6150_v2 = vpop.permute.xlu1 %6149  ;;  %v12122_v34 = vrot.slane %v10136_v17, 1  ;;  %v4654_v46 = vsel %vm11841_vm3, %v4605_v29, %v4220_v7  ;;  %v4460_v38 = vperm.slane %v3884_v6, 2  ;;  %v6420_v31 = vsel %vm5710_vm10, %v6404_v41, %v10561_v51  ;;  %v12132_v6 = vld [vmem:[#allocation65_spill] sm:$0xff] }
 0x3f1   :  { %v6423_v54 = vsel %vm5710_vm10, %v6407_v57, %v6150_v2  ;;  %v4703_v33 = vsel %vm11840_vm4, %v4654_v46, %v4364_v40  ;;  %v12126_v49 = vrot.slane %v10325_v24, 1  ;;  %v12127_v57 = vrot.slane %v9886_v3, 1 }
 0x3f2   :  { %v6204_v25 = vpop.permute.xlu2 %6203  ;;  %v10668_v63 = vsel %vm11830_vm5, %v4703_v33, %v4460_v38  ;;  %v12128_v0 = vrot.slane %v9365_v36, 2  ;;  %v11834_v32 = vrot.slane %v12125_v60, 2  ;;  %v2349_v8 = vadd.f32 %v10473_v37, %v2348_v58 }
 0x3f3   :  { %v10606_v62 = vsel %vm5727_vm11, %v6422_v55, %v6204_v25  ;;  %5925 = vrot.lane.b32.xlu0 %v12122_v34, %s7493_s1  ;;  %v11833_v53 = vrot.slane %v10668_v63, 1  ;;  %v2352_v26 = vadd.f32 %v10473_v37, %v12129_v20  ;;  %v12130_v50 = vrot.slane %v9886_v3, 2 }
 0x3f4   :  { %v2354_v59 = vadd.f32 %v10473_v37, %v12132_v6  ;;  %v12133_v45 = vrot.slane %v10325_v24, 2  ;;  %v11828_v38 = vrot.slane %v9985_v28, 2  ;;  %v12137_v6 = vld [vmem:[#allocation5_spill] sm:$0xff]  ;;  %vm12150_vm5 = vcmask 523264  }
 0x3f5   :  { %v6194_v19 = vpop.permute.xlu0 %6193  ;;  %v2552_v18 = vmax.f32 %v2352_v26, 0.0 }
 0x3f6   :  { %v10623_v42 = vsel %vm5727_vm11, %v6417_v9, %v6194_v19  ;;  %5927 = vrot.lane.b32.xlu1 %v11843_v11, %s7493_s1  ;;  %v12131_v19 = vrot.slane %v10136_v17, 2  ;;  %v2553_v41 = vmax.f32 %v2354_v59, 0.0 }
 0x3f7   :  { %v2840_v7 = vrot.slane %v2552_v18, 4 }
 0x3f8   :  { %5923 = vrot.lane.b32.xlu2 %v11839_v44, %s7493_s1  ;;  %v6196_v55 = vpop.permute.xlu1 %6195  ;;  %v2841_v20 = vrot.slane %v2553_v41, 4  ;;  %v12171_v44 = vld [vmem:[#allocation114_spill] sm:$0xff] }
 0x3f9   :  { %v10643_v14 = vsel %vm5727_vm11, %v6418_v35, %v6196_v55  ;;  %v7426_v35 = vld [vmem:[%s11735_s3 + $0x78] sm:$0xff]  ;;  %v11831_v55 = vrot.slane %v10668_v63, 2 }
 0x3fa   :  { %v10645_v30 = vpop.permute.xlu2 %6249  ;;  %6771 = vmatpush.bf16.msrb.mxu2 %v7426_v35  ;;  %v12138_v35 = vld [vmem:[#allocation9_spill] sm:$0xff] }
 0x3fb   :  { %5931 = vrot.lane.b32.xlu0 %v11838_v56, %s7493_s1  ;;  %v12167_v56 = vld [vmem:[#allocation100_spill] sm:$0xff] }
 0x3fd   :  { %v6200_v4 = vpop.permute.xlu0 %6199 }
 0x3fe   :  { %v10659_v52 = vsel %vm5727_vm11, %v6420_v31, %v6200_v4  ;;  %5933 = vrot.lane.b32.xlu1 %v12126_v49, %s7493_s1  ;;  %v12134_v31 = vld [vmem:[#allocation7_spill] sm:$0xff]  ;;  %v12135_v4 = vld [vmem:[#allocation2_spill] sm:$0xff] }
 0x3ff   :  { %v5643_v33 = vsel %vm5642_vm6, %v12135_v4, %v12134_v31 }
 0x400   :  { %5929 = vrot.lane.b32.xlu2 %v12127_v57, %s7493_s1  ;;  %v6202_v43 = vpop.permute.xlu1 %6201 }
 0x401   :  { %v10672_v51 = vsel %vm5727_vm11, %v10513_v47, %v6202_v43 }
 0x402   :  { %v10674_v2 = vpop.permute.xlu2 %6255 }
 0x403   :  { %5977 = vrot.lane.b32.xlu0 %v12128_v0, %s7492_s18  ;;  %v11827_v0 = vrot.slane %v12125_v60, 3 }
 0x405   :  { %v6206_v25 = vpop.permute.xlu0 %6205 }
 0x406   :  { %v10682_v23 = vsel %vm5727_vm11, %v6423_v54, %v6206_v25  ;;  %5979 = vrot.lane.b32.xlu1 %v11834_v32, %s7492_s18  ;;  %v2438_v54 = vpop.f32.mrf.mxu3 }
 0x408   :  { %5935 = vrot.lane.b32.xlu2 %v11833_v53, %s7493_s1  ;;  %v6208_v47 = vpop.permute.xlu1 %6207  ;;  %v12153_v53 = vld [vmem:[#allocation99_spill] sm:$0xff] }
 0x409   :  { %v10693_v34 = vsel %vm5727_vm11, %v10542_v15, %v6208_v47  ;;  %v2551_v15 = vmax.f32 %v2349_v8, 0.0  ;;  %v12136_v47 = vld [vmem:[#allocation11_spill] sm:$0xff] }
 0x40a   :  { %v10695_v61 = vpop.permute.xlu2 %6261  ;;  %v5660_v58 = vsel %vm5659_vm7, %v5643_v33, %v12136_v47  ;;  %v12141_v33 = vld [vmem:[#allocation14_spill] sm:$0xff] }
 0x40b   :  { %5983 = vrot.lane.b32.xlu0 %v11832_v27, %s7492_s18  ;;  %v2839_v29 = vrot.slane %v2551_v15, 4  ;;  %v3127_v40 = vmax.f32 %v2551_v15, %v2840_v7  ;;  %v5677_v59 = vsel %vm11845_vm8, %v5660_v58, %v12137_v6  ;;  %v2439_v7 = vadd.f32 %v10473_v37, %v2438_v54  ;;  %v12142_v6 = vld [vmem:[#allocation35_spill] sm:$0xff] }
 0x40c   :  { %v3129_v54 = vmax.f32 %v2552_v18, %v2841_v20 }
 0x40d   :  { %v10703_v9 = vpop.permute.xlu0 %6251  ;;  %v3128_v49 = vmax.f32 %v2839_v29, %v2553_v41  ;;  %v7139_v43 = vrot.slane %v3127_v40, 9  ;;  %v5694_v29 = vsel %vm11844_vm9, %v5677_v59, %v12138_v35  ;;  %v12140_v41 = vld [vmem:[#allocation3_spill] sm:$0xff]  ;;  %v5646_v59 = vsel %vm5642_vm6, %v12142_v6, %v9431_v21 }
 0x40e   :  { %5985 = vrot.lane.b32.xlu1 %v12130_v50, %s7492_s18  ;;  %v2441_v16 = vpop.f32.mrf.mxu3  ;;  %v11825_v50 = vrot.slane %v10136_v17, 3  ;;  %v5663_v18 = vsel %vm5659_vm7, %v5646_v59, %v9465_v1  ;;  %v12147_v59 = vld [vmem:[#allocation74_spill] sm:$0xff] }
 0x40f   :  { %v10744_v8 = vadd.f32 %v10473_v37, %v2441_v16  ;;  %v7187_v26 = vrot.slane %v3128_v49, 9  ;;  %v3393_v15 = vmax.f32 %v3127_v40, %v7139_v43  ;;  %v12139_v16 = vld [vmem:[#allocation12_spill] sm:$0xff]  ;;  %v5711_v43 = vsel %vm5710_vm10, %v5694_v29, %v12141_v33  ;;  %v12144_v29 = vld [vmem:[#allocation15_spill] sm:$0xff] }
 0x410   :  { %5981 = vrot.lane.b32.xlu2 %v12131_v19, %s7492_s18  ;;  %v10711_v48 = vpop.permute.xlu1 %6253  ;;  %v5644_v40 = vsel %vm5642_vm6, %v12140_v41, %v12139_v16  ;;  %v11829_v16 = vrot.slane %v9886_v3, 3  ;;  %v12143_v41 = vld [vmem:[#allocation6_spill] sm:$0xff] }
 0x411   :  { %v2588_v31 = vmax.f32 %v10744_v8, 0.0  ;;  %v3633_v47 = vmax.f32 %v3128_v49, %v7187_v26  ;;  %v3969_v35 = vperm.slane %v3393_v15, 2  ;;  %v2587_v49 = vmax.f32 %v2439_v7, 0.0  ;;  %v12176_v8 = vld [vmem:[#allocation63_spill] sm:$0xff] }
 0x412   :  { %v10715_v10 = vpop.permute.xlu2 %6307  ;;  %v7235_v7 = vrot.slane %v3129_v54, 9 }
 0x413   :  { %5989 = vrot.lane.b32.xlu0 %v12133_v45, %s7492_s18  ;;  %v11826_v45 = vrot.slane %v9365_v36, 3  ;;  %v2876_v6 = vrot.slane %v2588_v31, 4 }
 0x414   :  { %v3873_v27 = vmax.f32 %v3129_v54, %v7235_v7  ;;  %v12158_v7 = vld [vmem:[#allocation26_spill] sm:$0xff] }
 0x415   :  { %v10724_v46 = vpop.permute.xlu0 %6257 }
 0x416   :  { %5991 = vrot.lane.b32.xlu1 %v11831_v55, %s7492_s18  ;;  %v2443_v4 = vpop.f32.mrf.mxu3  ;;  %v12151_v55 = vld [vmem:[#allocation95_spill] sm:$0xff] }
 0x417   :  { %v2444_v20 = vadd.f32 %v10473_v37, %v2443_v4  ;;  %v4113_v37 = vperm.slane %v3633_v47, 0  ;;  %v11836_v4 = vrot.slane %v9985_v28, 3 }
 0x418   :  { %5987 = vrot.lane.b32.xlu2 %v11828_v38, %s7492_s18  ;;  %v10736_v57 = vpop.permute.xlu1 %6259 }
 0x419   :  { %v2589_v38 = vmax.f32 %v2444_v20, 0.0 }
 0x41a   :  { %v10739_v25 = vpop.permute.xlu2 %6313 }
 0x41b   :  { %6035 = vrot.lane.b32.xlu0 %v11827_v0, %s7491_s17  ;;  %v2875_v0 = vrot.slane %v2587_v49, 4 }
 0x41d   :  { %v10750_v19 = vpop.permute.xlu0 %6263 }
 0x41e   :  { %6037 = vrot.lane.b32.xlu1 %v11825_v50, %s7491_s17  ;;  %v5661_v50 = vsel %vm5659_vm7, %v5644_v40, %v12143_v41  ;;  %v12146_v40 = vld [vmem:[#allocation18_spill] sm:$0xff]  ;;  %v4546_v41 = vsel %vm4510_vm2, %v3393_v15, %v3969_v35  ;;  %v4209_v35 = vperm.slane %v3633_v47, 2  ;;  %v12156_v47 = vld [vmem:[#allocation111_spill] sm:$0xff] }
 0x41f   :  { %v5678_v33 = vsel %vm11845_vm8, %v5661_v50, %v12144_v29  ;;  %v5680_v50 = vsel %vm11845_vm8, %v5663_v18, %v12147_v59  ;;  %v12152_v18 = vld [vmem:[#allocation41_spill] sm:$0xff]  ;;  %v3163_v59 = vmax.f32 %v2587_v49, %v2876_v6  ;;  %v4594_v20 = vsel %vm11846_vm0, %v4546_v41, %v4113_v37  ;;  %v12160_v41 = vld [vmem:[#allocation24_spill] sm:$0xff] }
 0x420   :  { %6033 = vrot.lane.b32.xlu2 %v11826_v45, %s7491_s17  ;;  %v10770_v58 = vpop.permute.xlu1 %6305  ;;  %v12145_v45 = vld [vmem:[#allocation8_spill] sm:$0xff]  ;;  %v5649_v15 = vsel %vm5642_vm6, %v12152_v18, %v12151_v55  ;;  %v11837_v49 = vrot.slane %v10668_v63, 3 }
 0x421   :  { %v5728_v21 = vsel %vm5727_vm11, %v5711_v43, %v12145_v45  ;;  %v12148_v43 = vld [vmem:[#allocation17_spill] sm:$0xff] }
 0x422   :  { %v10781_v26 = vpop.permute.xlu2 %6319  ;;  %v5745_v1 = vsel %vm5744_vm12, %v5728_v21, %v12146_v40  ;;  %v5695_v29 = vsel %vm11844_vm9, %v5678_v33, %v12148_v43  ;;  %v12149_v21 = vld [vmem:[#allocation22_spill] sm:$0xff]  ;;  %v5666_v33 = vsel %vm5659_vm7, %v5649_v15, %v12153_v53  ;;  %v3164_v15 = vmax.f32 %v2875_v0, %v2589_v38 }
 0x423   :  { %6041 = vrot.lane.b32.xlu0 %v11829_v16, %s7491_s17  ;;  %v11835_v16 = vrot.slane %v10597_v5, 3  ;;  %v5762_v40 = vsel %vm12150_vm5, %v5745_v1, %v12149_v21  ;;  %v12154_v43 = vld [vmem:[#allocation90_spill] sm:$0xff]  ;;  %v12155_v21 = vld [vmem:[#allocation13_spill] sm:$0xff]  ;;  %v2877_v0 = vrot.slane %v2589_v38, 4 }
 0x424   :  { %v5697_v32 = vsel %vm11844_vm9, %v5680_v50, %v12154_v43  ;;  %v5712_v55 = vsel %vm5710_vm10, %v5695_v29, %v12155_v21  ;;  %v12157_v53 = vld [vmem:[#allocation10_spill] sm:$0xff]  ;;  %v12159_v50 = vld [vmem:[#allocation73_spill] sm:$0xff]  ;;  %v12162_v21 = vld [vmem:[#allocation80_spill] sm:$0xff]  ;;  %v7199_v38 = vrot.slane %v3164_v15, 9 }
 0x425   :  { %v10798_v45 = vpop.permute.xlu0 %6309  ;;  %v5714_v54 = vsel %vm5710_vm10, %v5697_v32, %v12156_v47  ;;  %v5779_v6 = vsel %vm5778_vm14, %v5762_v40, %v12157_v53  ;;  %v5729_v37 = vsel %vm5727_vm11, %v5712_v55, %v12158_v7  ;;  %v5645_v18 = vsel %vm5642_vm6, %v12160_v41, %v12159_v50  ;;  %v12163_v55 = vld [vmem:[#allocation94_spill] sm:$0xff]  ;;  %v12164_v50 = vld [vmem:[#allocation28_spill] sm:$0xff] }
 0x426   :  { %6043 = vrot.lane.b32.xlu1 %v11836_v4, %s7491_s17  ;;  %v5683_v32 = vsel %vm11845_vm8, %v5666_v33, %v12162_v21  ;;  %v4643_v47 = vsel %vm11841_vm3, %v4594_v20, %v4209_v35  ;;  %v7151_v4 = vrot.slane %v3163_v59, 9  ;;  %v4353_v40 = vperm.slane %v3873_v27, 0  ;;  %v12166_v35 = vld [vmem:[#allocation72_spill] sm:$0xff] }
 0x427   :  { %v5731_v53 = vsel %vm5727_vm11, %v5714_v54, %v12163_v55  ;;  %v6081_v7 = vrot.slane %v12125_v60, 7  ;;  %v4449_v41 = vperm.slane %v3873_v27, 2  ;;  %v5662_v20 = vsel %vm5659_vm7, %v5645_v18, %v12166_v35 }
 0x428   :  { %6039 = vrot.lane.b32.xlu2 %v11835_v16, %s7491_s17  ;;  %v10819_v1 = vpop.permute.xlu1 %6311  ;;  %v12161_v16 = vld [vmem:[#allocation21_spill] sm:$0xff]  ;;  %v5700_v54 = vsel %vm11844_vm9, %v5683_v32, %v12167_v56  ;;  %v11842_v55 = vrot.slane %v10325_v24, 3  ;;  %v3405_v35 = vmax.f32 %v3163_v59, %v7151_v4  ;;  %v3165_v56 = vmax.f32 %v2588_v31, %v2877_v0 }
 0x429   :  { %v5796_v29 = vsel %vm5795_vm15, %v5779_v6, %v12161_v16  ;;  %v12165_v6 = vld [vmem:[#allocation25_spill] sm:$0xff]  ;;  %v6083_v4 = vrot.slane %v10597_v5, 7  ;;  %vm12175_vm3 = vcmask 1044480  }
 0x42a   :  { %v10833_v43 = vpop.permute.xlu2 %5542  ;;  %v5813_v16 = vsel %vm5812_vm1, %v5796_v29, %v12164_v50  ;;  %v5746_v33 = vsel %vm5744_vm12, %v5729_v37, %v12165_v6  ;;  %v12168_v29 = vld [vmem:[#allocation76_spill] sm:$0xff]  ;;  %v12169_v37 = vld [vmem:[#allocation110_spill] sm:$0xff]  ;;  %v12170_v6 = vld [vmem:[#allocation119_spill] sm:$0xff] }
 0x42b   :  { %6047 = vrot.lane.b32.xlu0 %v11837_v49, %s7491_s17  ;;  %v4692_v49 = vsel %vm11840_vm4, %v4643_v47, %v4353_v40  ;;  %v5679_v50 = vsel %vm11845_vm8, %v5662_v20, %v12168_v29  ;;  %v5748_v27 = vsel %vm5744_vm12, %v5731_v53, %v12169_v37  ;;  %v5717_v18 = vsel %vm5710_vm10, %v5700_v54, %v12170_v6  ;;  %v12172_v40 = vld [vmem:[#allocation16_spill] sm:$0xff]  ;;  %vm12173_vm4 = vmmov %vm12150_vm5  ;;  %v12174_v53 = vld [vmem:[#allocation19_spill] sm:$0xff] }
 0x42c   :  { %v5765_v47 = vsel %vm12150_vm5, %v5748_v27, %v12171_v44  ;;  %v5830_v20 = vsel %vm5829_vm13, %v5813_v16, %v12174_v53  ;;  %v10882_v44 = vsel %vm12175_vm3, %v4692_v49, %v4449_v41  ;;  %vm5846_vm5 = vcmask 850944   ;;  %v12177_v59 = vld [vmem:[#allocation109_spill] sm:$0xff]  ;;  %v12179_v27 = vld [vmem:[#allocation98_spill] sm:$0xff]  ;;  %vm12181_vm3 = vmmov %vm12173_vm4 }
 0x42d   :  { %v10852_v21 = vpop.permute.xlu0 %6315  ;;  %v5696_v31 = vsel %vm11844_vm9, %v5679_v50, %v12176_v8  ;;  %v5734_v0 = vsel %vm5727_vm11, %v5717_v18, %v12177_v59  ;;  %v3645_v54 = vmax.f32 %v3164_v15, %v7199_v38  ;;  %v5782_v16 = vsel %vm5778_vm14, %v5765_v47, %v12179_v27  ;;  %v7418_v50 = vld [vmem:[%s11735_s3 + $0x38] sm:$0xff]  ;;  %v12180_v15 = vld [vmem:[#allocation133_spill] sm:$0xff] }
 0x42e   :  { %6105 = vrot.lane.b32.xlu1 %v6081_v7, %s7494_s25  ;;  %v10876_v7 = vsel %vm12173_vm4, %v5746_v33, %v12172_v40  ;;  %v12178_v33 = vld [vmem:[#allocation88_spill] sm:$0xff]  ;;  %v6449_v49 = vsel %vm5744_vm12, %v10623_v42, %v10645_v30  ;;  %v3981_v41 = vperm.slane %v3405_v35, 2  ;;  %v5799_v38 = vsel %vm5795_vm15, %v5782_v16, %v12180_v15  ;;  %v12182_v40 = vld [vmem:[#allocation33_spill] sm:$0xff]  ;;  %6752 = vmatpush.bf16.msrb.mxu1 %v7418_v50 }
 0x42f   :  { %v5713_v37 = vsel %vm5710_vm10, %v5696_v31, %v12178_v33  ;;  %v7247_v6 = vrot.slane %v3165_v56, 9  ;;  %v6465_v18 = vsel %vm12181_vm3, %v6449_v49, %v10770_v58  ;;  %v6084_v47 = vrot.slane %v10882_v44, 7  ;;  %v12183_v42 = vld [vmem:[#allocation93_spill] sm:$0xff]  ;;  %v12185_v31 = vld [vmem:[#allocation139_spill] sm:$0xff]  ;;  %v12186_v27 = vld [vmem:[#allocation168_spill] sm:$0xff] }
 0x430   :  { %6045 = vrot.lane.b32.xlu2 %v11842_v55, %s7491_s17  ;;  %v10872_v32 = vpop.permute.xlu1 %6317  ;;  %v5847_v53 = vsel %vm5846_vm5, %v5830_v20, %v12182_v40  ;;  %v5730_v30 = vsel %vm5727_vm11, %v5713_v37, %v12183_v42  ;;  %v5816_v59 = vsel %vm5812_vm1, %v5799_v38, %v12185_v31  ;;  %v12187_v16 = vld [vmem:[#allocation137_spill] sm:$0xff]  ;;  %v12188_v49 = vld [vmem:[#allocation175_spill] sm:$0xff]  ;;  %v4125_v20 = vperm.slane %v3645_v54, 0  ;;  %v12190_v40 = vld [vmem:[#allocation68_spill] sm:$0xff] }
 0x431   :  { %v5647_v58 = vsel %vm5642_vm6, %v12187_v16, %v12186_v27  ;;  %v12189_v15 = vld [vmem:[#allocation97_spill] sm:$0xff]  ;;  %v6082_v11 = vrot.slane %v12190_v40, 7  ;;  %v12191_v37 = vld [vmem:[#allocation182_spill] sm:$0xff]  ;;  %v4558_v38 = vsel %vm4510_vm2, %v3405_v35, %v3981_v41  ;;  %vm5863_vm4 = vcmask 916480   ;;  %v7417_v35 = vld [vmem:[%s11735_s3 + $0x30] sm:$0xff] }
 0x432   :  { %v10888_v29 = vpop.permute.xlu2 %5548  ;;  %v5648_v55 = vsel %vm5642_vm6, %v12189_v15, %v12188_v49  ;;  %v6481_v50 = vsel %vm5778_vm14, %v6465_v18, 0.0  ;;  %v12192_v42 = vld [vmem:[#allocation190_spill] sm:$0xff]  ;;  %v10928_v31 = vmax.f32 %v3165_v56, %v7247_v6  ;;  %vm5880_vm3 = vcmask 982016   ;;  %v12193_v41 = vld [vmem:[#allocation128_spill] sm:$0xff]  ;;  %v12195_v56 = vld [vmem:[#allocation171_spill] sm:$0xff]  ;;  %6753 = vmatpush.bf16.msrb.mxu1 %v7417_v35 }
 0x433   :  { %6109 = vrot.lane.b32.xlu0 %v6083_v4, %s7494_s25  ;;  %v12184_v4 = vld [vmem:[#allocation120_spill] sm:$0xff]  ;;  %vm12194_vm2 = vcmask 523264   ;;  %v5664_v6 = vsel %vm5659_vm7, %v5647_v58, %v12195_v56  ;;  %v12198_v15 = vld [vmem:[#allocation179_spill] sm:$0xff]  ;;  %v6452_v58 = vsel %vm5744_vm12, %v10659_v52, %v10674_v2  ;;  %v6087_v52 = vrot.slane %v10668_v63, 7 }
 0x434   :  { %v5751_v8 = vsel %vm5744_vm12, %v5734_v0, %v12184_v4  ;;  %v5665_v0 = vsel %vm5659_vm7, %v5648_v55, %v12191_v37  ;;  %v7425_v55 = vld [vmem:[%s11735_s3 + $0x70] sm:$0xff]  ;;  %v5681_v37 = vsel %vm11845_vm8, %v5664_v6, %v12198_v15 }
 0x435   :  { %v5539_v33 = vpop.permute.xlu0 %5538  ;;  %v5682_v4 = vsel %vm11845_vm8, %v5665_v0, %v12192_v42  ;;  %v5768_v18 = vsel %vm12194_vm2, %v5751_v8, %v12193_v41  ;;  %v4606_v0 = vsel %vm11846_vm0, %v4558_v38, %v4125_v20  ;;  %v7248_v42 = vrot.slane %v6481_v50, 7  ;;  %6772 = vmatpush.bf16.msrb.mxu2 %v7425_v55  ;;  %v12200_v41 = vld [vmem:[#allocation178_spill] sm:$0xff]  ;;  %v12204_v6 = vld [vmem:[#allocation123_spill] sm:$0xff] }
 0x436   :  { %6111 = vrot.lane.b32.xlu1 %v6084_v47, %s7494_s25  ;;  %v5864_v27 = vsel %vm5863_vm4, %v5847_v53, %v5539_v33  ;;  %v12196_v47 = vld [vmem:[#allocation157_spill] sm:$0xff]  ;;  %v12197_v33 = vld [vmem:[#allocation122_spill] sm:$0xff]  ;;  %v5698_v8 = vsel %vm11844_vm9, %v5681_v37, %v12199_v22  ;;  %v4365_v22 = vperm.slane %v10928_v31, 0  ;;  %v6468_v50 = vsel %vm12194_vm2, %v6452_v58, %v10819_v1  ;;  %v12209_v58 = vld [vmem:[#allocation136_spill] sm:$0xff] }
 0x437   :  { %v6086_v53 = vrot.slane %v12196_v47, 7  ;;  %v5833_v49 = vsel %vm5829_vm13, %v5816_v59, %v12197_v33  ;;  %v7416_v20 = vld [vmem:[%s11735_s3 + $0x28] sm:$0xff]  ;;  %v12206_v1 = vld [vmem:[#allocation113_spill] sm:$0xff] }
 0x438   :  { %6107 = vrot.lane.b32.xlu2 %v6082_v11, %s7494_s25  ;;  %v10932_v16 = vpop.permute.xlu1 %5540  ;;  %v4221_v11 = vperm.slane %v3645_v54, 2  ;;  %v5699_v54 = vsel %vm11844_vm9, %v5682_v4, %v12200_v41  ;;  %v7424_v38 = vld [vmem:[%s11735_s3 + $0x68] sm:$0xff]  ;;  %vm12203_vm9 = vcmask 1042432   ;;  %v5785_v15 = vsel %vm5778_vm14, %v5768_v18, %v12206_v1  ;;  %v12207_v37 = vld [vmem:[#allocation173_spill] sm:$0xff]  ;;  %6754 = vmatpush.bf16.msrb.mxu1 %v7416_v20  ;;  %v12210_v18 = vld [vmem:[#allocation92_spill] sm:$0xff] }
 0x439   :  { %v6085_v41 = vrot.slane %v9985_v28, 7  ;;  %6773 = vmatpush.bf16.msrb.mxu2 %v7424_v38  ;;  %v12214_v38 = vld [vmem:[#allocation32_spill] sm:$0xff] }
 0x43a   :  { %v5595_v12 = vpop.permute.xlu2 %5594  ;;  %v4655_v35 = vsel %vm12203_vm9, %v4606_v0, %v4221_v11  ;;  %v4461_v11 = vperm.slane %v10928_v31, 2  ;;  %v6484_v0 = vsel %vm5778_vm14, %v6468_v50, 0.0  ;;  %vm12211_vm9 = vmmov %vm12194_vm2  ;;  %vm12213_vm2 = vcmask 1043456   ;;  %v7415_v31 = vld [vmem:[%s11735_s3 + $0x20] sm:$0xff] }
 0x43b   :  { %v5881_v59 = vsel %vm5880_vm3, %v5864_v27, %v5595_v12  ;;  %6115 = vrot.lane.b32.xlu0 %v6086_v53, %s7494_s25  ;;  %v12201_v12 = vld [vmem:[#allocation29_spill] sm:$0xff]  ;;  %v12205_v53 = vld [vmem:[#allocation71_spill] sm:$0xff] }
 0x43c   :  { %v6561_v4 = vsel %vm11846_vm0, %v5881_v59, %v7248_v42  ;;  %v5780_v2 = vsel %vm5778_vm14, %v10876_v7, %v12201_v12  ;;  %v12202_v27 = vld [vmem:[#allocation77_spill] sm:$0xff]  ;;  %v5650_v33 = vsel %vm5642_vm6, %v12205_v53, %v12204_v6  ;;  %v5715_v42 = vsel %vm5710_vm10, %v5698_v8, %v12207_v37  ;;  %v12208_v7 = vld [vmem:[#allocation44_spill] sm:$0xff]  ;;  %v12218_v53 = vld [vmem:[#allocation106_spill] sm:$0xff]  ;;  %6755 = vmatpush.bf16.msrb.mxu1 %v7415_v31 }
 0x43d   :  { %v5747_v55 = vsel %vm5744_vm12, %v5730_v30, %v12202_v27  ;;  %6577 = vst [vmem:[#allocation1] ss:$4 sm:$0xff] %v6561_v4  ;;  %v5545_v56 = vpop.permute.xlu0 %5544  ;;  %v5716_v30 = vsel %vm5710_vm10, %v5699_v54, %v12208_v7  ;;  %v5850_v59 = vsel %vm5846_vm5, %v5833_v49, %v12209_v58  ;;  %v12212_v8 = vld [vmem:[#allocation141_spill] sm:$0xff]  ;;  %v5797_v50 = vsel %vm5795_vm15, %v5780_v2, %v12214_v38  ;;  %v12215_v27 = vld [vmem:[#allocation96_spill] sm:$0xff] }
 0x43e   :  { %6117 = vrot.lane.b32.xlu1 %v6087_v52, %s7494_s25  ;;  %v5764_v4 = vsel %vm12211_vm9, %v5747_v55, %v12210_v18  ;;  %v5802_v12 = vsel %vm5795_vm15, %v5785_v15, %v12212_v8  ;;  %v4704_v52 = vsel %vm12213_vm2, %v4655_v35, %v4365_v22  ;;  %v5867_v54 = vsel %vm5863_vm4, %v5850_v59, %v5545_v56  ;;  %v7423_v49 = vld [vmem:[%s11735_s3 + $0x60] sm:$0xff]  ;;  %v12219_v15 = vld [vmem:[#allocation47_spill] sm:$0xff]  ;;  %v12224_v8 = vld [vmem:[#allocation30_spill] sm:$0xff] }
 0x43f   :  { %v5781_v22 = vsel %vm5778_vm14, %v5764_v4, %v12215_v27  ;;  %v12216_v55 = vld [vmem:[#allocation145_spill] sm:$0xff]  ;;  %v5667_v1 = vsel %vm5659_vm7, %v5650_v33, %v12218_v53  ;;  %v5733_v37 = vsel %vm5727_vm11, %v5716_v30, %v12219_v15  ;;  %v7251_v58 = vrot.slane %v6484_v0, 7  ;;  %6774 = vmatpush.bf16.msrb.mxu2 %v7423_v49  ;;  %v7414_v33 = vld [vmem:[%s11735_s3 + $0x18] sm:$0xff]  ;;  %v12222_v0 = vld [vmem:[#allocation134_spill] sm:$0xff] }
 0x440   :  { %6113 = vrot.lane.b32.xlu2 %v6085_v41, %s7494_s25  ;;  %v10998_v20 = vpop.permute.xlu1 %5546  ;;  %v5819_v35 = vsel %vm5812_vm1, %v5802_v12, %v12216_v55  ;;  %v12217_v56 = vld [vmem:[#allocation185_spill] sm:$0xff]  ;;  %v6455_v59 = vsel %vm5744_vm12, %v10682_v23, %v10695_v61  ;;  %vm12221_vm9 = vcmask 1044480   ;;  %v7422_v30 = vld [vmem:[%s11735_s3 + $0x58] sm:$0xff]  ;;  %v6450_v61 = vsel %vm5744_vm12, %v10643_v14, %v10703_v9  ;;  %v12227_v49 = vld [vmem:[#allocation23_spill] sm:$0xff]  ;;  %6756 = vmatpush.bf16.msrb.mxu1 %v7414_v33 }
 0x441   :  { %v5732_v6 = vsel %vm5727_vm11, %v5715_v42, %v12217_v56  ;;  %v12220_v41 = vld [vmem:[#allocation193_spill] sm:$0xff]  ;;  %v11024_v18 = vsel %vm12221_vm9, %v4704_v52, %v4461_v11  ;;  %v5836_v23 = vsel %vm5829_vm13, %v5819_v35, %v12222_v0  ;;  %vm12223_vm2 = vcmask 523264   ;;  %v12228_v27 = vld [vmem:[#allocation91_spill] sm:$0xff]  ;;  %v12233_v15 = vld [vmem:[#allocation112_spill] sm:$0xff] }
 0x442   :  { %v5749_v7 = vsel %vm5744_vm12, %v5732_v6, %v12220_v41  ;;  %v5601_v2 = vpop.permute.xlu2 %5600  ;;  %v6471_v11 = vsel %vm12223_vm2, %v6455_v59, %v10872_v32  ;;  %v5750_v12 = vsel %vm5744_vm12, %v5733_v37, %v12224_v8  ;;  %v12225_v52 = vld [vmem:[#allocation181_spill] sm:$0xff]  ;;  %vm12226_vm9 = vmmov %vm12223_vm2  ;;  %v5814_v38 = vsel %vm5812_vm1, %v5797_v50, %v12227_v49  ;;  %v12229_v14 = vld [vmem:[#allocation115_spill] sm:$0xff] }
 0x443   :  { %v5884_v42 = vsel %vm5880_vm3, %v5867_v54, %v5601_v2  ;;  %6153 = vrot.lane.b32.xlu0 %v12125_v60, %s7495_s30  ;;  %v5766_v54 = vsel %vm12226_vm9, %v5749_v7, %v12225_v52  ;;  %v5798_v55 = vsel %vm5795_vm15, %v5781_v22, %v12228_v27  ;;  %v5684_v9 = vsel %vm11845_vm8, %v5667_v1, %v12229_v14  ;;  %v12230_v35 = vld [vmem:[#allocation125_spill] sm:$0xff]  ;;  %v12234_v37 = vld [vmem:[#allocation48_spill] sm:$0xff]  ;;  %vm12235_vm8 = vmmov %vm12226_vm9 }
 0x444   :  { %v6564_v4 = vsel %vm11846_vm0, %v5884_v42, %v7251_v58  ;;  %v6088_v32 = vrot.slane %v11024_v18, 7  ;;  %vm12231_vm2 = vcmask 261120   ;;  %v6466_v6 = vsel %vm12226_vm9, %v6450_v61, %v10715_v10  ;;  %v12232_v53 = vld [vmem:[#allocation149_spill] sm:$0xff]  ;;  %6775 = vmatpush.bf16.msrb.mxu2 %v7422_v30  ;;  %v7413_v59 = vld [vmem:[%s11735_s3 + $0x10] sm:$0xff] }
 0x445   :  { %6583 = vst [vmem:[#allocation1 + $0x3] ss:$4 sm:$0xff] %v6564_v4  ;;  %v5551_v31 = vpop.permute.xlu0 %5550  ;;  %v5701_v56 = vsel %vm12231_vm2, %v5684_v9, %v12230_v35  ;;  %v6487_v50 = vsel %vm5778_vm14, %v6471_v11, 0.0  ;;  %v5853_v22 = vsel %vm5846_vm5, %v5836_v23, %v12232_v53  ;;  %v5815_v1 = vsel %vm5812_vm1, %v5798_v55, %v12233_v15  ;;  %v12236_v7 = vld [vmem:[#allocation189_spill] sm:$0xff]  ;;  %v7421_v42 = vld [vmem:[%s11735_s3 + $0x50] sm:$0xff]  ;;  %6757 = vmatpush.bf16.msrb.mxu1 %v7413_v59  ;;  %vm12247_vm2 = vmmov %vm12235_vm8 }
 0x446   :  { %6155 = vrot.lane.b32.xlu1 %v12190_v40, %s7495_s30  ;;  %v5767_v41 = vsel %vm12235_vm8, %v5750_v12, %v12234_v37  ;;  %v5783_v58 = vsel %vm5778_vm14, %v5766_v54, %v12236_v7  ;;  %v5870_v2 = vsel %vm5863_vm4, %v5853_v22, %v5551_v31  ;;  %v12237_v33 = vld [vmem:[#allocation37_spill] sm:$0xff]  ;;  %v6451_v61 = vsel %vm5744_vm12, %v10570_v13, %v10711_v48  ;;  %v12239_v11 = vld [vmem:[#allocation127_spill] sm:$0xff]  ;;  %v7412_v13 = vld [vmem:[%s11735_s3 + $0x8] sm:$0xff] }
 0x447   :  { %v5831_v30 = vsel %vm5829_vm13, %v5814_v38, %v12237_v33  ;;  %v12238_v0 = vld [vmem:[#allocation117_spill] sm:$0xff]  ;;  %v5718_v4 = vsel %vm5710_vm10, %v5701_v56, %v12239_v11  ;;  %v6482_v8 = vsel %vm5778_vm14, %v6466_v6, 0.0  ;;  %v6467_v12 = vsel %vm12235_vm8, %v6451_v61, %v10798_v45  ;;  %v12240_v31 = vld [vmem:[#allocation43_spill] sm:$0xff]  ;;  %v7420_v48 = vld [vmem:[%s11735_s3 + $0x48] sm:$0xff] }
 0x448   :  { %6119 = vrot.lane.b32.xlu2 %v6088_v32, %s7494_s25  ;;  %v11071_v10 = vpop.permute.xlu1 %5552  ;;  %v5832_v23 = vsel %vm5829_vm13, %v5815_v1, %v12238_v0  ;;  %v7254_v52 = vrot.slane %v6487_v50, 7  ;;  %v5800_v49 = vsel %vm5795_vm15, %v5783_v58, %v12240_v31  ;;  %v12241_v38 = vld [vmem:[#allocation49_spill] sm:$0xff]  ;;  %6776 = vmatpush.bf16.msrb.mxu2 %v7421_v42  ;;  %v12242_v45 = vld [vmem:[#allocation144_spill] sm:$0xff]  ;;  %v6453_v9 = vsel %vm5744_vm12, %v10672_v51, %v10724_v46  ;;  %v12244_v6 = vld [vmem:[#allocation143_spill] sm:$0xff] }
 0x449   :  { %v5784_v27 = vsel %vm5778_vm14, %v5767_v41, %v12241_v38  ;;  %v5735_v14 = vsel %vm5727_vm11, %v5718_v4, %v12242_v45  ;;  %v12243_v32 = vld [vmem:[#allocation36_spill] sm:$0xff]  ;;  %v7249_v53 = vrot.slane %v6482_v8, 7  ;;  %v6483_v22 = vsel %vm5778_vm14, %v6467_v12, 0.0  ;;  %v12245_v37 = vld [vmem:[#allocation42_spill] sm:$0xff]  ;;  %6758 = vmatpush.bf16.msrb.mxu1 %v7412_v13  ;;  %v12249_v42 = vld [vmem:[#allocation131_spill] sm:$0xff] }
 0x44a   :  { %v5607_v54 = vpop.permute.xlu2 %5606  ;;  %v5848_v35 = vsel %vm5846_vm5, %v5831_v30, %v12243_v32  ;;  %v5752_v50 = vsel %vm5744_vm12, %v5735_v14, %v12244_v6  ;;  %v5801_v41 = vsel %vm5795_vm15, %v5784_v27, %v12245_v37  ;;  %v12246_v51 = vld [vmem:[#allocation34_spill] sm:$0xff]  ;;  %v6469_v58 = vsel %vm12247_vm2, %v6453_v9, %v10739_v25  ;;  %vm12250_vm9 = vmmov %vm12247_vm2  ;;  %v7411_v25 = vld [vmem:[%s11735_s3] sm:$0xff] }
 0x44b   :  { %v5887_v55 = vsel %vm5880_vm3, %v5870_v2, %v5607_v54  ;;  %6159 = vrot.lane.b32.xlu0 %v10882_v44, %s7495_s30  ;;  %v5865_v15 = vsel %vm5863_vm4, %v5848_v35, %v10932_v16  ;;  %v5817_v46 = vsel %vm5812_vm1, %v5800_v49, %v12246_v51  ;;  %v12248_v2 = vld [vmem:[#allocation103_spill] sm:$0xff]  ;;  %v5769_v33 = vsel %vm12250_vm9, %v5752_v50, %v12249_v42  ;;  %v12251_v4 = vld [vmem:[#allocation56_spill] sm:$0xff]  ;;  %vm12253_vm8 = vmmov %vm12247_vm2 }
 0x44c   :  { %v6567_v56 = vsel %vm11846_vm0, %v5887_v55, %v7254_v52  ;;  %v5849_v16 = vsel %vm5846_vm5, %v5832_v23, %v12248_v2  ;;  %6777 = vmatpush.bf16.msrb.mxu2 %v7420_v48  ;;  %v7250_v30 = vrot.slane %v6483_v22, 7  ;;  %v7419_v23 = vld [vmem:[%s11735_s3 + $0x40] sm:$0xff]  ;;  %v6454_v11 = vsel %vm5744_vm12, %v10606_v62, %v10736_v57  ;;  %v12252_v8 = vld [vmem:[#allocation51_spill] sm:$0xff]  ;;  %v12254_v62 = vld [vmem:[#allocation146_spill] sm:$0xff] }
 0x44d   :  { %6589 = vst [vmem:[#allocation1 + $0x22] ss:$4 sm:$0xff] %v6567_v56  ;;  %v5597_v1 = vpop.permute.xlu0 %5596  ;;  %v5866_v0 = vsel %vm5863_vm4, %v5849_v16, %v10833_v43  ;;  %v5818_v43 = vsel %vm5812_vm1, %v5801_v41, %v12251_v4  ;;  %v5834_v12 = vsel %vm5829_vm13, %v5817_v46, %v12252_v8  ;;  %v6485_v54 = vsel %vm5778_vm14, %v6469_v58, 0.0  ;;  %6759 = vmatpush.bf16.msrb.mxu1 %v7411_v25  ;;  %v12255_v55 = vld [vmem:[#allocation59_spill] sm:$0xff]  ;;  %v12256_v13 = vld [vmem:[#allocation52_spill] sm:$0xff]  ;;  %v12257_v45 = vld [vmem:[#allocation162_spill] sm:$0xff] }
 0x44e   :  { %v5882_v7 = vsel %vm5880_vm3, %v5865_v15, %v5597_v1  ;;  %6161 = vrot.lane.b32.xlu1 %v9985_v28, %s7495_s30  ;;  %v6470_v31 = vsel %vm12253_vm8, %v6454_v11, %v10852_v21  ;;  %v5786_v57 = vsel %vm5778_vm14, %v5769_v33, %v12254_v62  ;;  %v6456_v27 = vsel %vm5744_vm12, %v10693_v34, %v10750_v19  ;;  %v12258_v19 = vld [vmem:[#allocation45_spill] sm:$0xff]  ;;  %v12259_v22 = vld [vmem:[#allocation147_spill] sm:$0xff]  ;;  %v12260_v58 = vld [vmem:[#allocation160_spill] sm:$0xff] }
 0x44f   :  { %v6562_v59 = vsel %vm11846_vm0, %v5882_v7, %v7249_v53  ;;  %v5835_v21 = vsel %vm5829_vm13, %v5818_v43, %v12255_v55  ;;  %v5851_v48 = vsel %vm5846_vm5, %v5834_v12, %v12256_v13  ;;  %v5803_v14 = vsel %vm5795_vm15, %v5786_v57, %v12257_v45 }
 0x450   :  { %6157 = vrot.lane.b32.xlu2 %v10597_v5, %s7495_s30  ;;  %6579 = vst [vmem:[#allocation1 + $0x1] ss:$4 sm:$0xff] %v6562_v59  ;;  %v5599_v61 = vpop.permute.xlu1 %5598  ;;  %6778 = vmatpush.bf16.msrb.mxu2 %v7419_v23  ;;  %v7252_v9 = vrot.slane %v6485_v54, 7  ;;  %v6486_v32 = vsel %vm5778_vm14, %v6470_v31, 0.0  ;;  %v5868_v35 = vsel %vm5863_vm4, %v5851_v48, %v10998_v20  ;;  %v6472_v34 = vsel %vm12247_vm2, %v6456_v27, %v10781_v26 }
 0x451   :  { %v5883_v52 = vsel %vm5880_vm3, %v5866_v0, %v5599_v61  ;;  %v5852_v50 = vsel %vm5846_vm5, %v5835_v21, %v12258_v19  ;;  %v5820_v15 = vsel %vm5812_vm1, %v5803_v14, %v12259_v22  ;;  %v7253_v1 = vrot.slane %v6486_v32, 7 }
 0x452   :  { %v11152_v49 = vpop.permute.xlu2 %5923  ;;  %v6563_v38 = vsel %vm11846_vm0, %v5883_v52, %v7250_v30  ;;  %v5869_v20 = vsel %vm5863_vm4, %v5852_v50, %v10888_v29  ;;  %v6189_v41 = vrot.slane %v12190_v40, 1  ;;  %v6488_v51 = vsel %vm5778_vm14, %v6472_v34, 0.0  ;;  %v12261_v29 = vld [vmem:[#allocation164_spill] sm:$0xff] }
 0x453   :  { %6165 = vrot.lane.b32.xlu0 %v10668_v63, %s7495_s30  ;;  %6581 = vst [vmem:[#allocation1 + $0x2] ss:$4 sm:$0xff] %v6563_v38  ;;  %v5837_v2 = vsel %vm5829_vm13, %v5820_v15, %v12260_v58  ;;  %v7255_v59 = vrot.slane %v6488_v51, 7  ;;  %v12262_v0 = vrot.slane %v10597_v5, 1  ;;  %v12263_v25 = vrot.slane %v12125_v60, 1 }
 0x454   :  { %v5854_v16 = vsel %vm5846_vm5, %v5837_v2, %v12261_v29  ;;  %v12264_v4 = vrot.slane %v9985_v28, 1  ;;  %v6190_v43 = vrot.slane %v10882_v44, 1  ;;  %v6192_v55 = vrot.slane %v11024_v18, 1 }
 0x455   :  { %v5603_v56 = vpop.permute.xlu0 %5602  ;;  %v5871_v42 = vsel %vm5863_vm4, %v5854_v16, %v11071_v10  ;;  %v6191_v10 = vrot.slane %v12196_v47, 1  ;;  %v12265_v45 = vrot.slane %v12125_v60, 2  ;;  %v12266_v14 = vrot.slane %v10668_v63, 1 }
 0x456   :  { %v5885_v6 = vsel %vm5880_vm3, %v5868_v35, %v5603_v56  ;;  %6167 = vrot.lane.b32.xlu1 %v11024_v18, %s7495_s30  ;;  %v6246_v34 = vrot.slane %v10882_v44, 2  ;;  %v6362_v15 = vsel %vm5642_vm6, %v12125_v60, %v11152_v49  ;;  %vm12268_vm9 = vcmask 195584  }
 0x457   :  { %v6565_v53 = vsel %vm11846_vm0, %v5885_v6, %v7252_v9  ;;  %v12267_v6 = vrot.slane %v10597_v5, 2  ;;  %v12269_v49 = vrot.slane %v10668_v63, 2  ;;  %v12270_v29 = vrot.slane %v9985_v28, 2  ;;  %vm12271_vm8 = vmmov %vm12268_vm9 }
 0x458   :  { %6163 = vrot.lane.b32.xlu2 %v12196_v47, %s7495_s30  ;;  %6585 = vst [vmem:[#allocation1 + $0x20] ss:$4 sm:$0xff] %v6565_v53  ;;  %v5605_v37 = vpop.permute.xlu1 %5604  ;;  %v6245_v53 = vrot.slane %v12190_v40, 2  ;;  %vm12273_vm2 = vmmov %vm12271_vm8 }
 0x459   :  { %v5886_v26 = vsel %vm5880_vm3, %v5869_v20, %v5605_v37  ;;  %v6247_v20 = vrot.slane %v12196_v47, 2 }
 0x45a   :  { %v11188_v46 = vpop.permute.xlu2 %5929  ;;  %v6566_v7 = vsel %vm11846_vm0, %v5886_v26, %v7253_v1  ;;  %v6592_v12 = vld.sshfl [vmem:[#allocation1] sm:$0xff pattern:$0x73625140]  ;;  %v6593_v52 = vld.sshfl [vmem:[#allocation1 + $0x8] sm:$0xff pattern:$0x73625140] }
 0x45b   :  { %6211 = vrot.lane.b32.xlu0 %v6189_v41, %s7496_s10  ;;  %6587 = vst [vmem:[#allocation1 + $0x21] ss:$4 sm:$0xff] %v6566_v7  ;;  %v6365_v2 = vsel %vm5642_vm6, %v9886_v3, %v11188_v46 }
 0x45d   :  { %v5609_v33 = vpop.permute.xlu0 %5608 }
 0x45e   :  { %v5888_v30 = vsel %vm5880_vm3, %v5871_v42, %v5609_v33  ;;  %6213 = vrot.lane.b32.xlu1 %v12262_v0, %s7496_s10  ;;  %v6301_v0 = vrot.slane %v12190_v40, 3 }
 0x45f   :  { %v6568_v61 = vsel %vm11846_vm0, %v5888_v30, %v7255_v59  ;;  %v12272_v30 = vrot.slane %v12125_v60, 3  ;;  %vm12278_vm0 = vcmask 261120  }
 0x460   :  { %6209 = vrot.lane.b32.xlu2 %v12263_v25, %s7496_s10  ;;  %6591 = vst [vmem:[#allocation1 + $0x23] ss:$4 sm:$0xff] %v6568_v61  ;;  %v5922_v23 = vpop.permute.xlu1 %5921  ;;  %v6248_v25 = vrot.slane %v11024_v18, 2 }
 0x461   :  { %v6361_v19 = vsel %vm5642_vm6, %v9365_v36, %v5922_v23 }
 0x462   :  { %v5936_v11 = vpop.permute.xlu2 %5935 }
 0x463   :  { %6217 = vrot.lane.b32.xlu0 %v12264_v4, %s7496_s10  ;;  %v6368_v4 = vsel %vm5642_vm6, %v10668_v63, %v5936_v11  ;;  %v12276_v11 = vrot.slane %v10597_v5, 3 }
 0x465   :  { %v5926_v8 = vpop.permute.xlu0 %5925 }
 0x466   :  { %6219 = vrot.lane.b32.xlu1 %v6191_v10, %s7496_s10  ;;  %v6363_v38 = vsel %vm5642_vm6, %v10136_v17, %v5926_v8 }
 0x467   :  { %v6594_v54 = vld.sshfl [vmem:[#allocation1 + $0x20] sm:$0xff pattern:$0x73625140]  ;;  %v6595_v31 = vld.sshfl [vmem:[#allocation1 + $0x28] sm:$0xff pattern:$0x73625140] }
 0x468   :  { %6215 = vrot.lane.b32.xlu2 %v6190_v43, %s7496_s10  ;;  %v6616_v62 = vpack.c.bf16 %v6594_v54, %v6592_v12  ;;  %v6617_v57 = vpack.c.bf16 %v6595_v31, %v6593_v52  ;;  %v5928_v27 = vpop.permute.xlu1 %5927  ;;  %v6302_v43 = vrot.slane %v10882_v44, 3  ;;  %v12275_v31 = vrot.slane %v9985_v28, 3 }
 0x469   :  { %v6364_v51 = vsel %vm5642_vm6, %v10597_v5, %v5928_v27  ;;  %v12279_v27 = vrot.slane %v10668_v63, 3 }
 0x46a   :  { %v5982_v21 = vpop.permute.xlu2 %5981  ;;  %6760 = vmatmul.bf16.vlgmr.msrb.gmra.mxu1 %v6616_v62  ;;  %6779 = vmatmul.bf16.vlgmr.msrb.gmra.mxu2 %v6617_v57 }
 0x46b   :  { %v6379_v13 = vsel %vm5659_vm7, %v6363_v38, %v5982_v21  ;;  %6223 = vrot.lane.b32.xlu0 %v6192_v55, %s7496_s10  ;;  %v6304_v55 = vrot.slane %v11024_v18, 3 }
 0x46d   :  { %v5932_v48 = vpop.permute.xlu0 %5931 }
 0x46e   :  { %6265 = vrot.lane.b32.xlu1 %v12265_v45, %s7499_s21  ;;  %v6366_v9 = vsel %vm5642_vm6, %v9985_v28, %v5932_v48  ;;  %v6303_v48 = vrot.slane %v12196_v47, 3  ;;  %v12283_v47 = vld [vmem:[#allocation161_spill] sm:$0xff] }
 0x470   :  { %6221 = vrot.lane.b32.xlu2 %v12266_v14, %s7496_s10  ;;  %v5934_v32 = vpop.permute.xlu1 %5933 }
 0x471   :  { %v6367_v61 = vsel %vm5642_vm6, %v10325_v24, %v5934_v32 }
 0x472   :  { %v5988_v35 = vpop.permute.xlu2 %5987 }
 0x473   :  { %v6382_v56 = vsel %vm5659_vm7, %v6366_v9, %v5988_v35  ;;  %6269 = vrot.lane.b32.xlu0 %v12267_v6, %s7499_s21  ;;  %v12281_v35 = vrot.slane %v9365_v36, 3 }
 0x475   :  { %v5978_v50 = vpop.permute.xlu0 %5977 }
 0x476   :  { %v6377_v22 = vsel %vm5659_vm7, %v6361_v19, %v5978_v50  ;;  %6271 = vrot.lane.b32.xlu1 %v6246_v34, %s7499_s21  ;;  %v12284_v34 = vrot.slane %v12283_v47, 3  ;;  %v12285_v19 = vld [vmem:[#allocation46_spill] sm:$0xff] }
 0x477   :  { %v12286_v50 = vrot.slane %v12285_v19, 3 }
 0x478   :  { %6267 = vrot.lane.b32.xlu2 %v6245_v53, %s7499_s21  ;;  %v5980_v1 = vpop.permute.xlu1 %5979 }
 0x479   :  { %v6378_v37 = vsel %vm5659_vm7, %v6362_v15, %v5980_v1  ;;  %v12289_v1 = vld [vmem:[#allocation121_spill] sm:$0xff] }
 0x47a   :  { %v6034_v41 = vpop.permute.xlu2 %6033 }
 0x47b   :  { %v6393_v26 = vsel %vm12268_vm9, %v6377_v22, %v6034_v41  ;;  %6275 = vrot.lane.b32.xlu0 %v6247_v20, %s7499_s21  ;;  %vm12274_vm9 = vmmov %vm12273_vm2  ;;  %v12290_v20 = vrot.slane %v12289_v1, 3 }
 0x47d   :  { %v5984_v7 = vpop.permute.xlu0 %5983 }
 0x47e   :  { %v6380_v58 = vsel %vm5659_vm7, %v6364_v51, %v5984_v7  ;;  %6277 = vrot.lane.b32.xlu1 %v12269_v49, %s7499_s21  ;;  %v12291_v51 = vrot.slane %v9886_v3, 3  ;;  %v12292_v7 = vrot.slane %v10136_v17, 3 }
 0x480   :  { %6273 = vrot.lane.b32.xlu2 %v12270_v29, %s7499_s21  ;;  %v5986_v16 = vpop.permute.xlu1 %5985  ;;  %v12294_v29 = vrot.slane %v10325_v24, 3 }
 0x481   :  { %v6381_v59 = vsel %vm5659_vm7, %v6365_v2, %v5986_v16 }
 0x482   :  { %v6040_v42 = vpop.permute.xlu2 %6039 }
 0x483   :  { %v6396_v33 = vsel %vm12271_vm8, %v6380_v58, %v6040_v42  ;;  %6321 = vrot.lane.b32.xlu0 %v12272_v30, %s7497_s11  ;;  %vm12277_vm8 = vmmov %vm12273_vm2  ;;  %v12296_v42 = vrot.slane %v12285_v19, 4  ;;  %v12297_v30 = vld [vmem:[#allocation186_spill] sm:$0xff] }
 0x485   :  { %v5990_v46 = vpop.permute.xlu0 %5989 }
 0x486   :  { %v6383_v23 = vsel %vm5659_vm7, %v6367_v61, %v5990_v46  ;;  %6323 = vrot.lane.b32.xlu1 %v6301_v0, %s7497_s11  ;;  %v12298_v0 = vrot.slane %v12297_v30, 3 }
 0x488   :  { %6279 = vrot.lane.b32.xlu2 %v6248_v25, %s7499_s21  ;;  %v5992_v10 = vpop.permute.xlu1 %5991 }
 0x489   :  { %v6384_v40 = vsel %vm5659_vm7, %v6368_v4, %v5992_v10  ;;  %v7434_v4 = vld [vmem:[%s11737_s5 + $0x38] sm:$0xff]  ;;  %v5535_v10 = vrot.slane %v10136_v17, 4 }
 0x48a   :  { %v6046_v8 = vpop.permute.xlu2 %6045  ;;  %6971 = vmatpush.bf16.msrb.mxu3 %v7434_v4 }
 0x48b   :  { %v6399_v12 = vsel %vm12273_vm2, %v6383_v23, %v6046_v8  ;;  %6327 = vrot.lane.b32.xlu0 %v6302_v43, %s7497_s11  ;;  %v12300_v23 = vrot.slane %v12283_v47, 4 }
 0x48d   :  { %v6036_v52 = vpop.permute.xlu0 %6035 }
 0x48e   :  { %v6394_v54 = vsel %vm12274_vm9, %v6378_v37, %v6036_v52  ;;  %6329 = vrot.lane.b32.xlu1 %v12275_v31, %s7497_s11  ;;  %vm12280_vm9 = vmmov %vm12273_vm2  ;;  %v5536_v52 = vrot.slane %v9886_v3, 4 }
 0x490   :  { %6325 = vrot.lane.b32.xlu2 %v12276_v11, %s7497_s11  ;;  %v6038_v38 = vpop.permute.xlu1 %6037 }
 0x491   :  { %v6395_v44 = vsel %vm12277_vm8, %v6379_v13, %v6038_v38  ;;  %vm12282_vm8 = vmmov %vm12273_vm2 }
 0x492   :  { %v6108_v62 = vpop.permute.xlu2 %6107 }
 0x493   :  { %v6410_v57 = vsel %vm12278_vm0, %v6394_v54, %v6108_v62  ;;  %6333 = vrot.lane.b32.xlu0 %v12279_v27, %s7497_s11  ;;  %v12301_v62 = vrot.slane %v12297_v30, 4  ;;  %v12302_v27 = vrot.slane %v12289_v1, 4 }
 0x495   :  { %v6042_v21 = vpop.permute.xlu0 %6041 }
 0x496   :  { %v6397_v45 = vsel %vm12273_vm2, %v6381_v59, %v6042_v21  ;;  %6335 = vrot.lane.b32.xlu1 %v6304_v55, %s7497_s11  ;;  %vm12287_vm2 = vmmov %vm12278_vm0 }
 0x498   :  { %6331 = vrot.lane.b32.xlu2 %v6303_v48, %s7497_s11  ;;  %v6044_v14 = vpop.permute.xlu1 %6043 }
 0x499   :  { %v6398_v13 = vsel %vm12280_vm9, %v6382_v56, %v6044_v14  ;;  %vm12288_vm9 = vmmov %vm12278_vm0  ;;  %v5537_v14 = vrot.slane %v10325_v24, 4 }
 0x49a   :  { %v6114_v9 = vpop.permute.xlu2 %6113 }
 0x49b   :  { %v6413_v32 = vsel %vm12278_vm0, %v6397_v45, %v6114_v9  ;;  %5500 = vrot.lane.b32.xlu0 %v12281_v35, %s7503_s23 }
 0x49d   :  { %v6048_v18 = vpop.permute.xlu0 %6047 }
 0x49e   :  { %v6400_v6 = vsel %vm12282_vm8, %v6384_v40, %v6048_v18  ;;  %5502 = vrot.lane.b32.xlu1 %v12284_v34, %s7503_s23  ;;  %vm12293_vm8 = vmmov %vm12278_vm0  ;;  %v5534_v40 = vrot.slane %v9365_v36, 4 }
 0x4a0   :  { %5498 = vrot.lane.b32.xlu2 %v12286_v50, %s7503_s23  ;;  %v6106_v53 = vpop.permute.xlu1 %6105 }
 0x4a1   :  { %v6409_v56 = vsel %vm12287_vm2, %v6393_v26, %v6106_v53  ;;  %vm12295_vm2 = vmmov %vm12278_vm0 }
 0x4a2   :  { %v6120_v22 = vpop.permute.xlu2 %6119 }
 0x4a3   :  { %v6416_v15 = vsel %vm12288_vm9, %v6400_v6, %v6120_v22  ;;  %5506 = vrot.lane.b32.xlu0 %v12290_v20, %s7503_s23  ;;  %vm12299_vm9 = vmmov %vm12278_vm0 }
 0x4a5   :  { %v6110_v37 = vpop.permute.xlu0 %6109 }
 0x4a6   :  { %v6411_v41 = vsel %vm12278_vm0, %v6395_v44, %v6110_v37  ;;  %5508 = vrot.lane.b32.xlu1 %v12291_v51, %s7503_s23  ;;  %vm12307_vm0 = vcmask 195584  }
 0x4a8   :  { %5504 = vrot.lane.b32.xlu2 %v12292_v7, %s7503_s23  ;;  %v6112_v58 = vpop.permute.xlu1 %6111 }
 0x4a9   :  { %v6412_v26 = vsel %vm12293_vm8, %v6396_v33, %v6112_v58  ;;  %vm12309_vm8 = vmmov %vm12295_vm2 }
 0x4aa   :  { %v6158_v49 = vpop.permute.xlu2 %6157 }
 0x4ab   :  { %v6427_v2 = vsel %vm5710_vm10, %v6411_v41, %v6158_v49  ;;  %5512 = vrot.lane.b32.xlu0 %v12294_v29, %s7503_s23 }
 0x4ad   :  { %v6116_v16 = vpop.permute.xlu0 %6115 }
 0x4ae   :  { %v6414_v59 = vsel %vm12295_vm2, %v6398_v13, %v6116_v16  ;;  %5554 = vrot.lane.b32.xlu1 %v12296_v42, %s7504_s0  ;;  %vm12319_vm2 = vmmov %vm12307_vm0 }
 0x4b0   :  { %5510 = vrot.lane.b32.xlu2 %v12298_v0, %s7503_s23  ;;  %v6118_v61 = vpop.permute.xlu1 %6117  ;;  %v7432_v0 = vld [vmem:[%s11737_s5 + $0x28] sm:$0xff] }
 0x4b1   :  { %v6415_v33 = vsel %vm12299_vm9, %v6399_v12, %v6118_v61  ;;  %vm12324_vm9 = vmmov %vm12309_vm8 }
 0x4b2   :  { %v6164_v46 = vpop.permute.xlu2 %6163 }
 0x4b3   :  { %v6430_v25 = vsel %vm5710_vm10, %v6414_v59, %v6164_v46  ;;  %5558 = vrot.lane.b32.xlu0 %v12300_v23, %s7504_s0 }
 0x4b5   :  { %v6154_v43 = vpop.permute.xlu0 %6153 }
 0x4b6   :  { %v6425_v8 = vsel %vm5710_vm10, %v6409_v56, %v6154_v43  ;;  %5560 = vrot.lane.b32.xlu1 %v5535_v10, %s7504_s0  ;;  %v12303_v10 = vld [vmem:[#allocation180_spill] sm:$0xff]  ;;  %v12304_v43 = vld [vmem:[#allocation130_spill] sm:$0xff] }
 0x4b8   :  { %5556 = vrot.lane.b32.xlu2 %v5534_v40, %s7504_s0  ;;  %v6156_v12 = vpop.permute.xlu1 %6155  ;;  %v5653_v40 = vsel %vm5642_vm6, %v12304_v43, %v12303_v10  ;;  %v12330_v43 = vld [vmem:[#allocation66_spill] sm:$0xff] }
 0x4b9   :  { %v6426_v54 = vsel %vm5710_vm10, %v6410_v57, %v6156_v12  ;;  %v12305_v12 = vld [vmem:[#allocation163_spill] sm:$0xff] }
 0x4ba   :  { %v6210_v31 = vpop.permute.xlu2 %6209 }
 0x4bb   :  { %v6441_v11 = vsel %vm5727_vm11, %v6425_v8, %v6210_v31  ;;  %5564 = vrot.lane.b32.xlu0 %v5536_v52, %s7504_s0  ;;  %v5670_v52 = vsel %vm5659_vm7, %v5653_v40, %v12305_v12  ;;  %v12331_v12 = vld [vmem:[#allocation153_spill] sm:$0xff] }
 0x4bd   :  { %v6160_v38 = vpop.permute.xlu0 %6159 }
 0x4be   :  { %v6428_v44 = vsel %vm5710_vm10, %v6412_v26, %v6160_v38  ;;  %5566 = vrot.lane.b32.xlu1 %v12301_v62, %s7504_s0 }
 0x4c0   :  { %5562 = vrot.lane.b32.xlu2 %v12302_v27, %s7504_s0  ;;  %v6162_v55 = vpop.permute.xlu1 %6161  ;;  %v12310_v27 = vld [vmem:[#allocation150_spill] sm:$0xff] }
 0x4c1   :  { %v6429_v21 = vsel %vm5710_vm10, %v6413_v32, %v6162_v55  ;;  %v12311_v55 = vld [vmem:[#allocation102_spill] sm:$0xff] }
 0x4c2   :  { %v6216_v57 = vpop.permute.xlu2 %6215 }
 0x4c3   :  { %v6444_v48 = vsel %vm5727_vm11, %v6428_v44, %v6216_v57  ;;  %5610 = vrot.lane.b32.xlu0 %v9365_v36, %s7505_s2  ;;  %v12308_v44 = vld [vmem:[#allocation183_spill] sm:$0xff] }
 0x4c5   :  { %v6166_v45 = vpop.permute.xlu0 %6165 }
 0x4c6   :  { %v6431_v13 = vsel %vm5710_vm10, %v6415_v33, %v6166_v45  ;;  %5612 = vrot.lane.b32.xlu1 %v12125_v60, %s7505_s2 }
 0x4c8   :  { %5568 = vrot.lane.b32.xlu2 %v5537_v14, %s7504_s0  ;;  %v6168_v9 = vpop.permute.xlu1 %6167  ;;  %v12313_v14 = vld [vmem:[#allocation138_spill] sm:$0xff] }
 0x4c9   :  { %v6432_v35 = vsel %vm5710_vm10, %v6416_v15, %v6168_v9  ;;  %v12314_v9 = vld [vmem:[#allocation195_spill] sm:$0xff] }
 0x4ca   :  { %v6222_v32 = vpop.permute.xlu2 %6221 }
 0x4cb   :  { %v6447_v18 = vsel %vm5727_vm11, %v6431_v13, %v6222_v32  ;;  %5616 = vrot.lane.b32.xlu0 %v10597_v5, %s7505_s2 }
 0x4cd   :  { %v6212_v36 = vpop.permute.xlu0 %6211 }
 0x4ce   :  { %v6442_v6 = vsel %vm5727_vm11, %v6426_v54, %v6212_v36  ;;  %5618 = vrot.lane.b32.xlu1 %v9886_v3, %s7505_s2 }
 0x4d0   :  { %5614 = vrot.lane.b32.xlu2 %v10136_v17, %s7505_s2  ;;  %v6214_v60 = vpop.permute.xlu1 %6213 }
 0x4d1   :  { %v6443_v47 = vsel %vm5727_vm11, %v6427_v2, %v6214_v60  ;;  %v12316_v60 = vld [vmem:[#allocation78_spill] sm:$0xff] }
 0x4d2   :  { %v6268_v34 = vpop.permute.xlu2 %6267 }
 0x4d3   :  { %v11371_v19 = vsel %vm5744_vm12, %v6442_v6, %v6268_v34  ;;  %5622 = vrot.lane.b32.xlu0 %v10325_v24, %s7505_s2  ;;  %v7433_v24 = vld [vmem:[%s11737_s5 + $0x30] sm:$0xff] }
 0x4d4   :  { %6972 = vmatpush.bf16.msrb.mxu3 %v7433_v24  ;;  %v12322_v24 = vld [vmem:[#allocation79_spill] sm:$0xff] }
 0x4d5   :  { %v6218_v5 = vpop.permute.xlu0 %6217 }
 0x4d6   :  { %v6445_v50 = vsel %vm5727_vm11, %v6429_v21, %v6218_v5  ;;  %5624 = vrot.lane.b32.xlu1 %v10668_v63, %s7505_s2  ;;  %v5656_v21 = vsel %vm5642_vm6, %v12311_v55, %v12310_v27  ;;  %v12318_v5 = vld [vmem:[#allocation151_spill] sm:$0xff]  ;;  %v12334_v27 = vld [vmem:[#allocation201_spill] sm:$0xff] }
 0x4d7   :  { %v5673_v13 = vsel %vm5659_vm7, %v5656_v21, %v12313_v14 }
 0x4d8   :  { %5620 = vrot.lane.b32.xlu2 %v9985_v28, %s7505_s2  ;;  %v6220_v3 = vpop.permute.xlu1 %6219  ;;  %6973 = vmatpush.bf16.msrb.mxu3 %v7432_v0  ;;  %v12328_v0 = vld [vmem:[#allocation69_spill] sm:$0xff] }
 0x4d9   :  { %v6446_v17 = vsel %vm5727_vm11, %v6430_v25, %v6220_v3  ;;  %v12320_v3 = vld [vmem:[#allocation57_spill] sm:$0xff] }
 0x4da   :  { %v6274_v53 = vpop.permute.xlu2 %6273 }
 0x4db   :  { %v11382_v56 = vsel %vm5744_vm12, %v6445_v50, %v6274_v53  ;;  %v5690_v50 = vsel %vm12319_vm2, %v5673_v13, %v12318_v5  ;;  %v12336_v13 = vld [vmem:[#allocation169_spill] sm:$0xff] }
 0x4dd   :  { %v6224_v22 = vpop.permute.xlu0 %6223 }
 0x4de   :  { %v6448_v15 = vsel %vm5727_vm11, %v6432_v35, %v6224_v22 }
 0x4e0   :  { %v6266_v1 = vpop.permute.xlu1 %6265 }
 0x4e1   :  { %v11389_v63 = vsel %vm5744_vm12, %v6441_v11, %v6266_v1  ;;  %v12306_v11 = vld [vmem:[#allocation174_spill] sm:$0xff] }
 0x4e2   :  { %v6280_v28 = vpop.permute.xlu2 %6279  ;;  %v5687_v38 = vsel %vm12307_vm0, %v5670_v52, %v12306_v11  ;;  %vm12326_vm0 = vcmask 523264   ;;  %v12332_v11 = vld [vmem:[#allocation197_spill] sm:$0xff] }
 0x4e3   :  { %v11392_v20 = vsel %vm5744_vm12, %v6448_v15, %v6280_v28  ;;  %v5704_v62 = vsel %vm12309_vm8, %v5687_v38, %v12308_v44  ;;  %v12323_v15 = vld [vmem:[#allocation154_spill] sm:$0xff]  ;;  %vm12329_vm8 = vmmov %vm12319_vm2  ;;  %v12333_v44 = vld [vmem:[#allocation167_spill] sm:$0xff] }
 0x4e4   :  { %v5707_v1 = vsel %vm12324_vm9, %v5690_v50, %v12323_v15  ;;  %v12325_v28 = vld [vmem:[#allocation194_spill] sm:$0xff]  ;;  %v12341_v50 = vld [vmem:[#allocation101_spill] sm:$0xff] }
 0x4e5   :  { %v6270_v37 = vpop.permute.xlu0 %6269  ;;  %v5724_v52 = vsel %vm5710_vm10, %v5707_v1, %v12331_v12  ;;  %v12345_v1 = vld [vmem:[#allocation156_spill] sm:$0xff] }
 0x4e6   :  { %v11395_v41 = vsel %vm5744_vm12, %v6443_v47, %v6270_v37  ;;  %v12317_v47 = vld [vmem:[#allocation31_spill] sm:$0xff] }
 0x4e7   :  { %v5652_v34 = vsel %vm5642_vm6, %v12317_v47, %v12316_v60 }
 0x4e8   :  { %v6272_v51 = vpop.permute.xlu1 %6271  ;;  %v5669_v22 = vsel %vm5659_vm7, %v5652_v34, %v12322_v24  ;;  %v12340_v34 = vld [vmem:[#allocation82_spill] sm:$0xff] }
 0x4e9   :  { %v11398_v7 = vsel %vm5744_vm12, %v6444_v48, %v6272_v51  ;;  %v12312_v48 = vld [vmem:[#allocation184_spill] sm:$0xff]  ;;  %v12327_v51 = vld [vmem:[#allocation67_spill] sm:$0xff]  ;;  %v5686_v40 = vsel %vm12319_vm2, %v5669_v22, %v12330_v43  ;;  %v12343_v24 = vld [vmem:[#allocation126_spill] sm:$0xff] }
 0x4ea   :  { %v6326_v58 = vpop.permute.xlu2 %6325  ;;  %v5721_v45 = vsel %vm5710_vm10, %v5704_v62, %v12312_v48  ;;  %v5741_v62 = vsel %vm5727_vm11, %v5724_v52, %v12333_v44  ;;  %v7431_v48 = vld [vmem:[%s11737_s5 + $0x20] sm:$0xff]  ;;  %v12344_v22 = vld [vmem:[#allocation83_spill] sm:$0xff]  ;;  %v12353_v44 = vld [vmem:[#allocation196_spill] sm:$0xff] }
 0x4eb   :  { %v5738_v35 = vsel %vm5727_vm11, %v5721_v45, %v12314_v9  ;;  %v12335_v45 = vld [vmem:[#allocation61_spill] sm:$0xff]  ;;  %v5758_v9 = vsel %vm5744_vm12, %v5741_v62, %v12336_v13  ;;  %6974 = vmatpush.bf16.msrb.mxu3 %v7431_v48  ;;  %v5655_v15 = vsel %vm5642_vm6, %v12344_v22, %v12343_v24  ;;  %v12356_v48 = vld [vmem:[#allocation87_spill] sm:$0xff] }
 0x4ed   :  { %v6276_v26 = vpop.permute.xlu0 %6275 }
 0x4ee   :  { %v11401_v49 = vsel %vm5744_vm12, %v6446_v17, %v6276_v26  ;;  %v12321_v17 = vld [vmem:[#allocation20_spill] sm:$0xff] }
 0x4ef   :  { %v5651_v53 = vsel %vm5642_vm6, %v12321_v17, %v12320_v3  ;;  %v12342_v17 = vld [vmem:[#allocation202_spill] sm:$0xff] }
 0x4f0   :  { %v6278_v2 = vpop.permute.xlu1 %6277  ;;  %v5668_v26 = vsel %vm5659_vm7, %v5651_v53, %v12327_v51  ;;  %v12348_v51 = vld [vmem:[#allocation152_spill] sm:$0xff] }
 0x4f1   :  { %v11404_v29 = vsel %vm5744_vm12, %v6447_v18, %v6278_v2  ;;  %v12315_v18 = vld [vmem:[#allocation198_spill] sm:$0xff]  ;;  %v5685_v10 = vsel %vm12329_vm8, %v5668_v26, %v12328_v0  ;;  %vm12346_vm8 = vcmask 523264  }
 0x4f2   :  { %v11406_v16 = vpop.permute.xlu2 %6331  ;;  %v5755_v36 = vsel %vm5744_vm12, %v5738_v35, %v12315_v18  ;;  %v5702_v14 = vsel %vm12324_vm9, %v5685_v10, %v12335_v45  ;;  %v12337_v35 = vld [vmem:[#allocation75_spill] sm:$0xff]  ;;  %vm12349_vm2 = vmmov %vm12346_vm8  ;;  %v12350_v10 = vld [vmem:[#allocation132_spill] sm:$0xff] }
 0x4f3   :  { %v5772_v37 = vsel %vm12326_vm0, %v5755_v36, %v12325_v28  ;;  %v5719_v18 = vsel %vm5710_vm10, %v5702_v14, %v12337_v35  ;;  %v12338_v36 = vld [vmem:[#allocation81_spill] sm:$0xff]  ;;  %vm12339_vm0 = vmmov %vm12324_vm9  ;;  %v5775_v28 = vsel %vm12346_vm8, %v5758_v9, %v12345_v1  ;;  %v6475_v0 = vsel %vm12349_vm2, %v11395_v41, %v6326_v58  ;;  %v12357_v41 = vld [vmem:[#allocation170_spill] sm:$0xff] }
 0x4f4   :  { %v5789_v38 = vsel %vm5778_vm14, %v5772_v37, %v12332_v11  ;;  %v5703_v60 = vsel %vm12339_vm0, %v5686_v40, %v12338_v36  ;;  %v5736_v5 = vsel %vm5727_vm11, %v5719_v18, %v12340_v34  ;;  %v12347_v37 = vld [vmem:[#allocation188_spill] sm:$0xff]  ;;  %v5672_v43 = vsel %vm5659_vm7, %v5655_v15, %v12350_v10  ;;  %v12352_v11 = vld [vmem:[#allocation70_spill] sm:$0xff]  ;;  %v12360_v18 = vld [vmem:[#allocation177_spill] sm:$0xff] }
 0x4f5   :  { %v11408_v59 = vpop.permute.xlu0 %6321  ;;  %v5806_v55 = vsel %vm5795_vm15, %v5789_v38, %v12334_v27  ;;  %v5720_v3 = vsel %vm5710_vm10, %v5703_v60, %v12341_v50  ;;  %v5654_v26 = vsel %vm5642_vm6, %v12348_v51, %v12347_v37  ;;  %v12351_v40 = vld [vmem:[#allocation192_spill] sm:$0xff]  ;;  %v5753_v38 = vsel %vm5744_vm12, %v5736_v5, %v12352_v11  ;;  %v12355_v27 = vld [vmem:[#allocation206_spill] sm:$0xff]  ;;  %v12361_v5 = vld [vmem:[#allocation191_spill] sm:$0xff] }
 0x4f6   :  { %v5823_v53 = vsel %vm5812_vm1, %v5806_v55, %v12342_v17  ;;  %v5671_v12 = vsel %vm5659_vm7, %v5654_v26, %v12351_v40  ;;  %vm12354_vm9 = vcmask 195584   ;;  %v5737_v45 = vsel %vm5727_vm11, %v5720_v3, %v12356_v48  ;;  %v12358_v9 = vld [vmem:[#allocation116_spill] sm:$0xff]  ;;  %v12362_v3 = vld [vmem:[#allocation85_spill] sm:$0xff]  ;;  %vm12363_vm8 = vmmov %vm12349_vm2 }
 0x4f7   :  { %v5688_v62 = vsel %vm12354_vm9, %v5671_v12, %v12353_v44  ;;  %v5840_v55 = vsel %vm5829_vm13, %v5823_v53, %v12355_v27  ;;  %v5792_v58 = vsel %vm5778_vm14, %v5775_v28, %v12357_v41  ;;  %v6491_v14 = vsel %vm5778_vm14, %v6475_v0, 0.0  ;;  %vm12359_vm6 = vmmov %vm12354_vm9  ;;  %v12364_v53 = vld [vmem:[#allocation104_spill] sm:$0xff]  ;;  %v12365_v15 = vld [vmem:[#allocation105_spill] sm:$0xff] }
 0x4f8   :  { %v11410_v42 = vpop.permute.xlu1 %6323  ;;  %v5689_v35 = vsel %vm12359_vm6, %v5672_v43, %v12358_v9  ;;  %v5809_v36 = vsel %vm5795_vm15, %v5792_v58, %v12360_v18  ;;  %v5705_v50 = vsel %vm12339_vm0, %v5688_v62, %v12361_v5  ;;  %v5770_v17 = vsel %vm12363_vm8, %v5753_v38, %v12362_v3  ;;  %v12366_v28 = vld [vmem:[#allocation129_spill] sm:$0xff]  ;;  %vm12367_vm9 = vmmov %vm12339_vm0  ;;  %v12368_v51 = vld [vmem:[#allocation166_spill] sm:$0xff] }
 0x4f9   :  { %v5754_v24 = vsel %vm5744_vm12, %v5737_v45, %v12364_v53  ;;  %v5706_v37 = vsel %vm12367_vm9, %v5689_v35, %v12366_v28  ;;  %v5826_v26 = vsel %vm5812_vm1, %v5809_v36, %v12368_v51  ;;  %v12369_v10 = vld [vmem:[#allocation148_spill] sm:$0xff]  ;;  %vm12371_vm6 = vmmov %vm12349_vm2  ;;  %vm12372_vm0 = vcmask 1041408   ;;  %v12373_v38 = vld [vmem:[#allocation86_spill] sm:$0xff] }
 0x4fa   :  { %v11412_v30 = vpop.permute.xlu2 %5498  ;;  %v5771_v1 = vsel %vm12349_vm2, %v5754_v24, %v12365_v15  ;;  %v5723_v43 = vsel %vm5710_vm10, %v5706_v37, %v12369_v10  ;;  %v12370_v40 = vld [vmem:[#allocation200_spill] sm:$0xff]  ;;  %v5787_v44 = vsel %vm5778_vm14, %v5770_v17, %v12373_v38  ;;  %v12375_v48 = vld [vmem:[#allocation89_spill] sm:$0xff]  ;;  %v12381_v5 = vld [vmem:[#allocation199_spill] sm:$0xff] }
 0x4fb   :  { %v5722_v12 = vsel %vm5710_vm10, %v5705_v50, %v12370_v40  ;;  %v12374_v62 = vld [vmem:[#allocation204_spill] sm:$0xff]  ;;  %v5788_v45 = vsel %vm5778_vm14, %v5771_v1, %v12375_v48  ;;  %vm12378_vm10 = vmmov %vm12349_vm2  ;;  %v12382_v53 = vld [vmem:[#allocation107_spill] sm:$0xff] }
 0x4fc   :  { %v5739_v27 = vsel %vm5727_vm11, %v5722_v12, %v12374_v62  ;;  %v12376_v41 = vld [vmem:[#allocation176_spill] sm:$0xff]  ;;  %vm12388_vm8 = vmmov %vm12349_vm2  ;;  %v12389_v10 = vld [vmem:[#allocation203_spill] sm:$0xff] }
 0x4fd   :  { %v11417_v61 = vpop.permute.xlu0 %6327  ;;  %v5843_v58 = vsel %vm5829_vm13, %v5826_v26, %v12376_v41  ;;  %v12379_v35 = vld [vmem:[#allocation84_spill] sm:$0xff]  ;;  %v5756_v50 = vsel %vm5744_vm12, %v5739_v27, %v12381_v5  ;;  %v12387_v26 = vld [vmem:[#allocation158_spill] sm:$0xff]  ;;  %v12390_v12 = vld [vmem:[#allocation207_spill] sm:$0xff] }
 0x4fe   :  { %v5804_v18 = vsel %vm5795_vm15, %v5787_v44, %v12379_v35  ;;  %v12380_v36 = vld [vmem:[#allocation124_spill] sm:$0xff]  ;;  %v12391_v38 = vld [vmem:[#allocation118_spill] sm:$0xff]  ;;  %vm12395_vm9 = vmmov %vm12349_vm2 }
 0x4ff   :  { %v5821_v24 = vsel %vm5812_vm1, %v5804_v18, %v12382_v53  ;;  %v12386_v37 = vld [vmem:[#allocation108_spill] sm:$0xff]  ;;  %v12393_v41 = vld [vmem:[#allocation142_spill] sm:$0xff] }
 0x500   :  { %v11419_v33 = vpop.permute.xlu1 %6329  ;;  %v5838_v51 = vsel %vm5829_vm13, %v5821_v24, %v12386_v37 }
 0x502   :  { %v11421_v46 = vpop.permute.xlu2 %5504 }
 0x505   :  { %v11423_v25 = vpop.permute.xlu0 %6333 }
 0x508   :  { %v11425_v23 = vpop.permute.xlu1 %6335 }
 0x50a   :  { %v11427_v4 = vpop.permute.xlu2 %5510 }
 0x50d   :  { %v11432_v8 = vpop.permute.xlu0 %5500 }
 0x510   :  { %v5503_v54 = vpop.permute.xlu1 %5502 }
 0x511   :  { %v5857_v13 = vsel %vm5846_vm5, %v5840_v55, %v5503_v54  ;;  %v7258_v54 = vrot.slane %v6491_v14, 7  ;;  %v12377_v14 = vld [vmem:[#allocation140_spill] sm:$0xff] }
 0x512   :  { %v11436_v31 = vpop.permute.xlu2 %5556 }
 0x515   :  { %v11445_v57 = vpop.permute.xlu0 %5506 }
 0x518   :  { %v11453_v32 = vpop.permute.xlu1 %5508 }
 0x519   :  { %v5860_v9 = vsel %vm5846_vm5, %v5843_v58, %v11453_v32  ;;  %v12384_v32 = vld [vmem:[#allocation155_spill] sm:$0xff] }
 0x51a   :  { %v11457_v6 = vpop.permute.xlu2 %5562 }
 0x51d   :  { %v11475_v2 = vpop.permute.xlu0 %5512 }
 0x520   :  { %v11489_v21 = vpop.permute.xlu1 %5554 }
 0x522   :  { %v11502_v47 = vpop.permute.xlu2 %5568 }
 0x525   :  { %v5559_v52 = vpop.permute.xlu0 %5558 }
 0x526   :  { %v5874_v60 = vsel %vm5863_vm4, %v5857_v13, %v5559_v52  ;;  %v6478_v52 = vsel %vm12371_vm6, %v11401_v49, %v11406_v16  ;;  %v5740_v13 = vsel %vm5727_vm11, %v5723_v43, %v12377_v14  ;;  %v6473_v16 = vsel %vm12378_vm10, %v11389_v63, %v11408_v59  ;;  %v12383_v63 = vld [vmem:[#allocation135_spill] sm:$0xff]  ;;  %vm12385_vm11 = vmmov %vm12349_vm2  ;;  %v12394_v14 = vld [vmem:[#allocation205_spill] sm:$0xff] }
 0x527   :  { %v6494_v49 = vsel %vm5778_vm14, %v6478_v52, 0.0  ;;  %v6489_v15 = vsel %vm5778_vm14, %v6473_v16, 0.0  ;;  %v6474_v1 = vsel %vm12385_vm11, %v11371_v19, %v11410_v42  ;;  %v5773_v43 = vsel %vm12349_vm2, %v5756_v50, %v12389_v10  ;;  %vm12396_vm6 = vmmov %vm12372_vm0  ;;  %v12397_v16 = vld [vmem:[#allocation165_spill] sm:$0xff] }
 0x528   :  { %v11541_v34 = vpop.permute.xlu1 %5560  ;;  %v5790_v52 = vsel %vm5778_vm14, %v5773_v43, %v12390_v12  ;;  %v7256_v44 = vrot.slane %v6489_v15, 7  ;;  %v6490_v62 = vsel %vm5778_vm14, %v6474_v1, 0.0  ;;  %vm12405_vm10 = vmmov %vm12396_vm6  ;;  %v12408_v12 = vld [vmem:[#allocation210_spill] sm:$0xff] }
 0x529   :  { %v7257_v35 = vrot.slane %v6490_v62, 7 }
 0x52a   :  { %v5615_v22 = vpop.permute.xlu2 %5614 }
 0x52b   :  { %v5891_v0 = vsel %vm5880_vm3, %v5874_v60, %v5615_v22  ;;  %v5805_v60 = vsel %vm5795_vm15, %v5788_v45, %v12380_v36  ;;  %v7261_v22 = vrot.slane %v6494_v49, 7  ;;  %v7429_v49 = vld [vmem:[%s11737_s5 + $0x10] sm:$0xff] }
 0x52c   :  { %v6571_v11 = vsel %vm12372_vm0, %v5891_v0, %v7258_v54  ;;  %v5822_v59 = vsel %vm5812_vm1, %v5805_v60, %v12383_v63  ;;  %v5757_v54 = vsel %vm5744_vm12, %v5740_v13, %v12384_v32  ;;  %vm12392_vm12 = vmmov %vm12372_vm0  ;;  %v5807_v13 = vsel %vm5795_vm15, %v5790_v52, %v12394_v14  ;;  %v12398_v60 = vld [vmem:[#allocation172_spill] sm:$0xff]  ;;  %v12402_v63 = vld [vmem:[#allocation209_spill] sm:$0xff]  ;;  %v6780_v14 = vpop.f32.mrf.mxu2 }
 0x52d   :  { %6598 = vst [vmem:[#allocation1 + $0x2] ss:$4 sm:$0xff] %v6571_v11  ;;  %v5565_v55 = vpop.permute.xlu0 %5564  ;;  %v5774_v0 = vsel %vm12388_vm8, %v5757_v54, %v12387_v26  ;;  %v5855_v11 = vsel %vm5846_vm5, %v5838_v51, %v11412_v30  ;;  %v5839_v19 = vsel %vm5829_vm13, %v5822_v59, %v12391_v38  ;;  %v7430_v30 = vld [vmem:[%s11737_s5 + $0x18] sm:$0xff]  ;;  %vm12400_vm0 = vmmov %vm12349_vm2  ;;  %v7428_v59 = vld [vmem:[%s11737_s5 + $0x8] sm:$0xff] }
 0x52e   :  { %v5877_v3 = vsel %vm5863_vm4, %v5860_v9, %v5565_v55  ;;  %v5856_v27 = vsel %vm5846_vm5, %v5839_v19, %v11432_v8  ;;  %v5872_v55 = vsel %vm5863_vm4, %v5855_v11, %v11489_v21  ;;  %v5791_v58 = vsel %vm5778_vm14, %v5774_v0, %v12393_v41  ;;  %6975 = vmatpush.bf16.msrb.mxu3 %v7430_v30  ;;  %v12403_v54 = vld [vmem:[#allocation159_spill] sm:$0xff]  ;;  %v7427_v26 = vld [vmem:[%s11737_s5] sm:$0xff]  ;;  %vm12406_vm11 = vmmov %vm12400_vm0 }
 0x52f   :  { %v6476_v8 = vsel %vm12395_vm9, %v11398_v7, %v11417_v61  ;;  %v5808_v9 = vsel %vm5795_vm15, %v5791_v58, %v12397_v16  ;;  %v5873_v18 = vsel %vm5863_vm4, %v5856_v27, %v11436_v31  ;;  %v12399_v61 = vld [vmem:[#allocation208_spill] sm:$0xff]  ;;  %v6477_v53 = vsel %vm12400_vm0, %v11382_v56, %v11419_v33  ;;  %vm12401_vm15 = vmmov %vm12396_vm6  ;;  %v6761_v58 = vpop.f32.mrf.mxu1 }
 0x530   :  { %v11587_v17 = vpop.permute.xlu1 %5566  ;;  %v5825_v5 = vsel %vm5812_vm1, %v5808_v9, %v12398_v60  ;;  %v5824_v50 = vsel %vm5812_vm1, %v5807_v13, %v12399_v61  ;;  %v6493_v56 = vsel %vm5778_vm14, %v6477_v53, 0.0  ;;  %vm12404_vm1 = vmmov %vm12400_vm0  ;;  %vm6896_vm9 = vcmask 1046534  }
 0x531   :  { %v5841_v31 = vsel %vm5829_vm13, %v5824_v50, %v12402_v63  ;;  %v6479_v51 = vsel %vm12404_vm1, %v11404_v29, %v11423_v25  ;;  %v7260_v0 = vrot.slane %v6493_v56, 7  ;;  %v6480_v29 = vsel %vm12406_vm11, %v11392_v20, %v11425_v23  ;;  %vm12407_vm8 = vmmov %vm12396_vm6  ;;  %v7442_v50 = vld [vmem:[%s11739_s7 + $0x38] sm:$0xff] }
 0x532   :  { %v5621_v28 = vpop.permute.xlu2 %5620  ;;  %6976 = vmatpush.bf16.msrb.mxu3 %v7429_v49  ;;  %v5858_v32 = vsel %vm5846_vm5, %v5841_v31, %v11421_v46  ;;  %v6495_v43 = vsel %vm5778_vm14, %v6479_v51, 0.0  ;;  %v6496_v38 = vsel %vm5778_vm14, %v6480_v29, 0.0  ;;  %vm12410_vm2 = vmmov %vm12396_vm6  ;;  %7054 = vmatpush.bf16.msra.mxu1 %v7442_v50  ;;  %v7435_v50 = vld [vmem:[%s11739_s7] sm:$0xff] }
 0x533   :  { %v5894_v40 = vsel %vm5880_vm3, %v5877_v3, %v5621_v28  ;;  %v6492_v3 = vsel %vm5778_vm14, %v6476_v8, 0.0  ;;  %v5875_v1 = vsel %vm5863_vm4, %v5858_v32, %v11541_v34  ;;  %v7262_v11 = vrot.slane %v6495_v43, 7  ;;  %vm7368_vm0 = vmpackc.low %vm5659_vm7, %vm5659_vm7 }
 0x534   :  { %v6574_v42 = vsel %vm12392_vm12, %v5894_v40, %v7261_v22  ;;  %v5842_v22 = vsel %vm5829_vm13, %v5825_v5, %v12403_v54  ;;  %v7259_v15 = vrot.slane %v6492_v3, 7  ;;  %v5861_v40 = vsel %vm5846_vm5, %v10478_v39, %v11427_v4  ;;  %v7441_v3 = vld [vmem:[%s11739_s7 + $0x30] sm:$0xff] }
 0x535   :  { %6601 = vst [vmem:[#allocation1 + $0x21] ss:$4 sm:$0xff] %v6574_v42  ;;  %v5611_v48 = vpop.permute.xlu0 %5610  ;;  %v5859_v33 = vsel %vm5846_vm5, %v5842_v22, %v11445_v57  ;;  %v5878_v20 = vsel %vm5863_vm4, %v5861_v40, %v11587_v17  ;;  %v7263_v62 = vrot.slane %v6496_v38, 7  ;;  %v7438_v38 = vld [vmem:[%s11739_s7 + $0x18] sm:$0xff]  ;;  %vm6886_vm14 = vcmask 1041409  }
 0x536   :  { %v5889_v45 = vsel %vm5880_vm3, %v5872_v55, %v5611_v48  ;;  %6977 = vmatpush.bf16.msrb.mxu3 %v7428_v59  ;;  %v5876_v57 = vsel %vm5863_vm4, %v5859_v33, %v11457_v6  ;;  %v12409_v6 = vld [vmem:[#allocation4_spill] sm:$0xff]  ;;  %7055 = vmatpush.bf16.msra.mxu1 %v7441_v3  ;;  %vm6894_vm12 = vcmask 1045509   ;;  %v7484_v3 = vld [vmem:[%s11738_s6] ss:$0 sm:$0xff] }
 0x537   :  { %v6569_v21 = vsel %vm12396_vm6, %v5889_v45, %v7256_v44  ;;  %v5845_v52 = vsel %vm5829_vm13, %v12409_v6, %v12408_v12  ;;  %vm12411_vm13 = vmmov %vm12410_vm2  ;;  %v6763_v13 = vpop.f32.mrf.mxu1  ;;  %vm6898_vm6 = vcmask 1047559  }
 0x538   :  { %6596 = vst [vmem:[#allocation1] ss:$4 sm:$0xff] %v6569_v21  ;;  %v5613_v36 = vpop.permute.xlu1 %5612  ;;  %v5862_v19 = vsel %vm5846_vm5, %v5845_v52, %v11475_v2  ;;  %v6782_v21 = vpop.f32.mrf.mxu2  ;;  %vm6888_vm5 = vcmask 1042434  }
 0x539   :  { %v5890_v7 = vsel %vm5880_vm3, %v5873_v18, %v5613_v36  ;;  %v5879_v39 = vsel %vm5863_vm4, %v5862_v19, %v11502_v47  ;;  %v7483_v47 = vld [vmem:[%s11736_s4] ss:$0 sm:$0xff]  ;;  %vm6890_vm4 = vcmask 1043459  }
 0x53a   :  { %v6570_v24 = vsel %vm12401_vm15, %v5890_v7, %v7257_v35  ;;  %6978 = vmatpush.bf16.msrb.mxu3 %v7427_v26  ;;  %v6762_v8 = vadd.f32 %v7483_v47, %v6761_v58  ;;  %v6764_v49 = vadd.f32 %v7483_v47, %v6763_v13  ;;  %v7436_v13 = vld [vmem:[%s11739_s7 + $0x8] sm:$0xff] }
 0x53b   :  { %6597 = vst [vmem:[#allocation1 + $0x1] ss:$4 sm:$0xff] %v6570_v24 }
 0x53c   :  { %v6781_v16 = vadd.f32 %v6780_v14, %v6762_v8  ;;  %v6783_v9 = vadd.f32 %v6782_v21, %v6764_v49 }
 0x53d   :  { %v5617_v28 = vpop.permute.xlu0 %5616 }
 0x53e   :  { %v5892_v37 = vsel %vm5880_vm3, %v5875_v1, %v5617_v28  ;;  %v6790_v35 = vmax.f32 %v6781_v16, 0.0  ;;  %v6791_v18 = vmax.f32 %v6783_v9, 0.0 }
 0x53f   :  { %v6572_v46 = vsel %vm12405_vm10, %v5892_v37, %v7259_v15  ;;  %v7440_v15 = vld [vmem:[%s11739_s7 + $0x28] sm:$0xff] }
 0x540   :  { %6599 = vst [vmem:[#allocation1 + $0x3] ss:$4 sm:$0xff] %v6572_v46  ;;  %v5619_v34 = vpop.permute.xlu1 %5618  ;;  %v6798_v36 = vrot.slane %v6790_v35, 2  ;;  %v6799_v60 = vrot.slane %v6790_v35, 4  ;;  %v6800_v5 = vrot.slane %v6790_v35, 6  ;;  %v6801_v61 = vrot.slane %v6791_v18, 2  ;;  %7056 = vmatpush.bf16.msra.mxu1 %v7440_v15 }
 0x541   :  { %v5893_v10 = vsel %vm5880_vm3, %v5876_v57, %v5619_v34  ;;  %v6802_v63 = vrot.slane %v6791_v18, 4  ;;  %v6803_v31 = vrot.slane %v6791_v18, 6  ;;  %v7439_v57 = vld [vmem:[%s11739_s7 + $0x20] sm:$0xff] }
 0x542   :  { %v6573_v25 = vsel %vm12407_vm8, %v5893_v10, %v7260_v0  ;;  %v6822_v53 = vmax.f32 %v6790_v35, %v6798_v36  ;;  %v6823_v24 = vmax.f32 %v6799_v60, %v6800_v5  ;;  %v6824_v59 = vmax.f32 %v6791_v18, %v6801_v61 }
 0x543   :  { %6600 = vst [vmem:[#allocation1 + $0x20] ss:$4 sm:$0xff] %v6573_v25  ;;  %v6825_v1 = vmax.f32 %v6802_v63, %v6803_v31 }
 0x544   :  { %v7328_v56 = vrot.slane %v6822_v53, 9  ;;  %v7329_v33 = vrot.slane %v6823_v24, 9  ;;  %v7330_v28 = vrot.slane %v6824_v59, 9  ;;  %7057 = vmatpush.bf16.msra.mxu1 %v7439_v57 }
 0x545   :  { %v5623_v23 = vpop.permute.xlu0 %5622  ;;  %v7331_v43 = vrot.slane %v6825_v1, 9 }
 0x546   :  { %v5895_v42 = vsel %vm5880_vm3, %v5878_v20, %v5623_v23  ;;  %v6862_v34 = vmax.f32 %v6822_v53, %v7328_v56  ;;  %v6863_v10 = vmax.f32 %v6823_v24, %v7329_v33  ;;  %v6864_v29 = vmax.f32 %v6824_v59, %v7330_v28 }
 0x547   :  { %v6575_v44 = vsel %vm12410_vm2, %v5895_v42, %v7262_v11  ;;  %v6604_v2 = vld.sshfl [vmem:[#allocation1] sm:$0xff pattern:$0x73625140]  ;;  %v6605_v48 = vld.sshfl [vmem:[#allocation1 + $0x8] sm:$0xff pattern:$0x73625140]  ;;  %v6865_v23 = vmax.f32 %v6825_v1, %v7331_v43 }
 0x548   :  { %6602 = vst [vmem:[#allocation1 + $0x22] ss:$4 sm:$0xff] %v6575_v44  ;;  %v5625_v4 = vpop.permute.xlu1 %5624  ;;  %v6878_v19 = vperm.slane %v6862_v34, 0  ;;  %v6879_v20 = vperm.slane %v6863_v10, 0  ;;  %v6880_v44 = vperm.slane %v6864_v29, 0  ;;  %7058 = vmatpush.bf16.msra.mxu1 %v7438_v38 }
 0x549   :  { %v5896_v27 = vsel %vm5880_vm3, %v5879_v39, %v5625_v4  ;;  %vm6892_vm3 = vcmask 1044484  }
 0x54a   :  { %v6576_v55 = vsel %vm12411_vm13, %v5896_v27, %v7263_v62 }
 0x54b   :  { %6603 = vst [vmem:[#allocation1 + $0x23] ss:$4 sm:$0xff] %v6576_v55  ;;  %v7437_v55 = vld [vmem:[%s11739_s7 + $0x10] sm:$0xff] }
 0x54c   :  { %7059 = vmatpush.bf16.msra.mxu1 %v7437_v55 }
 0x550   :  { %7060 = vmatpush.bf16.msra.mxu1 %v7436_v13 }
 0x552   :  { %v6606_v30 = vld.sshfl [vmem:[#allocation1 + $0x20] sm:$0xff pattern:$0x73625140]  ;;  %v6607_v17 = vld.sshfl [vmem:[#allocation1 + $0x28] sm:$0xff pattern:$0x73625140] }
 0x553   :  { %v6618_v45 = vpack.c.bf16 %v6606_v30, %v6604_v2  ;;  %v6619_v41 = vpack.c.bf16 %v6607_v17, %v6605_v48  ;;  %v6887_v2 = vsel %vm6886_vm14, %v6879_v20, %v6878_v19  ;;  %v6881_v48 = vperm.slane %v6865_v23, 0 }
 0x554   :  { %7061 = vmatpush.bf16.msra.mxu1 %v7435_v50 }
 0x555   :  { %6765 = vmatmul.bf16.gmra.mxu1 %v6618_v45  ;;  %6784 = vmatmul.bf16.gmra.mxu2 %v6619_v41  ;;  %v6889_v45 = vsel %vm6888_vm5, %v6880_v44, %v6887_v2 }
 0x556   :  { %v6891_v8 = vsel %vm6890_vm4, %v6881_v48, %v6889_v45 }
 0x5d2   :  { %v6766_v7 = vpop.f32.mrf.mxu1 }
 0x5d3   :  { %v6767_v32 = vadd.f32 %v7483_v47, %v6766_v7 }
 0x5d8   :  { %v6785_v54 = vpop.f32.mrf.mxu2 }
 0x5d9   :  { %v6786_v22 = vadd.f32 %v6785_v54, %v6767_v32  ;;  %v7485_v32 = vld [vmem:[%s11740_s8] ss:$0 sm:$0xff] }
 0x5da   :  { %v6768_v51 = vpop.f32.mrf.mxu1 }
 0x5db   :  { %v6792_v37 = vmax.f32 %v6786_v22, 0.0  ;;  %v6769_v12 = vadd.f32 %v7483_v47, %v6768_v51 }
 0x5dd   :  { %v6804_v46 = vrot.slane %v6792_v37, 2  ;;  %v6805_v26 = vrot.slane %v6792_v37, 4  ;;  %v6806_v0 = vrot.slane %v6792_v37, 6 }
 0x5df   :  { %v6826_v25 = vmax.f32 %v6792_v37, %v6804_v46  ;;  %v6827_v40 = vmax.f32 %v6805_v26, %v6806_v0 }
 0x5e0   :  { %v6787_v6 = vpop.f32.mrf.mxu2 }
 0x5e1   :  { %v7332_v52 = vrot.slane %v6826_v25, 9  ;;  %v6788_v11 = vadd.f32 %v6787_v6, %v6769_v12  ;;  %v7333_v42 = vrot.slane %v6827_v40, 9 }
 0x5e3   :  { %v6866_v62 = vmax.f32 %v6826_v25, %v7332_v52  ;;  %v6793_v39 = vmax.f32 %v6788_v11, 0.0  ;;  %v6867_v30 = vmax.f32 %v6827_v40, %v7333_v42 }
 0x5e5   :  { %v6807_v4 = vrot.slane %v6793_v39, 2  ;;  %v6808_v27 = vrot.slane %v6793_v39, 4  ;;  %v6809_v17 = vrot.slane %v6793_v39, 6  ;;  %v6882_v41 = vperm.slane %v6866_v62, 0 }
 0x5e6   :  { %v6883_v21 = vperm.slane %v6867_v30, 0 }
 0x5e7   :  { %v6828_v58 = vmax.f32 %v6793_v39, %v6807_v4  ;;  %v6829_v14 = vmax.f32 %v6808_v27, %v6809_v17  ;;  %v6893_v16 = vsel %vm6892_vm3, %v6882_v41, %v6891_v8 }
 0x5e8   :  { %v6895_v60 = vsel %vm6894_vm12, %v6883_v21, %v6893_v16 }
 0x5e9   :  { %v7334_v47 = vrot.slane %v6828_v58, 9  ;;  %v7335_v49 = vrot.slane %v6829_v14, 9 }
 0x5eb   :  { %v6868_v9 = vmax.f32 %v6828_v58, %v7334_v47  ;;  %v6869_v35 = vmax.f32 %v6829_v14, %v7335_v49 }
 0x5ed   :  { %v6884_v18 = vperm.slane %v6868_v9, 0  ;;  %v6885_v36 = vperm.slane %v6869_v35, 0 }
 0x5ef   :  { %v6897_v5 = vsel %vm6896_vm9, %v6884_v18, %v6895_v60 }
 0x5f0   :  { %v6899_v7 = vsel %vm6898_vm6, %v6885_v36, %v6897_v5 }
 0x5f1   :  { %v7369_v61 = vpack.c.bf16 %v6899_v7, %v6899_v7 }
 0x5f3   :  { %7370 = vmatmul.msk.bf16.vlgmr.msrb.gmra.mxu3 %vm7368_vm0, %v7369_v61 }
 0x676   :  { %v6980_v53 = vpop.f32.mrf.mxu3 }
 0x677   :  { %v6981_v24 = vadd.f32 %v7484_v3, %v6980_v53 }
 0x679   :  { %v6984_v63 = vmax.f32 %v6981_v24, 0.0 }
 0x67b   :  { %v6985_v31 = vpack.c.bf16 %v6984_v63, %v6984_v63 }
 0x67d   :  { %7062 = vmatmul.bf16.vlgmr.msra.gmra.mxu1 %v6985_v31 }
 0x67e   :  { %v6982_v59 = vpop.f32.mrf.mxu3 }
 0x6fa   :  { %v7063_v54 = vpop.f32.mrf.mxu1 }
 0x6fb   :  { %v7064_v22 = vadd.f32 %v7485_v32, %v7063_v54 }
 0x6fd   :  { %7067 = vst [vmem:[%s11741_s9] sm:$0xff] %v7064_v22 }
 0x702   :  { %v7065_v15 = vpop.f32.mrf.mxu1 }

</bundles_post_ra>
